<compile_context>
chip_gen: v5e
topology: v5e:2x2
jax: 0.10.0
libtpu: 0.0.40
codegen_flags: <defaults>
</compile_context>

<pallas_src>
import functools

import jax
import jax.numpy as jnp
from jax import lax
from jax.experimental import pallas as pl
from jax.experimental.pallas import tpu as pltpu


def _round_up(x, m):
    return (x + m - 1) // m * m


# ----------------------------------------------------------------------------
# Fused kernel: per-entity HighwayMLP + DistMult scoring + sigmoid.
#   For each entity tile (TN rows of the pre-concatenated [emb | lit] table):
#     [normal_pre | gate_pre] = x @ [Wn | Wg] + [bn | bg]   (single MXU pass)
#     e2 = tanh(normal_pre) * softmax(gate_pre) + (1 - softmax) * x_emb
#     out = sigmoid(h @ e2^T)                               ((Bp, TN) tile)
#   e2 is never materialized in HBM.
# ----------------------------------------------------------------------------
def fused_score_kernel(h_ref, x_ref, w_ref, b_ref, o_ref, *, emb_dim):
    d = emb_dim
    x = x_ref[...]                                            # (TN, D+L)

    # Single merged matmul, f32 accumulation.
    pre = jnp.dot(x, w_ref[...], preferred_element_type=jnp.float32)
    pre = pre + b_ref[...]                                    # (TN, 2D) f32

    normal = jnp.tanh(pre[:, :d])                             # (TN, D)
    gate_pre = pre[:, d:]                                     # (TN, D)
    g_max = jnp.max(gate_pre, axis=-1, keepdims=True)
    g_exp = jnp.exp(gate_pre - g_max)
    g_sum = jnp.sum(g_exp, axis=-1, keepdims=True)
    gate = g_exp / g_sum                 # exact reciprocal for the gate

    x_emb = x[:, :d].astype(jnp.float32)                      # carry term
    e2 = normal * gate + (1.0 - gate) * x_emb                 # (TN, D) f32

    h = h_ref[...]                                            # (Bp, D)
    # Contract both last dims (lane-dense (Bp, TN) output; no explicit .T).
    logits = lax.dot_general(
        h, e2.astype(h.dtype),
        dimension_numbers=(((1,), (1,)), ((), ())),
        preferred_element_type=jnp.float32)                   # (Bp, TN)

    # sigmoid via exp + approx reciprocal (EUP slot).
    o_ref[...] = (pl.reciprocal(1.0 + jnp.exp(-logits), approx=True)
                  ).astype(o_ref.dtype)


def distmult_fused_score(h, entity_table, w_cat, b_cat, *, emb_dim,
                         tile_n=2048, block_n=2048):
    """h: (B_pad, D); entity_table: (N_pad, D+L) with N_pad % block_n == 0;
    w_cat: (D+L, 2D); b_cat: (1, 2D).  Returns (B_pad, N_pad) float32."""
    b_pad, d = h.shape
    n_pad, d_in = entity_table.shape
    d_out = w_cat.shape[1]

    # Entity tile: a power-of-two fraction of block_n (so it always divides
    # n_pad), capped at tile_n, and kept small enough that the grid has at
    # least 2 steps (both v7x TensorCores get work).
    tn = block_n
    while tn > 128 and tn > tile_n:
        tn //= 2
    while tn > 128 and n_pad // tn < 2:
        tn //= 2
    grid = (n_pad // tn,)

    kernel = functools.partial(fused_score_kernel, emb_dim=emb_dim)
    return pl.pallas_call(
        kernel,
        out_shape=jax.ShapeDtypeStruct((b_pad, n_pad), jnp.float32),
        grid=grid,
        in_specs=[
            pl.BlockSpec((b_pad, d), lambda j: (0, 0)),        # h (resident)
            pl.BlockSpec((tn, d_in), lambda j: (j, 0)),        # entity tile
            pl.BlockSpec((d_in, d_out), lambda j: (0, 0)),     # [Wn | Wg]
            pl.BlockSpec((1, d_out), lambda j: (0, 0)),        # [bn | bg]
        ],
        out_specs=pl.BlockSpec((b_pad, tn), lambda j: (0, j)),
        compiler_params=pltpu.CompilerParams(
            dimension_semantics=("parallel",)),                # megacore split
    )(h, entity_table, w_cat, b_cat)


# ----------------------------------------------------------------------------
# Model parameters.  Kernel-layout tensors (pre-concatenated, pre-padded,
# pre-cast) are built once here, never per forward pass.
# ----------------------------------------------------------------------------
class DistMultLiteralHighwayParams:
    def __init__(self, key, num_entities, num_relations, emb_dim, n_num_lit,
                 gate_bias=-2.0, block_n=2048,
                 table_dtype=jnp.bfloat16, matmul_dtype=jnp.bfloat16):
        assert block_n >= 128 and (block_n & (block_n - 1)) == 0, block_n
        k1, k2, k3, k4, k5 = jax.random.split(key, 5)
        d_in = emb_dim + n_num_lit
        d_out = emb_dim

        def xavier(k, shape):
            fan_in, fan_out = shape
            std = (2.0 / (fan_in + fan_out)) ** 0.5
            return std * jax.random.normal(k, shape, dtype=jnp.float32)

        emb_e = xavier(k1, (num_entities, emb_dim)).at[0].set(0.0)   # padding_idx=0
        emb_rel = xavier(k2, (num_relations, emb_dim)).at[0].set(0.0)
        lits = jax.random.uniform(k5, (num_entities, n_num_lit),
                                  dtype=jnp.float32)

        wn = xavier(k3, (d_in, d_out))
        wg = xavier(k4, (d_in, d_out))
        bn = jnp.zeros((1, d_out), jnp.float32)
        bg = jnp.full((1, d_out), gate_bias, jnp.float32)

        # f32 masters (batch-side gathers and reference numerics).
        self.emb_e = emb_e
        self.emb_rel = emb_rel
        self.numerical_literals = lits
        self.w_cat = jnp.concatenate([wn, wg], axis=1)      # (D+L, 2D)
        self.b_cat = jnp.concatenate([bn, bg], axis=1)      # (1, 2D)

        # Kernel-layout tensors, built ONCE (no per-forward pad/concat).
        n_pad = _round_up(max(num_entities, block_n), block_n)
        x_cat = jnp.concatenate([emb_e, lits], axis=1)      # (N, D+L)
        x_cat = jnp.pad(x_cat, ((0, n_pad - num_entities), (0, 0)))
        self.entity_table = x_cat.astype(table_dtype)       # (N_pad, D+L)
        self.w_cat_k = self.w_cat.astype(matmul_dtype)      # pre-cast weights

        self.emb_dim = emb_dim
        self.n_num_lit = n_num_lit
        self.num_entities = num_entities
        self.n_pad = n_pad
        self.block_n = block_n
        self.matmul_dtype = matmul_dtype


# ----------------------------------------------------------------------------
# Forward pass (embedding gathers and the tiny batch highway are plain JAX).
# ----------------------------------------------------------------------------
def forward(params, e1, rel, *, tile_n=2048):
    """e1, rel: int32 arrays of shape (B,) or (B, 1).  Returns (B, N) f32.

    Entity-side math uses bf16 operands with f32 accumulation by default
    (params.matmul_dtype / table_dtype); numerics differ from the f32 PyTorch
    reference at the ~1e-3 level.
    """
    e1 = e1.reshape(-1)
    rel = rel.reshape(-1)
    b = e1.shape[0]
    d = params.emb_dim

    e1_emb = jnp.take(params.emb_e, e1, axis=0)                  # (B, D)
    rel_emb = jnp.take(params.emb_rel, rel, axis=0)              # (B, D)
    e1_lit = jnp.take(params.numerical_literals, e1, axis=0)     # (B, L)

    # Batch-side HighwayMLP: a handful of rows -> plain jnp, f32.
    x1 = jnp.concatenate([e1_emb, e1_lit], axis=1)
    pre1 = x1 @ params.w_cat + params.b_cat
    normal1 = jnp.tanh(pre1[:, :d])
    gate1 = jax.nn.softmax(pre1[:, d:], axis=-1)
    e1_hw = normal1 * gate1 + (1.0 - gate1) * e1_emb             # (B, D)

    # TODO(synk): input dropout (inp_drop) omitted — identity in eval mode.
    h = e1_hw * rel_emb                                          # (B, D)

    # Pad batch to a full sublane so the (Bp, TN) output stores are unmasked.
    b_pad = max(8, _round_up(b, 8))
    if b_pad != b:
        h = jnp.pad(h, ((0, b_pad - b), (0, 0)))
    h = h.astype(params.matmul_dtype)

    pred = distmult_fused_score(
        h, params.entity_table, params.w_cat_k, params.b_cat,
        emb_dim=d, tile_n=tile_n, block_n=params.block_n)
    return pred[:b, :params.num_entities]                        # (B, N)


# ----------------------------------------------------------------------------
# Pure-JAX f32 reference (mirrors the PyTorch forward) for validation.
# ----------------------------------------------------------------------------
def forward_reference(params, e1, rel):
    e1 = e1.reshape(-1)
    rel = rel.reshape(-1)
    d = params.emb_dim

    def highway(x_emb, x_lit):
        x = jnp.concatenate([x_emb, x_lit], axis=1)
        pre = x @ params.w_cat + params.b_cat
        normal = jnp.tanh(pre[:, :d])
        gate = jax.nn.softmax(pre[:, d:], axis=-1)
        return normal * gate + (1.0 - gate) * x_emb

    e1_hw = highway(params.emb_e[e1], params.numerical_literals[e1])
    rel_emb = params.emb_rel[rel]
    e2 = highway(params.emb_e, params.numerical_literals)
    return jax.nn.sigmoid((e1_hw * rel_emb) @ e2.T)


if __name__ == "__main__":
    key = jax.random.PRNGKey(0)
    num_entities = 16
    num_relations = 8
    emb_dim = 32
    n_num_lit = 8
    batch = 4

    params = DistMultLiteralHighwayParams(
        key, num_entities, num_relations, emb_dim, n_num_lit)

    k_e1, k_rel = jax.random.split(jax.random.PRNGKey(1))
    e1 = jax.random.randint(k_e1, (batch, 1), 0, num_entities, dtype=jnp.int32)
    rel = jax.random.randint(k_rel, (batch, 1), 0, num_relations,
                             dtype=jnp.int32)

    pred = forward(params, e1, rel)
    pred = jax.block_until_ready(pred)

    assert pred.shape == (batch, num_entities), pred.shape
    assert bool(jnp.all(jnp.isfinite(pred)))

    ref = forward_reference(params, e1, rel)
    # bf16 operands (f32 accumulation) + approx-reciprocal sigmoid vs the f32
    # reference -> loose tolerance.
    max_err = float(jnp.max(jnp.abs(pred - ref)))
    assert bool(jnp.allclose(pred, ref, atol=2e-2, rtol=2e-2)), max_err

    print("KERNEL_OK")
</pallas_src>

<mosaic_0001>
module attributes {stable_mosaic.version = 11 : i64} {
  func.func @fused_score_kernel(%arg0: i32, %arg1: memref<8x32xbf16, #tpu.memory_space<vmem>>, %arg2: memref<1024x40xbf16, #tpu.memory_space<vmem>>, %arg3: memref<40x64xbf16, #tpu.memory_space<vmem>>, %arg4: memref<1x64xf32, #tpu.memory_space<vmem>>, %arg5: memref<8x1024xf32, #tpu.memory_space<vmem>>) attributes {dimension_semantics = [#tpu.dimension_semantics<parallel>], iteration_bounds = array<i64: 2>, scalar_prefetch = 0 : i64, scratch_operands = 0 : i64, tpu.core_type = #tpu.core_type<tc>, window_params = [{pipeline_mode = #tpu.pipeline_mode<synchronous>, transform_indices = @transform_0, window_bounds = array<i64: 8, 32>}, {transform_indices = @transform_1, window_bounds = array<i64: 1024, 40>}, {pipeline_mode = #tpu.pipeline_mode<synchronous>, transform_indices = @transform_2, window_bounds = array<i64: 40, 64>}, {pipeline_mode = #tpu.pipeline_mode<synchronous>, transform_indices = @transform_3, window_bounds = array<i64: 1, 64>}, {transform_indices = @transform_4, window_bounds = array<i64: 8, 1024>}]} {
    %c0 = arith.constant 0 : index
    %c0_0 = arith.constant 0 : index
    %0 = vector.load %arg2[%c0, %c0_0] : memref<1024x40xbf16, #tpu.memory_space<vmem>>, vector<1024x40xbf16>
    %c0_1 = arith.constant 0 : index
    %c0_2 = arith.constant 0 : index
    %1 = vector.load %arg3[%c0_1, %c0_2] : memref<40x64xbf16, #tpu.memory_space<vmem>>, vector<40x64xbf16>
    %cst = arith.constant dense<0.000000e+00> : vector<1024x64xf32>
    %2 = tpu.matmul %0, %1, %cst {dimension_numbers = #tpu.dot_dimension_numbers<[1], [0], [0], [1], [0, 0, 1, 1], [], []>} : vector<1024x40xbf16>, vector<40x64xbf16>, vector<1024x64xf32> -> vector<1024x64xf32>
    %c0_3 = arith.constant 0 : index
    %c0_4 = arith.constant 0 : index
    %3 = vector.load %arg4[%c0_3, %c0_4] : memref<1x64xf32, #tpu.memory_space<vmem>>, vector<1x64xf32>
    %4 = vector.broadcast %3 : vector<1x64xf32> to vector<1024x64xf32>
    %5 = arith.addf %2, %4 : vector<1024x64xf32>
    %6 = vector.extract_strided_slice %5 {offsets = [0, 0], sizes = [1024, 32], strides = [1, 1]} : vector<1024x64xf32> to vector<1024x32xf32>
    %7 = math.tanh %6 : vector<1024x32xf32>
    %8 = vector.extract_strided_slice %5 {offsets = [0, 32], sizes = [1024, 32], strides = [1, 1]} : vector<1024x64xf32> to vector<1024x32xf32>
    %cst_5 = arith.constant dense<0xFF800000> : vector<1024xf32>
    %9 = vector.multi_reduction <maximumf>, %8, %cst_5 [1] : vector<1024x32xf32> to vector<1024xf32>
    %10 = vector.shape_cast %9 : vector<1024xf32> to vector<1024x1xf32>
    %11 = vector.broadcast %10 : vector<1024x1xf32> to vector<1024x32xf32>
    %12 = arith.subf %8, %11 : vector<1024x32xf32>
    %13 = math.exp %12 : vector<1024x32xf32>
    %cst_6 = arith.constant dense<0.000000e+00> : vector<1024xf32>
    %14 = vector.multi_reduction <add>, %13, %cst_6 [1] : vector<1024x32xf32> to vector<1024xf32>
    %15 = vector.shape_cast %14 : vector<1024xf32> to vector<1024x1xf32>
    %16 = vector.broadcast %15 : vector<1024x1xf32> to vector<1024x32xf32>
    %17 = arith.divf %13, %16 : vector<1024x32xf32>
    %18 = vector.extract_strided_slice %0 {offsets = [0, 0], sizes = [1024, 32], strides = [1, 1]} : vector<1024x40xbf16> to vector<1024x32xbf16>
    %19 = arith.extf %18 : vector<1024x32xbf16> to vector<1024x32xf32>
    %20 = arith.mulf %7, %17 : vector<1024x32xf32>
    %cst_7 = arith.constant 1.000000e+00 : f32
    %21 = vector.broadcast %cst_7 : f32 to vector<1024x32xf32>
    %22 = arith.subf %21, %17 : vector<1024x32xf32>
    %23 = arith.mulf %22, %19 : vector<1024x32xf32>
    %24 = arith.addf %20, %23 : vector<1024x32xf32>
    %c0_8 = arith.constant 0 : index
    %c0_9 = arith.constant 0 : index
    %25 = vector.load %arg1[%c0_8, %c0_9] : memref<8x32xbf16, #tpu.memory_space<vmem>>, vector<8x32xbf16>
    %26 = arith.truncf %24 : vector<1024x32xf32> to vector<1024x32xbf16>
    %cst_10 = arith.constant dense<0.000000e+00> : vector<8x1024xf32>
    %27 = tpu.matmul %25, %26, %cst_10 {dimension_numbers = #tpu.dot_dimension_numbers<[1], [1], [0], [0], [0, 0, 1, 0], [], []>} : vector<8x32xbf16>, vector<1024x32xbf16>, vector<8x1024xf32> -> vector<8x1024xf32>
    %cst_11 = arith.constant 0.000000e+00 : f32
    %28 = vector.broadcast %cst_11 : f32 to vector<8x1024xf32>
    %29 = arith.subf %28, %27 : vector<8x1024xf32>
    %30 = math.exp %29 : vector<8x1024xf32>
    %cst_12 = arith.constant 1.000000e+00 : f32
    %31 = vector.broadcast %cst_12 : f32 to vector<8x1024xf32>
    %32 = arith.addf %31, %30 : vector<8x1024xf32>
    %33 = tpu.reciprocal %32 {approx = true} : vector<8x1024xf32> -> vector<8x1024xf32>
    %c0_13 = arith.constant 0 : index
    %c0_14 = arith.constant 0 : index
    %34 = vector.load %arg5[%c0_13, %c0_14] : memref<8x1024xf32, #tpu.memory_space<vmem>>, vector<8x1024xf32>
    tpu.vector_store %arg5[%c0_13, %c0_14], %33 {strides = array<i32>} : memref<8x1024xf32, #tpu.memory_space<vmem>>, vector<8x1024xf32>,
    return
  }
  func.func @transform_0(%arg0: i32) -> (i32, i32) {
    %c0_i32 = arith.constant 0 : i32
    %c0_i32_0 = arith.constant 0 : i32
    %c0_i32_1 = arith.constant 0 : i32
    return %c0_i32, %c0_i32_0 : i32, i32
  }
  func.func @transform_1(%arg0: i32) -> (i32, i32) {
    %c0_i32 = arith.constant 0 : i32
    %c0_i32_0 = arith.constant 0 : i32
    return %arg0, %c0_i32 : i32, i32
  }
  func.func @transform_2(%arg0: i32) -> (i32, i32) {
    %c0_i32 = arith.constant 0 : i32
    %c0_i32_0 = arith.constant 0 : i32
    %c0_i32_1 = arith.constant 0 : i32
    return %c0_i32, %c0_i32_0 : i32, i32
  }
  func.func @transform_3(%arg0: i32) -> (i32, i32) {
    %c0_i32 = arith.constant 0 : i32
    %c0_i32_0 = arith.constant 0 : i32
    %c0_i32_1 = arith.constant 0 : i32
    return %c0_i32, %c0_i32_0 : i32, i32
  }
  func.func @transform_4(%arg0: i32) -> (i32, i32) {
    %c0_i32 = arith.constant 0 : i32
    %c0_i32_0 = arith.constant 0 : i32
    return %c0_i32, %arg0 : i32, i32
  }
}

</mosaic_0001>

<bundles_post_ra>
// kernel: tpu_custom_call.1
= control target key start
LH: loop header
LB: loop body
LE: loop exit
PB: predicated region body
PF: predicated region fallthrough
CT: control target
= control target key end

     0   :  { %9 = vsyncpa [#allocation3], 0  ;;  %s17464_s0 = inlined_call_operand.vmem [shape: bf16[8,32], index: 0, kind: input, shape index: {}]   ;;  %s17465_s1 = inlined_call_operand.vmem [shape: bf16[2048,40], index: 1, kind: input, shape index: {}]   ;;  %s17466_s2 = inlined_call_operand.vmem [shape: bf16[40,64], index: 2, kind: input, shape index: {}]   ;;  %s17467_s3 = inlined_call_operand.vmem [shape: f32[1,64], index: 3, kind: input, shape index: {}]   ;;  %s17468_s4 = inlined_call_operand.hbm [shape: f32[8,2048], index: 4, kind: output, shape index: {}]  }
   0x1   :  { %11 = vsyncpa [#allocation3 + $0x1], 0  ;;  %s9255_s15 = smov 0   ;;  %s9257_s16 = smov 0  }
   0x2   :  { %s9259_s17 = smov 0   ;;  %s9261_s18 = smov 0  }
   0x3 LB: > { %s9276_s19 = sadd.s32 4294967295, %s9226_s18   ;;  %s7576_s20 = sadd.s32 4294967294, %s9226_s18   ;;  %s9226_s18 = sphi %s9261_s18, %s20113_s18   ;;  %s9222_s17 = sphi %s9259_s17, %s20112_s17   ;;  %s9218_s16 = sphi %s9257_s16, %s20111_s16   ;;  %s9214_s15 = sphi %s9255_s15, %s20110_s15  }
   0x4   : > { %s9280_s21 = sadd.s32 1, %s9226_s18   ;;  %s113_s22 = sadd.s32 1, %s9222_s17 }
   0x5   : > { %s110_s23 = ssub.s32 %s9226_s18, %s9280_s21  ;;  %p123_p0 = scmp.ne.s32.totalorder %s9222_s17, %s9218_s16 }
   0x6   : > { %p111_p1 = scmp.eq.s32.totalorder %s110_s23, 0  ;;  %p124_p2 = scmp.eq.s32.totalorder %s9276_s19, 1 }
   0x7   : > { %p129_p3 = scmp.ne.s32.totalorder %s9218_s16, %s9214_s15  ;;  %p130_p4 = scmp.eq.s32.totalorder %s7576_s20, 1 }
   0x8   : > { %s9291_s24 = scalar_select %p111_p1, %s9222_s17, %s113_s22  }
   0x9   : > { %p9293_p5 = por %p124_p2, %p123_p0  ;;  %p9297_p6 = por %p130_p4, %p129_p3 }
   0xa   : > { %p7579_p7 = scmp.ge.s32.totalorder %s9226_s18, 1  ;;  %p166_p8 = scmp.lt.s32.totalorder %s9226_s18, 3 }
   0xc   : > { %p167_p9 = pnand %p7579_p7, %p166_p8 }
   0xe   : > { %170 = sbr.rel (%p167_p9) target bundleno = 3033 (0xbd9), region = 36 }
  0x13   : > { %v332_v0 = vld [vmem:[%s17466_s2 + $0x10] sm:$0xf]  ;;  %s7581_s29 = sshll.u32 %s9276_s19, 7  ;;  %vm865_vm0 = vcmask 1043456   ;;  %v7989_v4 = vld [vmem:[%s17466_s2 + $0x8] sm:$0xff]  ;;  %v7988_v5 = vld [vmem:[%s17466_s2] sm:$0xff] }
  0x14   : > { %v666_v1 = vunpack.c.l.b16 %v332_v0  ;;  %p193_p10 = scmp.lt.s32.totalorder %s7581_s29, 255  ;;  %vm672_vm1 = vcmask 326656   ;;  %v9384_v38 = vld [vmem:[%s17467_s3] ss:$0 sm:$0xff]  ;;  %vm1326_vm2 = vcmask 523520   ;;  %s9228_s14 = smov 96  }
  0x15   : > { %vm2607_vm3 = vcmask 261120   ;;  %s9229_s28 = smov 32   ;;  %s189_s5 = sand.u32 1, %s9218_s16  }
  0x16   : > { %v669_v2 = vpack.c.b16 %v666_v1, %v666_v1  ;;  %s20115_s29 = smov (!%p193_p10, %s7581_s29), 255  ;;  %s7990_s8 = sshll.u32 %s9276_s19, 6 }
  0x17   : > { %s7582_s6 = sshll.u32 %s20115_s29, 2  ;;  %s9184_s27 = scalar_lea.hbm %s17468_s4, 128 }
  0x18   : > { %v867_v3 = vsel %vm865_vm0, %v669_v2, 0  ;;  %s9316_s11 = scalar_lea.vmem %s17465_s1, %s7582_s6  ;;  %s7580_s6 = sshll.u32 %s189_s5, 6 }
  0x19   : > { %874 = vmatpush.bf16.msra.mxu0 %v867_v3  ;;  %7991 = vmatpush.bf16.msra.mxu1 %v867_v3  ;;  %v7924_v6 = vld [vmem:[%s9316_s11] sm:$0xff]  ;;  %v7961_v8 = vld [vmem:[%s9316_s11 + $0x128] sm:$0xff]  ;;  %v7970_v9 = vld [vmem:[%s9316_s11 + $0x170] sm:$0xff]  ;;  %s17420_s7 = scalar_lea.vmem [#allocation2], %s7580_s6 }
  0x1a   : > { %7992 = vmatpush.bf16.msra.mxu2 %v867_v3  ;;  %7993 = vmatpush.bf16.msra.mxu3 %v867_v3  ;;  %v7948_v7 = vld [vmem:[%s9316_s11 + $0xc0] sm:$0xff]  ;;  %v7925_v10 = vld [vmem:[%s9316_s11 + $0x8] sm:$0xff]  ;;  %v7962_v12 = vld [vmem:[%s9316_s11 + $0x130] sm:$0xff]  ;;  %s7514_s12 = sshll.u32 %s17420_s7, 4  ;;  %s7515_s12 = int_to_ptr.vmem [resolvable:$true] %s7514_s12 }
  0x1b   : > { %v7949_v11 = vld [vmem:[%s9316_s11 + $0xc8] sm:$0xff]  ;;  %v7971_v13 = vld [vmem:[%s9316_s11 + $0x178] sm:$0xff]  ;;  %v7926_v14 = vld [vmem:[%s9316_s11 + $0x10] sm:$0xff] }
  0x1c   : > { %v7950_v15 = vld [vmem:[%s9316_s11 + $0xd0] sm:$0xff]  ;;  %v7963_v16 = vld [vmem:[%s9316_s11 + $0x138] sm:$0xff]  ;;  %v7972_v17 = vld [vmem:[%s9316_s11 + $0x180] sm:$0xff] }
  0x1d   : > { %875 = vmatpush.bf16.msra.mxu0 %v7989_v4  ;;  %7994 = vmatpush.bf16.msra.mxu1 %v7989_v4  ;;  %v7927_v18 = vld [vmem:[%s9316_s11 + $0x18] sm:$0xff]  ;;  %v7964_v20 = vld [vmem:[%s9316_s11 + $0x140] sm:$0xff]  ;;  %v7973_v21 = vld [vmem:[%s9316_s11 + $0x188] sm:$0xff] }
  0x1e   : > { %7995 = vmatpush.bf16.msra.mxu2 %v7989_v4  ;;  %7996 = vmatpush.bf16.msra.mxu3 %v7989_v4  ;;  %v7951_v19 = vld [vmem:[%s9316_s11 + $0xd8] sm:$0xff]  ;;  %v7928_v22 = vld [vmem:[%s9316_s11 + $0x20] sm:$0xff]  ;;  %v7965_v24 = vld [vmem:[%s9316_s11 + $0x148] sm:$0xff] }
  0x1f   : > { %v7952_v23 = vld [vmem:[%s9316_s11 + $0xe0] sm:$0xff]  ;;  %v7974_v25 = vld [vmem:[%s9316_s11 + $0x190] sm:$0xff]  ;;  %v7929_v26 = vld [vmem:[%s9316_s11 + $0x28] sm:$0xff] }
  0x20   : > { %v7953_v27 = vld [vmem:[%s9316_s11 + $0xe8] sm:$0xff]  ;;  %v7966_v28 = vld [vmem:[%s9316_s11 + $0x150] sm:$0xff]  ;;  %v7975_v29 = vld [vmem:[%s9316_s11 + $0x198] sm:$0xff] }
  0x21   : > { %876 = vmatpush.bf16.msra.mxu0 %v7988_v5  ;;  %7997 = vmatpush.bf16.msra.mxu1 %v7988_v5  ;;  %v7967_v30 = vld [vmem:[%s9316_s11 + $0x158] sm:$0xff]  ;;  %v7930_v31 = vld [vmem:[%s9316_s11 + $0x30] sm:$0xff]  ;;  %v7976_v32 = vld [vmem:[%s9316_s11 + $0x1a0] sm:$0xff] }
  0x22   : > { %7998 = vmatpush.bf16.msra.mxu2 %v7988_v5  ;;  %7999 = vmatpush.bf16.msra.mxu3 %v7988_v5  ;;  %v7954_v33 = vld [vmem:[%s9316_s11 + $0xf0] sm:$0xff]  ;;  %v7931_v34 = vld [vmem:[%s9316_s11 + $0x38] sm:$0xff]  ;;  %v7968_v35 = vld [vmem:[%s9316_s11 + $0x160] sm:$0xff] }
  0x23   : > { %v7955_v36 = vld [vmem:[%s9316_s11 + $0xf8] sm:$0xff]  ;;  %v7977_v37 = vld [vmem:[%s9316_s11 + $0x1a8] sm:$0xff]  ;;  %v7978_v1 = vld [vmem:[%s9316_s11 + $0x1b0] sm:$0xff] }
  0x24   : > { %7847 = vmatmul.msk.bf16.vlgmr.msra.gmra.mxu0 %vm672_vm1, %v7924_v6  ;;  %7871 = vmatmul.msk.bf16.vlgmr.msra.gmra.mxu1 %vm672_vm1, %v7948_v7  ;;  %v7969_v54 = vld [vmem:[%s9316_s11 + $0x168] sm:$0xff] }
  0x25   : > { %7884 = vmatmul.msk.bf16.vlgmr.msra.gmra.mxu2 %vm672_vm1, %v7961_v8  ;;  %7893 = vmatmul.msk.bf16.vlgmr.msra.gmra.mxu3 %vm672_vm1, %v7970_v9 }
  0x34   : > { %7848 = vmatmul.msk.bf16.gmra.mxu0 %vm672_vm1, %v7925_v10  ;;  %7872 = vmatmul.msk.bf16.gmra.mxu1 %vm672_vm1, %v7949_v11 }
  0x35   : > { %7885 = vmatmul.msk.bf16.gmra.mxu2 %vm672_vm1, %v7962_v12  ;;  %7894 = vmatmul.msk.bf16.gmra.mxu3 %vm672_vm1, %v7971_v13 }
  0x44   : > { %7849 = vmatmul.msk.bf16.gmra.mxu0 %vm672_vm1, %v7926_v14  ;;  %7873 = vmatmul.msk.bf16.gmra.mxu1 %vm672_vm1, %v7950_v15 }
  0x45   : > { %7886 = vmatmul.msk.bf16.gmra.mxu2 %vm672_vm1, %v7963_v16  ;;  %7895 = vmatmul.msk.bf16.gmra.mxu3 %vm672_vm1, %v7972_v17 }
  0x54   : > { %7850 = vmatmul.msk.bf16.gmra.mxu0 %vm672_vm1, %v7927_v18  ;;  %7874 = vmatmul.msk.bf16.gmra.mxu1 %vm672_vm1, %v7951_v19 }
  0x55   : > { %7887 = vmatmul.msk.bf16.gmra.mxu2 %vm672_vm1, %v7964_v20  ;;  %7896 = vmatmul.msk.bf16.gmra.mxu3 %vm672_vm1, %v7973_v21 }
  0x64   : > { %7851 = vmatmul.msk.bf16.gmra.mxu0 %vm672_vm1, %v7928_v22  ;;  %7875 = vmatmul.msk.bf16.gmra.mxu1 %vm672_vm1, %v7952_v23 }
  0x65   : > { %7888 = vmatmul.msk.bf16.gmra.mxu2 %vm672_vm1, %v7965_v24  ;;  %7897 = vmatmul.msk.bf16.gmra.mxu3 %vm672_vm1, %v7974_v25 }
  0x74   : > { %7852 = vmatmul.msk.bf16.gmra.mxu0 %vm672_vm1, %v7929_v26  ;;  %7876 = vmatmul.msk.bf16.gmra.mxu1 %vm672_vm1, %v7953_v27 }
  0x75   : > { %7889 = vmatmul.msk.bf16.gmra.mxu2 %vm672_vm1, %v7966_v28  ;;  %7898 = vmatmul.msk.bf16.gmra.mxu3 %vm672_vm1, %v7975_v29 }
  0x84   : > { %7853 = vmatmul.msk.bf16.gmra.mxu0 %vm672_vm1, %v7930_v31  ;;  %7877 = vmatmul.msk.bf16.gmra.mxu1 %vm672_vm1, %v7954_v33 }
  0x85   : > { %7890 = vmatmul.msk.bf16.gmra.mxu2 %vm672_vm1, %v7967_v30  ;;  %7899 = vmatmul.msk.bf16.gmra.mxu3 %vm672_vm1, %v7976_v32 }
  0x94   : > { %7854 = vmatmul.msk.bf16.gmra.mxu0 %vm672_vm1, %v7931_v34  ;;  %7878 = vmatmul.msk.bf16.gmra.mxu1 %vm672_vm1, %v7955_v36 }
  0x95   : > { %7891 = vmatmul.msk.bf16.gmra.mxu2 %vm672_vm1, %v7968_v35  ;;  %7900 = vmatmul.msk.bf16.gmra.mxu3 %vm672_vm1, %v7977_v37 }
  0xa1   : > { %v878_v39 = vpop.f32.mrf.mxu0  ;;  %v998_v40 = vpop.f32.mrf.mxu1 }
  0xa2   : > { %v9388_v41 = vadd.f32 %v9384_v38, %v878_v39  ;;  %v9393_v43 = vadd.f32 %v9384_v38, %v998_v40 }
  0xa4   : > { %18107 = vst [vmem:[#allocation5_spill] sm:$0xff] %v9388_v41  ;;  %v1327_v42 = vsel %vm1326_vm2, %v9388_v41, -inf  ;;  %v1471_v52 = vsel %vm1326_vm2, %v9393_v43, -inf }
  0xa5   : > { %1328 = vmax.xlane.f32.xlu0 %v1327_v42  ;;  %18108 = vst [vmem:[#allocation6_spill] sm:$0xff] %v9393_v43  ;;  %7892 = vmatmul.msk.bf16.gmra.mxu2 %vm672_vm1, %v7969_v54 }
  0xa6   : > { %7901 = vmatmul.msk.bf16.gmra.mxu3 %vm672_vm1, %v7978_v1 }
  0xa8   : > { %v1063_v44 = vpop.f32.mrf.mxu2  ;;  %v1108_v45 = vpop.f32.mrf.mxu3 }
  0xa9   : > { %v9396_v46 = vadd.f32 %v9384_v38, %v1063_v44  ;;  %v880_v47 = vpop.f32.mrf.mxu0  ;;  %v1000_v48 = vpop.f32.mrf.mxu1  ;;  %v9408_v53 = vadd.f32 %v9384_v38, %v1108_v45 }
  0xaa   : > { %v9399_v49 = vadd.f32 %v9384_v38, %v1000_v48  ;;  %v9413_v55 = vadd.f32 %v9384_v38, %v880_v47 }
  0xab   : > { %18109 = vst [vmem:[#allocation7_spill] sm:$0xff] %v9396_v46  ;;  %v1549_v50 = vsel %vm1326_vm2, %v9396_v46, -inf  ;;  %v1603_v59 = vsel %vm1326_vm2, %v9408_v53, -inf }
  0xac   : > { %18110 = vst [vmem:[#allocation8_spill] sm:$0xff] %v9399_v49  ;;  %1550 = vmax.xlane.f32.xlu2 %v1549_v50  ;;  %v1474_v51 = vsel %vm1326_vm2, %v9399_v49, -inf  ;;  %v1330_v63 = vsel %vm1326_vm2, %v9413_v55, -inf }
  0xad   : > { %18111 = vst [vmem:[#allocation9_spill] sm:$0xff] %v9408_v53  ;;  %1475 = vmax.xlane.f32.xlu1 %v1474_v51  ;;  %1472 = vmax.xlane.f32.xlu0 %v1471_v52  ;;  %v7932_v51 = vld [vmem:[%s9316_s11 + $0x40] sm:$0xff] }
  0xae   : > { %18112 = vst [vmem:[#allocation10_spill] sm:$0xff] %v9413_v55  ;;  %7855 = vmatmul.msk.bf16.gmra.mxu0 %vm672_vm1, %v7932_v51 }
  0xb0   : > { %v1065_v56 = vpop.f32.mrf.mxu2  ;;  %v1110_v57 = vpop.f32.mrf.mxu3 }
  0xb1   : > { %v883_v58 = vpop.f32.mrf.mxu0  ;;  %v1003_v61 = vpop.f32.mrf.mxu1  ;;  %v9430_v2 = vadd.f32 %v9384_v38, %v1065_v56  ;;  %v9442_v10 = vadd.f32 %v9384_v38, %v1110_v57 }
  0xb2   : > { %v9418_v60 = vadd.f32 %v9384_v38, %v883_v58  ;;  %v9425_v0 = vadd.f32 %v9384_v38, %v1003_v61 }
  0xb3   : > { %18115 = vst [vmem:[#allocation13_spill] sm:$0xff] %v9430_v2  ;;  %v1552_v8 = vsel %vm1326_vm2, %v9430_v2, -inf  ;;  %v1606_v17 = vsel %vm1326_vm2, %v9442_v10, -inf }
  0xb4   : > { %18113 = vst [vmem:[#allocation11_spill] sm:$0xff] %v9418_v60  ;;  %1604 = vmax.xlane.f32.xlu2 %v1603_v59  ;;  %v1333_v62 = vsel %vm1326_vm2, %v9418_v60, -inf  ;;  %v1477_v5 = vsel %vm1326_vm2, %v9425_v0, -inf }
  0xb5   : > { %18114 = vst [vmem:[#allocation12_spill] sm:$0xff] %v9425_v0  ;;  %1334 = vmax.xlane.f32.xlu1 %v1333_v62  ;;  %1331 = vmax.xlane.f32.xlu0 %v1330_v63 }
  0xb6   : > { %18117 = vst [vmem:[#allocation15_spill] sm:$0xff] %v9442_v10 }
  0xb8   : > { %v1068_v3 = vpop.f32.mrf.mxu2  ;;  %v1113_v6 = vpop.f32.mrf.mxu3 }
  0xb9   : > { %v9433_v4 = vadd.f32 %v9384_v38, %v1068_v3  ;;  %v885_v9 = vpop.f32.mrf.mxu0  ;;  %v9445_v11 = vadd.f32 %v9384_v38, %v1113_v6  ;;  %v1005_v18 = vpop.f32.mrf.mxu1  ;;  %v7956_v3 = vld [vmem:[%s9316_s11 + $0x100] sm:$0xff] }
  0xba   : > { %v9460_v20 = vadd.f32 %v9384_v38, %v1005_v18  ;;  %v9463_v21 = vadd.f32 %v9384_v38, %v885_v9  ;;  %7879 = vmatmul.msk.bf16.gmra.mxu1 %vm672_vm1, %v7956_v3 }
  0xbb   : > { %18116 = vst [vmem:[#allocation14_spill] sm:$0xff] %v9433_v4  ;;  %v1555_v7 = vsel %vm1326_vm2, %v9433_v4, -inf  ;;  %v1609_v16 = vsel %vm1326_vm2, %v9445_v11, -inf }
  0xbc   : > { %1478 = vmax.xlane.f32.xlu2 %v1477_v5  ;;  %18118 = vst [vmem:[#allocation16_spill] sm:$0xff] %v9445_v11  ;;  %v1336_v25 = vsel %vm1326_vm2, %v9463_v21, -inf  ;;  %v1480_v26 = vsel %vm1326_vm2, %v9460_v20, -inf }
  0xbd   : > { %1556 = vmax.xlane.f32.xlu1 %v1555_v7  ;;  %1553 = vmax.xlane.f32.xlu0 %v1552_v8  ;;  %18121 = vst [vmem:[#allocation19_spill] sm:$0xff] %v9460_v20 }
  0xbe   : > { %18122 = vst [vmem:[#allocation20_spill] sm:$0xff] %v9463_v21 }
  0xc0   : > { %v1070_v12 = vpop.f32.mrf.mxu2  ;;  %v1115_v15 = vpop.f32.mrf.mxu3 }
  0xc1   : > { %v9448_v13 = vadd.f32 %v9384_v38, %v1070_v12  ;;  %v9457_v19 = vadd.f32 %v9384_v38, %v1115_v15  ;;  %v888_v22 = vpop.f32.mrf.mxu0  ;;  %v1008_v28 = vpop.f32.mrf.mxu1 }
  0xc2   : > { %v9472_v27 = vadd.f32 %v9384_v38, %v888_v22  ;;  %v9475_v29 = vadd.f32 %v9384_v38, %v1008_v28 }
  0xc3   : > { %18119 = vst [vmem:[#allocation17_spill] sm:$0xff] %v9448_v13  ;;  %v1558_v14 = vsel %vm1326_vm2, %v9448_v13, -inf  ;;  %v1612_v23 = vsel %vm1326_vm2, %v9457_v19, -inf }
  0xc4   : > { %1559 = vmax.xlane.f32.xlu2 %v1558_v14  ;;  %18120 = vst [vmem:[#allocation18_spill] sm:$0xff] %v9457_v19  ;;  %v1339_v31 = vsel %vm1326_vm2, %v9472_v27, -inf  ;;  %v1483_v32 = vsel %vm1326_vm2, %v9475_v29, -inf }
  0xc5   : > { %1610 = vmax.xlane.f32.xlu1 %v1609_v16  ;;  %1607 = vmax.xlane.f32.xlu0 %v1606_v17  ;;  %18123 = vst [vmem:[#allocation21_spill] sm:$0xff] %v9472_v27 }
  0xc6   : > { %18124 = vst [vmem:[#allocation22_spill] sm:$0xff] %v9475_v29 }
  0xc8   : > { %v1073_v24 = vpop.f32.mrf.mxu2  ;;  %v1118_v35 = vpop.f32.mrf.mxu3 }
  0xc9   : > { %v9478_v30 = vadd.f32 %v9384_v38, %v1073_v24  ;;  %v890_v34 = vpop.f32.mrf.mxu0  ;;  %v9487_v37 = vadd.f32 %v9384_v38, %v1118_v35  ;;  %v1010_v44 = vpop.f32.mrf.mxu1 }
  0xca   : > { %v9490_v39 = vadd.f32 %v9384_v38, %v890_v34  ;;  %v9506_v54 = vadd.f32 %v9384_v38, %v1010_v44 }
  0xcb   : > { %18125 = vst [vmem:[#allocation23_spill] sm:$0xff] %v9478_v30  ;;  %v1561_v33 = vsel %vm1326_vm2, %v9478_v30, -inf  ;;  %v1615_v42 = vsel %vm1326_vm2, %v9487_v37, -inf }
  0xcc   : > { %1613 = vmax.xlane.f32.xlu2 %v1612_v23  ;;  %18126 = vst [vmem:[#allocation24_spill] sm:$0xff] %v9487_v37  ;;  %v1342_v45 = vsel %vm1326_vm2, %v9490_v39, -inf  ;;  %v1486_v59 = vsel %vm1326_vm2, %v9506_v54, -inf }
  0xcd   : > { %1337 = vmax.xlane.f32.xlu1 %v1336_v25  ;;  %1481 = vmax.xlane.f32.xlu0 %v1480_v26  ;;  %18127 = vst [vmem:[#allocation25_spill] sm:$0xff] %v9490_v39 }
  0xce   : > { %18130 = vst [vmem:[#allocation28_spill] sm:$0xff] %v9506_v54 }
  0xd0   : > { %v1075_v36 = vpop.f32.mrf.mxu2  ;;  %v1120_v50 = vpop.f32.mrf.mxu3 }
  0xd1   : > { %v9493_v40 = vadd.f32 %v9384_v38, %v1075_v36  ;;  %v893_v47 = vpop.f32.mrf.mxu0  ;;  %v9510_v56 = vadd.f32 %v9384_v38, %v1120_v50  ;;  %v1013_v61 = vpop.f32.mrf.mxu1 }
  0xd2   : > { %v9503_v52 = vadd.f32 %v9384_v38, %v893_v47  ;;  %v9523_v5 = vadd.f32 %v9384_v38, %v1013_v61 }
  0xd3   : > { %18128 = vst [vmem:[#allocation26_spill] sm:$0xff] %v9493_v40  ;;  %v1564_v48 = vsel %vm1326_vm2, %v9493_v40, -inf  ;;  %v1618_v62 = vsel %vm1326_vm2, %v9510_v56, -inf }
  0xd4   : > { %1340 = vmax.xlane.f32.xlu2 %v1339_v31  ;;  %18129 = vst [vmem:[#allocation27_spill] sm:$0xff] %v9503_v52  ;;  %v1345_v57 = vsel %vm1326_vm2, %v9503_v52, -inf  ;;  %v1489_v8 = vsel %vm1326_vm2, %v9523_v5, -inf }
  0xd5   : > { %1484 = vmax.xlane.f32.xlu1 %v1483_v32  ;;  %1562 = vmax.xlane.f32.xlu0 %v1561_v33  ;;  %18131 = vst [vmem:[#allocation29_spill] sm:$0xff] %v9510_v56 }
  0xd6   : > { %18133 = vst [vmem:[#allocation31_spill] sm:$0xff] %v9523_v5 }
  0xd8   : > { %v1078_v58 = vpop.f32.mrf.mxu2  ;;  %v1123_v9 = vpop.f32.mrf.mxu3 }
  0xd9   : > { %v9519_v63 = vadd.f32 %v9384_v38, %v1078_v58  ;;  %v895_v1 = vpop.f32.mrf.mxu0  ;;  %v9536_v15 = vadd.f32 %v9384_v38, %v1123_v9  ;;  %v1015_v16 = vpop.f32.mrf.mxu1  ;;  %v7933_v58 = vld [vmem:[%s9316_s11 + $0x48] sm:$0xff] }
  0xda   : > { %v9527_v6 = vadd.f32 %v9384_v38, %v895_v1  ;;  %v9542_v18 = vadd.f32 %v9384_v38, %v1015_v16  ;;  %7856 = vmatmul.msk.bf16.gmra.mxu0 %vm672_vm1, %v7933_v58 }
  0xdb   : > { %18132 = vst [vmem:[#allocation30_spill] sm:$0xff] %v9519_v63  ;;  %v1567_v7 = vsel %vm1326_vm2, %v9519_v63, -inf  ;;  %v1621_v22 = vsel %vm1326_vm2, %v9536_v15, -inf }
  0xdc   : > { %1343 = vmax.xlane.f32.xlu2 %v1342_v45  ;;  %18134 = vst [vmem:[#allocation32_spill] sm:$0xff] %v9527_v6  ;;  %v1348_v12 = vsel %vm1326_vm2, %v9527_v6, -inf  ;;  %v1492_v24 = vsel %vm1326_vm2, %v9542_v18, -inf }
  0xdd   : > { %1565 = vmax.xlane.f32.xlu1 %v1564_v48  ;;  %1616 = vmax.xlane.f32.xlu0 %v1615_v42  ;;  %18135 = vst [vmem:[#allocation33_spill] sm:$0xff] %v9536_v15 }
  0xde   : > { %18137 = vst [vmem:[#allocation35_spill] sm:$0xff] %v9542_v18 }
  0xe0   : > { %v1080_v14 = vpop.f32.mrf.mxu2  ;;  %v1125_v28 = vpop.f32.mrf.mxu3 }
  0xe1   : > { %v9539_v17 = vadd.f32 %v9384_v38, %v1080_v14  ;;  %v898_v23 = vpop.f32.mrf.mxu0  ;;  %v9557_v33 = vadd.f32 %v9384_v38, %v1125_v28  ;;  %v1018_v36 = vpop.f32.mrf.mxu1  ;;  %v7957_v14 = vld [vmem:[%s9316_s11 + $0x108] sm:$0xff] }
  0xe2   : > { %v9551_v26 = vadd.f32 %v9384_v38, %v898_v23  ;;  %v9566_v45 = vadd.f32 %v9384_v38, %v1018_v36  ;;  %7880 = vmatmul.msk.bf16.gmra.mxu1 %vm672_vm1, %v7957_v14 }
  0xe3   : > { %18136 = vst [vmem:[#allocation34_spill] sm:$0xff] %v9539_v17  ;;  %v1570_v25 = vsel %vm1326_vm2, %v9539_v17, -inf  ;;  %v1624_v42 = vsel %vm1326_vm2, %v9557_v33, -inf }
  0xe4   : > { %1487 = vmax.xlane.f32.xlu2 %v1486_v59  ;;  %18138 = vst [vmem:[#allocation36_spill] sm:$0xff] %v9551_v26  ;;  %v1351_v34 = vsel %vm1326_vm2, %v9551_v26, -inf  ;;  %v1495_v51 = vsel %vm1326_vm2, %v9566_v45, -inf }
  0xe5   : > { %1619 = vmax.xlane.f32.xlu1 %v1618_v62  ;;  %1346 = vmax.xlane.f32.xlu0 %v1345_v57  ;;  %18140 = vst [vmem:[#allocation38_spill] sm:$0xff] %v9557_v33  ;;  %v7979_v62 = vld [vmem:[%s9316_s11 + $0x1b8] sm:$0xff] }
  0xe6   : > { %18141 = vst [vmem:[#allocation39_spill] sm:$0xff] %v9566_v45  ;;  %7902 = vmatmul.msk.bf16.gmra.mxu3 %vm672_vm1, %v7979_v62 }
  0xe8   : > { %v1083_v31 = vpop.f32.mrf.mxu2  ;;  %v1128_v47 = vpop.f32.mrf.mxu3 }
  0xe9   : > { %v9554_v32 = vadd.f32 %v9384_v38, %v1083_v31  ;;  %v900_v44 = vpop.f32.mrf.mxu0  ;;  %v9569_v48 = vadd.f32 %v9384_v38, %v1128_v47  ;;  %v1020_v1 = vpop.f32.mrf.mxu1 }
  0xea   : > { %v9572_v50 = vadd.f32 %v9384_v38, %v900_v44  ;;  %v9591_v9 = vadd.f32 %v9384_v38, %v1020_v1 }
  0xeb   : > { %18139 = vst [vmem:[#allocation37_spill] sm:$0xff] %v9554_v32  ;;  %v1573_v35 = vsel %vm1326_vm2, %v9554_v32, -inf  ;;  %v1627_v57 = vsel %vm1326_vm2, %v9569_v48, -inf }
  0xec   : > { %1568 = vmax.xlane.f32.xlu2 %v1567_v7  ;;  %18142 = vst [vmem:[#allocation40_spill] sm:$0xff] %v9569_v48  ;;  %v1354_v61 = vsel %vm1326_vm2, %v9572_v50, -inf }
  0xed   : > { %1349 = vmax.xlane.f32.xlu1 %v1348_v12  ;;  %1490 = vmax.xlane.f32.xlu0 %v1489_v8  ;;  %18143 = vst [vmem:[#allocation41_spill] sm:$0xff] %v9572_v50 }
  0xee   : > { %18146 = vst [vmem:[#allocation44_spill] sm:$0xff] %v9591_v9 }
  0xf0   : > { %v1085_v59 = vpop.f32.mrf.mxu2  ;;  %v1130_v16 = vpop.f32.mrf.mxu3 }
  0xf1   : > { %v903_v3 = vpop.f32.mrf.mxu0  ;;  %v9588_v8 = vadd.f32 %v9384_v38, %v1085_v59 }
  0xf2   : > { %v9584_v7 = vadd.f32 %v9384_v38, %v903_v3 }
  0xf3   : > { %18145 = vst [vmem:[#allocation43_spill] sm:$0xff] %v9588_v8 }
  0xf4   : > { %1622 = vmax.xlane.f32.xlu2 %v1621_v22  ;;  %18144 = vst [vmem:[#allocation42_spill] sm:$0xff] %v9584_v7  ;;  %v1357_v12 = vsel %vm1326_vm2, %v9584_v7, -inf  ;;  %v1576_v22 = vsel %vm1326_vm2, %v9588_v8, -inf }
  0xf5   : > { %1493 = vmax.xlane.f32.xlu1 %v1492_v24  ;;  %1571 = vmax.xlane.f32.xlu0 %v1570_v25  ;;  %v1498_v24 = vsel %vm1326_vm2, %v9591_v9, -inf  ;;  %v1023_v25 = vpop.f32.mrf.mxu1 }
  0xf6   : > { %v9602_v28 = vadd.f32 %v9384_v38, %v1023_v25 }
  0xf8   : > { %v1088_v23 = vpop.f32.mrf.mxu2  ;;  %18147 = vst [vmem:[#allocation45_spill] sm:$0xff] %v9602_v28  ;;  %v1133_v47 = vpop.f32.mrf.mxu3 }
  0xf9   : > { %v9605_v31 = vadd.f32 %v9384_v38, %v1088_v23 }
  0xfb   : > { %18148 = vst [vmem:[#allocation46_spill] sm:$0xff] %v9605_v31  ;;  %v1579_v36 = vsel %vm1326_vm2, %v9605_v31, -inf }
  0xfc   : > { %1352 = vmax.xlane.f32.xlu2 %v1351_v34  ;;  %v9608_v34 = vadd.f32 %v9384_v38, %v1130_v16 }
  0xfd   : > { %1574 = vmax.xlane.f32.xlu1 %v1573_v35  ;;  %1625 = vmax.xlane.f32.xlu0 %v1624_v42  ;;  %v1501_v35 = vsel %vm1326_vm2, %v9602_v28, -inf  ;;  %v905_v42 = vpop.f32.mrf.mxu0  ;;  %v1025_v62 = vpop.f32.mrf.mxu1 }
  0xfe   : > { %18149 = vst [vmem:[#allocation47_spill] sm:$0xff] %v9608_v34  ;;  %v1630_v44 = vsel %vm1326_vm2, %v9608_v34, -inf  ;;  %v9620_v58 = vadd.f32 %v9384_v38, %v905_v42 }
 0x100   : > { %18151 = vst [vmem:[#allocation49_spill] sm:$0xff] %v9620_v58  ;;  %v1360_v1 = vsel %vm1326_vm2, %v9620_v58, -inf  ;;  %v1135_v14 = vpop.f32.mrf.mxu3 }
 0x101   : > { %v9638_v23 = vadd.f32 %v9384_v38, %v1135_v14 }
 0x103   : > { %18155 = vst [vmem:[#allocation53_spill] sm:$0xff] %v9638_v23  ;;  %v1636_v42 = vsel %vm1326_vm2, %v9638_v23, -inf }
 0x104   : > { %1496 = vmax.xlane.f32.xlu2 %v1495_v51  ;;  %v1090_v51 = vpop.f32.mrf.mxu2 }
 0x105   : > { %1628 = vmax.xlane.f32.xlu1 %v1627_v57  ;;  %1355 = vmax.xlane.f32.xlu0 %v1354_v61  ;;  %v9617_v57 = vadd.f32 %v9384_v38, %v1133_v47  ;;  %v9623_v59 = vadd.f32 %v9384_v38, %v1090_v51  ;;  %v908_v3 = vpop.f32.mrf.mxu0 }
 0x106   : > { %v9632_v16 = vadd.f32 %v9384_v38, %v908_v3 }
 0x107   : > { %18150 = vst [vmem:[#allocation48_spill] sm:$0xff] %v9617_v57  ;;  %v1633_v61 = vsel %vm1326_vm2, %v9617_v57, -inf }
 0x108   : > { %18152 = vst [vmem:[#allocation50_spill] sm:$0xff] %v9623_v59  ;;  %v1138_v3 = vpop.f32.mrf.mxu3 }
 0x109   : > { %18153 = vst [vmem:[#allocation51_spill] sm:$0xff] %v9632_v16 }
 0x10c   : > { %1577 = vmax.xlane.f32.xlu2 %v1576_v22  ;;  %v9635_v22 = vadd.f32 %v9384_v38, %v1025_v62  ;;  %v1093_v25 = vpop.f32.mrf.mxu2 }
 0x10d   : > { %1358 = vmax.xlane.f32.xlu1 %v1357_v12  ;;  %1499 = vmax.xlane.f32.xlu0 %v1498_v24  ;;  %v1582_v12 = vsel %vm1326_vm2, %v9623_v59, -inf  ;;  %v1363_v24 = vsel %vm1326_vm2, %v9632_v16, -inf  ;;  %v910_v47 = vpop.f32.mrf.mxu0 }
 0x10e   : > { %18154 = vst [vmem:[#allocation52_spill] sm:$0xff] %v9635_v22 }
 0x114   : > { %1631 = vmax.xlane.f32.xlu2 %v1630_v44  ;;  %v9647_v44 = vadd.f32 %v9384_v38, %v1093_v25  ;;  %v1095_v14 = vpop.f32.mrf.mxu2 }
 0x115   : > { %1502 = vmax.xlane.f32.xlu1 %v1501_v35  ;;  %1580 = vmax.xlane.f32.xlu0 %v1579_v36  ;;  %v1504_v35 = vsel %vm1326_vm2, %v9635_v22, -inf  ;;  %v1028_v36 = vpop.f32.mrf.mxu1 }
 0x116   : > { %18156 = vst [vmem:[#allocation54_spill] sm:$0xff] %v9647_v44  ;;  %v9650_v51 = vadd.f32 %v9384_v38, %v1028_v36  ;;  %v1585_v62 = vsel %vm1326_vm2, %v9647_v44, -inf }
 0x118   : > { %18157 = vst [vmem:[#allocation55_spill] sm:$0xff] %v9650_v51 }
 0x11c   : > { %1361 = vmax.xlane.f32.xlu2 %v1360_v1  ;;  %v1507_v1 = vsel %vm1326_vm2, %v9650_v51, -inf }
 0x11d   : > { %1583 = vmax.xlane.f32.xlu1 %v1582_v12  ;;  %1634 = vmax.xlane.f32.xlu0 %v1633_v61  ;;  %v9653_v61 = vadd.f32 %v9384_v38, %v910_v47  ;;  %v1030_v25 = vpop.f32.mrf.mxu1  ;;  %v913_v47 = vpop.f32.mrf.mxu0 }
 0x11e   : > { %v9668_v36 = vadd.f32 %v9384_v38, %v1030_v25 }
 0x11f   : > { %18158 = vst [vmem:[#allocation56_spill] sm:$0xff] %v9653_v61  ;;  %v1366_v12 = vsel %vm1326_vm2, %v9653_v61, -inf }
 0x120   : > { %18161 = vst [vmem:[#allocation59_spill] sm:$0xff] %v9668_v36 }
 0x124   : > { %1505 = vmax.xlane.f32.xlu2 %v1504_v35  ;;  %v9665_v35 = vadd.f32 %v9384_v38, %v1095_v14  ;;  %v1098_v14 = vpop.f32.mrf.mxu2 }
 0x125   : > { %1637 = vmax.xlane.f32.xlu1 %v1636_v42  ;;  %1364 = vmax.xlane.f32.xlu0 %v1363_v24  ;;  %v9662_v24 = vadd.f32 %v9384_v38, %v1138_v3  ;;  %v9680_v25 = vadd.f32 %v9384_v38, %v1098_v14  ;;  %v1033_v15 = vpop.f32.mrf.mxu1 }
 0x126   : > { %18160 = vst [vmem:[#allocation58_spill] sm:$0xff] %v9665_v35  ;;  %v1588_v3 = vsel %vm1326_vm2, %v9665_v35, -inf }
 0x127   : > { %18159 = vst [vmem:[#allocation57_spill] sm:$0xff] %v9662_v24  ;;  %v1639_v42 = vsel %vm1326_vm2, %v9662_v24, -inf  ;;  %v1591_v34 = vsel %vm1326_vm2, %v9680_v25, -inf }
 0x128   : > { %18163 = vst [vmem:[#allocation61_spill] sm:$0xff] %v9680_v25 }
 0x12c   : > { %1586 = vmax.xlane.f32.xlu2 %v1585_v62  ;;  %v1510_v62 = vsel %vm1326_vm2, %v9668_v36, -inf  ;;  %v1100_v33 = vpop.f32.mrf.mxu2 }
 0x12d   : > { %1367 = vmax.xlane.f32.xlu1 %v1366_v12  ;;  %1508 = vmax.xlane.f32.xlu0 %v1507_v1  ;;  %v9677_v1 = vadd.f32 %v9384_v38, %v913_v47  ;;  %v1140_v12 = vpop.f32.mrf.mxu3 }
 0x12e   : > { %v9683_v24 = vadd.f32 %v9384_v38, %v1140_v12 }
 0x12f   : > { %18162 = vst [vmem:[#allocation60_spill] sm:$0xff] %v9677_v1 }
 0x130   : > { %18164 = vst [vmem:[#allocation62_spill] sm:$0xff] %v9683_v24  ;;  %v1642_v47 = vsel %vm1326_vm2, %v9683_v24, -inf }
 0x134   : > { %1640 = vmax.xlane.f32.xlu2 %v1639_v42  ;;  %v1369_v42 = vsel %vm1326_vm2, %v9677_v1, -inf  ;;  %v1103_v37 = vpop.f32.mrf.mxu2 }
 0x135   : > { %1511 = vmax.xlane.f32.xlu1 %v1510_v62  ;;  %1589 = vmax.xlane.f32.xlu0 %v1588_v3  ;;  %v915_v62 = vpop.f32.mrf.mxu0  ;;  %v9692_v3 = vadd.f32 %v9384_v38, %v1033_v15  ;;  %v1143_v14 = vpop.f32.mrf.mxu3 }
 0x136   : > { %v9695_v12 = vadd.f32 %v9384_v38, %v1143_v14  ;;  %v9698_v57 = vadd.f32 %v9384_v38, %v915_v62 }
 0x137   : > { %18165 = vst [vmem:[#allocation63_spill] sm:$0xff] %v9692_v3  ;;  %v1513_v19 = vsel %vm1326_vm2, %v9692_v3, -inf }
 0x138   : > { %18166 = vst [vmem:[#allocation64_spill] sm:$0xff] %v9695_v12  ;;  %v1645_v24 = vsel %vm1326_vm2, %v9695_v12, -inf  ;;  %v1372_v15 = vsel %vm1326_vm2, %v9698_v57, -inf }
 0x139   : > { %18167 = vst [vmem:[#allocation65_spill] sm:$0xff] %v9698_v57 }
 0x13c   : > { %1370 = vmax.xlane.f32.xlu2 %v1369_v42  ;;  %v1329_v42 = vpop.xlane.xlu0 %1328 }
 0x13d   : > { %1592 = vmax.xlane.f32.xlu1 %v1591_v34  ;;  %1643 = vmax.xlane.f32.xlu0 %v1642_v47  ;;  %v1035_v34 = vpop.f32.mrf.mxu1  ;;  %v9707_v47 = vadd.f32 %v9384_v38, %v1100_v33  ;;  %v1145_v14 = vpop.f32.mrf.mxu3 }
 0x13e   : > { %v9710_v62 = vadd.f32 %v9384_v38, %v1035_v34  ;;  %v7934_v34 = vld [vmem:[%s9316_s11 + $0x50] sm:$0xff] }
 0x13f   : > { %18168 = vst [vmem:[#allocation66_spill] sm:$0xff] %v9707_v47  ;;  %v1594_v53 = vsel %vm1326_vm2, %v9707_v47, -inf  ;;  %7857 = vmatmul.msk.bf16.gmra.mxu0 %vm672_vm1, %v7934_v34  ;;  %v1711_v34 = vsub.f32 %v9388_v41, %v1329_v42 }
 0x140   : > { %18169 = vst [vmem:[#allocation67_spill] sm:$0xff] %v9710_v62  ;;  %v1516_v10 = vsel %vm1326_vm2, %v9710_v62, -inf }
 0x144   : > { %1514 = vmax.xlane.f32.xlu2 %v1513_v19  ;;  %v1473_v19 = vpop.xlane.xlu0 %1472 }
 0x145   : > { %1646 = vmax.xlane.f32.xlu1 %v1645_v24  ;;  %1373 = vmax.xlane.f32.xlu0 %v1372_v15  ;;  %v9717_v24 = vadd.f32 %v9384_v38, %v1103_v37  ;;  %v1759_v33 = vsub.f32 %v9393_v43, %v1473_v19  ;;  %v9721_v15 = vadd.f32 %v9384_v38, %v1145_v14  ;;  %v1148_v12 = vpop.f32.mrf.mxu3  ;;  %v7958_v14 = vld [vmem:[%s9316_s11 + $0x110] sm:$0xff]  ;;  %v1476_v43 = vpop.xlane.xlu1 %1475 }
 0x146   : > { %v9732_v37 = vadd.f32 %v9384_v38, %v1148_v12  ;;  %7881 = vmatmul.msk.bf16.gmra.mxu1 %vm672_vm1, %v7958_v14  ;;  %v1760_v14 = vsub.f32 %v9399_v49, %v1476_v43 }
 0x147   : > { %18170 = vst [vmem:[#allocation68_spill] sm:$0xff] %v9717_v24  ;;  %v1597_v47 = vsel %vm1326_vm2, %v9717_v24, -inf  ;;  %v1935_v44 = vmul.f32 1.442695, %v1759_v33 }
 0x148   : > { %18171 = vst [vmem:[#allocation69_spill] sm:$0xff] %v9721_v15  ;;  %v1651_v19 = vsel %vm1326_vm2, %v9732_v37, -inf  ;;  %v1937_v42 = vmul.f32 1.442695, %v1760_v14 }
 0x149   : > { %18172 = vst [vmem:[#allocation70_spill] sm:$0xff] %v9732_v37  ;;  %8362 = vpow2.f32 %v1935_v44  ;;  %v7981_v44 = vld [vmem:[%s9316_s11 + $0x1c8] sm:$0xff] }
 0x14c   : > { %1595 = vmax.xlane.f32.xlu2 %v1594_v53  ;;  %v7980_v53 = vld [vmem:[%s9316_s11 + $0x1c0] sm:$0xff] }
 0x14d   : > { %1517 = vmax.xlane.f32.xlu0 %v1516_v10  ;;  %v1648_v10 = vsel %vm1326_vm2, %v9721_v15, -inf  ;;  %7903 = vmatmul.msk.bf16.gmra.mxu3 %vm672_vm1, %v7980_v53  ;;  %v1839_v53 = vmul.f32 1.442695, %v1711_v34 }
 0x14f   : > { %v9738_v33 = vpop.eup %8362  ;;  %8364 = vpow2.f32 %v1839_v53  ;;  %v9762_v53 = vpop.xlane.xlu2 %1550 }
 0x150   : > { %18173 = vst [vmem:[#allocation71_spill] sm:$0xff] %v9738_v33 }
 0x154   : > { %1649 = vmax.xlane.f32.xlu2 %v1648_v10 }
 0x155   : > { %1598 = vmax.xlane.f32.xlu0 %v1597_v47  ;;  %v1332_v47 = vpop.xlane.xlu0 %1331  ;;  %v9747_v15 = vpop.eup %8364 }
 0x156   : > { %v1712_v12 = vsub.f32 %v9413_v55, %v1332_v47  ;;  %18174 = vst [vmem:[#allocation72_spill] sm:$0xff] %v9747_v15  ;;  %v918_v47 = vpop.f32.mrf.mxu0  ;;  %v1105_v55 = vpop.f32.mrf.mxu2 }
 0x157   : > { %v9760_v43 = vadd.f32 %v9384_v38, %v918_v47  ;;  %v9769_v14 = vpop.xlane.xlu2 %1604  ;;  %v9777_v41 = vadd.f32 %v9384_v38, %v1105_v55 }
 0x158   : > { %v1841_v10 = vmul.f32 1.442695, %v1712_v12  ;;  %18179 = vst [vmem:[#allocation77_spill] sm:$0xff] %v9769_v14 }
 0x159   : > { %18177 = vst [vmem:[#allocation75_spill] sm:$0xff] %v9760_v43  ;;  %v1375_v12 = vsel %vm1326_vm2, %v9760_v43, -inf }
 0x15a   : > { %8366 = vpow2.f32 %v1841_v10  ;;  %18181 = vst [vmem:[#allocation79_spill] sm:$0xff] %v9777_v41 }
 0x15b   : > { %8368 = vpow2.f32 %v1937_v42 }
 0x15d   : > { %1652 = vmax.xlane.f32.xlu0 %v1651_v19  ;;  %7904 = vmatmul.msk.bf16.gmra.mxu3 %vm672_vm1, %v7981_v44  ;;  %v1038_v44 = vpop.f32.mrf.mxu1 }
 0x15e   : > { %2319 = vrot.lane.b32.xlu1 %v9738_v33, %s9228_s14  ;;  %v9767_v10 = vadd.f32 %v9384_v38, %v1038_v44  ;;  %v920_v42 = vpop.f32.mrf.mxu0  ;;  %v1335_v44 = vpop.xlane.xlu1 %1334  ;;  %v1600_v33 = vsel %vm1326_vm2, %v9777_v41, -inf }
 0x15f   : > { %v9774_v47 = vadd.f32 %v9384_v38, %v920_v42  ;;  %v9789_v42 = vpop.xlane.xlu0 %1553  ;;  %v1713_v30 = vsub.f32 %v9418_v60, %v1335_v44 }
 0x160   : > { %v9751_v19 = vpop.eup %8366  ;;  %18178 = vst [vmem:[#allocation76_spill] sm:$0xff] %v9767_v10  ;;  %v1519_v49 = vsel %vm1326_vm2, %v9767_v10, -inf }
 0x161   : > { %18175 = vst [vmem:[#allocation73_spill] sm:$0xff] %v9751_v19  ;;  %v9755_v34 = vpop.eup %8368 }
 0x162   : > { %18176 = vst [vmem:[#allocation74_spill] sm:$0xff] %v9755_v34 }
 0x163   : > { %18180 = vst [vmem:[#allocation78_spill] sm:$0xff] %v9774_v47 }
 0x166   : > { %v923_v55 = vpop.f32.mrf.mxu0  ;;  %v9799_v8 = vpop.xlane.xlu1 %1556 }
 0x16c   : > { %2223 = vrot.lane.b32.xlu2 %v9747_v15, %s9228_s14  ;;  %v1150_v15 = vpop.f32.mrf.mxu3 }
 0x171   : > { %2225 = vrot.lane.b32.xlu0 %v9751_v19, %s9228_s14  ;;  %v1479_v19 = vpop.xlane.xlu2 %1478 }
 0x172   : > { %v1761_v31 = vsub.f32 %v9425_v0, %v1479_v19  ;;  %v1843_v19 = vmul.f32 1.442695, %v1713_v30  ;;  %v7982_v0 = vld [vmem:[%s9316_s11 + $0x1d0] sm:$0xff]  ;;  %v7960_v30 = vld [vmem:[%s9316_s11 + $0x120] sm:$0xff] }
 0x173   : > { %7905 = vmatmul.msk.bf16.gmra.mxu3 %vm672_vm1, %v7982_v0 }
 0x179   : > { %2321 = vrot.lane.b32.xlu0 %v9755_v34, %s9228_s14  ;;  %v1040_v34 = vpop.f32.mrf.mxu1  ;;  %v9804_v23 = vpop.xlane.xlu2 %1559 }
 0x17a   : > { %v9784_v37 = vadd.f32 %v9384_v38, %v1040_v34  ;;  %v7935_v34 = vld [vmem:[%s9316_s11 + $0x58] sm:$0xff]  ;;  %18185 = vst [vmem:[#allocation83_spill] sm:$0xff] %v9804_v23 }
 0x17b   : > { %7858 = vmatmul.msk.bf16.gmra.mxu0 %vm672_vm1, %v7935_v34  ;;  %v9816_v34 = vpop.xlane.xlu1 %1610 }
 0x17c   : > { %18182 = vst [vmem:[#allocation80_spill] sm:$0xff] %v9784_v37  ;;  %v1522_v14 = vsel %vm1326_vm2, %v9784_v37, -inf }
 0x181   : > { %v1043_v35 = vpop.f32.mrf.mxu1  ;;  %v9819_v48 = vpop.xlane.xlu2 %1613 }
 0x182   : > { %18188 = vst [vmem:[#allocation86_spill] sm:$0xff] %v9819_v48 }
 0x183   : > { %v1338_v44 = vpop.xlane.xlu1 %1337 }
 0x188   : > { %1376 = vmax.xlane.f32.xlu1 %v1375_v12  ;;  %v1378_v12 = vsel %vm1326_vm2, %v9774_v47, -inf }
 0x190   : > { %1520 = vmax.xlane.f32.xlu1 %v1519_v49  ;;  %v9787_v49 = vadd.f32 %v9384_v38, %v1150_v15 }
 0x192   : > { %18183 = vst [vmem:[#allocation81_spill] sm:$0xff] %v9787_v49  ;;  %v1654_v24 = vsel %vm1326_vm2, %v9787_v49, -inf  ;;  %v7959_v49 = vld [vmem:[%s9316_s11 + $0x118] sm:$0xff] }
 0x193   : > { %7882 = vmatmul.msk.bf16.gmra.mxu1 %vm672_vm1, %v7959_v49 }
 0x195   : > { %1379 = vmax.xlane.f32.xlu2 %v1378_v12  ;;  %v9794_v12 = vadd.f32 %v9384_v38, %v923_v55  ;;  %v9809_v55 = vpop.xlane.xlu0 %1607 }
 0x196   : > { %18187 = vst [vmem:[#allocation85_spill] sm:$0xff] %v9809_v55  ;;  %v7936_v55 = vld [vmem:[%s9316_s11 + $0x60] sm:$0xff] }
 0x197   : > { %18184 = vst [vmem:[#allocation82_spill] sm:$0xff] %v9794_v12  ;;  %v1381_v15 = vsel %vm1326_vm2, %v9794_v12, -inf  ;;  %7859 = vmatmul.msk.bf16.gmra.mxu0 %vm672_vm1, %v7936_v55 }
 0x198   : > { %1601 = vmax.xlane.f32.xlu1 %v1600_v33  ;;  %v1153_v33 = vpop.f32.mrf.mxu3 }
 0x19d   : > { %1523 = vmax.xlane.f32.xlu2 %v1522_v14  ;;  %v9807_v14 = vadd.f32 %v9384_v38, %v1043_v35  ;;  %v1482_v49 = vpop.xlane.xlu0 %1481 }
 0x19f   : > { %18186 = vst [vmem:[#allocation84_spill] sm:$0xff] %v9807_v14 }
 0x1a0   : > { %1655 = vmax.xlane.f32.xlu1 %v1654_v24  ;;  %v1525_v24 = vsel %vm1326_vm2, %v9807_v14, -inf  ;;  %v1155_v17 = vpop.f32.mrf.mxu3 }
 0x1a1   : > { %v9822_v35 = vadd.f32 %v9384_v38, %v1155_v17 }
 0x1a3   : > { %1382 = vmax.xlane.f32.xlu0 %v1381_v15  ;;  %v1939_v15 = vmul.f32 1.442695, %v1761_v31  ;;  %18189 = vst [vmem:[#allocation87_spill] sm:$0xff] %v9822_v35  ;;  %v1660_v63 = vsel %vm1326_vm2, %v9822_v35, -inf  ;;  %v1762_v31 = vsub.f32 %v9460_v20, %v1482_v49  ;;  %7883 = vmatmul.msk.bf16.gmra.mxu1 %vm672_vm1, %v7960_v30 }
 0x1a5   : > { %8370 = vpow2.f32 %v1939_v15  ;;  %v1941_v15 = vmul.f32 1.442695, %v1762_v31 }
 0x1a6   : > { %8372 = vpow2.f32 %v1843_v19 }
 0x1a7   : > { %8374 = vpow2.f32 %v1941_v15  ;;  %v9856_v15 = vadd.f32 %v9384_v38, %v1153_v33  ;;  %v9866_v33 = vpop.xlane.xlu0 %1562 }
 0x1a8   : > { %18197 = vst [vmem:[#allocation95_spill] sm:$0xff] %v9866_v33 }
 0x1a9   : > { %18195 = vst [vmem:[#allocation93_spill] sm:$0xff] %v9856_v15 }
 0x1ab   : > { %1526 = vmax.xlane.f32.xlu0 %v1525_v24  ;;  %v9831_v17 = vpop.eup %8370  ;;  %v1341_v24 = vpop.xlane.xlu2 %1340 }
 0x1ac   : > { %18190 = vst [vmem:[#allocation88_spill] sm:$0xff] %v9831_v17  ;;  %v9837_v60 = vpop.eup %8372  ;;  %v1715_v55 = vsub.f32 %v9472_v27, %v1341_v24 }
 0x1ad   : > { %18191 = vst [vmem:[#allocation89_spill] sm:$0xff] %v9837_v60  ;;  %v9842_v19 = vpop.eup %8374 }
 0x1ae   : > { %v1847_v0 = vmul.f32 1.442695, %v1715_v55  ;;  %18192 = vst [vmem:[#allocation90_spill] sm:$0xff] %v9842_v19  ;;  %v1657_v55 = vsel %vm1326_vm2, %v9856_v15, -inf  ;;  %v7937_v15 = vld [vmem:[%s9316_s11 + $0x68] sm:$0xff] }
 0x1af   : > { %7860 = vmatmul.msk.bf16.gmra.mxu0 %vm672_vm1, %v7937_v15 }
 0x1b0   : > { %8376 = vpow2.f32 %v1847_v0  ;;  %v925_v0 = vpop.f32.mrf.mxu0 }
 0x1b3   : > { %1661 = vmax.xlane.f32.xlu0 %v1660_v63  ;;  %v1485_v63 = vpop.xlane.xlu1 %1484 }
 0x1b4   : > { %v1763_v49 = vsub.f32 %v9475_v29, %v1485_v63  ;;  %v1045_v63 = vpop.f32.mrf.mxu1 }
 0x1b5   : > { %2323 = vrot.lane.b32.xlu2 %v9831_v17, %s9228_s14 }
 0x1b6   : > { %v1943_v31 = vmul.f32 1.442695, %v1763_v49  ;;  %v9847_v30 = vpop.eup %8376  ;;  %v9861_v49 = vadd.f32 %v9384_v38, %v925_v0 }
 0x1b7   : > { %18193 = vst [vmem:[#allocation91_spill] sm:$0xff] %v9847_v30 }
 0x1b8   : > { %8378 = vpow2.f32 %v1943_v31  ;;  %18196 = vst [vmem:[#allocation94_spill] sm:$0xff] %v9861_v49  ;;  %v1714_v31 = vsub.f32 %v9463_v21, %v1338_v44  ;;  %v1384_v29 = vsel %vm1326_vm2, %v9861_v49, -inf }
 0x1b9   : > { %2227 = vrot.lane.b32.xlu1 %v9837_v60, %s9228_s14 }
 0x1ba   : > { %v1845_v27 = vmul.f32 1.442695, %v1714_v31 }
 0x1bb   : > { %v9881_v21 = vpop.xlane.xlu1 %1565 }
 0x1bc   : > { %v928_v20 = vpop.f32.mrf.mxu0  ;;  %8380 = vpow2.f32 %v1845_v27 }
 0x1be   : > { %v9851_v24 = vpop.eup %8378 }
 0x1bf   : > { %18194 = vst [vmem:[#allocation92_spill] sm:$0xff] %v9851_v24 }
 0x1c1   : > { %2325 = vrot.lane.b32.xlu1 %v9842_v19, %s9228_s14  ;;  %v9869_v19 = vadd.f32 %v9384_v38, %v1045_v63 }
 0x1c2   : > { %v9879_v31 = vpop.eup %8380 }
 0x1c3   : > { %18198 = vst [vmem:[#allocation96_spill] sm:$0xff] %v9869_v19  ;;  %v1528_v0 = vsel %vm1326_vm2, %v9869_v19, -inf  ;;  %v9902_v35 = vpop.xlane.xlu1 %1619 }
 0x1c4   : > { %v930_v17 = vpop.f32.mrf.mxu0  ;;  %18201 = vst [vmem:[#allocation99_spill] sm:$0xff] %v9879_v31 }
 0x1c5   : > { %v9874_v44 = vadd.f32 %v9384_v38, %v930_v17  ;;  %v7983_v17 = vld [vmem:[%s9316_s11 + $0x1d8] sm:$0xff]  ;;  %18204 = vst [vmem:[#allocation102_spill] sm:$0xff] %v9902_v35 }
 0x1c6   : > { %7906 = vmatmul.msk.bf16.gmra.mxu3 %vm672_vm1, %v7983_v17  ;;  %v7984_v17 = vld [vmem:[%s9316_s11 + $0x1e0] sm:$0xff] }
 0x1c7   : > { %2231 = vrot.lane.b32.xlu0 %v9847_v30, %s9228_s14  ;;  %18199 = vst [vmem:[#allocation97_spill] sm:$0xff] %v9874_v44  ;;  %v9885_v30 = vpop.xlane.xlu0 %1616  ;;  %v1390_v27 = vsel %vm1326_vm2, %v9874_v44, -inf }
 0x1c8   : > { %18202 = vst [vmem:[#allocation100_spill] sm:$0xff] %v9885_v30 }
 0x1cf   : > { %2327 = vrot.lane.b32.xlu0 %v9851_v24, %s9228_s14  ;;  %v1347_v30 = vpop.xlane.xlu0 %1346 }
 0x1d0   : > { %v1158_v24 = vpop.f32.mrf.mxu3 }
 0x1d6   : > { %7907 = vmatmul.msk.bf16.gmra.mxu3 %vm672_vm1, %v7984_v17  ;;  %v9920_v17 = vadd.f32 %v9384_v38, %v928_v20 }
 0x1d7   : > { %v1491_v33 = vpop.xlane.xlu0 %1490 }
 0x1d8   : > { %v9883_v63 = vpop.f32.mrf.mxu3  ;;  %v1765_v56 = vsub.f32 %v9523_v5, %v1491_v33  ;;  %18207 = vst [vmem:[#allocation105_spill] sm:$0xff] %v9920_v17 }
 0x1da   : > { %v1947_v35 = vmul.f32 1.442695, %v1765_v56  ;;  %v1387_v56 = vsel %vm1326_vm2, %v9920_v17, -inf }
 0x1de   : > { %1658 = vmax.xlane.f32.xlu2 %v1657_v55  ;;  %v1048_v55 = vpop.f32.mrf.mxu1 }
 0x1e0   : > { %v1163_v48 = vpop.f32.mrf.mxu3 }
 0x1eb   : > { %1385 = vmax.xlane.f32.xlu1 %v1384_v29  ;;  %v9877_v29 = vadd.f32 %v9384_v38, %v1158_v24 }
 0x1ed   : > { %18200 = vst [vmem:[#allocation98_spill] sm:$0xff] %v9877_v29  ;;  %v1663_v24 = vsel %vm1326_vm2, %v9877_v29, -inf  ;;  %v9905_v29 = vadd.f32 %v9384_v38, %v1163_v48 }
 0x1ef   : > { %18205 = vst [vmem:[#allocation103_spill] sm:$0xff] %v9905_v29 }
 0x1f3   : > { %1529 = vmax.xlane.f32.xlu1 %v1528_v0  ;;  %v1050_v0 = vpop.f32.mrf.mxu1 }
 0x1f4   : > { %v9896_v60 = vadd.f32 %v9384_v38, %v1050_v0  ;;  %v1669_v0 = vsel %vm1326_vm2, %v9905_v29, -inf }
 0x1f6   : > { %2229 = vrot.lane.b32.xlu2 %v9879_v31, %s9228_s14  ;;  %18203 = vst [vmem:[#allocation101_spill] sm:$0xff] %v9896_v60  ;;  %v1534_v31 = vsel %vm1326_vm2, %v9896_v60, -inf }
 0x1f9   : > { %1391 = vmax.xlane.f32.xlu0 %v1390_v27  ;;  %v1717_v27 = vsub.f32 %v9503_v52, %v1347_v30 }
 0x1fb   : > { %1664 = vmax.xlane.f32.xlu1 %v1663_v24  ;;  %v1851_v15 = vmul.f32 1.442695, %v1717_v27  ;;  %v1350_v24 = vpop.xlane.xlu1 %1349 }
 0x1fd   : > { %8382 = vpow2.f32 %v1851_v15 }
 0x1fe   : > { %8384 = vpow2.f32 %v1947_v35  ;;  %v9933_v35 = vadd.f32 %v9384_v38, %v1048_v55 }
 0x200   : > { %18210 = vst [vmem:[#allocation108_spill] sm:$0xff] %v9933_v35 }
 0x201   : > { %1535 = vmax.xlane.f32.xlu0 %v1534_v31  ;;  %v1718_v31 = vsub.f32 %v9527_v6, %v1350_v24  ;;  %v1531_v24 = vsel %vm1326_vm2, %v9933_v35, -inf }
 0x203   : > { %v1853_v48 = vmul.f32 1.442695, %v1718_v31  ;;  %v9914_v13 = vpop.eup %8382  ;;  %v1494_v30 = vpop.xlane.xlu1 %1493 }
 0x204   : > { %18206 = vst [vmem:[#allocation104_spill] sm:$0xff] %v9914_v13  ;;  %v1766_v27 = vsub.f32 %v9542_v18, %v1494_v30  ;;  %v9922_v15 = vpop.eup %8384  ;;  %v1344_v31 = vpop.xlane.xlu2 %1343 }
 0x205   : > { %8386 = vpow2.f32 %v1853_v48  ;;  %18208 = vst [vmem:[#allocation106_spill] sm:$0xff] %v9922_v15  ;;  %v1716_v48 = vsub.f32 %v9490_v39, %v1344_v31  ;;  %v933_v30 = vpop.f32.mrf.mxu0  ;;  %v7938_v31 = vld [vmem:[%s9316_s11 + $0x70] sm:$0xff] }
 0x206   : > { %v9948_v52 = vadd.f32 %v9384_v38, %v933_v30  ;;  %7861 = vmatmul.msk.bf16.gmra.mxu0 %vm672_vm1, %v7938_v31  ;;  %v9960_v30 = vpop.xlane.xlu0 %1571 }
 0x207   : > { %18215 = vst [vmem:[#allocation113_spill] sm:$0xff] %v9960_v30 }
 0x208   : > { %18213 = vst [vmem:[#allocation111_spill] sm:$0xff] %v9948_v52 }
 0x209   : > { %1670 = vmax.xlane.f32.xlu0 %v1669_v0  ;;  %v1949_v0 = vmul.f32 1.442695, %v1766_v27  ;;  %v1849_v27 = vmul.f32 1.442695, %v1716_v48  ;;  %v1393_v48 = vsel %vm1326_vm2, %v9948_v52, -inf }
 0x20b   : > { %v9924_v33 = vpop.eup %8386  ;;  %8388 = vpow2.f32 %v1949_v0  ;;  %v9970_v39 = vpop.xlane.xlu1 %1574 }
 0x20c   : > { %18209 = vst [vmem:[#allocation107_spill] sm:$0xff] %v9924_v33  ;;  %v1488_v0 = vpop.xlane.xlu2 %1487  ;;  %8390 = vpow2.f32 %v1849_v27 }
 0x20d   : > { %v1764_v55 = vsub.f32 %v9506_v54, %v1488_v0  ;;  %v9943_v18 = vpop.f32.mrf.mxu0 }
 0x20f   : > { %v1945_v5 = vmul.f32 1.442695, %v1764_v55 }
 0x211   : > { %v9935_v20 = vpop.eup %8388  ;;  %8392 = vpow2.f32 %v1945_v5 }
 0x212   : > { %18211 = vst [vmem:[#allocation109_spill] sm:$0xff] %v9935_v20  ;;  %v9945_v6 = vpop.eup %8390 }
 0x213   : > { %18212 = vst [vmem:[#allocation110_spill] sm:$0xff] %v9945_v6 }
 0x214   : > { %2235 = vrot.lane.b32.xlu1 %v9914_v13, %s9228_s14  ;;  %v7939_v13 = vld [vmem:[%s9316_s11 + $0x78] sm:$0xff] }
 0x215   : > { %v938_v0 = vpop.f32.mrf.mxu0 }
 0x216   : > { %v9968_v5 = vadd.f32 %v9384_v38, %v938_v0  ;;  %7862 = vmatmul.msk.bf16.gmra.mxu0 %vm672_vm1, %v7939_v13 }
 0x217   : > { %v9958_v55 = vpop.eup %8392 }
 0x218   : > { %18214 = vst [vmem:[#allocation112_spill] sm:$0xff] %v9958_v55 }
 0x219   : > { %18217 = vst [vmem:[#allocation115_spill] sm:$0xff] %v9968_v5 }
 0x21c   : > { %2331 = vrot.lane.b32.xlu1 %v9922_v15, %s9228_s14  ;;  %v1399_v15 = vsel %vm1326_vm2, %v9968_v5, -inf }
 0x21d   : > { %2237 = vrot.lane.b32.xlu0 %v9924_v33, %s9228_s14 }
 0x21f   : > { %1388 = vmax.xlane.f32.xlu2 %v1387_v56  ;;  %v1053_v56 = vpop.f32.mrf.mxu1 }
 0x220   : > { %v9963_v54 = vadd.f32 %v9384_v38, %v1053_v56 }
 0x222   : > { %18216 = vst [vmem:[#allocation114_spill] sm:$0xff] %v9963_v54  ;;  %v1537_v31 = vsel %vm1326_vm2, %v9963_v54, -inf }
 0x225   : > { %2333 = vrot.lane.b32.xlu0 %v9935_v20, %s9228_s14 }
 0x227   : > { %1532 = vmax.xlane.f32.xlu2 %v1531_v24  ;;  %v1165_v24 = vpop.f32.mrf.mxu3  ;;  %v9955_v27 = vpop.f32.mrf.mxu1 }
 0x228   : > { %v9981_v56 = vadd.f32 %v9384_v38, %v1165_v24 }
 0x22a   : > { %18218 = vst [vmem:[#allocation116_spill] sm:$0xff] %v9981_v56 }
 0x22f   : > { %v9974_v20 = vpop.f32.mrf.mxu3  ;;  %v1058_v33 = vpop.f32.mrf.mxu1 }
 0x230   : > { %v9984_v0 = vadd.f32 %v9384_v38, %v1058_v33  ;;  %v9999_v38 = vld [vmem:[%s17467_s3] ss:$0 sm:$0xff] }
 0x232   : > { %18219 = vst [vmem:[#allocation117_spill] sm:$0xff] %v9984_v0  ;;  %v1543_v29 = vsel %vm1326_vm2, %v9984_v0, -inf }
 0x23f   : > { %2233 = vrot.lane.b32.xlu2 %v9945_v6, %s9228_s14  ;;  %v1672_v6 = vsel %vm1326_vm2, %v9981_v56, -inf }
 0x246   : > { %1394 = vmax.xlane.f32.xlu1 %v1393_v48  ;;  %v7985_v48 = vld [vmem:[%s9316_s11 + $0x1e8] sm:$0xff] }
 0x247   : > { %2329 = vrot.lane.b32.xlu2 %v9958_v55, %s9228_s14  ;;  %7908 = vmatmul.msk.bf16.gmra.mxu3 %vm672_vm1, %v7985_v48  ;;  %v9986_v55 = vpop.xlane.xlu0 %1625  ;;  %v9994_v48 = vpop.xlane.xlu1 %1628 }
 0x248   : > { %18220 = vst [vmem:[#allocation118_spill] sm:$0xff] %v9986_v55 }
 0x249   : > { %18221 = vst [vmem:[#allocation119_spill] sm:$0xff] %v9994_v48 }
 0x24e   : > { %1538 = vmax.xlane.f32.xlu1 %v1537_v31  ;;  %v1170_v31 = vpop.f32.mrf.mxu3 }
 0x24f   : > { %1400 = vmax.xlane.f32.xlu0 %v1399_v15  ;;  %v10002_v15 = vadd.f32 %v9999_v38, %v1170_v31  ;;  %v1356_v33 = vpop.xlane.xlu0 %1355  ;;  %v1359_v56 = vpop.xlane.xlu1 %1358  ;;  %v10011_v31 = vadd.f32 %v9999_v38, %v9883_v63  ;;  %v10026_v63 = vadd.f32 %v9999_v38, %v9943_v18  ;;  %v10042_v18 = vadd.f32 %v9999_v38, %v9955_v27  ;;  %v7986_v27 = vld [vmem:[%s9316_s11 + $0x1f0] sm:$0xff] }
 0x250   : > { %v1720_v13 = vsub.f32 %v9572_v50, %v1356_v33 }
 0x251   : > { %18222 = vst [vmem:[#allocation120_spill] sm:$0xff] %v10002_v15  ;;  %v1678_v24 = vsel %vm1326_vm2, %v10002_v15, -inf  ;;  %v1666_v33 = vsel %vm1326_vm2, %v10011_v31, -inf }
 0x252   : > { %v1857_v55 = vmul.f32 1.442695, %v1720_v13  ;;  %18223 = vst [vmem:[#allocation121_spill] sm:$0xff] %v10011_v31 }
 0x253   : > { %18227 = vst [vmem:[#allocation125_spill] sm:$0xff] %v10026_v63 }
 0x254   : > { %8394 = vpow2.f32 %v1857_v55  ;;  %v10020_v55 = vpop.xlane.xlu2 %1568  ;;  %18231 = vst [vmem:[#allocation129_spill] sm:$0xff] %v10042_v18 }
 0x255   : > { %18225 = vst [vmem:[#allocation123_spill] sm:$0xff] %v10020_v55 }
 0x256   : > { %1673 = vmax.xlane.f32.xlu1 %v1672_v6  ;;  %v1721_v6 = vsub.f32 %v9584_v7, %v1359_v56  ;;  %v7940_v7 = vld [vmem:[%s9316_s11 + $0x80] sm:$0xff] }
 0x257   : > { %1544 = vmax.xlane.f32.xlu0 %v1543_v29  ;;  %v1500_v29 = vpop.xlane.xlu0 %1499  ;;  %v1503_v23 = vpop.xlane.xlu1 %1502  ;;  %7909 = vmatmul.msk.bf16.gmra.mxu3 %vm672_vm1, %v7986_v27 }
 0x258   : > { %v1859_v30 = vmul.f32 1.442695, %v1721_v6  ;;  %v1768_v48 = vsub.f32 %v9591_v9, %v1500_v29  ;;  %v1769_v15 = vsub.f32 %v9602_v28, %v1503_v23  ;;  %v940_v29 = vpop.f32.mrf.mxu0  ;;  %v1173_v9 = vpop.f32.mrf.mxu3  ;;  %7863 = vmatmul.msk.bf16.gmra.mxu0 %vm672_vm1, %v7940_v7 }
 0x259   : > { %v1060_v27 = vpop.f32.mrf.mxu1 }
 0x25a   : > { %8396 = vpow2.f32 %v1859_v30  ;;  %v1953_v11 = vmul.f32 1.442695, %v1768_v48  ;;  %v1955_v56 = vmul.f32 1.442695, %v1769_v15  ;;  %v1396_v30 = vsel %vm1326_vm2, %v10026_v63, -inf }
 0x25b   : > { %v1540_v15 = vsel %vm1326_vm2, %v10042_v18, -inf }
 0x25c   : > { %8398 = vpow2.f32 %v1953_v11  ;;  %v10038_v48 = vpop.xlane.xlu2 %1622 }
 0x25d   : > { %8400 = vpow2.f32 %v1955_v56  ;;  %18230 = vst [vmem:[#allocation128_spill] sm:$0xff] %v10038_v48 }
 0x25f   : > { %1679 = vmax.xlane.f32.xlu0 %v1678_v24  ;;  %v10014_v24 = vpop.eup %8394 }
 0x260   : > { %18224 = vst [vmem:[#allocation122_spill] sm:$0xff] %v10014_v24  ;;  %v10022_v13 = vpop.eup %8396  ;;  %v943_v50 = vpop.f32.mrf.mxu0 }
 0x261   : > { %18226 = vst [vmem:[#allocation124_spill] sm:$0xff] %v10022_v13 }
 0x262   : > { %v10030_v23 = vpop.eup %8398 }
 0x263   : > { %18228 = vst [vmem:[#allocation126_spill] sm:$0xff] %v10030_v23  ;;  %v10036_v11 = vpop.eup %8400 }
 0x264   : > { %18229 = vst [vmem:[#allocation127_spill] sm:$0xff] %v10036_v11  ;;  %v1353_v6 = vpop.xlane.xlu2 %1352 }
 0x26f   : > { %2241 = vrot.lane.b32.xlu1 %v10014_v24, %s9228_s14 }
 0x270   : > { %1667 = vmax.xlane.f32.xlu2 %v1666_v33  ;;  %v1719_v33 = vsub.f32 %v9551_v26, %v1353_v6  ;;  %v10060_v6 = vpop.f32.mrf.mxu3 }
 0x272   : > { %v1855_v56 = vmul.f32 1.442695, %v1719_v33  ;;  %v10063_v33 = vadd.f32 %v9999_v38, %v940_v29 }
 0x273   : > { %2243 = vrot.lane.b32.xlu0 %v10022_v13, %s9228_s14 }
 0x274   : > { %8402 = vpow2.f32 %v1855_v56  ;;  %18233 = vst [vmem:[#allocation131_spill] sm:$0xff] %v10063_v33  ;;  %v945_v56 = vpop.f32.mrf.mxu0  ;;  %v1402_v7 = vsel %vm1326_vm2, %v10063_v33, -inf }
 0x277   : > { %2337 = vrot.lane.b32.xlu1 %v10030_v23, %s9228_s14 }
 0x278   : > { %1397 = vmax.xlane.f32.xlu2 %v1396_v30  ;;  %v1497_v30 = vpop.xlane.xlu2 %1496  ;;  %v1178_v13 = vpop.f32.mrf.mxu3 }
 0x279   : > { %v1767_v28 = vsub.f32 %v9566_v45, %v1497_v30  ;;  %v10066_v30 = vadd.f32 %v9999_v38, %v945_v56  ;;  %v10077_v45 = vadd.f32 %v9999_v38, %v1060_v27  ;;  %v7987_v56 = vld [vmem:[%s9316_s11 + $0x1f8] sm:$0xff]  ;;  %v10086_v24 = vadd.f32 %v9999_v38, %v1178_v13 }
 0x27a   : > { %v10054_v23 = vpop.eup %8402  ;;  %7910 = vmatmul.msk.bf16.gmra.mxu3 %vm672_vm1, %v7987_v56  ;;  %v10091_v27 = vadd.f32 %v9999_v38, %v1173_v9 }
 0x27b   : > { %2339 = vrot.lane.b32.xlu0 %v10036_v11, %s9228_s14  ;;  %v1951_v11 = vmul.f32 1.442695, %v1767_v28  ;;  %18232 = vst [vmem:[#allocation130_spill] sm:$0xff] %v10054_v23  ;;  %v1408_v29 = vsel %vm1326_vm2, %v10066_v30, -inf }
 0x27c   : > { %18234 = vst [vmem:[#allocation132_spill] sm:$0xff] %v10066_v30 }
 0x27d   : > { %8404 = vpow2.f32 %v1951_v11  ;;  %v10074_v11 = vpop.xlane.xlu0 %1580  ;;  %18237 = vst [vmem:[#allocation135_spill] sm:$0xff] %v10077_v45 }
 0x27e   : > { %18236 = vst [vmem:[#allocation134_spill] sm:$0xff] %v10074_v11 }
 0x27f   : > { %18239 = vst [vmem:[#allocation137_spill] sm:$0xff] %v10086_v24 }
 0x280   : > { %1541 = vmax.xlane.f32.xlu2 %v1540_v15  ;;  %v10058_v15 = vpop.xlane.xlu1 %1583  ;;  %18240 = vst [vmem:[#allocation138_spill] sm:$0xff] %v10091_v27 }
 0x283   : > { %v10070_v28 = vpop.eup %8404 }
 0x284   : > { %18235 = vst [vmem:[#allocation133_spill] sm:$0xff] %v10070_v28 }
 0x288   : > { %v10082_v26 = vpop.xlane.xlu1 %1637 }
 0x289   : > { %18238 = vst [vmem:[#allocation136_spill] sm:$0xff] %v10082_v26 }
 0x290   : > { %v1368_v31 = vpop.xlane.xlu1 %1367 }
 0x291   : > { %v1724_v13 = vsub.f32 %v9653_v61, %v1368_v31 }
 0x293   : > { %v1865_v48 = vmul.f32 1.442695, %v1724_v13 }
 0x295   : > { %8406 = vpow2.f32 %v1865_v48  ;;  %v10111_v48 = vadd.f32 %v9999_v38, %v9974_v20 }
 0x297   : > { %18243 = vst [vmem:[#allocation141_spill] sm:$0xff] %v10111_v48  ;;  %v1675_v13 = vsel %vm1326_vm2, %v10111_v48, -inf }
 0x298   : > { %2239 = vrot.lane.b32.xlu2 %v10054_v23, %s9228_s14  ;;  %v10095_v23 = vpop.xlane.xlu0 %1634  ;;  %v1512_v26 = vpop.xlane.xlu1 %1511 }
 0x299   : > { %18241 = vst [vmem:[#allocation139_spill] sm:$0xff] %v10095_v23  ;;  %v1772_v9 = vsub.f32 %v9668_v36, %v1512_v26 }
 0x29b   : > { %v1961_v11 = vmul.f32 1.442695, %v1772_v9  ;;  %v10102_v55 = vpop.eup %8406 }
 0x29c   : > { %18242 = vst [vmem:[#allocation140_spill] sm:$0xff] %v10102_v55 }
 0x29d   : > { %8408 = vpow2.f32 %v1961_v11 }
 0x2a0   : > { %2335 = vrot.lane.b32.xlu2 %v10070_v28, %s9228_s14  ;;  %v1687_v28 = vsel %vm1326_vm2, %v10086_v24, -inf  ;;  %v1365_v56 = vpop.xlane.xlu0 %1364  ;;  %v10137_v61 = vpop.xlane.xlu1 %1592 }
 0x2a1   : > { %1403 = vmax.xlane.f32.xlu1 %v1402_v7  ;;  %v1546_v7 = vsel %vm1326_vm2, %v10077_v45, -inf }
 0x2a5   : > { %1409 = vmax.xlane.f32.xlu0 %v1408_v29  ;;  %v1681_v29 = vsel %vm1326_vm2, %v10091_v27, -inf }
 0x2a8   : > { %v1509_v23 = vpop.xlane.xlu0 %1508 }
 0x2a9   : > { %1547 = vmax.xlane.f32.xlu1 %v1546_v7  ;;  %v1723_v7 = vsub.f32 %v9632_v16, %v1365_v56  ;;  %v1771_v31 = vsub.f32 %v9650_v51, %v1509_v23 }
 0x2ab   : > { %v1863_v24 = vmul.f32 1.442695, %v1723_v7  ;;  %v1959_v26 = vmul.f32 1.442695, %v1771_v31  ;;  %v948_v7 = vpop.f32.mrf.mxu0 }
 0x2ad   : > { %1688 = vmax.xlane.f32.xlu0 %v1687_v28  ;;  %v10104_v28 = vpop.xlane.xlu2 %1577  ;;  %8410 = vpow2.f32 %v1863_v24  ;;  %v10122_v24 = vadd.f32 %v9999_v38, %v943_v50  ;;  %v7941_v50 = vld [vmem:[%s9316_s11 + $0x88] sm:$0xff] }
 0x2ae   : > { %8412 = vpow2.f32 %v1959_v26  ;;  %7864 = vmatmul.msk.bf16.gmra.mxu0 %vm672_vm1, %v7941_v50  ;;  %v10148_v50 = vpop.xlane.xlu1 %1646 }
 0x2af   : > { %18246 = vst [vmem:[#allocation144_spill] sm:$0xff] %v10122_v24  ;;  %v1405_v23 = vsel %vm1326_vm2, %v10122_v24, -inf }
 0x2b1   : > { %1682 = vmax.xlane.f32.xlu1 %v1681_v29  ;;  %v10113_v29 = vpop.eup %8408 }
 0x2b2   : > { %18244 = vst [vmem:[#allocation142_spill] sm:$0xff] %v10113_v29 }
 0x2b3   : > { %v10117_v56 = vpop.eup %8410  ;;  %v950_v51 = vpop.f32.mrf.mxu0 }
 0x2b4   : > { %18245 = vst [vmem:[#allocation143_spill] sm:$0xff] %v10117_v56  ;;  %v10130_v11 = vpop.eup %8412 }
 0x2b5   : > { %v10126_v20 = vpop.xlane.xlu2 %1631  ;;  %18248 = vst [vmem:[#allocation146_spill] sm:$0xff] %v10130_v11 }
 0x2b6   : > { %18247 = vst [vmem:[#allocation145_spill] sm:$0xff] %v10126_v20 }
 0x2bd   : > { %v1362_v9 = vpop.xlane.xlu2 %1361 }
 0x2be   : > { %v1722_v31 = vsub.f32 %v9620_v58, %v1362_v9  ;;  %v953_v9 = vpop.f32.mrf.mxu0 }
 0x2c0   : > { %v1861_v36 = vmul.f32 1.442695, %v1722_v31  ;;  %v10151_v31 = vadd.f32 %v9999_v38, %v953_v9  ;;  %v10167_v9 = vadd.f32 %v9999_v38, %v948_v7 }
 0x2c1   : > { %2249 = vrot.lane.b32.xlu0 %v10102_v55, %s9228_s14 }
 0x2c2   : > { %8414 = vpow2.f32 %v1861_v36  ;;  %18250 = vst [vmem:[#allocation148_spill] sm:$0xff] %v10151_v31 }
 0x2c3   : > { %18254 = vst [vmem:[#allocation152_spill] sm:$0xff] %v10167_v9 }
 0x2c5   : > { %v1506_v26 = vpop.xlane.xlu2 %1505 }
 0x2c6   : > { %v1770_v16 = vsub.f32 %v9635_v22, %v1506_v26 }
 0x2c9   : > { %1676 = vmax.xlane.f32.xlu2 %v1675_v13  ;;  %2345 = vrot.lane.b32.xlu0 %v10113_v29, %s9228_s14  ;;  %v1180_v13 = vpop.f32.mrf.mxu3  ;;  %v1957_v29 = vmul.f32 1.442695, %v1770_v16  ;;  %v1417_v16 = vsel %vm1326_vm2, %v10151_v31, -inf }
 0x2ca   : > { %2247 = vrot.lane.b32.xlu1 %v10117_v56, %s9228_s14  ;;  %v1411_v56 = vsel %vm1326_vm2, %v10167_v9, -inf }
 0x2cb   : > { %8416 = vpow2.f32 %v1957_v29  ;;  %v10164_v29 = vpop.xlane.xlu0 %1589 }
 0x2d1   : > { %1406 = vmax.xlane.f32.xlu2 %v1405_v23  ;;  %v7942_v23 = vld [vmem:[%s9316_s11 + $0x90] sm:$0xff]  ;;  %v10141_v55 = vpop.f32.mrf.mxu3 }
 0x2d2   : > { %2343 = vrot.lane.b32.xlu1 %v10130_v11, %s9228_s14  ;;  %v10143_v11 = vpop.eup %8414  ;;  %7865 = vmatmul.msk.bf16.gmra.mxu0 %vm672_vm1, %v7942_v23  ;;  %v10159_v23 = vpop.permute.xlu1 %2319 }
 0x2d3   : > { %18249 = vst [vmem:[#allocation147_spill] sm:$0xff] %v10143_v11  ;;  %v10153_v36 = vpop.eup %8416 }
 0x2d4   : > { %18251 = vst [vmem:[#allocation149_spill] sm:$0xff] %v10153_v36 }
 0x2d5   : > { %18252 = vst [vmem:[#allocation150_spill] sm:$0xff] %v10159_v23 }
 0x2d9   : > { %v1185_v26 = vpop.f32.mrf.mxu3 }
 0x2da   : > { %v10162_v22 = vadd.f32 %v9999_v38, %v1185_v26 }
 0x2dc   : > { %18253 = vst [vmem:[#allocation151_spill] sm:$0xff] %v10162_v22  ;;  %v1696_v58 = vsel %vm1326_vm2, %v10162_v22, -inf }
 0x2e9   : > { %2245 = vrot.lane.b32.xlu2 %v10143_v11, %s9228_s14  ;;  %v1377_v11 = vpop.xlane.xlu1 %1376 }
 0x2ea   : > { %v1727_v26 = vsub.f32 %v9760_v43, %v1377_v11  ;;  %v10187_v11 = vpop.xlane.xlu2 %1586 }
 0x2ec   : > { %v1871_v23 = vmul.f32 1.442695, %v1727_v26  ;;  %v10191_v26 = vadd.f32 %v9999_v38, %v10060_v6  ;;  %v10205_v6 = vadd.f32 %v9999_v38, %v950_v51 }
 0x2ee   : > { %8418 = vpow2.f32 %v1871_v23  ;;  %18257 = vst [vmem:[#allocation155_spill] sm:$0xff] %v10191_v26 }
 0x2ef   : > { %18261 = vst [vmem:[#allocation159_spill] sm:$0xff] %v10205_v6 }
 0x2f1   : > { %2341 = vrot.lane.b32.xlu2 %v10153_v36, %s9228_s14  ;;  %v10174_v36 = vadd.f32 %v9999_v38, %v1180_v13  ;;  %v1521_v48 = vpop.xlane.xlu1 %1520 }
 0x2f2   : > { %v1775_v22 = vsub.f32 %v9767_v10, %v1521_v48 }
 0x2f3   : > { %1418 = vmax.xlane.f32.xlu0 %v1417_v16  ;;  %18255 = vst [vmem:[#allocation153_spill] sm:$0xff] %v10174_v36  ;;  %v10176_v16 = vpop.xlane.xlu0 %1643  ;;  %v1690_v7 = vsel %vm1326_vm2, %v10174_v36, -inf }
 0x2f4   : > { %v1967_v20 = vmul.f32 1.442695, %v1775_v22 }
 0x2f6   : > { %8420 = vpow2.f32 %v1967_v20 }
 0x2f9   : > { %v10217_v51 = vpop.xlane.xlu1 %1601 }
 0x2fb   : > { %1697 = vmax.xlane.f32.xlu0 %v1696_v58  ;;  %v1374_v27 = vpop.xlane.xlu0 %1373  ;;  %v10182_v58 = vpop.eup %8418 }
 0x2fc   : > { %1412 = vmax.xlane.f32.xlu1 %v1411_v56  ;;  %18256 = vst [vmem:[#allocation154_spill] sm:$0xff] %v10182_v58  ;;  %v1726_v56 = vsub.f32 %v9698_v57, %v1374_v27  ;;  %v10193_v23 = vpop.eup %8420  ;;  %v1684_v27 = vsel %vm1326_vm2, %v10191_v26, -inf }
 0x2fd   : > { %18258 = vst [vmem:[#allocation156_spill] sm:$0xff] %v10193_v23 }
 0x2fe   : > { %v1869_v13 = vmul.f32 1.442695, %v1726_v56  ;;  %v955_v56 = vpop.f32.mrf.mxu0 }
 0x300   : > { %8422 = vpow2.f32 %v1869_v13 }
 0x303   : > { %v1518_v43 = vpop.xlane.xlu0 %1517 }
 0x304   : > { %1691 = vmax.xlane.f32.xlu1 %v1690_v7  ;;  %v1774_v22 = vsub.f32 %v9710_v62, %v1518_v43  ;;  %v10202_v7 = vpop.xlane.xlu2 %1640  ;;  %v1414_v43 = vsel %vm1326_vm2, %v10205_v6, -inf  ;;  %v1188_v62 = vpop.f32.mrf.mxu3 }
 0x305   : > { %18260 = vst [vmem:[#allocation158_spill] sm:$0xff] %v10202_v7 }
 0x306   : > { %v1965_v48 = vmul.f32 1.442695, %v1774_v22  ;;  %v10200_v20 = vpop.eup %8422  ;;  %v7943_v22 = vld [vmem:[%s9316_s11 + $0x98] sm:$0xff] }
 0x307   : > { %18259 = vst [vmem:[#allocation157_spill] sm:$0xff] %v10200_v20  ;;  %7866 = vmatmul.msk.bf16.gmra.mxu0 %vm672_vm1, %v7943_v22 }
 0x308   : > { %8424 = vpow2.f32 %v1965_v48  ;;  %v958_v48 = vpop.f32.mrf.mxu0 }
 0x30b   : > { %v10225_v36 = vpop.xlane.xlu0 %1598 }
 0x30e   : > { %v10211_v13 = vpop.eup %8424 }
 0x30f   : > { %2255 = vrot.lane.b32.xlu0 %v10182_v58, %s9228_s14  ;;  %18262 = vst [vmem:[#allocation160_spill] sm:$0xff] %v10211_v13  ;;  %v10220_v58 = vpop.xlane.xlu1 %1655 }
 0x310   : > { %18263 = vst [vmem:[#allocation161_spill] sm:$0xff] %v10220_v58 }
 0x317   : > { %2351 = vrot.lane.b32.xlu0 %v10193_v23, %s9228_s14  ;;  %v10229_v7 = vpop.permute.xlu1 %2227 }
 0x318   : > { %18265 = vst [vmem:[#allocation163_spill] sm:$0xff] %v10229_v7 }
 0x31a   : > { %1685 = vmax.xlane.f32.xlu2 %v1684_v27  ;;  %v1371_v27 = vpop.xlane.xlu2 %1370 }
 0x31b   : > { %v1725_v10 = vsub.f32 %v9677_v1, %v1371_v27 }
 0x31d   : > { %2253 = vrot.lane.b32.xlu1 %v10200_v20, %s9228_s14  ;;  %v1867_v57 = vmul.f32 1.442695, %v1725_v10  ;;  %v10223_v20 = vpop.f32.mrf.mxu3 }
 0x31f   : > { %8426 = vpow2.f32 %v1867_v57  ;;  %v10247_v1 = vpop.permute.xlu1 %2325 }
 0x320   : > { %18270 = vst [vmem:[#allocation168_spill] sm:$0xff] %v10247_v1 }
 0x322   : > { %1415 = vmax.xlane.f32.xlu2 %v1414_v43  ;;  %v1515_v23 = vpop.xlane.xlu2 %1514 }
 0x323   : > { %v1773_v43 = vsub.f32 %v9692_v3, %v1515_v23 }
 0x325   : > { %2349 = vrot.lane.b32.xlu1 %v10211_v13, %s9228_s14  ;;  %v1963_v26 = vmul.f32 1.442695, %v1773_v43  ;;  %v960_v13 = vpop.f32.mrf.mxu0  ;;  %v10227_v22 = vpop.eup %8426 }
 0x326   : > { %18264 = vst [vmem:[#allocation162_spill] sm:$0xff] %v10227_v22  ;;  %v10234_v10 = vadd.f32 %v9999_v38, %v960_v13  ;;  %v1193_v23 = vpop.f32.mrf.mxu3  ;;  %v10240_v43 = vpop.xlane.xlu0 %1652  ;;  %v10252_v13 = vadd.f32 %v9999_v38, %v955_v56 }
 0x327   : > { %8428 = vpow2.f32 %v1963_v26  ;;  %18268 = vst [vmem:[#allocation166_spill] sm:$0xff] %v10240_v43  ;;  %v10245_v3 = vadd.f32 %v9999_v38, %v1193_v23  ;;  %v10260_v23 = vadd.f32 %v9999_v38, %v1188_v62  ;;  %v7944_v62 = vld [vmem:[%s9316_s11 + $0xa0] sm:$0xff] }
 0x328   : > { %18266 = vst [vmem:[#allocation164_spill] sm:$0xff] %v10234_v10  ;;  %v1426_v57 = vsel %vm1326_vm2, %v10234_v10, -inf  ;;  %v1420_v7 = vsel %vm1326_vm2, %v10252_v13, -inf  ;;  %7867 = vmatmul.msk.bf16.gmra.mxu0 %vm672_vm1, %v7944_v62 }
 0x329   : > { %18269 = vst [vmem:[#allocation167_spill] sm:$0xff] %v10245_v3  ;;  %v1705_v26 = vsel %vm1326_vm2, %v10245_v3, -inf  ;;  %v1699_v56 = vsel %vm1326_vm2, %v10260_v23, -inf }
 0x32a   : > { %18271 = vst [vmem:[#allocation169_spill] sm:$0xff] %v10252_v13 }
 0x32b   : > { %18273 = vst [vmem:[#allocation171_spill] sm:$0xff] %v10260_v23 }
 0x32d   : > { %v10238_v27 = vpop.eup %8428 }
 0x32e   : > { %18267 = vst [vmem:[#allocation165_spill] sm:$0xff] %v10238_v27 }
 0x33a   : > { %2251 = vrot.lane.b32.xlu2 %v10227_v22, %s9228_s14  ;;  %v10254_v22 = vpop.permute.xlu0 %2225 }
 0x33b   : > { %18272 = vst [vmem:[#allocation170_spill] sm:$0xff] %v10254_v22 }
 0x341   : > { %1427 = vmax.xlane.f32.xlu0 %v1426_v57  ;;  %v1386_v57 = vpop.xlane.xlu1 %1385 }
 0x342   : > { %2347 = vrot.lane.b32.xlu2 %v10238_v27, %s9228_s14  ;;  %v1730_v27 = vsub.f32 %v9861_v49, %v1386_v57  ;;  %v10262_v43 = vpop.permute.xlu0 %2321 }
 0x343   : > { %18274 = vst [vmem:[#allocation172_spill] sm:$0xff] %v10262_v43  ;;  %v963_v43 = vpop.f32.mrf.mxu0 }
 0x344   : > { %v1877_v1 = vmul.f32 1.442695, %v1730_v27 }
 0x346   : > { %8430 = vpow2.f32 %v1877_v1  ;;  %v10279_v1 = vadd.f32 %v9999_v38, %v10141_v55  ;;  %v7945_v55 = vld [vmem:[%s9316_s11 + $0xa8] sm:$0xff] }
 0x347   : > { %7868 = vmatmul.msk.bf16.gmra.mxu0 %vm672_vm1, %v7945_v55 }
 0x348   : > { %18277 = vst [vmem:[#allocation175_spill] sm:$0xff] %v10279_v1 }
 0x349   : > { %1706 = vmax.xlane.f32.xlu0 %v1705_v26  ;;  %v10266_v26 = vpop.xlane.xlu2 %1595 }
 0x34a   : > { %v1383_v3 = vpop.xlane.xlu0 %1382 }
 0x34c   : > { %v10268_v22 = vpop.eup %8430 }
 0x34d   : > { %18275 = vst [vmem:[#allocation173_spill] sm:$0xff] %v10268_v22 }
 0x34f   : > { %1421 = vmax.xlane.f32.xlu1 %v1420_v7  ;;  %v1729_v7 = vsub.f32 %v9794_v12, %v1383_v3  ;;  %v10285_v3 = vadd.f32 %v9999_v38, %v958_v48  ;;  %v1530_v12 = vpop.xlane.xlu1 %1529 }
 0x351   : > { %v10275_v27 = vpop.xlane.xlu2 %1649  ;;  %v1875_v57 = vmul.f32 1.442695, %v1729_v7  ;;  %18278 = vst [vmem:[#allocation176_spill] sm:$0xff] %v10285_v3 }
 0x352   : > { %18276 = vst [vmem:[#allocation174_spill] sm:$0xff] %v10275_v27  ;;  %v1527_v49 = vpop.xlane.xlu0 %1526 }
 0x353   : > { %8432 = vpow2.f32 %v1875_v57  ;;  %v965_v57 = vpop.f32.mrf.mxu0 }
 0x357   : > { %1700 = vmax.xlane.f32.xlu1 %v1699_v56  ;;  %v1777_v56 = vsub.f32 %v9807_v14, %v1527_v49  ;;  %v1423_v49 = vsel %vm1326_vm2, %v10285_v3, -inf }
 0x359   : > { %v1971_v62 = vmul.f32 1.442695, %v1777_v56  ;;  %v10287_v7 = vpop.eup %8432  ;;  %v10289_v23 = vpop.permute.xlu2 %2223 }
 0x35a   : > { %18279 = vst [vmem:[#allocation177_spill] sm:$0xff] %v10287_v7  ;;  %v10299_v56 = vpop.xlane.xlu1 %1664 }
 0x35b   : > { %18280 = vst [vmem:[#allocation178_spill] sm:$0xff] %v10289_v23  ;;  %8434 = vpow2.f32 %v1971_v62 }
 0x35c   : > { %18282 = vst [vmem:[#allocation180_spill] sm:$0xff] %v10299_v56 }
 0x35d   : > { %2261 = vrot.lane.b32.xlu0 %v10268_v22, %s9228_s14  ;;  %v1693_v22 = vsel %vm1326_vm2, %v10279_v1, -inf }
 0x361   : > { %v10297_v48 = vpop.eup %8434 }
 0x362   : > { %18281 = vst [vmem:[#allocation179_spill] sm:$0xff] %v10297_v48  ;;  %v10304_v23 = vpop.permute.xlu1 %2235 }
 0x363   : > { %18283 = vst [vmem:[#allocation181_spill] sm:$0xff] %v10304_v23 }
 0x36a   : > { %v10312_v58 = vpop.permute.xlu1 %2331 }
 0x36b   : > { %1694 = vmax.xlane.f32.xlu2 %v1693_v22  ;;  %v1380_v22 = vpop.xlane.xlu2 %1379  ;;  %18285 = vst [vmem:[#allocation183_spill] sm:$0xff] %v10312_v58 }
 0x36c   : > { %v1728_v14 = vsub.f32 %v9774_v47, %v1380_v22  ;;  %v7946_v47 = vld [vmem:[%s9316_s11 + $0xb0] sm:$0xff] }
 0x36d   : > { %7869 = vmatmul.msk.bf16.gmra.mxu0 %vm672_vm1, %v7946_v47  ;;  %v10364_v47 = vadd.f32 %v9999_v38, %v965_v57 }
 0x36e   : > { %v1873_v1 = vmul.f32 1.442695, %v1728_v14  ;;  %v1778_v14 = vsub.f32 %v9869_v19, %v1530_v12 }
 0x36f   : > { %18299 = vst [vmem:[#allocation197_spill] sm:$0xff] %v10364_v47 }
 0x370   : > { %2259 = vrot.lane.b32.xlu1 %v10287_v7, %s9228_s14  ;;  %v968_v7 = vpop.f32.mrf.mxu0  ;;  %8436 = vpow2.f32 %v1873_v1 }
 0x371   : > { %v10307_v62 = vadd.f32 %v9999_v38, %v968_v7  ;;  %v1973_v7 = vmul.f32 1.442695, %v1778_v14 }
 0x372   : > { %v1395_v22 = vpop.xlane.xlu1 %1394 }
 0x373   : > { %1424 = vmax.xlane.f32.xlu2 %v1423_v49  ;;  %18284 = vst [vmem:[#allocation182_spill] sm:$0xff] %v10307_v62  ;;  %v1524_v49 = vpop.xlane.xlu2 %1523  ;;  %v1435_v27 = vsel %vm1326_vm2, %v10307_v62, -inf }
 0x374   : > { %v1776_v55 = vsub.f32 %v9784_v37, %v1524_v49  ;;  %v10324_v49 = vpop.xlane.xlu0 %1661 }
 0x375   : > { %18288 = vst [vmem:[#allocation186_spill] sm:$0xff] %v10324_v49 }
 0x376   : > { %v1969_v56 = vmul.f32 1.442695, %v1776_v55 }
 0x378   : > { %2355 = vrot.lane.b32.xlu1 %v10297_v48, %s9228_s14  ;;  %v10314_v48 = vpop.eup %8436  ;;  %8438 = vpow2.f32 %v1969_v56  ;;  %v10329_v56 = vadd.f32 %v9999_v38, %v963_v43 }
 0x379   : > { %18286 = vst [vmem:[#allocation184_spill] sm:$0xff] %v10314_v48  ;;  %8440 = vpow2.f32 %v1973_v7  ;;  %v1195_v7 = vpop.f32.mrf.mxu3 }
 0x37a   : > { %18290 = vst [vmem:[#allocation188_spill] sm:$0xff] %v10329_v56  ;;  %v1429_v14 = vsel %vm1326_vm2, %v10329_v56, -inf }
 0x37c   : > { %v10333_v12 = vpop.permute.xlu0 %2231 }
 0x37d   : > { %18291 = vst [vmem:[#allocation189_spill] sm:$0xff] %v10333_v12 }
 0x37e   : > { %v10319_v1 = vpop.eup %8438 }
 0x37f   : > { %18287 = vst [vmem:[#allocation185_spill] sm:$0xff] %v10319_v1  ;;  %v10326_v37 = vpop.eup %8440 }
 0x380   : > { %18289 = vst [vmem:[#allocation187_spill] sm:$0xff] %v10326_v37 }
 0x384   : > { %v10346_v19 = vpop.permute.xlu0 %2327 }
 0x385   : > { %18294 = vst [vmem:[#allocation192_spill] sm:$0xff] %v10346_v19 }
 0x387   : > { %1436 = vmax.xlane.f32.xlu0 %v1435_v27  ;;  %v1733_v27 = vsub.f32 %v9948_v52, %v1395_v22  ;;  %v970_v52 = vpop.f32.mrf.mxu0 }
 0x389   : > { %v1883_v55 = vmul.f32 1.442695, %v1733_v27  ;;  %v10342_v27 = vadd.f32 %v9999_v38, %v1195_v7  ;;  %v10357_v7 = vadd.f32 %v9999_v38, %v10223_v20  ;;  %v1432_v20 = vsel %vm1326_vm2, %v10364_v47, -inf }
 0x38b   : > { %2257 = vrot.lane.b32.xlu2 %v10314_v48, %s9228_s14  ;;  %8442 = vpow2.f32 %v1883_v55  ;;  %18293 = vst [vmem:[#allocation191_spill] sm:$0xff] %v10342_v27  ;;  %v1708_v43 = vsel %vm1326_vm2, %v10342_v27, -inf  ;;  %v10348_v55 = vpop.permute.xlu2 %2323 }
 0x38c   : > { %18295 = vst [vmem:[#allocation193_spill] sm:$0xff] %v10348_v55 }
 0x38d   : > { %18297 = vst [vmem:[#allocation195_spill] sm:$0xff] %v10357_v7 }
 0x38f   : > { %v973_v58 = vpop.f32.mrf.mxu0 }
 0x391   : > { %v10337_v22 = vpop.eup %8442 }
 0x392   : > { %18292 = vst [vmem:[#allocation190_spill] sm:$0xff] %v10337_v22 }
 0x393   : > { %2353 = vrot.lane.b32.xlu2 %v10319_v1, %s9228_s14 }
 0x39b   : > { %2357 = vrot.lane.b32.xlu0 %v10326_v37, %s9228_s14  ;;  %v1392_v37 = vpop.xlane.xlu0 %1391 }
 0x39c   : > { %v1732_v1 = vsub.f32 %v9874_v44, %v1392_v37 }
 0x39e   : > { %v1881_v48 = vmul.f32 1.442695, %v1732_v1  ;;  %v975_v1 = vpop.f32.mrf.mxu0 }
 0x3a0   : > { %8444 = vpow2.f32 %v1881_v48  ;;  %v10377_v48 = vadd.f32 %v9999_v38, %v975_v1 }
 0x3a2   : > { %1430 = vmax.xlane.f32.xlu1 %v1429_v14  ;;  %v1539_v14 = vpop.xlane.xlu1 %1538  ;;  %18303 = vst [vmem:[#allocation201_spill] sm:$0xff] %v10377_v48  ;;  %v1444_v57 = vsel %vm1326_vm2, %v10377_v48, -inf }
 0x3a3   : > { %2267 = vrot.lane.b32.xlu0 %v10337_v22, %s9228_s14  ;;  %v10353_v22 = vpop.xlane.xlu2 %1658  ;;  %v1536_v1 = vpop.xlane.xlu0 %1535 }
 0x3a4   : > { %18296 = vst [vmem:[#allocation194_spill] sm:$0xff] %v10353_v22 }
 0x3a6   : > { %v10368_v37 = vpop.eup %8444 }
 0x3a7   : > { %18301 = vst [vmem:[#allocation199_spill] sm:$0xff] %v10368_v37 }
 0x3aa   : > { %1709 = vmax.xlane.f32.xlu1 %v1708_v43  ;;  %v1702_v43 = vsel %vm1326_vm2, %v10357_v7, -inf  ;;  %v10361_v19 = vpop.xlane.xlu1 %1673 }
 0x3ab   : > { %18298 = vst [vmem:[#allocation196_spill] sm:$0xff] %v10361_v19  ;;  %v10366_v55 = vpop.permute.xlu2 %2229 }
 0x3ac   : > { %18300 = vst [vmem:[#allocation198_spill] sm:$0xff] %v10366_v55 }
 0x3b2   : > { %v10374_v44 = vpop.permute.xlu1 %2241 }
 0x3b3   : > { %18302 = vst [vmem:[#allocation200_spill] sm:$0xff] %v10374_v44 }
 0x3ba   : > { %v10382_v55 = vpop.permute.xlu1 %2337 }
 0x3bb   : > { %18304 = vst [vmem:[#allocation202_spill] sm:$0xff] %v10382_v55 }
 0x3bc   : > { %1703 = vmax.xlane.f32.xlu2 %v1702_v43  ;;  %v1389_v43 = vpop.xlane.xlu2 %1388 }
 0x3bd   : > { %v1731_v23 = vsub.f32 %v9920_v17, %v1389_v43 }
 0x3bf   : > { %v1879_v12 = vmul.f32 1.442695, %v1731_v23 }
 0x3c1   : > { %8446 = vpow2.f32 %v1879_v12  ;;  %v10395_v12 = vpop.xlane.xlu0 %1670 }
 0x3c2   : > { %v1404_v27 = vpop.xlane.xlu1 %1403 }
 0x3c3   : > { %2265 = vrot.lane.b32.xlu1 %v10368_v37, %s9228_s14  ;;  %v1781_v37 = vsub.f32 %v9963_v54, %v1539_v14  ;;  %v1736_v49 = vsub.f32 %v10063_v33, %v1404_v27 }
 0x3c4   : > { %1433 = vmax.xlane.f32.xlu2 %v1432_v20  ;;  %v1533_v7 = vpop.xlane.xlu2 %1532 }
 0x3c5   : > { %v1779_v20 = vsub.f32 %v9933_v35, %v1533_v7  ;;  %v1979_v44 = vmul.f32 1.442695, %v1781_v37  ;;  %v1889_v23 = vmul.f32 1.442695, %v1736_v49 }
 0x3c7   : > { %v1975_v22 = vmul.f32 1.442695, %v1779_v20  ;;  %8448 = vpow2.f32 %v1979_v44  ;;  %v10387_v19 = vpop.eup %8446  ;;  %v10402_v44 = vadd.f32 %v9999_v38, %v970_v52  ;;  %v1780_v20 = vsub.f32 %v9896_v60, %v1536_v1 }
 0x3c8   : > { %18305 = vst [vmem:[#allocation203_spill] sm:$0xff] %v10387_v19 }
 0x3c9   : > { %8450 = vpow2.f32 %v1975_v22  ;;  %18308 = vst [vmem:[#allocation206_spill] sm:$0xff] %v10402_v44  ;;  %v10408_v49 = vpop.permute.xlu0 %2237  ;;  %v1438_v22 = vsel %vm1326_vm2, %v10402_v44, -inf }
 0x3ca   : > { %8452 = vpow2.f32 %v1889_v23  ;;  %18310 = vst [vmem:[#allocation208_spill] sm:$0xff] %v10408_v49  ;;  %v1548_v52 = vpop.xlane.xlu1 %1547  ;;  %v1977_v23 = vmul.f32 1.442695, %v1780_v20 }
 0x3cc   : > { %v10414_v37 = vpop.permute.xlu2 %2233  ;;  %8454 = vpow2.f32 %v1977_v23 }
 0x3cd   : > { %1445 = vmax.xlane.f32.xlu0 %v1444_v57  ;;  %v10391_v43 = vpop.eup %8448  ;;  %v978_v57 = vpop.f32.mrf.mxu0 }
 0x3ce   : > { %18306 = vst [vmem:[#allocation204_spill] sm:$0xff] %v10391_v43 }
 0x3cf   : > { %v10397_v14 = vpop.eup %8450 }
 0x3d0   : > { %18307 = vst [vmem:[#allocation205_spill] sm:$0xff] %v10397_v14  ;;  %v10404_v27 = vpop.eup %8452 }
 0x3d1   : > { %18309 = vst [vmem:[#allocation207_spill] sm:$0xff] %v10404_v27  ;;  %v10412_v7 = vpop.permute.xlu0 %2333 }
 0x3d2   : > { %18311 = vst [vmem:[#allocation209_spill] sm:$0xff] %v10412_v7 }
 0x3d4   : > { %v10417_v54 = vpop.permute.xlu2 %2329 }
 0x3d5   : > { %18312 = vst [vmem:[#allocation210_spill] sm:$0xff] %v10417_v54  ;;  %v10420_v33 = vpop.f32.mrf.mxu0 }
 0x3d9   : > { %v1401_v35 = vpop.xlane.xlu0 %1400 }
 0x3da   : > { %v1735_v17 = vsub.f32 %v9968_v5, %v1401_v35 }
 0x3dc   : > { %2263 = vrot.lane.b32.xlu2 %v10387_v19, %s9228_s14  ;;  %v10431_v1 = vpop.xlane.xlu2 %1667  ;;  %v1784_v19 = vsub.f32 %v10077_v45, %v1548_v52 }
 0x3dd   : > { %v983_v20 = vpop.f32.mrf.mxu0 }
 0x3de   : > { %v1985_v7 = vmul.f32 1.442695, %v1784_v19  ;;  %v7947_v19 = vld [vmem:[%s9316_s11 + $0xb8] sm:$0xff] }
 0x3df   : > { %7870 = vmatmul.msk.bf16.gmra.mxu0 %vm672_vm1, %v7947_v19 }
 0x3e1   : > { %2363 = vrot.lane.b32.xlu0 %v10391_v43, %s9228_s14  ;;  %v1887_v43 = vmul.f32 1.442695, %v1735_v17  ;;  %v10438_v17 = vadd.f32 %v9999_v38, %v983_v20  ;;  %v1545_v49 = vpop.xlane.xlu0 %1544 }
 0x3e3   : > { %8456 = vpow2.f32 %v1887_v43  ;;  %18316 = vst [vmem:[#allocation214_spill] sm:$0xff] %v10438_v17 }
 0x3e4   : > { %2359 = vrot.lane.b32.xlu2 %v10397_v14, %s9228_s14  ;;  %v10422_v14 = vpop.xlane.xlu1 %1682  ;;  %v1398_v43 = vpop.xlane.xlu2 %1397 }
 0x3e9   : > { %2273 = vrot.lane.b32.xlu0 %v10404_v27, %s9228_s14  ;;  %v10427_v27 = vadd.f32 %v9999_v38, %v973_v58  ;;  %v1453_v58 = vsel %vm1326_vm2, %v10438_v17, -inf }
 0x3eb   : > { %18314 = vst [vmem:[#allocation212_spill] sm:$0xff] %v10427_v27  ;;  %v1441_v35 = vsel %vm1326_vm2, %v10427_v27, -inf }
 0x3ec   : > { %v10435_v23 = vpop.permute.xlu1 %2247  ;;  %v1542_v20 = vpop.xlane.xlu2 %1541 }
 0x3ed   : > { %1439 = vmax.xlane.f32.xlu1 %v1438_v22  ;;  %v10424_v22 = vpop.eup %8454  ;;  %18315 = vst [vmem:[#allocation213_spill] sm:$0xff] %v10435_v23 }
 0x3ee   : > { %18313 = vst [vmem:[#allocation211_spill] sm:$0xff] %v10424_v22  ;;  %v10440_v60 = vpop.eup %8456 }
 0x3ef   : > { %18317 = vst [vmem:[#allocation215_spill] sm:$0xff] %v10440_v60 }
 0x3f4   : > { %v10446_v5 = vpop.permute.xlu1 %2343 }
 0x3f5   : > { %18318 = vst [vmem:[#allocation216_spill] sm:$0xff] %v10446_v5 }
 0x3fc   : > { %v1413_v54 = vpop.xlane.xlu1 %1412 }
 0x406   : > { %2361 = vrot.lane.b32.xlu1 %v10424_v22, %s9228_s14  ;;  %v1734_v22 = vsub.f32 %v10026_v63, %v1398_v43  ;;  %v985_v43 = vpop.f32.mrf.mxu0 }
 0x408   : > { %v1885_v55 = vmul.f32 1.442695, %v1734_v22 }
 0x40a   : > { %8458 = vpow2.f32 %v1885_v55 }
 0x40b   : > { %8460 = vpow2.f32 %v1985_v7  ;;  %v10473_v7 = vadd.f32 %v9999_v38, %v978_v57 }
 0x40d   : > { %1442 = vmax.xlane.f32.xlu2 %v1441_v35  ;;  %v1782_v35 = vsub.f32 %v10042_v18, %v1542_v20  ;;  %18323 = vst [vmem:[#allocation221_spill] sm:$0xff] %v10473_v7  ;;  %v1783_v18 = vsub.f32 %v9984_v0, %v1545_v49 }
 0x40e   : > { %2271 = vrot.lane.b32.xlu1 %v10440_v60, %s9228_s14  ;;  %v1739_v60 = vsub.f32 %v10167_v9, %v1413_v54  ;;  %v10464_v54 = vpop.xlane.xlu0 %1679  ;;  %v10488_v45 = vpop.f32.mrf.mxu0 }
 0x40f   : > { %v1981_v23 = vmul.f32 1.442695, %v1782_v35  ;;  %v10483_v35 = vpop.permute.xlu2 %2239  ;;  %v1983_v57 = vmul.f32 1.442695, %v1783_v18 }
 0x410   : > { %v1895_v5 = vmul.f32 1.442695, %v1739_v60  ;;  %18326 = vst [vmem:[#allocation224_spill] sm:$0xff] %v10483_v35 }
 0x411   : > { %8462 = vpow2.f32 %v1981_v23  ;;  %v10479_v23 = vpop.xlane.xlu1 %1691 }
 0x412   : > { %8464 = vpow2.f32 %v1895_v5  ;;  %v1447_v5 = vsel %vm1326_vm2, %v10473_v7, -inf }
 0x413   : > { %1454 = vmax.xlane.f32.xlu0 %v1453_v58  ;;  %v10452_v58 = vpop.eup %8458  ;;  %8466 = vpow2.f32 %v1983_v57 }
 0x414   : > { %18319 = vst [vmem:[#allocation217_spill] sm:$0xff] %v10452_v58  ;;  %v10456_v52 = vpop.eup %8460 }
 0x415   : > { %18320 = vst [vmem:[#allocation218_spill] sm:$0xff] %v10456_v52 }
 0x416   : > { %v10475_v22 = vpop.permute.xlu0 %2243 }
 0x417   : > { %v10462_v55 = vpop.eup %8462  ;;  %18324 = vst [vmem:[#allocation222_spill] sm:$0xff] %v10475_v22  ;;  %v10490_v9 = vpop.permute.xlu2 %2335 }
 0x418   : > { %18321 = vst [vmem:[#allocation219_spill] sm:$0xff] %v10462_v55  ;;  %v10468_v60 = vpop.eup %8464 }
 0x419   : > { %18322 = vst [vmem:[#allocation220_spill] sm:$0xff] %v10468_v60  ;;  %v10485_v19 = vpop.permute.xlu1 %2253 }
 0x41a   : > { %18327 = vst [vmem:[#allocation225_spill] sm:$0xff] %v10485_v19 }
 0x41b   : > { %18328 = vst [vmem:[#allocation226_spill] sm:$0xff] %v10490_v9 }
 0x41e   : > { %v10481_v20 = vpop.permute.xlu0 %2339 }
 0x41f   : > { %18325 = vst [vmem:[#allocation223_spill] sm:$0xff] %v10481_v20  ;;  %v10499_v20 = vadd.f32 %v9999_v38, %v10420_v33  ;;  %v10503_v18 = vpop.xlane.xlu2 %1676 }
 0x421   : > { %18331 = vst [vmem:[#allocation229_spill] sm:$0xff] %v10499_v20  ;;  %v1450_v57 = vsel %vm1326_vm2, %v10499_v20, -inf }
 0x425   : > { %2269 = vrot.lane.b32.xlu2 %v10452_v58, %s9228_s14  ;;  %v10495_v58 = vpop.eup %8466 }
 0x426   : > { %v1410_v63 = vpop.xlane.xlu0 %1409  ;;  %18330 = vst [vmem:[#allocation228_spill] sm:$0xff] %v10495_v58 }
 0x427   : > { %2369 = vrot.lane.b32.xlu0 %v10456_v52, %s9228_s14  ;;  %v10493_v52 = vpop.permute.xlu1 %2349  ;;  %v1407_v33 = vpop.xlane.xlu2 %1406 }
 0x428   : > { %18329 = vst [vmem:[#allocation227_spill] sm:$0xff] %v10493_v52 }
 0x42d   : > { %2365 = vrot.lane.b32.xlu2 %v10462_v55, %s9228_s14 }
 0x42f   : > { %2279 = vrot.lane.b32.xlu0 %v10468_v60, %s9228_s14  ;;  %v990_v60 = vpop.f32.mrf.mxu0 }
 0x430   : > { %v10506_v49 = vadd.f32 %v9999_v38, %v990_v60  ;;  %v1787_v60 = vsub.f32 %v9433_v4, %v9799_v8  ;;  %v1790_v8 = vsub.f32 %v9493_v40, %v9881_v21 }
 0x432   : > { %18332 = vst [vmem:[#allocation230_spill] sm:$0xff] %v10506_v49 }
 0x438   : > { %1448 = vmax.xlane.f32.xlu1 %v1447_v5  ;;  %v1738_v5 = vsub.f32 %v10066_v30, %v1410_v63  ;;  %v1422_v63 = vpop.xlane.xlu1 %1421  ;;  %v1737_v30 = vsub.f32 %v10122_v24, %v1407_v33  ;;  %v10553_v33 = vadd.f32 %v9999_v38, %v985_v43  ;;  %v1796_v43 = vsub.f32 %v9623_v59, %v10058_v15 }
 0x439   : > { %v1742_v9 = vsub.f32 %v10252_v13, %v1422_v63  ;;  %v1799_v15 = vsub.f32 %v9680_v25, %v10137_v61  ;;  %v10594_v61 = vadd.f32 %v9999_v38, %v10488_v45  ;;  %v1802_v45 = vsub.f32 %v9777_v41, %v10217_v51 }
 0x43a   : > { %v1893_v55 = vmul.f32 1.442695, %v1738_v5  ;;  %v1462_v5 = vsel %vm1326_vm2, %v10506_v49, -inf  ;;  %v1891_v52 = vmul.f32 1.442695, %v1737_v30  ;;  %18340 = vst [vmem:[#allocation238_spill] sm:$0xff] %v10553_v33 }
 0x43b   : > { %v2015_v59 = vmul.f32 1.442695, %v1799_v15  ;;  %18345 = vst [vmem:[#allocation243_spill] sm:$0xff] %v10594_v61  ;;  %v2021_v38 = vmul.f32 1.442695, %v1802_v45 }
 0x43c   : > { %8468 = vpow2.f32 %v1893_v55 }
 0x440   : > { %v10516_v55 = vpop.xlane.xlu1 %1700 }
 0x442   : > { %v10512_v0 = vpop.eup %8468 }
 0x443   : > { %18333 = vst [vmem:[#allocation231_spill] sm:$0xff] %v10512_v0 }
 0x451   : > { %2367 = vrot.lane.b32.xlu1 %v10495_v58, %s9228_s14  ;;  %v1991_v58 = vmul.f32 1.442695, %v1787_v60 }
 0x453   : > { %8470 = vpow2.f32 %v1991_v58 }
 0x454   : > { %8472 = vpow2.f32 %v1891_v52  ;;  %v1793_v52 = vsub.f32 %v9554_v32, %v9970_v39  ;;  %v1456_v39 = vsel %vm1326_vm2, %v10553_v33, -inf  ;;  %v2009_v32 = vmul.f32 1.442695, %v1796_v43 }
 0x456   : > { %1451 = vmax.xlane.f32.xlu2 %v1450_v57  ;;  %v10521_v57 = vpop.permute.xlu1 %2259 }
 0x459   : > { %1463 = vmax.xlane.f32.xlu0 %v1462_v5  ;;  %2277 = vrot.lane.b32.xlu1 %v10512_v0, %s9228_s14  ;;  %v1785_v5 = vsub.f32 %v9396_v46, %v9762_v53  ;;  %v1901_v0 = vmul.f32 1.442695, %v1742_v9  ;;  %v10526_v22 = vpop.eup %8470  ;;  %v1997_v53 = vmul.f32 1.442695, %v1790_v8 }
 0x45a   : > { %18334 = vst [vmem:[#allocation232_spill] sm:$0xff] %v10526_v22  ;;  %v10528_v35 = vpop.eup %8472 }
 0x45b   : > { %v1987_v19 = vmul.f32 1.442695, %v1785_v5  ;;  %18335 = vst [vmem:[#allocation233_spill] sm:$0xff] %v10528_v35  ;;  %8474 = vpow2.f32 %v1901_v0  ;;  %v10548_v0 = vpop.xlane.xlu0 %1688 }
 0x45d   : > { %8476 = vpow2.f32 %v1987_v19  ;;  %v2003_v19 = vmul.f32 1.442695, %v1793_v52 }
 0x45e   : > { %v10536_v30 = vpop.permute.xlu1 %2355  ;;  %8478 = vpow2.f32 %v1997_v53 }
 0x45f   : > { %18336 = vst [vmem:[#allocation234_spill] sm:$0xff] %v10536_v30  ;;  %8480 = vpow2.f32 %v2003_v19  ;;  %v10570_v19 = vpop.permute.xlu2 %2245 }
 0x461   : > { %v10538_v9 = vpop.eup %8474 }
 0x462   : > { %18337 = vst [vmem:[#allocation235_spill] sm:$0xff] %v10538_v9 }
 0x463   : > { %v10540_v58 = vpop.eup %8476  ;;  %v10558_v5 = vpop.permute.xlu0 %2249 }
 0x464   : > { %18338 = vst [vmem:[#allocation236_spill] sm:$0xff] %v10540_v58  ;;  %v10550_v63 = vpop.eup %8478 }
 0x465   : > { %18339 = vst [vmem:[#allocation237_spill] sm:$0xff] %v10550_v63  ;;  %v10564_v52 = vpop.eup %8480 }
 0x466   : > { %v1431_v21 = vpop.xlane.xlu1 %1430  ;;  %18341 = vst [vmem:[#allocation239_spill] sm:$0xff] %v10564_v52 }
 0x467   : > { %v1745_v60 = vsub.f32 %v10329_v56, %v1431_v21  ;;  %v10584_v4 = vpop.permute.xlu2 %2341 }
 0x469   : > { %v1907_v53 = vmul.f32 1.442695, %v1745_v60  ;;  %v1786_v60 = vsub.f32 %v9430_v2, %v9789_v42 }
 0x46b   : > { %8482 = vpow2.f32 %v1907_v53  ;;  %v10574_v56 = vpop.permute.xlu0 %2345 }
 0x46c   : > { %18342 = vst [vmem:[#allocation240_spill] sm:$0xff] %v10574_v56  ;;  %8484 = vpow2.f32 %v2009_v32 }
 0x46d   : > { %2375 = vrot.lane.b32.xlu0 %v10526_v22, %s9228_s14 }
 0x46e   : > { %2275 = vrot.lane.b32.xlu2 %v10528_v35, %s9228_s14  ;;  %v10562_v8 = vpop.xlane.xlu1 %1709 }
 0x46f   : > { %v10598_v15 = vpop.xlane.xlu2 %1685 }
 0x471   : > { %v10576_v46 = vpop.eup %8482 }
 0x472   : > { %18343 = vst [vmem:[#allocation241_spill] sm:$0xff] %v10576_v46  ;;  %v10586_v40 = vpop.eup %8484 }
 0x473   : > { %v1419_v43 = vpop.xlane.xlu0 %1418  ;;  %18344 = vst [vmem:[#allocation242_spill] sm:$0xff] %v10586_v40 }
 0x474   : > { %v1741_v24 = vsub.f32 %v10151_v31, %v1419_v43 }
 0x475   : > { %2285 = vrot.lane.b32.xlu0 %v10538_v9, %s9228_s14 }
 0x476   : > { %2371 = vrot.lane.b32.xlu2 %v10540_v58, %s9228_s14  ;;  %v10572_v21 = vpop.permute.xlu1 %2265  ;;  %v1899_v42 = vmul.f32 1.442695, %v1741_v24 }
 0x47b   : > { %v10629_v13 = vpop.xlane.xlu0 %1697 }
 0x47d   : > { %2381 = vrot.lane.b32.xlu0 %v10550_v63, %s9228_s14 }
 0x47e   : > { %v1440_v53 = vpop.xlane.xlu1 %1439 }
 0x47f   : > { %v1748_v32 = vsub.f32 %v10402_v44, %v1440_v53 }
 0x481   : > { %v1913_v25 = vmul.f32 1.442695, %v1748_v32  ;;  %v1416_v32 = vpop.xlane.xlu2 %1415 }
 0x483   : > { %1457 = vmax.xlane.f32.xlu1 %v1456_v39  ;;  %v1989_v39 = vmul.f32 1.442695, %v1786_v60 }
 0x485   : > { %2387 = vrot.lane.b32.xlu0 %v10564_v52, %s9228_s14  ;;  %8486 = vpow2.f32 %v1989_v39  ;;  %v10644_v52 = vpop.permute.xlu0 %2255 }
 0x486   : > { %8488 = vpow2.f32 %v2015_v59  ;;  %v10596_v60 = vpop.permute.xlu1 %2361  ;;  %v1459_v59 = vsel %vm1326_vm2, %v10594_v61, -inf }
 0x487   : > { %18346 = vst [vmem:[#allocation244_spill] sm:$0xff] %v10596_v60  ;;  %8490 = vpow2.f32 %v1899_v42  ;;  %v18351_v42 = vld [vmem:[#allocation16_spill] sm:$0xff] }
 0x488   : > { %8492 = vpow2.f32 %v1913_v25  ;;  %v1805_v44 = vsub.f32 %v18351_v42, %v9816_v34  ;;  %v1740_v25 = vsub.f32 %v10205_v6, %v1416_v32  ;;  %v18354_v34 = vld [vmem:[#allocation17_spill] sm:$0xff] }
 0x489   : > { %8494 = vpow2.f32 %v2021_v38  ;;  %v10631_v31 = vpop.permute.xlu2 %2251  ;;  %v18358_v6 = vld [vmem:[#allocation29_spill] sm:$0xff] }
 0x48a   : > { %v2027_v51 = vmul.f32 1.442695, %v1805_v44  ;;  %v1897_v41 = vmul.f32 1.442695, %v1740_v25 }
 0x48b   : > { %v10600_v2 = vpop.eup %8486 }
 0x48c   : > { %18347 = vst [vmem:[#allocation245_spill] sm:$0xff] %v10600_v2  ;;  %v10602_v39 = vpop.eup %8488  ;;  %8496 = vpow2.f32 %v2027_v51  ;;  %v18357_v51 = vld [vmem:[#allocation102_spill] sm:$0xff] }
 0x48d   : > { %2291 = vrot.lane.b32.xlu0 %v10576_v46, %s9228_s14  ;;  %18348 = vst [vmem:[#allocation246_spill] sm:$0xff] %v10602_v39  ;;  %v10612_v24 = vpop.eup %8490  ;;  %8498 = vpow2.f32 %v1897_v41  ;;  %v18359_v41 = vld [vmem:[#allocation123_spill] sm:$0xff]  ;;  %v18375_v46 = vld [vmem:[#allocation34_spill] sm:$0xff] }
 0x48e   : > { %18349 = vst [vmem:[#allocation247_spill] sm:$0xff] %v10612_v24  ;;  %v10614_v53 = vpop.permute.xlu1 %2271  ;;  %v10616_v43 = vpop.eup %8492 }
 0x48f   : > { %18350 = vst [vmem:[#allocation248_spill] sm:$0xff] %v10616_v43  ;;  %v10625_v45 = vpop.eup %8494 }
 0x490   : > { %18352 = vst [vmem:[#allocation249_spill] sm:$0xff] %v10625_v45 }
 0x492   : > { %v10636_v44 = vpop.eup %8496 }
 0x493   : > { %v10640_v25 = vpop.eup %8498 }
 0x494   : > { %18356 = vst [vmem:[#allocation250_spill] sm:$0xff] %v10640_v25 }
 0x495   : > { %2393 = vrot.lane.b32.xlu0 %v10586_v40, %s9228_s14  ;;  %v18353_v40 = vld [vmem:[#allocation83_spill] sm:$0xff] }
 0x496   : > { %v1788_v38 = vsub.f32 %v18354_v34, %v18353_v40  ;;  %18355 = vst [vmem:[#allocation83_spill] sm:$0xff] %v10636_v44  ;;  %v18360_v40 = vld [vmem:[#allocation30_spill] sm:$0xff] }
 0x498   : > { %v1993_v42 = vmul.f32 1.442695, %v1788_v38 }
 0x49c   : > { %2373 = vrot.lane.b32.xlu1 %v10600_v2, %s9228_s14  ;;  %v18372_v2 = vld [vmem:[#allocation23_spill] sm:$0xff] }
 0x49d   : > { %2399 = vrot.lane.b32.xlu0 %v10602_v39, %s9228_s14 }
 0x49f   : > { %1460 = vmax.xlane.f32.xlu2 %v1459_v59 }
 0x4a4   : > { %2283 = vrot.lane.b32.xlu1 %v10612_v24, %s9228_s14 }
 0x4a5   : > { %2297 = vrot.lane.b32.xlu0 %v10616_v43, %s9228_s14  ;;  %v18374_v43 = vld [vmem:[#allocation113_spill] sm:$0xff] }
 0x4a6   : > { %v1792_v9 = vsub.f32 %v18375_v46, %v18374_v43 }
 0x4ab   : > { %v1449_v59 = vpop.xlane.xlu1 %1448 }
 0x4ac   : > { %v1751_v39 = vsub.f32 %v10473_v7, %v1449_v59  ;;  %v10650_v59 = vpop.permute.xlu2 %2347 }
 0x4ad   : > { %2405 = vrot.lane.b32.xlu0 %v10625_v45, %s9228_s14  ;;  %v1808_v45 = vsub.f32 %v18358_v6, %v18357_v51  ;;  %18361 = vst [vmem:[#allocation102_spill] sm:$0xff] %v10650_v59  ;;  %v18365_v6 = vld [vmem:[#allocation40_spill] sm:$0xff] }
 0x4ae   : > { %v1919_v32 = vmul.f32 1.442695, %v1751_v39  ;;  %v1791_v39 = vsub.f32 %v18360_v40, %v18359_v41 }
 0x4af   : > { %v2033_v38 = vmul.f32 1.442695, %v1808_v45 }
 0x4b0   : > { %8500 = vpow2.f32 %v1919_v32  ;;  %v1999_v34 = vmul.f32 1.442695, %v1791_v39  ;;  %v18364_v32 = vld [vmem:[#allocation119_spill] sm:$0xff]  ;;  %v993_v39 = vpop.f32.mrf.mxu0 }
 0x4b1   : > { %8502 = vpow2.f32 %v1993_v42  ;;  %v10662_v42 = vpop.permute.xlu0 %2351 }
 0x4b2   : > { %8504 = vpow2.f32 %v2033_v38  ;;  %18366 = vst [vmem:[#allocation119_spill] sm:$0xff] %v10662_v42 }
 0x4b3   : > { %8506 = vpow2.f32 %v1999_v34  ;;  %v9163_v34 = vld [vmem:[%s17467_s3] ss:$0 sm:$0xff] }
 0x4b4   : > { %v10664_v41 = vpop.xlane.xlu2 %1694  ;;  %v10677_v38 = vadd.f32 %v9163_v34, %v993_v39 }
 0x4b5   : > { %2411 = vrot.lane.b32.xlu0 %v10636_v44, %s9228_s14  ;;  %v1811_v44 = vsub.f32 %v18365_v6, %v18364_v32 }
 0x4b6   : > { %v10652_v7 = vpop.eup %8500  ;;  %18369 = vst [vmem:[#allocation254_spill] sm:$0xff] %v10677_v38  ;;  %v1465_v6 = vsel %vm1326_vm2, %v10677_v38, -inf }
 0x4b7   : > { %2281 = vrot.lane.b32.xlu2 %v10640_v25, %s9228_s14  ;;  %18362 = vst [vmem:[#allocation123_spill] sm:$0xff] %v10652_v7  ;;  %v10656_v51 = vpop.eup %8502  ;;  %v2039_v45 = vmul.f32 1.442695, %v1811_v44  ;;  %v2001_v25 = vmul.f32 1.442695, %v1792_v9 }
 0x4b8   : > { %18363 = vst [vmem:[#allocation251_spill] sm:$0xff] %v10656_v51  ;;  %v10666_v40 = vpop.eup %8504 }
 0x4b9   : > { %18367 = vst [vmem:[#allocation252_spill] sm:$0xff] %v10666_v40  ;;  %v10670_v63 = vpop.eup %8506  ;;  %8508 = vpow2.f32 %v2039_v45  ;;  %v1428_v32 = vpop.xlane.xlu0 %1427 }
 0x4ba   : > { %18368 = vst [vmem:[#allocation253_spill] sm:$0xff] %v10670_v63 }
 0x4bc   : > { %v1425_v44 = vpop.xlane.xlu2 %1424 }
 0x4bd   : > { %2303 = vrot.lane.b32.xlu0 %v10652_v7, %s9228_s14 }
 0x4bf   : > { %2377 = vrot.lane.b32.xlu2 %v10656_v51, %s9228_s14  ;;  %v10681_v22 = vpop.eup %8508 }
 0x4c0   : > { %18370 = vst [vmem:[#allocation255_spill] sm:$0xff] %v10681_v22 }
 0x4c1   : > { %v10685_v45 = vpop.xlane.xlu0 %1706 }
 0x4c5   : > { %2417 = vrot.lane.b32.xlu0 %v10666_v40, %s9228_s14  ;;  %v10687_v40 = vpop.permute.xlu2 %2257 }
 0x4c7   : > { %2383 = vrot.lane.b32.xlu2 %v10670_v63, %s9228_s14  ;;  %v18371_v63 = vld [vmem:[#allocation95_spill] sm:$0xff] }
 0x4c8   : > { %v1789_v51 = vsub.f32 %v18372_v2, %v18371_v63  ;;  %v1744_v63 = vsub.f32 %v10234_v10, %v1428_v32 }
 0x4c9   : > { %v10691_v39 = vpop.permute.xlu0 %2261 }
 0x4ca   : > { %v1995_v58 = vmul.f32 1.442695, %v1789_v51  ;;  %v995_v51 = vpop.f32.mrf.mxu0  ;;  %v1905_v43 = vmul.f32 1.442695, %v1744_v63 }
 0x4cc   : > { %8510 = vpow2.f32 %v1995_v58  ;;  %v10708_v58 = vadd.f32 %v9163_v34, %v995_v51 }
 0x4cd   : > { %2423 = vrot.lane.b32.xlu0 %v10681_v22, %s9228_s14  ;;  %v10693_v7 = vpop.permute.xlu2 %2353  ;;  %v10697_v22 = vpop.permute.xlu1 %2367  ;;  %8512 = vpow2.f32 %v2001_v25  ;;  %v18382_v25 = vld [vmem:[#allocation46_spill] sm:$0xff] }
 0x4ce   : > { %1466 = vmax.xlane.f32.xlu1 %v1465_v6  ;;  %18373 = vst [vmem:[#allocation95_spill] sm:$0xff] %v10693_v7  ;;  %8514 = vpow2.f32 %v1905_v43 }
 0x4cf   : > { %18376 = vst [vmem:[#allocation113_spill] sm:$0xff] %v10697_v22  ;;  %v1468_v22 = vsel %vm1326_vm2, %v10708_v58, -inf }
 0x4d0   : > { %18379 = vst [vmem:[#allocation258_spill] sm:$0xff] %v10708_v58 }
 0x4d1   : > { %v1437_v24 = vpop.xlane.xlu0 %1436 }
 0x4d2   : > { %v10699_v6 = vpop.eup %8510 }
 0x4d3   : > { %18377 = vst [vmem:[#allocation256_spill] sm:$0xff] %v10699_v6  ;;  %v10710_v46 = vpop.eup %8512 }
 0x4d4   : > { %18380 = vst [vmem:[#allocation259_spill] sm:$0xff] %v10710_v46  ;;  %v10722_v63 = vpop.eup %8514 }
 0x4d5   : > { %v10701_v35 = vpop.xlane.xlu2 %1703  ;;  %v10712_v9 = vpop.permute.xlu1 %2277 }
 0x4d9   : > { %v10706_v2 = vpop.permute.xlu0 %2357 }
 0x4da   : > { %18378 = vst [vmem:[#allocation257_spill] sm:$0xff] %v10706_v2 }
 0x4dd   : > { %v1434_v32 = vpop.xlane.xlu2 %1433 }
 0x4e1   : > { %v10720_v34 = vpop.permute.xlu0 %2267 }
 0x4e7   : > { %2379 = vrot.lane.b32.xlu1 %v10699_v6, %s9228_s14  ;;  %v18381_v6 = vld [vmem:[#allocation134_spill] sm:$0xff] }
 0x4e8   : > { %v1795_v60 = vsub.f32 %v18382_v25, %v18381_v6  ;;  %18383 = vst [vmem:[#allocation134_spill] sm:$0xff] %v10722_v63  ;;  %v1743_v6 = vsub.f32 %v10285_v3, %v1425_v44  ;;  %v10730_v25 = vpop.permute.xlu2 %2263 }
 0x4e9   : > { %v1446_v7 = vpop.xlane.xlu0 %1445 }
 0x4ea   : > { %v2007_v10 = vmul.f32 1.442695, %v1795_v60  ;;  %v18386_v60 = vld [vmem:[#allocation53_spill] sm:$0xff]  ;;  %v1903_v59 = vmul.f32 1.442695, %v1743_v6 }
 0x4ec   : > { %8516 = vpow2.f32 %v2007_v10 }
 0x4ef   : > { %2385 = vrot.lane.b32.xlu1 %v10710_v46, %s9228_s14  ;;  %v18384_v46 = vld [vmem:[#allocation58_spill] sm:$0xff] }
 0x4f0   : > { %1469 = vmax.xlane.f32.xlu2 %v1468_v22  ;;  %v1798_v2 = vsub.f32 %v18384_v46, %v10164_v29  ;;  %v18385_v22 = vld [vmem:[#allocation136_spill] sm:$0xff]  ;;  %v1747_v29 = vsub.f32 %v10307_v62, %v1437_v24 }
 0x4f1   : > { %v1814_v42 = vsub.f32 %v18386_v60, %v18385_v22  ;;  %v10749_v22 = vpop.permute.xlu0 %2363 }
 0x4f2   : > { %v2013_v56 = vmul.f32 1.442695, %v1798_v2  ;;  %v18390_v2 = vld [vmem:[#allocation64_spill] sm:$0xff] }
 0x4f3   : > { %v1817_v6 = vsub.f32 %v18390_v2, %v10148_v50 }
 0x4f5   : > { %v2051_v60 = vmul.f32 1.442695, %v1817_v6 }
 0x4f6   : > { %v1458_v51 = vpop.xlane.xlu1 %1457 }
 0x4f7   : > { %v1754_v30 = vsub.f32 %v10553_v33, %v1458_v51  ;;  %2289 = vrot.lane.b32.xlu1 %v10722_v63, %s9228_s14  ;;  %v10734_v51 = vpop.eup %8516  ;;  %v2045_v33 = vmul.f32 1.442695, %v1814_v42  ;;  %v1911_v42 = vmul.f32 1.442695, %v1747_v29 }
 0x4f8   : > { %18387 = vst [vmem:[#allocation136_spill] sm:$0xff] %v10734_v51 }
 0x4f9   : > { %v1925_v43 = vmul.f32 1.442695, %v1754_v30  ;;  %v18389_v30 = vld [vmem:[#allocation43_spill] sm:$0xff] }
 0x4fa   : > { %v1794_v44 = vsub.f32 %v18389_v30, %v10104_v28  ;;  %v18393_v28 = vld [vmem:[#allocation68_spill] sm:$0xff] }
 0x4fb   : > { %8518 = vpow2.f32 %v1925_v43  ;;  %v10747_v43 = vpop.permute.xlu2 %2359 }
 0x4fc   : > { %8520 = vpow2.f32 %v2013_v56  ;;  %v2005_v56 = vmul.f32 1.442695, %v1794_v44 }
 0x4fd   : > { %8522 = vpow2.f32 %v1903_v59  ;;  %v18395_v59 = vld [vmem:[#allocation54_spill] sm:$0xff] }
 0x4fe   : > { %8524 = vpow2.f32 %v2045_v33  ;;  %v1801_v33 = vsub.f32 %v18393_v28, %v10225_v36  ;;  %v1797_v29 = vsub.f32 %v18395_v59, %v10187_v11  ;;  %v10769_v36 = vpop.permute.xlu0 %2273  ;;  %v18399_v28 = vld [vmem:[#allocation15_spill] sm:$0xff] }
 0x4ff   : > { %2391 = vrot.lane.b32.xlu1 %v10734_v51, %s9228_s14  ;;  %8526 = vpow2.f32 %v1911_v42 }
 0x500   : > { %8528 = vpow2.f32 %v2005_v56  ;;  %v2019_v44 = vmul.f32 1.442695, %v1801_v33  ;;  %v2011_v30 = vmul.f32 1.442695, %v1797_v29  ;;  %v18398_v56 = vld [vmem:[#allocation85_spill] sm:$0xff] }
 0x501   : > { %v10739_v10 = vpop.eup %8518  ;;  %8530 = vpow2.f32 %v2051_v60  ;;  %v1804_v2 = vsub.f32 %v18399_v28, %v18398_v56  ;;  %v1746_v60 = vsub.f32 %v10364_v47, %v1434_v32  ;;  %v18403_v32 = vld [vmem:[#allocation66_spill] sm:$0xff] }
 0x502   : > { %18388 = vst [vmem:[#allocation260_spill] sm:$0xff] %v10739_v10  ;;  %2309 = vrot.lane.b32.xlu0 %v10739_v10, %s9228_s14  ;;  %v10751_v24 = vpop.eup %8520  ;;  %8532 = vpow2.f32 %v2019_v44 }
 0x503   : > { %18391 = vst [vmem:[#allocation261_spill] sm:$0xff] %v10751_v24  ;;  %v10753_v46 = vpop.eup %8522  ;;  %v1443_v6 = vpop.xlane.xlu2 %1442  ;;  %8534 = vpow2.f32 %v2011_v30  ;;  %v2025_v33 = vmul.f32 1.442695, %v1804_v2  ;;  %v1909_v29 = vmul.f32 1.442695, %v1746_v60  ;;  %v1750_v30 = vsub.f32 %v10377_v48, %v1446_v7  ;;  %v18407_v7 = vld [vmem:[#allocation24_spill] sm:$0xff] }
 0x504   : > { %18392 = vst [vmem:[#allocation262_spill] sm:$0xff] %v10753_v46  ;;  %v10761_v50 = vpop.eup %8524  ;;  %v1800_v2 = vsub.f32 %v18403_v32, %v10266_v26  ;;  %v18408_v26 = vld [vmem:[#allocation77_spill] sm:$0xff] }
 0x505   : > { %18394 = vst [vmem:[#allocation263_spill] sm:$0xff] %v10761_v50  ;;  %v10767_v62 = vpop.eup %8526  ;;  %8536 = vpow2.f32 %v2025_v33  ;;  %v1917_v44 = vmul.f32 1.442695, %v1750_v30  ;;  %v18406_v33 = vld [vmem:[#allocation100_spill] sm:$0xff] }
 0x506   : > { %18396 = vst [vmem:[#allocation264_spill] sm:$0xff] %v10767_v62  ;;  %v10771_v42 = vpop.eup %8528  ;;  %8538 = vpow2.f32 %v1909_v29  ;;  %v2017_v60 = vmul.f32 1.442695, %v1800_v2  ;;  %v1807_v48 = vsub.f32 %v18407_v7, %v18406_v33  ;;  %v18409_v29 = vld [vmem:[#allocation9_spill] sm:$0xff]  ;;  %v18413_v33 = vld [vmem:[#allocation38_spill] sm:$0xff] }
 0x507   : > { %2397 = vrot.lane.b32.xlu1 %v10751_v24, %s9228_s14  ;;  %18397 = vst [vmem:[#allocation265_spill] sm:$0xff] %v10771_v42  ;;  %v10779_v11 = vpop.eup %8530  ;;  %8540 = vpow2.f32 %v1917_v44  ;;  %v1803_v30 = vsub.f32 %v18409_v29, %v18408_v26  ;;  %v18412_v44 = vld [vmem:[#allocation118_spill] sm:$0xff] }
 0x508   : > { %2287 = vrot.lane.b32.xlu2 %v10753_v46, %s9228_s14  ;;  %18400 = vst [vmem:[#allocation85_spill] sm:$0xff] %v10779_v11  ;;  %v10784_v59 = vpop.eup %8532  ;;  %8542 = vpow2.f32 %v2017_v60  ;;  %v2031_v2 = vmul.f32 1.442695, %v1807_v48  ;;  %v1810_v7 = vsub.f32 %v18413_v33, %v18412_v44  ;;  %v1749_v48 = vsub.f32 %v10427_v27, %v1443_v6  ;;  %v18417_v6 = vld [vmem:[#allocation18_spill] sm:$0xff] }
 0x509   : > { %18401 = vst [vmem:[#allocation266_spill] sm:$0xff] %v10784_v59  ;;  %v10788_v56 = vpop.eup %8534  ;;  %v2023_v32 = vmul.f32 1.442695, %v1803_v30 }
 0x50a   : > { %2429 = vrot.lane.b32.xlu0 %v10761_v50, %s9228_s14  ;;  %v1455_v50 = vpop.xlane.xlu0 %1454  ;;  %18402 = vst [vmem:[#allocation267_spill] sm:$0xff] %v10788_v56  ;;  %8544 = vpow2.f32 %v2031_v2  ;;  %v2037_v60 = vmul.f32 1.442695, %v1810_v7  ;;  %v1915_v26 = vmul.f32 1.442695, %v1749_v48 }
 0x50b   : > { %v10786_v3 = vpop.permute.xlu2 %2269  ;;  %v10797_v47 = vpop.eup %8536  ;;  %8546 = vpow2.f32 %v2023_v32  ;;  %v1753_v2 = vsub.f32 %v10438_v17, %v1455_v50  ;;  %v18416_v32 = vld [vmem:[#allocation86_spill] sm:$0xff]  ;;  %v18420_v50 = vld [vmem:[#allocation139_spill] sm:$0xff] }
 0x50c   : > { %18404 = vst [vmem:[#allocation268_spill] sm:$0xff] %v10797_v47  ;;  %8548 = vpow2.f32 %v2037_v60  ;;  %v1806_v7 = vsub.f32 %v18417_v6, %v18416_v32  ;;  %v18421_v60 = vld [vmem:[#allocation48_spill] sm:$0xff] }
 0x50d   : > { %8550 = vpow2.f32 %v1915_v26  ;;  %v1923_v33 = vmul.f32 1.442695, %v1753_v2  ;;  %v1813_v17 = vsub.f32 %v18421_v60, %v18420_v50  ;;  %v18422_v26 = vld [vmem:[#allocation128_spill] sm:$0xff]  ;;  %v18423_v2 = vld [vmem:[#allocation33_spill] sm:$0xff] }
 0x50e   : > { %v2029_v27 = vmul.f32 1.442695, %v1806_v7  ;;  %v1809_v32 = vsub.f32 %v18423_v2, %v18422_v26 }
 0x50f   : > { %2295 = vrot.lane.b32.xlu1 %v10767_v62, %s9228_s14  ;;  %8552 = vpow2.f32 %v1923_v33  ;;  %v2043_v6 = vmul.f32 1.442695, %v1813_v17  ;;  %v18426_v33 = vld [vmem:[#allocation62_spill] sm:$0xff] }
 0x510   : > { %2389 = vrot.lane.b32.xlu2 %v10771_v42, %s9228_s14  ;;  %v10830_v42 = vpop.permute.xlu1 %2373  ;;  %8554 = vpow2.f32 %v2029_v27  ;;  %v1816_v27 = vsub.f32 %v18426_v33, %v10176_v16 }
 0x511   : > { %8556 = vpow2.f32 %v2043_v6  ;;  %v18428_v6 = vld [vmem:[#allocation161_spill] sm:$0xff] }
 0x512   : > { %2435 = vrot.lane.b32.xlu0 %v10779_v11, %s9228_s14  ;;  %v10799_v28 = vpop.permute.xlu0 %2369  ;;  %v10801_v11 = vpop.eup %8538  ;;  %v2049_v2 = vmul.f32 1.442695, %v1816_v27  ;;  %v18432_v27 = vld [vmem:[#allocation47_spill] sm:$0xff] }
 0x513   : > { %18405 = vst [vmem:[#allocation269_spill] sm:$0xff] %v10801_v11  ;;  %v10813_v24 = vpop.eup %8540 }
 0x514   : > { %18410 = vst [vmem:[#allocation100_spill] sm:$0xff] %v10813_v24  ;;  %v10815_v51 = vpop.eup %8542 }
 0x515   : > { %18411 = vst [vmem:[#allocation77_spill] sm:$0xff] %v10815_v51  ;;  %v10826_v30 = vpop.eup %8544 }
 0x516   : > { %18414 = vst [vmem:[#allocation118_spill] sm:$0xff] %v10826_v30  ;;  %v10828_v29 = vpop.eup %8546 }
 0x517   : > { %2403 = vrot.lane.b32.xlu1 %v10784_v59, %s9228_s14  ;;  %v10807_v59 = vpop.permute.xlu2 %2365  ;;  %18415 = vst [vmem:[#allocation270_spill] sm:$0xff] %v10828_v29 }
 0x518   : > { %2395 = vrot.lane.b32.xlu2 %v10788_v56, %s9228_s14  ;;  %v10855_v7 = vpop.permute.xlu1 %2283 }
 0x51f   : > { %2409 = vrot.lane.b32.xlu1 %v10797_v47, %s9228_s14  ;;  %v10821_v47 = vpop.permute.xlu0 %2279  ;;  %v1452_v56 = vpop.xlane.xlu2 %1451 }
 0x520   : > { %2293 = vrot.lane.b32.xlu2 %v10801_v11, %s9228_s14  ;;  %v1752_v17 = vsub.f32 %v10499_v20, %v1452_v56  ;;  %v18429_v11 = vld [vmem:[#allocation81_spill] sm:$0xff]  ;;  %v18436_v20 = vld [vmem:[#allocation98_spill] sm:$0xff] }
 0x521   : > { %v1820_v16 = vsub.f32 %v18429_v11, %v18428_v6  ;;  %v18431_v56 = vld [vmem:[#allocation145_spill] sm:$0xff] }
 0x522   : > { %v1921_v63 = vmul.f32 1.442695, %v1752_v17  ;;  %v1812_v17 = vsub.f32 %v18432_v27, %v18431_v56 }
 0x524   : > { %v2041_v11 = vmul.f32 1.442695, %v1812_v17  ;;  %v18440_v17 = vld [vmem:[#allocation158_spill] sm:$0xff] }
 0x527   : > { %2301 = vrot.lane.b32.xlu1 %v10813_v24, %s9228_s14  ;;  %v1464_v44 = vpop.xlane.xlu0 %1463  ;;  %v10839_v48 = vpop.permute.xlu2 %2275  ;;  %v2035_v24 = vmul.f32 1.442695, %v1809_v32 }
 0x528   : > { %2401 = vrot.lane.b32.xlu2 %v10815_v51, %s9228_s14  ;;  %v10841_v51 = vpop.eup %8548 }
 0x529   : > { %18418 = vst [vmem:[#allocation86_spill] sm:$0xff] %v10841_v51  ;;  %v10843_v10 = vpop.eup %8550  ;;  %8558 = vpow2.f32 %v2035_v24  ;;  %v1756_v24 = vsub.f32 %v10506_v49, %v1464_v44  ;;  %v18435_v44 = vld [vmem:[#allocation180_spill] sm:$0xff] }
 0x52a   : > { %18419 = vst [vmem:[#allocation271_spill] sm:$0xff] %v10843_v10  ;;  %v1823_v49 = vsub.f32 %v18436_v20, %v18435_v44 }
 0x52b   : > { %v1929_v6 = vmul.f32 1.442695, %v1756_v24 }
 0x52f   : > { %2415 = vrot.lane.b32.xlu1 %v10826_v30, %s9228_s14  ;;  %v10849_v30 = vpop.permute.xlu0 %2375 }
 0x530   : > { %2407 = vrot.lane.b32.xlu2 %v10828_v29, %s9228_s14  ;;  %v10857_v29 = vpop.permute.xlu2 %2371 }
 0x537   : > { %2421 = vrot.lane.b32.xlu1 %v10841_v51, %s9228_s14  ;;  %v10859_v51 = vpop.eup %8552  ;;  %v10870_v26 = vpop.permute.xlu0 %2285 }
 0x538   : > { %2299 = vrot.lane.b32.xlu2 %v10843_v10, %s9228_s14  ;;  %18424 = vst [vmem:[#allocation139_spill] sm:$0xff] %v10859_v51  ;;  %v10861_v62 = vpop.eup %8554  ;;  %v1461_v60 = vpop.xlane.xlu2 %1460 }
 0x539   : > { %18425 = vst [vmem:[#allocation128_spill] sm:$0xff] %v10861_v62 }
 0x53f   : > { %2307 = vrot.lane.b32.xlu1 %v10859_v51, %s9228_s14  ;;  %v10873_v51 = vpop.eup %8556 }
 0x540   : > { %2413 = vrot.lane.b32.xlu2 %v10861_v62, %s9228_s14  ;;  %18427 = vst [vmem:[#allocation272_spill] sm:$0xff] %v10873_v51  ;;  %v10877_v33 = vpop.eup %8558 }
 0x541   : > { %v1467_v50 = vpop.xlane.xlu1 %1466  ;;  %18430 = vst [vmem:[#allocation161_spill] sm:$0xff] %v10877_v33 }
 0x542   : > { %v1757_v32 = vsub.f32 %v10677_v38, %v1467_v50  ;;  %v2057_v50 = vmul.f32 1.442695, %v1820_v16  ;;  %v10896_v38 = vpop.permute.xlu2 %2281  ;;  %v18439_v16 = vld [vmem:[#allocation70_spill] sm:$0xff] }
 0x544   : > { %v1931_v10 = vmul.f32 1.442695, %v1757_v32 }
 0x546   : > { %8560 = vpow2.f32 %v1931_v10  ;;  %v10888_v10 = vpop.permute.xlu0 %2381 }
 0x547   : > { %2427 = vrot.lane.b32.xlu1 %v10873_v51, %s9228_s14  ;;  %8562 = vpow2.f32 %v2049_v2  ;;  %v2063_v51 = vmul.f32 1.442695, %v1823_v49  ;;  %v18447_v49 = vld [vmem:[#allocation186_spill] sm:$0xff] }
 0x548   : > { %2419 = vrot.lane.b32.xlu2 %v10877_v33, %s9228_s14  ;;  %8564 = vpow2.f32 %v1921_v63  ;;  %v18438_v63 = vld [vmem:[#allocation166_spill] sm:$0xff] }
 0x549   : > { %8566 = vpow2.f32 %v2057_v50  ;;  %v1819_v24 = vsub.f32 %v18439_v16, %v18438_v63  ;;  %v18441_v50 = vld [vmem:[#allocation57_spill] sm:$0xff]  ;;  %v18444_v63 = vld [vmem:[#allocation196_spill] sm:$0xff] }
 0x54a   : > { %8568 = vpow2.f32 %v1929_v6  ;;  %v1815_v27 = vsub.f32 %v18441_v50, %v18440_v17  ;;  %v18445_v6 = vld [vmem:[#allocation116_spill] sm:$0xff]  ;;  %v10924_v17 = vpop.permute.xlu2 %2377 }
 0x54b   : > { %8570 = vpow2.f32 %v2041_v11  ;;  %v2055_v20 = vmul.f32 1.442695, %v1819_v24  ;;  %v1826_v16 = vsub.f32 %v18445_v6, %v18444_v63  ;;  %v18448_v24 = vld [vmem:[#allocation87_spill] sm:$0xff] }
 0x54c   : > { %v10886_v32 = vpop.eup %8560  ;;  %v2047_v33 = vmul.f32 1.442695, %v1815_v27  ;;  %8572 = vpow2.f32 %v2063_v51  ;;  %v1822_v27 = vsub.f32 %v18448_v24, %v18447_v49  ;;  %v1755_v51 = vsub.f32 %v10594_v61, %v1461_v60  ;;  %v18451_v49 = vld [vmem:[#allocation138_spill] sm:$0xff]  ;;  %v18453_v60 = vld [vmem:[#allocation103_spill] sm:$0xff] }
 0x54d   : > { %18433 = vst [vmem:[#allocation145_spill] sm:$0xff] %v10886_v32  ;;  %2315 = vrot.lane.b32.xlu0 %v10886_v32, %s9228_s14  ;;  %v10892_v2 = vpop.eup %8562  ;;  %8574 = vpow2.f32 %v2055_v20  ;;  %v2069_v6 = vmul.f32 1.442695, %v1826_v16  ;;  %v1829_v24 = vsub.f32 %v18451_v49, %v10422_v14 }
 0x54e   : > { %18434 = vst [vmem:[#allocation273_spill] sm:$0xff] %v10892_v2  ;;  %v10898_v56 = vpop.eup %8564  ;;  %v10916_v62 = vpop.permute.xlu0 %2387  ;;  %8576 = vpow2.f32 %v2047_v33  ;;  %v1927_v32 = vmul.f32 1.442695, %v1755_v51  ;;  %v1825_v33 = vsub.f32 %v18453_v60, %v10395_v12  ;;  %v18455_v51 = vld [vmem:[#allocation69_spill] sm:$0xff] }
 0x54f   : > { %18437 = vst [vmem:[#allocation180_spill] sm:$0xff] %v10898_v56  ;;  %2433 = vrot.lane.b32.xlu1 %v10892_v2, %s9228_s14  ;;  %v10908_v44 = vpop.eup %8566  ;;  %8578 = vpow2.f32 %v2069_v6  ;;  %v2075_v14 = vmul.f32 1.442695, %v1829_v24  ;;  %v18458_v60 = vld [vmem:[#allocation153_spill] sm:$0xff] }
 0x550   : > { %2305 = vrot.lane.b32.xlu2 %v10898_v56, %s9228_s14  ;;  %18442 = vst [vmem:[#allocation166_spill] sm:$0xff] %v10908_v44  ;;  %v10912_v2 = vpop.eup %8568  ;;  %v2623_v56 = vsel %vm2607_vm3, %v10414_v37, 0.0 }
 0x551   : > { %18443 = vst [vmem:[#allocation158_spill] sm:$0xff] %v10912_v2  ;;  %v10918_v11 = vpop.eup %8570 }
 0x552   : > { %18446 = vst [vmem:[#allocation196_spill] sm:$0xff] %v10918_v11  ;;  %v10931_v50 = vpop.eup %8572  ;;  %v10953_v49 = vpop.permute.xlu2 %2383 }
 0x553   : > { %18449 = vst [vmem:[#allocation186_spill] sm:$0xff] %v10931_v50  ;;  %v10935_v20 = vpop.eup %8574 }
 0x554   : > { %18450 = vst [vmem:[#allocation274_spill] sm:$0xff] %v10935_v20 }
 0x555   : > { %2441 = vrot.lane.b32.xlu0 %v10908_v44, %s9228_s14  ;;  %v2061_v44 = vmul.f32 1.442695, %v1822_v27  ;;  %v18454_v27 = vld [vmem:[#allocation174_spill] sm:$0xff] }
 0x556   : > { %v10945_v16 = vpop.permute.xlu0 %2291  ;;  %v1818_v6 = vsub.f32 %v18455_v51, %v18454_v27 }
 0x557   : > { %2313 = vrot.lane.b32.xlu1 %v10912_v2, %s9228_s14  ;;  %8580 = vpow2.f32 %v2061_v44  ;;  %v2067_v44 = vmul.f32 1.442695, %v1825_v33  ;;  %v18461_v33 = vld [vmem:[#allocation194_spill] sm:$0xff] }
 0x558   : > { %2425 = vrot.lane.b32.xlu2 %v10918_v11, %s9228_s14  ;;  %v10939_v11 = vpop.eup %8576  ;;  %8582 = vpow2.f32 %v1927_v32  ;;  %v18460_v32 = vld [vmem:[#allocation120_spill] sm:$0xff] }
 0x559   : > { %v10929_v63 = vpop.permute.xlu1 %2379  ;;  %18452 = vst [vmem:[#allocation275_spill] sm:$0xff] %v10939_v11  ;;  %8584 = vpow2.f32 %v2075_v14  ;;  %v1828_v24 = vsub.f32 %v18460_v32, %v10464_v54 }
 0x55a   : > { %8586 = vpow2.f32 %v2067_v44 }
 0x55d   : > { %2447 = vrot.lane.b32.xlu0 %v10931_v50, %s9228_s14  ;;  %v10955_v50 = vpop.eup %8578 }
 0x55e   : > { %18456 = vst [vmem:[#allocation174_spill] sm:$0xff] %v10955_v50  ;;  %v10959_v12 = vpop.eup %8580 }
 0x55f   : > { %2439 = vrot.lane.b32.xlu1 %v10935_v20, %s9228_s14  ;;  %v2053_v20 = vmul.f32 1.442695, %v1818_v6  ;;  %18457 = vst [vmem:[#allocation276_spill] sm:$0xff] %v10959_v12  ;;  %v10963_v27 = vpop.eup %8582  ;;  %v18462_v6 = vld [vmem:[#allocation93_spill] sm:$0xff] }
 0x560   : > { %2431 = vrot.lane.b32.xlu2 %v10939_v11, %s9228_s14  ;;  %v1832_v11 = vsub.f32 %v18458_v60, %v10479_v23  ;;  %18459 = vst [vmem:[#allocation277_spill] sm:$0xff] %v10963_v27  ;;  %v1821_v51 = vsub.f32 %v18462_v6, %v18461_v33  ;;  %v10975_v23 = vpop.permute.xlu0 %2393  ;;  %v10977_v2 = vpop.eup %8584 }
 0x561   : > { %v10951_v61 = vpop.permute.xlu1 %2385  ;;  %8588 = vpow2.f32 %v2053_v20  ;;  %18463 = vst [vmem:[#allocation194_spill] sm:$0xff] %v10977_v2  ;;  %v10981_v54 = vpop.eup %8586  ;;  %v18465_v20 = vld [vmem:[#allocation171_spill] sm:$0xff] }
 0x562   : > { %v2059_v44 = vmul.f32 1.442695, %v1821_v51  ;;  %18464 = vst [vmem:[#allocation278_spill] sm:$0xff] %v10981_v54  ;;  %v1835_v32 = vsub.f32 %v18465_v20, %v10516_v55 }
 0x563   : > { %v1470_v60 = vpop.xlane.xlu2 %1469 }
 0x564   : > { %v1758_v51 = vsub.f32 %v10708_v58, %v1470_v60 }
 0x565   : > { %2453 = vrot.lane.b32.xlu0 %v10955_v50, %s9228_s14  ;;  %v2081_v50 = vmul.f32 1.442695, %v1832_v11  ;;  %v18467_v11 = vld [vmem:[#allocation137_spill] sm:$0xff] }
 0x566   : > { %v1831_v6 = vsub.f32 %v18467_v11, %v10548_v0 }
 0x567   : > { %2445 = vrot.lane.b32.xlu1 %v10959_v12, %s9228_s14  ;;  %v2073_v12 = vmul.f32 1.442695, %v1828_v24  ;;  %8590 = vpow2.f32 %v2081_v50  ;;  %v10985_v33 = vpop.eup %8588  ;;  %v2087_v50 = vmul.f32 1.442695, %v1835_v32  ;;  %v18472_v32 = vld [vmem:[#allocation151_spill] sm:$0xff] }
 0x568   : > { %2311 = vrot.lane.b32.xlu2 %v10963_v27, %s9228_s14  ;;  %18466 = vst [vmem:[#allocation279_spill] sm:$0xff] %v10985_v33  ;;  %v2079_v55 = vmul.f32 1.442695, %v1831_v6  ;;  %v10998_v20 = vpop.permute.xlu0 %2399  ;;  %v1834_v6 = vsub.f32 %v18472_v32, %v10629_v13 }
 0x569   : > { %v10973_v14 = vpop.permute.xlu1 %2289  ;;  %8592 = vpow2.f32 %v2073_v12  ;;  %v1933_v12 = vmul.f32 1.442695, %v1758_v51  ;;  %v18473_v51 = vld [vmem:[#allocation121_spill] sm:$0xff] }
 0x56a   : > { %8594 = vpow2.f32 %v2059_v44  ;;  %v18470_v44 = vld [vmem:[#allocation191_spill] sm:$0xff]  ;;  %v1824_v58 = vsub.f32 %v18473_v51, %v10431_v1 }
 0x56b   : > { %v11000_v27 = vpop.permute.xlu2 %2287  ;;  %8596 = vpow2.f32 %v2087_v50  ;;  %v1838_v60 = vsub.f32 %v18470_v44, %v10562_v8  ;;  %v2085_v44 = vmul.f32 1.442695, %v1834_v6  ;;  %v18478_v1 = vld [vmem:[#allocation167_spill] sm:$0xff] }
 0x56c   : > { %8598 = vpow2.f32 %v2079_v55 }
 0x56d   : > { %2459 = vrot.lane.b32.xlu0 %v10977_v2, %s9228_s14  ;;  %v10996_v2 = vpop.eup %8590  ;;  %8600 = vpow2.f32 %v1933_v12  ;;  %v2093_v50 = vmul.f32 1.442695, %v1838_v60  ;;  %v1837_v12 = vsub.f32 %v18478_v1, %v10685_v45 }
 0x56e   : > { %18468 = vst [vmem:[#allocation280_spill] sm:$0xff] %v10996_v2 }
 0x56f   : > { %2451 = vrot.lane.b32.xlu1 %v10981_v54, %s9228_s14  ;;  %v11004_v0 = vpop.eup %8592  ;;  %v2065_v54 = vmul.f32 1.442695, %v1824_v58  ;;  %8602 = vpow2.f32 %v2093_v50  ;;  %v18479_v58 = vld [vmem:[#allocation141_spill] sm:$0xff]  ;;  %v2091_v50 = vmul.f32 1.442695, %v1837_v12 }
 0x570   : > { %2437 = vrot.lane.b32.xlu2 %v10985_v33, %s9228_s14  ;;  %18469 = vst [vmem:[#allocation281_spill] sm:$0xff] %v11004_v0  ;;  %v11008_v11 = vpop.eup %8594  ;;  %v11026_v13 = vpop.permute.xlu0 %2297  ;;  %8604 = vpow2.f32 %v2085_v44  ;;  %v1827_v60 = vsub.f32 %v18479_v58, %v10503_v18 }
 0x571   : > { %v10994_v24 = vpop.permute.xlu1 %2391  ;;  %18471 = vst [vmem:[#allocation282_spill] sm:$0xff] %v11008_v11  ;;  %v11020_v8 = vpop.eup %8596  ;;  %8606 = vpow2.f32 %v2065_v54  ;;  %v18483_v54 = vld [vmem:[#allocation155_spill] sm:$0xff] }
 0x572   : > { %18475 = vst [vmem:[#allocation284_spill] sm:$0xff] %v11020_v8  ;;  %v11024_v55 = vpop.eup %8598  ;;  %8608 = vpow2.f32 %v2091_v50  ;;  %v1830_v12 = vsub.f32 %v18483_v54, %v10598_v15  ;;  %v18487_v50 = vld [vmem:[#allocation175_spill] sm:$0xff] }
 0x573   : > { %18476 = vst [vmem:[#allocation285_spill] sm:$0xff] %v11024_v55  ;;  %v11028_v32 = vpop.permute.xlu2 %2389 }
 0x575   : > { %2465 = vrot.lane.b32.xlu0 %v10996_v2, %s9228_s14 }
 0x577   : > { %2457 = vrot.lane.b32.xlu1 %v11004_v0, %s9228_s14  ;;  %v11030_v0 = vpop.eup %8600 }
 0x578   : > { %2443 = vrot.lane.b32.xlu2 %v11008_v11, %s9228_s14  ;;  %18477 = vst [vmem:[#allocation286_spill] sm:$0xff] %v11030_v0  ;;  %v11040_v6 = vpop.eup %8602  ;;  %v11052_v45 = vpop.permute.xlu0 %2405 }
 0x579   : > { %v11018_v2 = vpop.permute.xlu1 %2397  ;;  %18480 = vst [vmem:[#allocation287_spill] sm:$0xff] %v11040_v6  ;;  %v11046_v44 = vpop.eup %8604 }
 0x57a   : > { %18474 = vst [vmem:[#allocation283_spill] sm:$0xff] %v11018_v2 }
 0x57b   : > { %18481 = vst [vmem:[#allocation288_spill] sm:$0xff] %v11046_v44  ;;  %v11054_v18 = vpop.permute.xlu2 %2395 }
 0x57d   : > { %2471 = vrot.lane.b32.xlu0 %v11020_v8, %s9228_s14  ;;  %v2071_v8 = vmul.f32 1.442695, %v1827_v60  ;;  %v2077_v60 = vmul.f32 1.442695, %v1830_v12 }
 0x57f   : > { %2463 = vrot.lane.b32.xlu1 %v11024_v55, %s9228_s14  ;;  %v11048_v55 = vpop.eup %8606  ;;  %8610 = vpow2.f32 %v2071_v8  ;;  %v1833_v8 = vsub.f32 %v18487_v50, %v10664_v41 }
 0x580   : > { %2317 = vrot.lane.b32.xlu2 %v11030_v0, %s9228_s14  ;;  %18482 = vst [vmem:[#allocation289_spill] sm:$0xff] %v11048_v55  ;;  %v11060_v58 = vpop.eup %8608  ;;  %8612 = vpow2.f32 %v2077_v60 }
 0x581   : > { %v11042_v51 = vpop.permute.xlu1 %2295  ;;  %18484 = vst [vmem:[#allocation290_spill] sm:$0xff] %v11060_v58  ;;  %v2083_v12 = vmul.f32 1.442695, %v1833_v8 }
 0x583   : > { %v11074_v15 = vpop.permute.xlu2 %2293  ;;  %8614 = vpow2.f32 %v2083_v12 }
 0x585   : > { %2477 = vrot.lane.b32.xlu0 %v11040_v6, %s9228_s14  ;;  %v11064_v6 = vpop.eup %8610 }
 0x586   : > { %18486 = vst [vmem:[#allocation292_spill] sm:$0xff] %v11064_v6  ;;  %v11076_v54 = vpop.eup %8612 }
 0x587   : > { %2469 = vrot.lane.b32.xlu1 %v11046_v44, %s9228_s14  ;;  %v11072_v44 = vpop.permute.xlu0 %2411  ;;  %18489 = vst [vmem:[#allocation294_spill] sm:$0xff] %v11076_v54 }
 0x588   : > { %2449 = vrot.lane.b32.xlu2 %v11048_v55, %s9228_s14  ;;  %18488 = vst [vmem:[#allocation293_spill] sm:$0xff] %v11072_v44  ;;  %v18506_v44 = vld [vmem:[#allocation222_spill] sm:$0xff] }
 0x589   : > { %v11062_v1 = vpop.permute.xlu1 %2403  ;;  %v11088_v50 = vpop.eup %8614 }
 0x58a   : > { %18485 = vst [vmem:[#allocation291_spill] sm:$0xff] %v11062_v1  ;;  %v18501_v1 = vld [vmem:[#allocation189_spill] sm:$0xff] }
 0x58b   : > { %v11086_v11 = vpop.permute.xlu2 %2401  ;;  %18492 = vst [vmem:[#allocation296_spill] sm:$0xff] %v11088_v50 }
 0x58f   : > { %2475 = vrot.lane.b32.xlu1 %v11060_v58, %s9228_s14  ;;  %v18491_v58 = vld [vmem:[#allocation195_spill] sm:$0xff]  ;;  %v11084_v60 = vpop.permute.xlu0 %2303 }
 0x590   : > { %2455 = vrot.lane.b32.xlu2 %v11064_v6, %s9228_s14  ;;  %v1836_v6 = vsub.f32 %v18491_v58, %v10701_v35 }
 0x591   : > { %v11078_v55 = vpop.permute.xlu1 %2409 }
 0x592   : > { %18490 = vst [vmem:[#allocation295_spill] sm:$0xff] %v11078_v55  ;;  %v2089_v41 = vmul.f32 1.442695, %v1836_v6  ;;  %v18496_v6 = vld [vmem:[#allocation163_spill] sm:$0xff] }
 0x593   : > { %v2614_v58 = vsel %vm2607_vm3, %v18496_v6, 0.0  ;;  %v18500_v6 = vld [vmem:[#allocation224_spill] sm:$0xff] }
 0x594   : > { %8616 = vpow2.f32 %v2089_v41 }
 0x597   : > { %v11094_v33 = vpop.permute.xlu0 %2417 }
 0x598   : > { %2461 = vrot.lane.b32.xlu2 %v11076_v54, %s9228_s14  ;;  %18493 = vst [vmem:[#allocation297_spill] sm:$0xff] %v11094_v33  ;;  %v11096_v54 = vpop.permute.xlu2 %2407 }
 0x599   : > { %v11092_v8 = vpop.permute.xlu1 %2301 }
 0x59a   : > { %v11098_v12 = vpop.eup %8616 }
 0x59b   : > { %18494 = vst [vmem:[#allocation298_spill] sm:$0xff] %v11098_v12 }
 0x5a0   : > { %2467 = vrot.lane.b32.xlu2 %v11088_v50, %s9228_s14  ;;  %v11106_v50 = vpop.permute.xlu0 %2423  ;;  %v11108_v41 = vpop.permute.xlu2 %2299 }
 0x5a1   : > { %v11102_v35 = vpop.permute.xlu1 %2415  ;;  %18497 = vst [vmem:[#allocation163_spill] sm:$0xff] %v11106_v50 }
 0x5a2   : > { %18495 = vst [vmem:[#allocation299_spill] sm:$0xff] %v11102_v35 }
 0x5a8   : > { %2473 = vrot.lane.b32.xlu2 %v11098_v12, %s9228_s14  ;;  %v11114_v46 = vpop.permute.xlu0 %2309  ;;  %v18499_v12 = vld [vmem:[#allocation170_spill] sm:$0xff]  ;;  %v11118_v55 = vpop.permute.xlu2 %2413 }
 0x5a9   : > { %v11110_v0 = vpop.permute.xlu1 %2421  ;;  %v2611_v35 = vsel %vm2607_vm3, %v18499_v12, 0.0  ;;  %v2641_v12 = vsel %vm2607_vm3, %v10570_v19, 0.0  ;;  %v2638_v19 = vsel %vm2607_vm3, %v18506_v44, 0.0 }
 0x5aa   : > { %18498 = vst [vmem:[#allocation300_spill] sm:$0xff] %v11110_v0  ;;  %v2620_v0 = vsel %vm2607_vm3, %v18501_v1, 0.0  ;;  %v18505_v1 = vld [vmem:[#allocation178_spill] sm:$0xff] }
 0x5af   : > { %2615 = vadd.xlane.f32.xlu0 %v2614_v58  ;;  %v2632_v58 = vsel %vm2607_vm3, %v18500_v6, 0.0 }
 0x5b0   : > { %v11126_v37 = vpop.permute.xlu0 %2429 }
 0x5b1   : > { %v11122_v50 = vpop.permute.xlu1 %2307  ;;  %18502 = vst [vmem:[#allocation170_spill] sm:$0xff] %v11126_v37  ;;  %v2608_v37 = vsel %vm2607_vm3, %v18505_v1, 0.0  ;;  %v2647_v1 = vsel %vm2607_vm3, %v10558_v5, 0.0  ;;  %v2677_v5 = vsel %vm2607_vm3, %v10786_v3, 0.0 }
 0x5b7   : > { %2624 = vadd.xlane.f32.xlu0 %v2623_v56  ;;  %v11128_v56 = vpop.permute.xlu2 %2419 }
 0x5b9   : > { %2612 = vadd.xlane.f32.xlu1 %v2611_v35  ;;  %v18503_v35 = vld [vmem:[#allocation208_spill] sm:$0xff]  ;;  %v11134_v6 = vpop.permute.xlu1 %2427 }
 0x5ba   : > { %v2629_v33 = vsel %vm2607_vm3, %v18503_v35, 0.0  ;;  %18504 = vst [vmem:[#allocation224_spill] sm:$0xff] %v11134_v6  ;;  %v2659_v35 = vsel %vm2607_vm3, %v10687_v40, 0.0  ;;  %v18509_v40 = vld [vmem:[#allocation181_spill] sm:$0xff] }
 0x5bf   : > { %2633 = vadd.xlane.f32.xlu0 %v2632_v58  ;;  %v11136_v58 = vpop.permute.xlu0 %2435  ;;  %v11138_v2 = vpop.permute.xlu2 %2305 }
 0x5c1   : > { %2621 = vadd.xlane.f32.xlu1 %v2620_v0  ;;  %v2650_v0 = vsel %vm2607_vm3, %v10631_v31, 0.0  ;;  %v18508_v31 = vld [vmem:[#allocation198_spill] sm:$0xff] }
 0x5c7   : > { %2642 = vadd.xlane.f32.xlu0 %v2641_v12  ;;  %v11146_v12 = vpop.permute.xlu0 %2315  ;;  %v11152_v6 = vpop.permute.xlu2 %2425 }
 0x5c9   : > { %2630 = vadd.xlane.f32.xlu1 %v2629_v33  ;;  %v11148_v33 = vpop.permute.xlu1 %2433 }
 0x5ca   : > { %18507 = vst [vmem:[#allocation189_spill] sm:$0xff] %v11148_v33  ;;  %v2656_v33 = vsel %vm2607_vm3, %v10644_v52, 0.0 }
 0x5cf   : > { %2651 = vadd.xlane.f32.xlu0 %v2650_v0  ;;  %v2617_v0 = vsel %vm2607_vm3, %v18508_v31, 0.0  ;;  %v11158_v44 = vpop.permute.xlu0 %2441  ;;  %v11168_v31 = vpop.permute.xlu2 %2431 }
 0x5d1   : > { %2609 = vadd.xlane.f32.xlu2 %v2608_v37  ;;  %2639 = vadd.xlane.f32.xlu1 %v2638_v19  ;;  %v11160_v37 = vpop.permute.xlu1 %2313  ;;  %v2668_v19 = vsel %vm2607_vm3, %v10730_v25, 0.0  ;;  %v18511_v25 = vld [vmem:[#allocation200_spill] sm:$0xff] }
 0x5d7   : > { %2660 = vadd.xlane.f32.xlu0 %v2659_v35  ;;  %v2626_v35 = vsel %vm2607_vm3, %v18509_v40, 0.0  ;;  %v2665_v40 = vsel %vm2607_vm3, %v10691_v39, 0.0  ;;  %v2312_v52 = vpop.permute.xlu2 %2311 }
 0x5d9   : > { %2618 = vadd.xlane.f32.xlu2 %v2617_v0  ;;  %2648 = vadd.xlane.f32.xlu1 %v2647_v1  ;;  %v11172_v0 = vpop.permute.xlu0 %2447  ;;  %v11174_v1 = vpop.permute.xlu1 %2439 }
 0x5da   : > { %18510 = vst [vmem:[#allocation208_spill] sm:$0xff] %v11174_v1 }
 0x5df   : > { %2669 = vadd.xlane.f32.xlu0 %v2668_v19  ;;  %v2635_v19 = vsel %vm2607_vm3, %v18511_v25, 0.0  ;;  %v11190_v39 = vpop.permute.xlu2 %2437 }
 0x5e1   : > { %2627 = vadd.xlane.f32.xlu2 %v2626_v35  ;;  %2657 = vadd.xlane.f32.xlu1 %v2656_v33  ;;  %v2686_v33 = vsel %vm2607_vm3, %v10839_v48, 0.0  ;;  %v18512_v35 = vld [vmem:[#allocation213_spill] sm:$0xff]  ;;  %v11186_v1 = vpop.permute.xlu0 %2453  ;;  %v11188_v25 = vpop.permute.xlu1 %2445 }
 0x5e2   : > { %v2644_v3 = vsel %vm2607_vm3, %v18512_v35, 0.0  ;;  %v18513_v48 = vld [vmem:[#allocation225_spill] sm:$0xff] }
 0x5e7   : > { %2678 = vadd.xlane.f32.xlu0 %v2677_v5  ;;  %v2674_v5 = vsel %vm2607_vm3, %v10720_v34, 0.0 }
 0x5e9   : > { %2636 = vadd.xlane.f32.xlu2 %v2635_v19  ;;  %2666 = vadd.xlane.f32.xlu1 %v2665_v40  ;;  %v2695_v19 = vsel %vm2607_vm3, %v10896_v38, 0.0  ;;  %v2653_v40 = vsel %vm2607_vm3, %v18513_v48, 0.0  ;;  %v11198_v34 = vpop.permute.xlu0 %2459  ;;  %v11200_v35 = vpop.permute.xlu1 %2451  ;;  %v2662_v38 = vsel %vm2607_vm3, %v10521_v57, 0.0 }
 0x5ef   : > { %2687 = vadd.xlane.f32.xlu0 %v2686_v33  ;;  %v2683_v33 = vsel %vm2607_vm3, %v10769_v36, 0.0 }
 0x5f1   : > { %2645 = vadd.xlane.f32.xlu2 %v2644_v3  ;;  %2675 = vadd.xlane.f32.xlu1 %v2674_v5  ;;  %v2704_v3 = vsel %vm2607_vm3, %v11000_v27, 0.0  ;;  %v11204_v5 = vpop.permute.xlu2 %2443  ;;  %v11210_v36 = vpop.permute.xlu0 %2465  ;;  %v2671_v27 = vsel %vm2607_vm3, %v10572_v21, 0.0  ;;  %v2710_v21 = vsel %vm2607_vm3, %v10945_v16, 0.0 }
 0x5f2   : > { %v11212_v48 = vpop.permute.xlu1 %2457 }
 0x5f7   : > { %2696 = vadd.xlane.f32.xlu0 %v2695_v19  ;;  %v2692_v19 = vsel %vm2607_vm3, %v10821_v47, 0.0  ;;  %v2722_v47 = vsel %vm2607_vm3, %v11108_v41, 0.0  ;;  %v2689_v41 = vsel %vm2607_vm3, %v10712_v9, 0.0  ;;  %v2728_v9 = vsel %vm2607_vm3, %v11084_v60, 0.0 }
 0x5f9   : > { %2654 = vadd.xlane.f32.xlu2 %v2653_v40  ;;  %2684 = vadd.xlane.f32.xlu1 %v2683_v33  ;;  %v2713_v40 = vsel %vm2607_vm3, %v11074_v15, 0.0  ;;  %v2701_v33 = vsel %vm2607_vm3, %v10870_v26, 0.0  ;;  %v2318_v57 = vpop.permute.xlu2 %2317  ;;  %v2680_v15 = vsel %vm2607_vm3, %v10614_v53, 0.0 }
 0x5ff   : > { %2705 = vadd.xlane.f32.xlu0 %v2704_v3  ;;  %v11222_v3 = vpop.permute.xlu0 %2471 }
 0x601   : > { %2663 = vadd.xlane.f32.xlu2 %v2662_v38  ;;  %2693 = vadd.xlane.f32.xlu1 %v2692_v19  ;;  %v11224_v38 = vpop.permute.xlu1 %2463  ;;  %v11230_v26 = vpop.permute.xlu2 %2449  ;;  %v2731_v19 = vsel %vm2607_vm3, %v11138_v2, 0.0  ;;  %v2698_v2 = vsel %vm2607_vm3, %v10855_v7, 0.0  ;;  %v2737_v7 = vsel %vm2607_vm3, %v11114_v46, 0.0 }
 0x607   : > { %2714 = vadd.xlane.f32.xlu0 %v2713_v40  ;;  %v2719_v40 = vsel %vm2607_vm3, %v11026_v13, 0.0  ;;  %v11238_v53 = vpop.permute.xlu0 %2477 }
 0x609   : > { %2672 = vadd.xlane.f32.xlu2 %v2671_v27  ;;  %2702 = vadd.xlane.f32.xlu1 %v2701_v33  ;;  %v11240_v27 = vpop.permute.xlu1 %2469  ;;  %v11242_v16 = vpop.permute.xlu2 %2455  ;;  %v2740_v33 = vsel %vm2607_vm3, %v2312_v52, 0.0  ;;  %v2707_v52 = vsel %vm2607_vm3, %v10973_v14, 0.0 }
 0x60f   : > { %2723 = vadd.xlane.f32.xlu0 %v2722_v47 }
 0x611   : > { %2681 = vadd.xlane.f32.xlu2 %v2680_v15  ;;  %2711 = vadd.xlane.f32.xlu1 %v2710_v21  ;;  %v11251_v47 = vpop.permute.xlu1 %2475  ;;  %v2749_v15 = vsel %vm2607_vm3, %v2318_v57, 0.0  ;;  %v11254_v21 = vpop.permute.xlu2 %2461  ;;  %v2716_v57 = vsel %vm2607_vm3, %v11042_v51, 0.0 }
 0x617   : > { %2732 = vadd.xlane.f32.xlu0 %v2731_v19 }
 0x619   : > { %2690 = vadd.xlane.f32.xlu2 %v2689_v41  ;;  %2720 = vadd.xlane.f32.xlu1 %v2719_v40  ;;  %v18514_v41 = vld [vmem:[#allocation193_spill] sm:$0xff]  ;;  %v11270_v14 = vpop.permute.xlu2 %2467 }
 0x61a   : > { %v2758_v40 = vsel %vm2607_vm3, %v18514_v41, 0.0 }
 0x61f   : > { %2741 = vadd.xlane.f32.xlu0 %v2740_v33  ;;  %v2746_v33 = vsel %vm2607_vm3, %v11146_v12, 0.0 }
 0x621   : > { %2699 = vadd.xlane.f32.xlu2 %v2698_v2  ;;  %2729 = vadd.xlane.f32.xlu1 %v2728_v9  ;;  %v18515_v9 = vld [vmem:[#allocation210_spill] sm:$0xff]  ;;  %v11284_v41 = vpop.permute.xlu2 %2473 }
 0x622   : > { %v11249_v13 = vpop.xlane.xlu0 %2615 }
 0x623   : > { %8618 = vrcp.f32 %v11249_v13  ;;  %vm3027_vm5 = vweird.f32 %v11249_v13 }
 0x627   : > { %2750 = vadd.xlane.f32.xlu0 %v2749_v15  ;;  %v2767_v15 = vsel %vm2607_vm3, %v18515_v9, 0.0  ;;  %v2734_v9 = vsel %vm2607_vm3, %v11122_v50, 0.0 }
 0x629   : > { %2708 = vadd.xlane.f32.xlu2 %v2707_v52  ;;  %2738 = vadd.xlane.f32.xlu1 %v2737_v7  ;;  %v2725_v52 = vsel %vm2607_vm3, %v11092_v8, 0.0  ;;  %v18516_v7 = vld [vmem:[#allocation172_spill] sm:$0xff] }
 0x62a   : > { %v11260_v60 = vpop.xlane.xlu0 %2624  ;;  %v2755_v51 = vsel %vm2607_vm3, %v18516_v7, 0.0 }
 0x62b   : > { %8620 = vrcp.f32 %v11260_v60  ;;  %vm3072_vm7 = vweird.f32 %v11260_v60 }
 0x62c   : > { %v11262_v19 = vpop.xlane.xlu1 %2612 }
 0x62d   : > { %8622 = vrcp.f32 %v11262_v19  ;;  %vm3012_vm9 = vweird.f32 %v11262_v19 }
 0x62f   : > { %2759 = vadd.xlane.f32.xlu0 %v2758_v40 }
 0x631   : > { %2717 = vadd.xlane.f32.xlu2 %v2716_v57  ;;  %2747 = vadd.xlane.f32.xlu1 %v2746_v33  ;;  %v18518_v57 = vld [vmem:[#allocation226_spill] sm:$0xff] }
 0x632   : > { %v11272_v46 = vpop.xlane.xlu0 %2633  ;;  %v2776_v33 = vsel %vm2607_vm3, %v18518_v57, 0.0  ;;  %v2743_v57 = vsel %vm2607_vm3, %v11160_v37, 0.0 }
 0x633   : > { %8624 = vrcp.f32 %v11272_v46  ;;  %vm3117_vm0 = vweird.f32 %v11272_v46 }
 0x634   : > { %v11274_v2 = vpop.xlane.xlu1 %2621 }
 0x635   : > { %8626 = vrcp.f32 %v11274_v2  ;;  %vm3057_vm1 = vweird.f32 %v11274_v2 }
 0x637   : > { %2768 = vadd.xlane.f32.xlu0 %v2767_v15  ;;  %v18519_v15 = vld [vmem:[#allocation192_spill] sm:$0xff] }
 0x638   : > { %v2764_v8 = vsel %vm2607_vm3, %v18519_v15, 0.0 }
 0x639   : > { %2726 = vadd.xlane.f32.xlu2 %v2725_v52  ;;  %2756 = vadd.xlane.f32.xlu1 %v2755_v51 }
 0x63a   : > { %v11282_v12 = vpop.xlane.xlu0 %2642 }
 0x63b   : > { %8628 = vrcp.f32 %v11282_v12 }
 0x63c   : > { %v11286_v40 = vpop.xlane.xlu1 %2630 }
 0x63d   : > { %18517 = vst [vmem:[#allocation178_spill] sm:$0xff] %v11286_v40  ;;  %v2785_v40 = vsel %vm2607_vm3, %v10584_v4, 0.0  ;;  %v18528_v4 = vld [vmem:[#allocation150_spill] sm:$0xff] }
 0x63f   : > { %2777 = vadd.xlane.f32.xlu0 %v2776_v33  ;;  %v18523_v33 = vld [vmem:[#allocation209_spill] sm:$0xff] }
 0x640   : > { %v2773_v50 = vsel %vm2607_vm3, %v18523_v33, 0.0 }
 0x641   : > { %2735 = vadd.xlane.f32.xlu2 %v2734_v9  ;;  %2765 = vadd.xlane.f32.xlu1 %v2764_v8 }
 0x642   : > { %v11294_v52 = vpop.xlane.xlu0 %2651 }
 0x643   : > { %18520 = vst [vmem:[#allocation222_spill] sm:$0xff] %v11294_v52  ;;  %v18527_v52 = vld [vmem:[#allocation102_spill] sm:$0xff] }
 0x644   : > { %v11296_v7 = vpop.xlane.xlu2 %2609  ;;  %v11298_v51 = vpop.xlane.xlu1 %2639 }
 0x645   : > { %18521 = vst [vmem:[#allocation198_spill] sm:$0xff] %v11296_v7  ;;  %v18529_v7 = vld [vmem:[#allocation223_spill] sm:$0xff] }
 0x646   : > { %18522 = vst [vmem:[#allocation181_spill] sm:$0xff] %v11298_v51  ;;  %v2794_v51 = vsel %vm2607_vm3, %v18527_v52, 0.0  ;;  %v2782_v37 = vsel %vm2607_vm3, %v18529_v7, 0.0  ;;  %v18533_v52 = vld [vmem:[#allocation168_spill] sm:$0xff] }
 0x647   : > { %2786 = vadd.xlane.f32.xlu0 %v2785_v40  ;;  %v2752_v40 = vsel %vm2607_vm3, %v18528_v4, 0.0 }
 0x649   : > { %2744 = vadd.xlane.f32.xlu2 %v2743_v57  ;;  %2774 = vadd.xlane.f32.xlu1 %v2773_v50 }
 0x64a   : > { %v11306_v9 = vpop.xlane.xlu0 %2660 }
 0x64b   : > { %18524 = vst [vmem:[#allocation200_spill] sm:$0xff] %v11306_v9  ;;  %v18532_v9 = vld [vmem:[#allocation95_spill] sm:$0xff] }
 0x64c   : > { %v11308_v15 = vpop.xlane.xlu2 %2618  ;;  %v11310_v8 = vpop.xlane.xlu1 %2648 }
 0x64d   : > { %18525 = vst [vmem:[#allocation213_spill] sm:$0xff] %v11308_v15  ;;  %v18534_v15 = vld [vmem:[#allocation240_spill] sm:$0xff] }
 0x64e   : > { %18526 = vst [vmem:[#allocation225_spill] sm:$0xff] %v11310_v8  ;;  %v2803_v8 = vsel %vm2607_vm3, %v18532_v9, 0.0  ;;  %v2791_v4 = vsel %vm2607_vm3, %v18534_v15, 0.0  ;;  %v18537_v9 = vld [vmem:[#allocation183_spill] sm:$0xff] }
 0x64f   : > { %2795 = vadd.xlane.f32.xlu0 %v2794_v51  ;;  %v2761_v51 = vsel %vm2607_vm3, %v18533_v52, 0.0 }
 0x651   : > { %2753 = vadd.xlane.f32.xlu2 %v2752_v40  ;;  %2783 = vadd.xlane.f32.xlu1 %v2782_v37 }
 0x652   : > { %v11318_v57 = vpop.xlane.xlu0 %2669 }
 0x653   : > { %18530 = vst [vmem:[#allocation193_spill] sm:$0xff] %v11318_v57  ;;  %v18538_v57 = vld [vmem:[#allocation119_spill] sm:$0xff] }
 0x654   : > { %v11320_v33 = vpop.xlane.xlu2 %2627  ;;  %v11322_v50 = vpop.xlane.xlu1 %2657  ;;  %v2800_v52 = vsel %vm2607_vm3, %v18538_v57, 0.0 }
 0x655   : > { %18531 = vst [vmem:[#allocation210_spill] sm:$0xff] %v11322_v50  ;;  %v2812_v50 = vsel %vm2607_vm3, %v10747_v43, 0.0  ;;  %v18540_v43 = vld [vmem:[#allocation202_spill] sm:$0xff] }
 0x657   : > { %2804 = vadd.xlane.f32.xlu0 %v2803_v8  ;;  %v2770_v8 = vsel %vm2607_vm3, %v18537_v9, 0.0 }
 0x659   : > { %2762 = vadd.xlane.f32.xlu2 %v2761_v51  ;;  %2792 = vadd.xlane.f32.xlu1 %v2791_v4 }
 0x65a   : > { %v11330_v7 = vpop.xlane.xlu0 %2678 }
 0x65b   : > { %18535 = vst [vmem:[#allocation172_spill] sm:$0xff] %v11330_v7  ;;  %v18541_v7 = vld [vmem:[#allocation257_spill] sm:$0xff] }
 0x65c   : > { %v11332_v40 = vpop.xlane.xlu2 %2636  ;;  %v11334_v37 = vpop.xlane.xlu1 %2666  ;;  %v2809_v9 = vsel %vm2607_vm3, %v18541_v7, 0.0 }
 0x65d   : > { %18536 = vst [vmem:[#allocation226_spill] sm:$0xff] %v11334_v37  ;;  %v2821_v37 = vsel %vm2607_vm3, %v10807_v59, 0.0  ;;  %v18543_v59 = vld [vmem:[#allocation216_spill] sm:$0xff] }
 0x65f   : > { %2813 = vadd.xlane.f32.xlu0 %v2812_v50  ;;  %v2779_v50 = vsel %vm2607_vm3, %v18540_v43, 0.0  ;;  %v2818_v43 = vsel %vm2607_vm3, %v10749_v22, 0.0 }
 0x661   : > { %2771 = vadd.xlane.f32.xlu2 %v2770_v8  ;;  %2801 = vadd.xlane.f32.xlu1 %v2800_v52 }
 0x662   : > { %v11342_v15 = vpop.xlane.xlu0 %2687 }
 0x664   : > { %v11344_v51 = vpop.xlane.xlu2 %2645  ;;  %v11346_v4 = vpop.xlane.xlu1 %2675 }
 0x665   : > { %18539 = vst [vmem:[#allocation192_spill] sm:$0xff] %v11346_v4  ;;  %v2830_v4 = vsel %vm2607_vm3, %v10857_v29, 0.0  ;;  %v18546_v29 = vld [vmem:[#allocation227_spill] sm:$0xff] }
 0x667   : > { %2822 = vadd.xlane.f32.xlu0 %v2821_v37  ;;  %v2788_v37 = vsel %vm2607_vm3, %v18543_v59, 0.0  ;;  %v2827_v59 = vsel %vm2607_vm3, %v10799_v28, 0.0 }
 0x669   : > { %2780 = vadd.xlane.f32.xlu2 %v2779_v50  ;;  %2810 = vadd.xlane.f32.xlu1 %v2809_v9 }
 0x66a   : > { %v11354_v57 = vpop.xlane.xlu0 %2696 }
 0x66c   : > { %v11356_v8 = vpop.xlane.xlu2 %2654  ;;  %v11358_v52 = vpop.xlane.xlu1 %2684 }
 0x66d   : > { %18542 = vst [vmem:[#allocation209_spill] sm:$0xff] %v11358_v52  ;;  %v2839_v52 = vsel %vm2607_vm3, %v10924_v17, 0.0  ;;  %v18549_v17 = vld [vmem:[#allocation234_spill] sm:$0xff] }
 0x66f   : > { %2831 = vadd.xlane.f32.xlu0 %v2830_v4  ;;  %v2797_v4 = vsel %vm2607_vm3, %v18546_v29, 0.0  ;;  %v2836_v29 = vsel %vm2607_vm3, %v10849_v30, 0.0 }
 0x671   : > { %2789 = vadd.xlane.f32.xlu2 %v2788_v37  ;;  %2819 = vadd.xlane.f32.xlu1 %v2818_v43 }
 0x672   : > { %v11366_v7 = vpop.xlane.xlu0 %2705 }
 0x673   : > { %18544 = vst [vmem:[#allocation102_spill] sm:$0xff] %v11366_v7 }
 0x674   : > { %v11368_v50 = vpop.xlane.xlu2 %2663  ;;  %v11370_v9 = vpop.xlane.xlu1 %2693 }
 0x675   : > { %18545 = vst [vmem:[#allocation150_spill] sm:$0xff] %v11370_v9  ;;  %v2848_v9 = vsel %vm2607_vm3, %v10953_v49, 0.0  ;;  %v18552_v49 = vld [vmem:[#allocation244_spill] sm:$0xff] }
 0x677   : > { %2840 = vadd.xlane.f32.xlu0 %v2839_v52  ;;  %v2806_v52 = vsel %vm2607_vm3, %v18549_v17, 0.0  ;;  %v2845_v17 = vsel %vm2607_vm3, %v10888_v10, 0.0 }
 0x679   : > { %2798 = vadd.xlane.f32.xlu2 %v2797_v4  ;;  %2828 = vadd.xlane.f32.xlu1 %v2827_v59 }
 0x67a   : > { %v11378_v22 = vpop.xlane.xlu0 %2714 }
 0x67b   : > { %18547 = vst [vmem:[#allocation223_spill] sm:$0xff] %v11378_v22 }
 0x67c   : > { %v11380_v37 = vpop.xlane.xlu2 %2672  ;;  %v11382_v43 = vpop.xlane.xlu1 %2702 }
 0x67d   : > { %18548 = vst [vmem:[#allocation95_spill] sm:$0xff] %v11382_v43  ;;  %v2857_v43 = vsel %vm2607_vm3, %v11028_v32, 0.0  ;;  %v18556_v32 = vld [vmem:[#allocation113_spill] sm:$0xff] }
 0x67f   : > { %2849 = vadd.xlane.f32.xlu0 %v2848_v9  ;;  %v2815_v9 = vsel %vm2607_vm3, %v18552_v49, 0.0  ;;  %v2854_v49 = vsel %vm2607_vm3, %v10916_v62, 0.0 }
 0x681   : > { %2807 = vadd.xlane.f32.xlu2 %v2806_v52  ;;  %2837 = vadd.xlane.f32.xlu1 %v2836_v29 }
 0x682   : > { %v11390_v28 = vpop.xlane.xlu0 %2723 }
 0x683   : > { %18550 = vst [vmem:[#allocation168_spill] sm:$0xff] %v11390_v28 }
 0x684   : > { %v11392_v4 = vpop.xlane.xlu2 %2681  ;;  %v11394_v59 = vpop.xlane.xlu1 %2711 }
 0x685   : > { %18551 = vst [vmem:[#allocation240_spill] sm:$0xff] %v11394_v59  ;;  %v2866_v59 = vsel %vm2607_vm3, %v11054_v18, 0.0  ;;  %v2833_v18 = vsel %vm2607_vm3, %v10830_v42, 0.0  ;;  %v2872_v42 = vsel %vm2607_vm3, %v10998_v20, 0.0 }
 0x687   : > { %2858 = vadd.xlane.f32.xlu0 %v2857_v43  ;;  %v2824_v43 = vsel %vm2607_vm3, %v18556_v32, 0.0 }
 0x689   : > { %2816 = vadd.xlane.f32.xlu2 %v2815_v9  ;;  %2846 = vadd.xlane.f32.xlu1 %v2845_v17 }
 0x68a   : > { %v11402_v30 = vpop.xlane.xlu0 %2732 }
 0x68b   : > { %18553 = vst [vmem:[#allocation183_spill] sm:$0xff] %v11402_v30 }
 0x68c   : > { %v11404_v52 = vpop.xlane.xlu2 %2690  ;;  %v11406_v29 = vpop.xlane.xlu1 %2720 }
 0x68d   : > { %18554 = vst [vmem:[#allocation119_spill] sm:$0xff] %v11404_v52 }
 0x68e   : > { %18555 = vst [vmem:[#allocation202_spill] sm:$0xff] %v11406_v29  ;;  %v2875_v29 = vsel %vm2607_vm3, %v11086_v11, 0.0  ;;  %v2842_v11 = vsel %vm2607_vm3, %v10929_v63, 0.0  ;;  %v2881_v63 = vsel %vm2607_vm3, %v11052_v45, 0.0 }
 0x68f   : > { %2867 = vadd.xlane.f32.xlu0 %v2866_v59  ;;  %v2863_v59 = vsel %vm2607_vm3, %v10975_v23, 0.0 }
 0x691   : > { %2825 = vadd.xlane.f32.xlu2 %v2824_v43  ;;  %2855 = vadd.xlane.f32.xlu1 %v2854_v49  ;;  %v2884_v49 = vsel %vm2607_vm3, %v11096_v54, 0.0  ;;  %v2851_v54 = vsel %vm2607_vm3, %v10951_v61, 0.0 }
 0x692   : > { %v11414_v10 = vpop.xlane.xlu0 %2741 }
 0x693   : > { %18557 = vst [vmem:[#allocation257_spill] sm:$0xff] %v11414_v10 }
 0x694   : > { %v11416_v9 = vpop.xlane.xlu2 %2699  ;;  %v11418_v17 = vpop.xlane.xlu1 %2729 }
 0x695   : > { %18558 = vst [vmem:[#allocation216_spill] sm:$0xff] %v11416_v9 }
 0x696   : > { %18559 = vst [vmem:[#allocation227_spill] sm:$0xff] %v11418_v17 }
 0x697   : > { %2876 = vadd.xlane.f32.xlu0 %v2875_v29 }
 0x699   : > { %2834 = vadd.xlane.f32.xlu2 %v2833_v18  ;;  %2864 = vadd.xlane.f32.xlu1 %v2863_v59  ;;  %v2893_v59 = vsel %vm2607_vm3, %v11118_v55, 0.0  ;;  %v2860_v55 = vsel %vm2607_vm3, %v10994_v24, 0.0 }
 0x69a   : > { %v11426_v62 = vpop.xlane.xlu0 %2750 }
 0x69b   : > { %18560 = vst [vmem:[#allocation234_spill] sm:$0xff] %v11426_v62  ;;  %v3061_v62 = vand.u32 2147483647, %v11274_v2 }
 0x69c   : > { %v11428_v32 = vpop.xlane.xlu2 %2708  ;;  %v11430_v43 = vpop.xlane.xlu1 %2738 }
 0x69d   : > { %18561 = vst [vmem:[#allocation244_spill] sm:$0xff] %v11428_v32 }
 0x69e   : > { %18562 = vst [vmem:[#allocation113_spill] sm:$0xff] %v11430_v43  ;;  %v18606_v43 = vld [vmem:[#allocation198_spill] sm:$0xff] }
 0x69f   : > { %2885 = vadd.xlane.f32.xlu0 %v2884_v49  ;;  %8630 = vrcp.f32 %v18606_v43 }
 0x6a1   : > { %2843 = vadd.xlane.f32.xlu2 %v2842_v11  ;;  %2873 = vadd.xlane.f32.xlu1 %v2872_v42  ;;  %v2902_v42 = vsel %vm2607_vm3, %v11128_v56, 0.0  ;;  %v18573_v56 = vld [vmem:[#allocation283_spill] sm:$0xff] }
 0x6a2   : > { %v11438_v23 = vpop.xlane.xlu0 %2759 }
 0x6a3   : > { %18563 = vst [vmem:[#allocation301_spill] sm:$0xff] %v11438_v23 }
 0x6a4   : > { %v11440_v29 = vpop.xlane.xlu2 %2717  ;;  %v11442_v18 = vpop.xlane.xlu1 %2747 }
 0x6a5   : > { %18564 = vst [vmem:[#allocation302_spill] sm:$0xff] %v11440_v29  ;;  %v3016_v29 = vand.u32 2147483647, %v11262_v19 }
 0x6a6   : > { %18565 = vst [vmem:[#allocation303_spill] sm:$0xff] %v11442_v18  ;;  %v11621_v18 = vsel %vm2607_vm3, %v11251_v47, 0.0 }
 0x6a7   : > { %2894 = vadd.xlane.f32.xlu0 %v2893_v59  ;;  %v18569_v59 = vld [vmem:[#allocation293_spill] sm:$0xff]  ;;  %vm11687_vm14 = vcmp.eq.f32.partialorder %v3016_v29, 8.507059e+37 }
 0x6a8   : > { %v2890_v61 = vsel %vm2607_vm3, %v18569_v59, 0.0 }
 0x6a9   : > { %2852 = vadd.xlane.f32.xlu2 %v2851_v54  ;;  %2882 = vadd.xlane.f32.xlu1 %v2881_v63 }
 0x6aa   : > { %v11450_v20 = vpop.xlane.xlu0 %2768 }
 0x6ab   : > { %18566 = vst [vmem:[#allocation304_spill] sm:$0xff] %v11450_v20  ;;  %v2974_v20 = vsel %vm2607_vm3, %v11270_v14, 0.0 }
 0x6ac   : > { %v11452_v49 = vpop.xlane.xlu2 %2726  ;;  %v11454_v11 = vpop.xlane.xlu1 %2756 }
 0x6ad   : > { %18567 = vst [vmem:[#allocation305_spill] sm:$0xff] %v11452_v49  ;;  %v18574_v49 = vld [vmem:[#allocation297_spill] sm:$0xff] }
 0x6ae   : > { %18568 = vst [vmem:[#allocation306_spill] sm:$0xff] %v11454_v11  ;;  %v2911_v11 = vsel %vm2607_vm3, %v11152_v6, 0.0  ;;  %v2899_v24 = vsel %vm2607_vm3, %v18574_v49, 0.0  ;;  %v18578_v6 = vld [vmem:[#allocation291_spill] sm:$0xff] }
 0x6af   : > { %2903 = vadd.xlane.f32.xlu0 %v2902_v42  ;;  %v2869_v42 = vsel %vm2607_vm3, %v18573_v56, 0.0 }
 0x6b1   : > { %2861 = vadd.xlane.f32.xlu2 %v2860_v55  ;;  %2891 = vadd.xlane.f32.xlu1 %v2890_v61 }
 0x6b2   : > { %v11462_v45 = vpop.xlane.xlu0 %2777 }
 0x6b3   : > { %18570 = vst [vmem:[#allocation293_spill] sm:$0xff] %v11462_v45 }
 0x6b4   : > { %v11464_v54 = vpop.xlane.xlu2 %2735  ;;  %v11466_v63 = vpop.xlane.xlu1 %2765 }
 0x6b5   : > { %18571 = vst [vmem:[#allocation307_spill] sm:$0xff] %v11464_v54  ;;  %v18579_v54 = vld [vmem:[#allocation163_spill] sm:$0xff] }
 0x6b6   : > { %18572 = vst [vmem:[#allocation308_spill] sm:$0xff] %v11466_v63  ;;  %v2920_v63 = vsel %vm2607_vm3, %v11168_v31, 0.0  ;;  %v2908_v56 = vsel %vm2607_vm3, %v18579_v54, 0.0  ;;  %v18583_v31 = vld [vmem:[#allocation295_spill] sm:$0xff] }
 0x6b7   : > { %2912 = vadd.xlane.f32.xlu0 %v2911_v11  ;;  %v2878_v11 = vsel %vm2607_vm3, %v18578_v6, 0.0 }
 0x6b9   : > { %2870 = vadd.xlane.f32.xlu2 %v2869_v42  ;;  %2900 = vadd.xlane.f32.xlu1 %v2899_v24 }
 0x6ba   : > { %v11474_v55 = vpop.xlane.xlu0 %2786 }
 0x6bb   : > { %18575 = vst [vmem:[#allocation283_spill] sm:$0xff] %v11474_v55 }
 0x6bc   : > { %v11476_v59 = vpop.xlane.xlu2 %2744  ;;  %v11478_v61 = vpop.xlane.xlu1 %2774 }
 0x6bd   : > { %18576 = vst [vmem:[#allocation297_spill] sm:$0xff] %v11476_v59  ;;  %v18584_v59 = vld [vmem:[#allocation170_spill] sm:$0xff] }
 0x6be   : > { %18577 = vst [vmem:[#allocation309_spill] sm:$0xff] %v11478_v61  ;;  %v2929_v61 = vsel %vm2607_vm3, %v11190_v39, 0.0  ;;  %v2917_v6 = vsel %vm2607_vm3, %v18584_v59, 0.0  ;;  %v2938_v39 = vsel %vm2607_vm3, %v11204_v5, 0.0  ;;  %v2926_v59 = vsel %vm2607_vm3, %v11136_v58, 0.0  ;;  %v18592_v58 = vld [vmem:[#allocation300_spill] sm:$0xff] }
 0x6bf   : > { %2921 = vadd.xlane.f32.xlu0 %v2920_v63  ;;  %v2887_v63 = vsel %vm2607_vm3, %v18583_v31, 0.0  ;;  %v2947_v5 = vsel %vm2607_vm3, %v11230_v26, 0.0 }
 0x6c1   : > { %2879 = vadd.xlane.f32.xlu2 %v2878_v11  ;;  %2909 = vadd.xlane.f32.xlu1 %v2908_v56 }
 0x6c2   : > { %v11486_v49 = vpop.xlane.xlu0 %2795 }
 0x6c3   : > { %18580 = vst [vmem:[#allocation291_spill] sm:$0xff] %v11486_v49 }
 0x6c4   : > { %v11488_v42 = vpop.xlane.xlu2 %2753  ;;  %v11490_v24 = vpop.xlane.xlu1 %2783 }
 0x6c5   : > { %18581 = vst [vmem:[#allocation163_spill] sm:$0xff] %v11488_v42 }
 0x6c6   : > { %18582 = vst [vmem:[#allocation310_spill] sm:$0xff] %v11490_v24 }
 0x6c7   : > { %2930 = vadd.xlane.f32.xlu0 %v2929_v61  ;;  %v18588_v61 = vld [vmem:[#allocation299_spill] sm:$0xff] }
 0x6c8   : > { %v2896_v31 = vsel %vm2607_vm3, %v18588_v61, 0.0  ;;  %v2905_v61 = vsel %vm2607_vm3, %v18592_v58, 0.0  ;;  %v18596_v58 = vld [vmem:[#allocation224_spill] sm:$0xff] }
 0x6c9   : > { %2888 = vadd.xlane.f32.xlu2 %v2887_v63  ;;  %2918 = vadd.xlane.f32.xlu1 %v2917_v6  ;;  %v11514_v6 = vpop.eup %8618  ;;  %v2914_v24 = vsel %vm2607_vm3, %v18596_v58, 0.0 }
 0x6ca   : > { %v11498_v54 = vpop.xlane.xlu0 %2804  ;;  %vm3028_vm4 = vweird.f32 %v11514_v6 }
 0x6cb   : > { %18585 = vst [vmem:[#allocation295_spill] sm:$0xff] %v11498_v54  ;;  %vm11633_vm6 = vmor %vm3027_vm5, %vm3028_vm4 }
 0x6cc   : > { %v11500_v11 = vpop.xlane.xlu2 %2762  ;;  %v11502_v56 = vpop.xlane.xlu1 %2792 }
 0x6cd   : > { %18586 = vst [vmem:[#allocation170_spill] sm:$0xff] %v11500_v11 }
 0x6ce   : > { %18587 = vst [vmem:[#allocation311_spill] sm:$0xff] %v11502_v56 }
 0x6cf   : > { %2939 = vadd.xlane.f32.xlu0 %v2938_v39  ;;  %v3023_v39 = vmul.f32 %v11514_v6, %v11249_v13 }
 0x6d1   : > { %2897 = vadd.xlane.f32.xlu2 %v2896_v31  ;;  %2927 = vadd.xlane.f32.xlu1 %v2926_v59  ;;  %v2935_v31 = vsel %vm2607_vm3, %v11158_v44, 0.0  ;;  %v11530_v59 = vpop.eup %8620  ;;  %v3024_v26 = vsub.f32 1.0, %v3023_v39  ;;  %v2944_v44 = vsel %vm2607_vm3, %v11172_v0, 0.0  ;;  %v2956_v39 = vsel %vm2607_vm3, %v11242_v16, 0.0 }
 0x6d2   : > { %v11511_v63 = vpop.xlane.xlu0 %2813  ;;  %v11540_v54 = vpop.eup %8622  ;;  %v11562_v0 = vsel %vm2607_vm3, %v11198_v34, 0.0  ;;  %v11570_v16 = vsel %vm2607_vm3, %v11200_v35, 0.0  ;;  %v11587_v35 = vsel %vm2607_vm3, %v11212_v48, 0.0  ;;  %v3078_v48 = vand.u32 2147483648, %v11260_v60 }
 0x6d3   : > { %18589 = vst [vmem:[#allocation299_spill] sm:$0xff] %v11511_v63  ;;  %v3025_v58 = vmul.f32 %v11514_v6, %v3024_v26  ;;  %v11577_v26 = vsel %vm2607_vm3, %v11210_v36, 0.0  ;;  %v3033_v36 = vand.u32 2147483648, %v11249_v13  ;;  %vm3073_vm10 = vweird.f32 %v11530_v59 }
 0x6d4   : > { %v11516_v56 = vpop.xlane.xlu2 %2771  ;;  %v11518_v11 = vpop.xlane.xlu1 %2801  ;;  %vm11671_vm12 = vmor %vm3072_vm7, %vm3073_vm10  ;;  %vm3013_vm13 = vweird.f32 %v11540_v54  ;;  %vm11742_vm7 = vcmp.eq.f32.partialorder %v3061_v62, 8.507059e+37 }
 0x6d5   : > { %18590 = vst [vmem:[#allocation312_spill] sm:$0xff] %v11516_v56  ;;  %v3068_v56 = vmul.f32 %v11530_v59, %v11260_v60  ;;  %v3026_v49 = vadd.f32 %v11514_v6, %v3025_v58  ;;  %v11626_v58 = vsel %vm2607_vm3, %v11284_v41, 0.0  ;;  %v3034_v14 = vor.u32 1.1754944e-38, %v3033_v36  ;;  %vm11705_vm2 = vmor %vm3012_vm9, %vm3013_vm13 }
 0x6d6   : > { %18591 = vst [vmem:[#allocation313_spill] sm:$0xff] %v11518_v11  ;;  %v3079_v41 = vor.u32 1.1754944e-38, %v3078_v48  ;;  %vm2997_vm13 = vweird.f32 %v18606_v43 }
 0x6d7   : > { %2948 = vadd.xlane.f32.xlu0 %v2947_v5 }
 0x6d9   : > { %2906 = vadd.xlane.f32.xlu2 %v2905_v61  ;;  %2936 = vadd.xlane.f32.xlu1 %v2935_v31  ;;  %v18597_v61 = vld [vmem:[#allocation189_spill] sm:$0xff] }
 0x6da   : > { %v11532_v11 = vpop.xlane.xlu0 %2822  ;;  %v2923_v31 = vsel %vm2607_vm3, %v18597_v61, 0.0  ;;  %v11566_v61 = vsel %vm2607_vm3, %v11188_v25, 0.0  ;;  %v11583_v25 = vsel %vm2607_vm3, %v11222_v3, 0.0  ;;  %v11602_v3 = vsel %vm2607_vm3, %v11240_v27, 0.0 }
 0x6db   : > { %18593 = vst [vmem:[#allocation300_spill] sm:$0xff] %v11532_v11  ;;  %v11548_v11 = vpop.eup %8624 }
 0x6dc   : > { %v11536_v63 = vpop.xlane.xlu2 %2780  ;;  %v11538_v5 = vpop.xlane.xlu1 %2810  ;;  %v3113_v34 = vmul.f32 %v11548_v11, %v11272_v46  ;;  %vm3118_vm15 = vweird.f32 %v11548_v11 }
 0x6dd   : > { %18594 = vst [vmem:[#allocation314_spill] sm:$0xff] %v11536_v63  ;;  %v18598_v63 = vld [vmem:[#allocation208_spill] sm:$0xff]  ;;  %vm11722_vm5 = vmor %vm3117_vm0, %vm3118_vm15 }
 0x6de   : > { %18595 = vst [vmem:[#allocation315_spill] sm:$0xff] %v11538_v5  ;;  %v2953_v5 = vsel %vm2607_vm3, %v11186_v1, 0.0  ;;  %v11557_v42 = vsel %vm2607_vm3, %v18598_v63, 0.0  ;;  %v3069_v1 = vsub.f32 1.0, %v3068_v56  ;;  %v3008_v63 = vmul.f32 %v11540_v54, %v11262_v19 }
 0x6df   : > { %2957 = vadd.xlane.f32.xlu0 %v2956_v39  ;;  %v11591_v56 = vsel %vm2607_vm3, %v11224_v38, 0.0  ;;  %v2965_v38 = vsel %vm2607_vm3, %v11254_v21, 0.0  ;;  %v3114_v21 = vsub.f32 1.0, %v3113_v34 }
 0x6e0   : > { %v3009_v55 = vsub.f32 1.0, %v3008_v63 }
 0x6e1   : > { %2915 = vadd.xlane.f32.xlu2 %v2914_v24  ;;  %2945 = vadd.xlane.f32.xlu1 %v2944_v44  ;;  %v11598_v24 = vsel %vm2607_vm3, %v11238_v53, 0.0  ;;  %v3031_v44 = vand.u32 2147483647, %v11249_v13  ;;  %v3070_v53 = vmul.f32 %v11530_v59, %v3069_v1  ;;  %v3076_v1 = vand.u32 2147483647, %v11260_v60 }
 0x6e2   : > { %v11594_v39 = vpop.xlane.xlu0 %2831  ;;  %v3018_v13 = vand.u32 2147483648, %v11262_v19  ;;  %v3010_v36 = vmul.f32 %v11540_v54, %v3009_v55  ;;  %v3115_v48 = vmul.f32 %v11548_v11, %v3114_v21  ;;  %v3123_v55 = vand.u32 2147483648, %v11272_v46 }
 0x6e3   : > { %18599 = vst [vmem:[#allocation224_spill] sm:$0xff] %v11594_v39  ;;  %v11610_v39 = vpop.eup %8626  ;;  %vm11639_vm8 = vcmp.eq.f32.partialorder %v3031_v44, 8.507059e+37  ;;  %v3071_v44 = vadd.f32 %v11530_v59, %v3070_v53  ;;  %vm11657_vm11 = vcmp.eq.f32.partialorder %v3076_v1, 8.507059e+37  ;;  %v3063_v21 = vand.u32 2147483648, %v11274_v2  ;;  %v18613_v1 = vld [vmem:[#allocation222_spill] sm:$0xff] }
 0x6e4   : > { %v11613_v45 = vpop.xlane.xlu2 %2789  ;;  %v11615_v27 = vpop.xlane.xlu1 %2819  ;;  %v3053_v34 = vmul.f32 %v11610_v39, %v11274_v2  ;;  %v3116_v32 = vadd.f32 %v11548_v11, %v3115_v48  ;;  %v18643_v2 = vld [vmem:[#allocation130_spill] sm:$0xff] }
 0x6e5   : > { %18600 = vst [vmem:[#allocation189_spill] sm:$0xff] %v11613_v45  ;;  %v11629_v63 = vpop.eup %8628  ;;  %v3030_v45 = vsel %vm11633_vm6, %v11514_v6, %v3026_v49  ;;  %v3019_v49 = vor.u32 1.1754944e-38, %v3018_v13  ;;  %v18609_v6 = vld [vmem:[#allocation178_spill] sm:$0xff]  ;;  %v3121_v13 = vand.u32 2147483647, %v11272_v46  ;;  %v3075_v60 = vsel %vm11671_vm12, %v11530_v59, %v3071_v44 }
 0x6e6   : > { %18601 = vst [vmem:[#allocation208_spill] sm:$0xff] %v11615_v27  ;;  %v3158_v23 = vmul.f32 %v11629_v63, %v11282_v12  ;;  %8632 = vrcp.f32 %v18609_v6  ;;  %v3035_v27 = vsel %vm11639_vm8, %v3034_v14, %v3030_v45  ;;  %v3011_v14 = vadd.f32 %v11540_v54, %v3010_v36  ;;  %v11699_v36 = vpop.eup %8630 }
 0x6e7   : > { %2966 = vadd.xlane.f32.xlu0 %v2965_v38  ;;  %8634 = vrcp.f32 %v18613_v1  ;;  %v11710_v44 = vor.u32 1.1754944e-38, %v3063_v21  ;;  %v3080_v46 = vsel %vm11657_vm11, %v3079_v41, %v3075_v60  ;;  %vm11714_vm4 = vcmp.eq.f32.partialorder %v3121_v13, 8.507059e+37  ;;  %v18627_v13 = vld [vmem:[#allocation213_spill] sm:$0xff] }
 0x6e8   : > { %vm3162_vm6 = vweird.f32 %v11282_v12  ;;  %v3015_v41 = vsel %vm11705_vm2, %v11540_v54, %v3011_v14  ;;  %v3108_v21 = vand.u32 2147483648, %v18609_v6  ;;  %v3120_v60 = vsel %vm11722_vm5, %v11548_v11, %v3116_v32  ;;  %v18633_v32 = vld [vmem:[#allocation200_spill] sm:$0xff] }
 0x6e9   : > { %2924 = vadd.xlane.f32.xlu2 %v2923_v31  ;;  %2954 = vadd.xlane.f32.xlu1 %v2953_v5  ;;  %v3054_v31 = vsub.f32 1.0, %v3053_v34  ;;  %v3159_v34 = vsub.f32 1.0, %v3158_v23  ;;  %v18618_v5 = vld [vmem:[#allocation89_spill] sm:$0xff]  ;;  %vm3058_vm8 = vweird.f32 %v11610_v39  ;;  %v2993_v54 = vmul.f32 %v11699_v36, %v18606_v43 }
 0x6ea   : > { %v11663_v53 = vpop.xlane.xlu0 %2840  ;;  %v11697_v59 = vmul.f32 %v18618_v5, %v3035_v27  ;;  %v3168_v27 = vand.u32 2147483648, %v11282_v12  ;;  %v3020_v62 = vsel %vm11687_vm14, %v3019_v49, %v3015_v41  ;;  %vm3163_vm9 = vweird.f32 %v11629_v63  ;;  %vm11781_vm10 = vmor %vm3057_vm1, %vm3058_vm8  ;;  %v18641_v41 = vld [vmem:[#allocation73_spill] sm:$0xff] }
 0x6eb   : > { %18610 = vst [vmem:[#allocation198_spill] sm:$0xff] %v11663_v53  ;;  %v3055_v29 = vmul.f32 %v11610_v39, %v3054_v31  ;;  %v3160_v31 = vmul.f32 %v11629_v63, %v3159_v34  ;;  %v18631_v34 = vld [vmem:[#allocation110_spill] sm:$0xff]  ;;  %v11771_v9 = vor.u32 1.1754944e-38, %v3108_v21  ;;  %v3003_v49 = vand.u32 2147483648, %v18606_v43  ;;  %vm11807_vm12 = vmor %vm3162_vm6, %vm3163_vm9 }
 0x6ec   : > { %v11679_v53 = vpop.xlane.xlu2 %2798  ;;  %v11681_v45 = vpop.xlane.xlu1 %2828  ;;  %18619 = vst [vmem:[#allocation89_spill] sm:$0xff] %v11697_v59  ;;  %v11752_v23 = vmul.f32 %v18631_v34, %v3080_v46  ;;  %v3169_v19 = vor.u32 1.1754944e-38, %v3168_v27  ;;  %v2994_v48 = vsub.f32 1.0, %v2993_v54  ;;  %v11791_v21 = vmul.f32 %v18641_v41, %v3020_v62  ;;  %v18647_v41 = vld [vmem:[#allocation225_spill] sm:$0xff] }
 0x6ed   : > { %18614 = vst [vmem:[#allocation178_spill] sm:$0xff] %v11679_v53  ;;  %v3056_v11 = vadd.f32 %v11610_v39, %v3055_v29  ;;  %v3161_v47 = vadd.f32 %v11629_v63, %v3160_v31  ;;  %vm3207_vm14 = vweird.f32 %v18613_v1  ;;  %v3211_v27 = vand.u32 2147483647, %v18613_v1 }
 0x6ee   : > { %18615 = vst [vmem:[#allocation222_spill] sm:$0xff] %v11681_v45  ;;  %v3124_v45 = vor.u32 1.1754944e-38, %v3123_v55  ;;  %v11718_v55 = vpop.eup %8632  ;;  %vm2998_vm1 = vweird.f32 %v11699_v36  ;;  %vm3042_vm2 = vweird.f32 %v18627_v13 }
 0x6ef   : > { %2975 = vadd.xlane.f32.xlu0 %v2974_v20  ;;  %v18626_v20 = vld [vmem:[#allocation181_spill] sm:$0xff]  ;;  %v11732_v38 = vpop.eup %8634  ;;  %18632 = vst [vmem:[#allocation213_spill] sm:$0xff] %v11752_v23  ;;  %v3060_v54 = vsel %vm11781_vm10, %v11610_v39, %v3056_v11  ;;  %v11818_v39 = vor.u32 1.1754944e-38, %v3003_v49  ;;  %vm11891_vm5 = vmor %vm2997_vm13, %vm2998_vm1  ;;  %vm3087_vm10 = vweird.f32 %v11320_v33 }
 0x6f0   : > { %8636 = vrcp.f32 %v18626_v20  ;;  %v3203_v53 = vmul.f32 %v11732_v38, %v18613_v1  ;;  %v3125_v17 = vsel %vm11714_vm4, %v3124_v45, %v3120_v60  ;;  %18636 = vst [vmem:[#allocation316_spill] sm:$0xff] %v11771_v9  ;;  %vm3208_vm0 = vweird.f32 %v11732_v38  ;;  %v18658_v45 = vld [vmem:[#allocation210_spill] sm:$0xff] }
 0x6f1   : > { %8638 = vrcp.f32 %v18627_v13  ;;  %2933 = vadd.xlane.f32.xlu2 %v11557_v42  ;;  %2963 = vadd.xlane.f32.xlu1 %v11562_v0  ;;  %v3166_v42 = vand.u32 2147483647, %v11282_v12  ;;  %v3098_v0 = vmul.f32 %v11718_v55, %v18609_v6  ;;  %18642 = vst [vmem:[#allocation73_spill] sm:$0xff] %v11791_v21  ;;  %v3048_v21 = vand.u32 2147483648, %v18627_v13  ;;  %vm11917_vm6 = vmor %vm3207_vm14, %vm3208_vm0 }
 0x6f2   : > { %v11749_v14 = vpop.xlane.xlu0 %2849  ;;  %8640 = vrcp.f32 %v18633_v32  ;;  %vm11881_vm4 = vcmp.eq.f32.partialorder %v3211_v27, 8.507059e+37 }
 0x6f3   : > { %18630 = vst [vmem:[#allocation181_spill] sm:$0xff] %v11749_v14  ;;  %v3213_v14 = vand.u32 2147483648, %v18613_v1  ;;  %8642 = vrcp.f32 %v11320_v33  ;;  %vm11786_vm11 = vcmp.eq.f32.partialorder %v3166_v42, 8.507059e+37  ;;  %v3099_v60 = vsub.f32 1.0, %v3098_v0 }
 0x6f4   : > { %v11764_v46 = vpop.xlane.xlu2 %2807  ;;  %v11766_v34 = vpop.xlane.xlu1 %2837  ;;  %v3204_v0 = vsub.f32 1.0, %v3203_v53  ;;  %8644 = vrcp.f32 %v18647_v41  ;;  %v3165_v53 = vsel %vm11807_vm12, %v11629_v63, %v3161_v47  ;;  %v3258_v63 = vand.u32 2147483648, %v18633_v32  ;;  %v18650_v47 = vld [vmem:[#allocation193_spill] sm:$0xff] }
 0x6f5   : > { %18634 = vst [vmem:[#allocation110_spill] sm:$0xff] %v11764_v46  ;;  %v11798_v46 = vmul.f32 %v18643_v2, %v3125_v17  ;;  %v11811_v62 = vor.u32 1.1754944e-38, %v3213_v14  ;;  %v3001_v17 = vand.u32 2147483647, %v18606_v43  ;;  %v2995_v14 = vmul.f32 %v11699_v36, %v2994_v48 }
 0x6f6   : > { %18635 = vst [vmem:[#allocation200_spill] sm:$0xff] %v11766_v34  ;;  %v11775_v29 = vpop.eup %8636  ;;  %v3153_v34 = vand.u32 2147483648, %v18626_v20  ;;  %8646 = vrcp.f32 %v18650_v47  ;;  %v3205_v42 = vmul.f32 %v11732_v38, %v3204_v0  ;;  %v18655_v0 = vld [vmem:[#allocation91_spill] sm:$0xff] }
 0x6f7   : > { %v11793_v31 = vpop.eup %8638  ;;  %2984 = vadd.xlane.f32.xlu0 %v11626_v58  ;;  %18644 = vst [vmem:[#allocation130_spill] sm:$0xff] %v11798_v46  ;;  %v3143_v12 = vmul.f32 %v11775_v29, %v18626_v20  ;;  %vm11852_vm15 = vcmp.eq.f32.partialorder %v3001_v17, 8.507059e+37  ;;  %8648 = vrcp.f32 %v11332_v40  ;;  %v2996_v17 = vadd.f32 %v11699_v36, %v2995_v14 }
 0x6f8   : > { %v11815_v58 = vpop.eup %8640  ;;  %v3038_v11 = vmul.f32 %v11793_v31, %v18627_v13  ;;  %v11838_v2 = vor.u32 1.1754944e-38, %v3153_v34  ;;  %v3170_v34 = vsel %vm11786_vm11, %v3169_v19, %v3165_v53  ;;  %8650 = vrcp.f32 %v18658_v45 }
 0x6f9   : > { %2942 = vadd.xlane.f32.xlu2 %v11566_v61  ;;  %2972 = vadd.xlane.f32.xlu1 %v11577_v26  ;;  %v3065_v61 = vsel %vm11742_vm7, %v11710_v44, %v3060_v54  ;;  %v3100_v26 = vmul.f32 %v11718_v55, %v3099_v60  ;;  %v11842_v48 = vpop.eup %8642  ;;  %v3144_v60 = vsub.f32 1.0, %v3143_v12  ;;  %v3198_v54 = vand.u32 2147483648, %v18647_v41  ;;  %v18659_v12 = vld [vmem:[#allocation147_spill] sm:$0xff] }
 0x6fa   : > { %v11831_v49 = vpop.xlane.xlu0 %2858  ;;  %18649 = vst [vmem:[#allocation318_spill] sm:$0xff] %v11838_v2  ;;  %v11861_v2 = vmul.f32 %v18655_v0, %v3065_v61  ;;  %v11863_v9 = vpop.eup %8644  ;;  %v3083_v19 = vmul.f32 %v11842_v48, %v11320_v33  ;;  %v11874_v53 = vmul.f32 %v18659_v12, %v3170_v34  ;;  %v11877_v0 = vor.u32 1.1754944e-38, %v3048_v21 }
 0x6fb   : > { %18648 = vst [vmem:[#allocation317_spill] sm:$0xff] %v11831_v49  ;;  %v3248_v49 = vmul.f32 %v11815_v58, %v18633_v32  ;;  %v11896_v21 = vmul.f32 %v11775_v29, %v3144_v60  ;;  %v11900_v27 = vor.u32 1.1754944e-38, %v3198_v54  ;;  %v3303_v12 = vand.u32 2147483648, %v18650_v47 }
 0x6fc   : > { %v11848_v10 = vpop.xlane.xlu2 %2816  ;;  %v11850_v44 = vpop.xlane.xlu1 %2846  ;;  %18656 = vst [vmem:[#allocation91_spill] sm:$0xff] %v11861_v2  ;;  %v3206_v2 = vadd.f32 %v11732_v38, %v3205_v42  ;;  %v3188_v42 = vmul.f32 %v11863_v9, %v18647_v41  ;;  %v3000_v60 = vsel %vm11891_vm5, %v11699_v36, %v2996_v17  ;;  %v3243_v54 = vand.u32 2147483648, %v18658_v45  ;;  %v18675_v41 = vld [vmem:[#allocation226_spill] sm:$0xff] }
 0x6fd   : > { %18651 = vst [vmem:[#allocation193_spill] sm:$0xff] %v11848_v10  ;;  %v11868_v10 = vor.u32 1.1754944e-38, %v3258_v63  ;;  %v3249_v61 = vsub.f32 1.0, %v3248_v49  ;;  %v11885_v63 = vpop.eup %8646  ;;  %v11924_v34 = vadd.f32 %v11718_v55, %v3100_v26  ;;  %vm3253_vm8 = vweird.f32 %v11815_v58 }
 0x6fe   : > { %18652 = vst [vmem:[#allocation319_spill] sm:$0xff] %v11850_v44  ;;  %v3039_v44 = vsub.f32 1.0, %v3038_v11  ;;  %v3046_v11 = vand.u32 2147483647, %v18627_v13  ;;  %v3293_v17 = vmul.f32 %v11885_v63, %v18650_v47  ;;  %v3210_v26 = vsel %vm11917_vm6, %v11732_v38, %v3206_v2 }
 0x6ff   : > { %18657 = vst [vmem:[#allocation320_spill] sm:$0xff] %v11863_v9  ;;  %v3250_v36 = vmul.f32 %v11815_v58, %v3249_v61  ;;  %v3189_v61 = vsub.f32 1.0, %v3188_v42  ;;  %vm3043_vm9 = vweird.f32 %v11793_v31  ;;  %vm3252_vm11 = vweird.f32 %v18633_v32 }
 0x700   : > { %18660 = vst [vmem:[#allocation147_spill] sm:$0xff] %v11874_v53  ;;  %v3040_v43 = vmul.f32 %v11793_v31, %v3039_v44  ;;  %v18667_v53 = vld [vmem:[#allocation172_spill] sm:$0xff]  ;;  %v3093_v44 = vand.u32 2147483648, %v11320_v33  ;;  %vm11936_vm7 = vcmp.eq.f32.partialorder %v3046_v11, 8.507059e+37  ;;  %v3091_v11 = vand.u32 2147483647, %v11320_v33  ;;  %vm11974_vm12 = vmor %vm3042_vm2, %vm3043_vm9 }
 0x701   : > { %18665 = vst [vmem:[#allocation321_spill] sm:$0xff] %v11896_v21  ;;  %2951 = vadd.xlane.f32.xlu2 %v11570_v16  ;;  %2981 = vadd.xlane.f32.xlu1 %v11583_v25  ;;  %8652 = vrcp.f32 %v18667_v53  ;;  %v3084_v25 = vsub.f32 1.0, %v3083_v19  ;;  %v11960_v16 = vor.u32 1.1754944e-38, %v3243_v54  ;;  %v3348_v21 = vand.u32 2147483648, %v18667_v53  ;;  %vm12052_vm1 = vmor %vm3252_vm11, %vm3253_vm8 }
 0x702   : > { %18666 = vst [vmem:[#allocation322_spill] sm:$0xff] %v11900_v27  ;;  %v11908_v52 = vpop.xlane.xlu0 %2867  ;;  %8654 = vrcp.f32 %v11344_v51  ;;  %v3041_v38 = vadd.f32 %v11793_v31, %v3040_v43  ;;  %v11958_v42 = vor.u32 1.1754944e-38, %v3093_v44  ;;  %v18677_v43 = vld [vmem:[#allocation72_spill] sm:$0xff]  ;;  %v11979_v44 = vmul.f32 %v11863_v9, %v3189_v61 }
 0x703   : > { %18668 = vst [vmem:[#allocation172_spill] sm:$0xff] %v11908_v52  ;;  %v11926_v52 = vpop.eup %8648  ;;  %8656 = vrcp.f32 %v18675_v41  ;;  %v3085_v2 = vmul.f32 %v11842_v48, %v3084_v25  ;;  %vm11983_vm13 = vcmp.eq.f32.partialorder %v3091_v11, 8.507059e+37  ;;  %v11991_v13 = vadd.f32 %v11815_v58, %v3250_v36 }
 0x704   : > { %v11932_v1 = vpop.xlane.xlu2 %2825  ;;  %v11934_v49 = vpop.xlane.xlu1 %2855  ;;  %18676 = vst [vmem:[#allocation325_spill] sm:$0xff] %v11960_v16  ;;  %vm3088_vm14 = vweird.f32 %v11842_v48  ;;  %v3138_v61 = vand.u32 2147483648, %v11332_v40  ;;  %8658 = vrcp.f32 %v11342_v15  ;;  %v18689_v16 = vld [vmem:[#allocation192_spill] sm:$0xff]  ;;  %vm3177_vm5 = vweird.f32 %v11344_v51 }
 0x705   : > { %18671 = vst [vmem:[#allocation323_spill] sm:$0xff] %v11932_v1  ;;  %v11943_v27 = vpop.eup %8650  ;;  %v3005_v1 = vsel %vm11852_vm15, %v11818_v39, %v3000_v60  ;;  %v3128_v39 = vmul.f32 %v11926_v52, %v11332_v40  ;;  %v3294_v60 = vsub.f32 1.0, %v3293_v17  ;;  %v3215_v17 = vsel %vm11881_vm4, %v11811_v62, %v3210_v26  ;;  %vm12031_vm0 = vmor %vm3087_vm10, %vm3088_vm14 }
 0x706   : > { %18672 = vst [vmem:[#allocation324_spill] sm:$0xff] %v11934_v49  ;;  %v11952_v49 = vor.u32 1.1754944e-38, %v3303_v12  ;;  %v3233_v12 = vmul.f32 %v11943_v27, %v18658_v45  ;;  %v11970_v30 = vmul.f32 %v18677_v43, %v3005_v1  ;;  %8660 = vrcp.f32 %v11356_v8 }
 0x707   : > { %v11964_v5 = vpop.eup %8652  ;;  %18681 = vst [vmem:[#allocation326_spill] sm:$0xff] %v11979_v44  ;;  %v3129_v14 = vsub.f32 1.0, %v3128_v39  ;;  %v3086_v36 = vadd.f32 %v11842_v48, %v3085_v2  ;;  %v3295_v26 = vmul.f32 %v11885_v63, %v3294_v60  ;;  %vm3132_vm15 = vweird.f32 %v11332_v40 }
 0x708   : > { %18678 = vst [vmem:[#allocation72_spill] sm:$0xff] %v11970_v30  ;;  %v11993_v1 = vpop.eup %8654  ;;  %v3338_v62 = vmul.f32 %v11964_v5, %v18667_v53  ;;  %v3234_v43 = vsub.f32 1.0, %v3233_v12  ;;  %8662 = vrcp.f32 %v18689_v16  ;;  %v12035_v12 = vor.u32 1.1754944e-38, %v3138_v61 }
 0x709   : > { %2960 = vadd.xlane.f32.xlu2 %v11587_v35  ;;  %2990 = vadd.xlane.f32.xlu1 %v11598_v24  ;;  %v3045_v24 = vsel %vm11974_vm12, %v11793_v31, %v3041_v38  ;;  %v12003_v11 = vpop.eup %8656  ;;  %v3288_v31 = vand.u32 2147483648, %v18675_v41  ;;  %v3173_v39 = vmul.f32 %v11993_v1, %v11344_v51  ;;  %8664 = vrcp.f32 %v11354_v57 }
 0x70a   : > { %v11998_v35 = vpop.xlane.xlu0 %2876  ;;  %18685 = vst [vmem:[#allocation328_spill] sm:$0xff] %v12003_v11  ;;  %v3050_v2 = vsel %vm11936_vm7, %v11877_v0, %v3045_v24  ;;  %v3339_v0 = vsub.f32 1.0, %v3338_v62  ;;  %v3130_v19 = vmul.f32 %v11926_v52, %v3129_v14  ;;  %v3183_v24 = vand.u32 2147483648, %v11344_v51  ;;  %v18695_v14 = vld [vmem:[#allocation99_spill] sm:$0xff] }
 0x70b   : > { %18684 = vst [vmem:[#allocation327_spill] sm:$0xff] %v11998_v35  ;;  %5168 = vrot.lane.b32.xlu0 %v11970_v30, %s9228_s14  ;;  %v12012_v35 = vor.u32 1.1754944e-38, %v3348_v21  ;;  %v3136_v21 = vand.u32 2147483647, %v11332_v40  ;;  %v3278_v30 = vmul.f32 %v12003_v11, %v18675_v41  ;;  %v3090_v33 = vsel %vm12031_vm0, %v11842_v48, %v3086_v36 }
 0x70c   : > { %v12015_v38 = vpop.xlane.xlu2 %2834  ;;  %v12017_v25 = vpop.xlane.xlu1 %2864  ;;  %v12056_v41 = vor.u32 1.1754944e-38, %v3288_v31  ;;  %v3333_v62 = vand.u32 2147483648, %v18689_v16  ;;  %v12060_v45 = vmul.f32 %v18695_v14, %v3050_v2  ;;  %v12068_v36 = vmul.f32 %v11943_v27, %v3234_v43 }
 0x70d   : > { %18686 = vst [vmem:[#allocation329_spill] sm:$0xff] %v12012_v35  ;;  %v18697_v35 = vld [vmem:[#allocation162_spill] sm:$0xff]  ;;  %v3174_v44 = vsub.f32 1.0, %v3173_v39  ;;  %vm12071_vm2 = vcmp.eq.f32.partialorder %v3136_v21, 8.507059e+37  ;;  %v3255_v31 = vsel %vm12052_vm1, %v11815_v58, %v11991_v13  ;;  %vm3133_vm4 = vweird.f32 %v11926_v52 }
 0x70e   : > { %18687 = vst [vmem:[#allocation330_spill] sm:$0xff] %v12015_v38  ;;  %v12046_v38 = vpop.eup %8658  ;;  %v12063_v60 = vmul.f32 %v18697_v35, %v3215_v17  ;;  %v3279_v17 = vsub.f32 1.0, %v3278_v30  ;;  %v12090_v39 = vmul.f32 %v11964_v5, %v3339_v0  ;;  %v12095_v58 = vor.u32 1.1754944e-38, %v3183_v24  ;;  %vm12123_vm7 = vmor %vm3132_vm15, %vm3133_vm4 }
 0x70f   : > { %18688 = vst [vmem:[#allocation331_spill] sm:$0xff] %v12017_v25  ;;  %v3393_v25 = vand.u32 2147483648, %v11342_v15  ;;  %v12065_v48 = vpop.eup %8660  ;;  %v3383_v21 = vmul.f32 %v12046_v38, %v11342_v15  ;;  %v3131_v30 = vadd.f32 %v11926_v52, %v3130_v19  ;;  %v3181_v24 = vand.u32 2147483647, %v11344_v51  ;;  %v18707_v19 = vld [vmem:[#allocation104_spill] sm:$0xff] }
 0x710   : > { %18694 = vst [vmem:[#allocation332_spill] sm:$0xff] %v12056_v41  ;;  %v12087_v43 = vpop.eup %8662  ;;  %v3218_v54 = vmul.f32 %v12065_v48, %v11356_v8  ;;  %v3175_v61 = vmul.f32 %v11993_v1, %v3174_v44  ;;  %v3438_v14 = vand.u32 2147483648, %v11354_v57  ;;  %vm3103_vm6 = vweird.f32 %v11718_v55  ;;  %v18716_v41 = vld [vmem:[#allocation150_spill] sm:$0xff] }
 0x711   : > { %18696 = vst [vmem:[#allocation99_spill] sm:$0xff] %v12060_v45  ;;  %2969 = vadd.xlane.f32.xlu2 %v11591_v56  ;;  %v12080_v35 = vor.u32 1.1754944e-38, %v3393_v25  ;;  %v3095_v56 = vsel %vm11983_vm13, %v11958_v42, %v3090_v33  ;;  %v12100_v13 = vpop.eup %8664  ;;  %v12102_v42 = vor.u32 1.1754944e-38, %v3333_v62  ;;  %v18704_v25 = vld [vmem:[#allocation209_spill] sm:$0xff]  ;;  %v3323_v44 = vmul.f32 %v12087_v43, %v18689_v16 }
 0x712   : > { %18698 = vst [vmem:[#allocation162_spill] sm:$0xff] %v12063_v60  ;;  %v12082_v2 = vpop.xlane.xlu0 %2885  ;;  %8666 = vrcp.f32 %v18704_v25  ;;  %v12116_v62 = vmul.f32 %v18707_v19, %v3095_v56  ;;  %v12139_v19 = vadd.f32 %v11885_v63, %v3295_v26  ;;  %vm3298_vm9 = vweird.f32 %v11885_v63 }
 0x713   : > { %18701 = vst [vmem:[#allocation333_spill] sm:$0xff] %v12082_v2  ;;  %5174 = vrot.lane.b32.xlu0 %v12060_v45, %s9228_s14  ;;  %8668 = vrcp.f32 %v11366_v7  ;;  %v3384_v40 = vsub.f32 1.0, %v3383_v21  ;;  %v3428_v2 = vmul.f32 %v12100_v13, %v11354_v57  ;;  %vm3102_vm10 = vweird.f32 %v18609_v6 }
 0x714   : > { %18702 = vst [vmem:[#allocation334_spill] sm:$0xff] %v12087_v43  ;;  %v12107_v0 = vpop.xlane.xlu2 %2843  ;;  %v12109_v33 = vpop.xlane.xlu1 %2873  ;;  %8670 = vrcp.f32 %v11368_v50  ;;  %v3378_v26 = vand.u32 2147483648, %v18704_v25  ;;  %vm12151_vm11 = vcmp.eq.f32.partialorder %v3181_v24, 8.507059e+37  ;;  %vm3297_vm12 = vweird.f32 %v18650_v47 }
 0x715   : > { %18703 = vst [vmem:[#allocation335_spill] sm:$0xff] %v12102_v42  ;;  %vm3178_vm13 = vweird.f32 %v11993_v1  ;;  %v12157_v21 = vor.u32 1.1754944e-38, %v3438_v14  ;;  %8672 = vrcp.f32 %v18716_v41  ;;  %vm3222_vm14 = vweird.f32 %v11356_v8  ;;  %vm12260_vm4 = vmor %vm3297_vm12, %vm3298_vm9 }
 0x716   : > { %18705 = vst [vmem:[#allocation336_spill] sm:$0xff] %v12107_v0  ;;  %v18711_v0 = vand.u32 2147483647, %v18633_v32  ;;  %v3219_v32 = vsub.f32 1.0, %v3218_v54  ;;  %v3226_v16 = vand.u32 2147483647, %v11356_v8  ;;  %8674 = vrcp.f32 %v11378_v22  ;;  %vm12187_vm15 = vmor %vm3177_vm5, %vm3178_vm13 }
 0x717   : > { %18706 = vst [vmem:[#allocation337_spill] sm:$0xff] %v12109_v33  ;;  %v12128_v33 = vmul.f32 %v12003_v11, %v3279_v17  ;;  %v3135_v17 = vsel %vm12123_vm7, %v11926_v52, %v3131_v30  ;;  %v3176_v52 = vadd.f32 %v11993_v1, %v3175_v61  ;;  %v3324_v30 = vsub.f32 1.0, %v3323_v44 }
 0x718   : > { %18708 = vst [vmem:[#allocation104_spill] sm:$0xff] %v12116_v62  ;;  %vm12134_vm8 = vcmp.eq.f32.partialorder %v18711_v0, 8.507059e+37  ;;  %v3228_v0 = vand.u32 2147483648, %v11356_v8  ;;  %v12162_v45 = vpop.eup %8666  ;;  %v3140_v24 = vsel %vm12071_vm2, %v12035_v12, %v3135_v17  ;;  %v12177_v61 = vmul.f32 %v12046_v38, %v3384_v40  ;;  %v18724_v17 = vld [vmem:[#allocation122_spill] sm:$0xff]  ;;  %vm12246_vm2 = vmor %vm3102_vm10, %vm3103_vm6 }
 0x719   : > { %2978 = vadd.xlane.f32.xlu2 %v11602_v3  ;;  %18717 = vst [vmem:[#allocation338_spill] sm:$0xff] %v12162_v45  ;;  %v3260_v14 = vsel %vm12134_vm8, %v11868_v10, %v3255_v31  ;;  %v12174_v3 = vpop.eup %8668  ;;  %v3429_v44 = vsub.f32 1.0, %v3428_v2  ;;  %v3483_v11 = vand.u32 2147483648, %v11366_v7  ;;  %v3220_v9 = vmul.f32 %v12065_v48, %v3219_v32 }
 0x71a   : > { %v12165_v54 = vpop.xlane.xlu0 %2894  ;;  %v12192_v12 = vor.u32 1.1754944e-38, %v3228_v0  ;;  %v12194_v31 = vor.u32 1.1754944e-38, %v3378_v26  ;;  %8676 = vrcp.f32 %v11380_v37  ;;  %v12201_v40 = vpop.eup %8670  ;;  %v3368_v51 = vmul.f32 %v12162_v45, %v18704_v25  ;;  %v18726_v0 = vld [vmem:[#allocation184_spill] sm:$0xff] }
 0x71b   : > { %18718 = vst [vmem:[#allocation339_spill] sm:$0xff] %v12165_v54  ;;  %5178 = vrot.lane.b32.xlu0 %v11752_v23, %s9228_s14  ;;  %v12206_v23 = vmul.f32 %v18724_v17, %v3140_v24  ;;  %v3180_v32 = vsel %vm12187_vm15, %v11993_v1, %v3176_v52  ;;  %v12212_v26 = vmul.f32 %v18726_v0, %v3260_v14  ;;  %vm3223_vm0 = vweird.f32 %v12065_v48  ;;  %v12224_v24 = vpop.eup %8672  ;;  %v18733_v17 = vld [vmem:[#allocation95_spill] sm:$0xff] }
 0x71c   : > { %18721 = vst [vmem:[#allocation340_spill] sm:$0xff] %v12194_v31  ;;  %v12197_v2 = vpop.xlane.xlu2 %2852  ;;  %v12199_v56 = vpop.xlane.xlu1 %2882  ;;  %v12215_v54 = vmul.f32 %v12087_v43, %v3324_v30  ;;  %vm12220_vm1 = vcmp.eq.f32.partialorder %v3226_v16, 8.507059e+37  ;;  %v12227_v10 = vmul.f32 %v12100_v13, %v3429_v44  ;;  %v12229_v1 = vor.u32 1.1754944e-38, %v3483_v11  ;;  %vm12276_vm5 = vmor %vm3222_vm14, %vm3223_vm0 }
 0x71d   : > { %18722 = vst [vmem:[#allocation341_spill] sm:$0xff] %v12197_v2  ;;  %v3273_v52 = vand.u32 2147483648, %v11368_v50  ;;  %v3423_v30 = vand.u32 2147483648, %v18716_v41  ;;  %v3263_v14 = vmul.f32 %v12201_v40, %v11368_v50  ;;  %8678 = vrcp.f32 %v18733_v17  ;;  %v12240_v31 = vpop.eup %8674 }
 0x71e   : > { %18723 = vst [vmem:[#allocation342_spill] sm:$0xff] %v12199_v56  ;;  %v3473_v56 = vmul.f32 %v12174_v3, %v11366_v7  ;;  %v3185_v16 = vsel %vm12151_vm11, %v12095_v58, %v3180_v32  ;;  %v3221_v0 = vadd.f32 %v12065_v48, %v3220_v9  ;;  %v3369_v44 = vsub.f32 1.0, %v3368_v51 }
 0x71f   : > { %18725 = vst [vmem:[#allocation122_spill] sm:$0xff] %v12206_v23  ;;  %v3528_v25 = vand.u32 2147483648, %v11378_v22  ;;  %8680 = vrcp.f32 %v11390_v28  ;;  %v3301_v58 = vand.u32 2147483647, %v18650_v47  ;;  %v3413_v51 = vmul.f32 %v12224_v24, %v18716_v41 }
 0x720   : > { %18727 = vst [vmem:[#allocation184_spill] sm:$0xff] %v12212_v26  ;;  %v12254_v42 = vpop.eup %8676  ;;  %v3474_v32 = vsub.f32 1.0, %v3473_v56  ;;  %8682 = vrcp.f32 %v11392_v4  ;;  %v12280_v56 = vor.u32 1.1754944e-38, %v3273_v52  ;;  %v12282_v41 = vor.u32 1.1754944e-38, %v3423_v30 }
 0x721   : > { %18728 = vst [vmem:[#allocation343_spill] sm:$0xff] %v12215_v54  ;;  %2987 = vadd.xlane.f32.xlu2 %v11621_v18  ;;  %v3318_v54 = vand.u32 2147483648, %v11380_v37  ;;  %v3264_v8 = vsub.f32 1.0, %v3263_v14  ;;  %v3225_v30 = vsel %vm12276_vm5, %v12065_v48, %v3221_v0  ;;  %vm3148_vm6 = vweird.f32 %v11775_v29 }
 0x722   : > { %18731 = vst [vmem:[#allocation344_spill] sm:$0xff] %v12224_v24  ;;  %5172 = vrot.lane.b32.xlu1 %v11697_v59, %s9228_s14  ;;  %v12270_v18 = vpop.xlane.xlu0 %2903  ;;  %v3300_v59 = vsel %vm12260_vm4, %v11885_v63, %v12139_v19  ;;  %v12308_v63 = vmul.f32 %v12162_v45, %v3369_v44  ;;  %v3308_v19 = vmul.f32 %v12254_v42, %v11380_v37  ;;  %v3468_v14 = vand.u32 2147483648, %v18733_v17  ;;  %v18752_v44 = vld [vmem:[#allocation240_spill] sm:$0xff] }
 0x723   : > { %18732 = vst [vmem:[#allocation345_spill] sm:$0xff] %v12229_v1  ;;  %5184 = vrot.lane.b32.xlu0 %v11798_v46, %s9228_s14  ;;  %v18743_v1 = vld [vmem:[#allocation143_spill] sm:$0xff]  ;;  %vm3302_vm7 = vcmp.eq.f32.partialorder %v3301_v58, 8.507059e+37  ;;  %vm3343_vm8 = vweird.f32 %v11964_v5  ;;  %v12317_v48 = vmul.f32 %v12174_v3, %v3474_v32  ;;  %v3414_v0 = vsub.f32 1.0, %v3413_v51 }
 0x724   : > { %18734 = vst [vmem:[#allocation346_spill] sm:$0xff] %v12240_v31  ;;  %v12287_v43 = vmul.f32 %v18743_v1, %v3185_v16  ;;  %v12295_v7 = vpop.xlane.xlu2 %2861  ;;  %v12297_v52 = vpop.xlane.xlu1 %2891  ;;  %v3105_v1 = vsel %vm12246_vm2, %v11718_v55, %v11924_v34  ;;  %v12319_v55 = vor.u32 1.1754944e-38, %v3528_v25  ;;  %v12321_v34 = vor.u32 1.1754944e-38, %v3318_v54 }
 0x725   : > { %18739 = vst [vmem:[#allocation347_spill] sm:$0xff] %v12270_v18  ;;  %v3518_v18 = vmul.f32 %v12240_v31, %v11378_v22  ;;  %v12313_v16 = vpop.eup %8678  ;;  %vm3147_vm9 = vweird.f32 %v18626_v20  ;;  %8684 = vrcp.f32 %v18752_v44  ;;  %v3230_v58 = vsel %vm12220_vm1, %v12192_v12, %v3225_v30  ;;  %v18759_v30 = vld [vmem:[#allocation203_spill] sm:$0xff]  ;;  %v18785_v22 = vld [vmem:[#allocation225_spill] sm:$0xff] }
 0x726   : > { %18742 = vst [vmem:[#allocation348_spill] sm:$0xff] %v12282_v41  ;;  %v12323_v11 = vpop.eup %8680  ;;  %v3305_v9 = vsel %vm3302_vm7, %v11952_v49, %v3300_v59  ;;  %v3106_v32 = vand.u32 2147483647, %v18609_v6  ;;  %vm3342_vm10 = vweird.f32 %v18667_v53  ;;  %v12336_v25 = vmul.f32 %v12201_v40, %v3264_v8  ;;  %v18754_v59 = vld [vmem:[#allocation183_spill] sm:$0xff]  ;;  %v18767_v41 = vld [vmem:[#allocation316_spill] sm:$0xff]  ;;  %vm12402_vm13 = vmor %vm3147_vm9, %vm3148_vm6 }
 0x727   : > { %18744 = vst [vmem:[#allocation143_spill] sm:$0xff] %v12287_v43  ;;  %v12332_v47 = vpop.eup %8682  ;;  %v3519_v54 = vsub.f32 1.0, %v3518_v18  ;;  %v3573_v51 = vand.u32 2147483648, %v11390_v28  ;;  %v3363_v46 = vand.u32 2147483648, %v11392_v4  ;;  %v3458_v12 = vmul.f32 %v12313_v16, %v18733_v17  ;;  %v18757_v18 = vld [vmem:[#allocation157_spill] sm:$0xff]  ;;  %vm12421_vm0 = vmor %vm3342_vm10, %vm3343_vm8 }
 0x728   : > { %18745 = vst [vmem:[#allocation349_spill] sm:$0xff] %v12295_v7  ;;  %v12342_v2 = vor.u32 1.1754944e-38, %v3468_v14  ;;  %8686 = vrcp.f32 %v18754_v59  ;;  %v12346_v6 = vmul.f32 %v12224_v24, %v3414_v0  ;;  %v12353_v8 = vmul.f32 %v18757_v18, %v3230_v58  ;;  %v18772_v24 = vld [vmem:[#allocation107_spill] sm:$0xff] }
 0x729   : > { %18746 = vst [vmem:[#allocation350_spill] sm:$0xff] %v12297_v52  ;;  %v3309_v52 = vsub.f32 1.0, %v3308_v19  ;;  %v12356_v19 = vmul.f32 %v18759_v30, %v3305_v9  ;;  %v3346_v7 = vand.u32 2147483647, %v18667_v53  ;;  %v3563_v14 = vmul.f32 %v12323_v11, %v11390_v28 }
 0x72a   : > { %18747 = vst [vmem:[#allocation351_spill] sm:$0xff] %v12308_v63  ;;  %5180 = vrot.lane.b32.xlu1 %v12116_v62, %s9228_s14  ;;  %v12350_v49 = vpop.xlane.xlu0 %2912  ;;  %v3353_v0 = vmul.f32 %v12332_v47, %v11392_v4  ;;  %v18762_v62 = vld [vmem:[#allocation147_spill] sm:$0xff]  ;;  %vm3107_vm11 = vcmp.eq.f32.partialorder %v3106_v32, 8.507059e+37  ;;  %v12367_v58 = vmul.f32 %v12240_v31, %v3519_v54  ;;  %v12369_v18 = vor.u32 1.1754944e-38, %v3573_v51  ;;  %v18769_v54 = vld [vmem:[#allocation202_spill] sm:$0xff] }
 0x72b   : > { %18748 = vst [vmem:[#allocation352_spill] sm:$0xff] %v12313_v16  ;;  %5190 = vrot.lane.b32.xlu0 %v18762_v62, %s9228_s14  ;;  %v12371_v9 = vor.u32 1.1754944e-38, %v3363_v46  ;;  %v3110_v17 = vsel %vm3107_vm11, %v18767_v41, %v3105_v1  ;;  %v12381_v63 = vmul.f32 %v12254_v42, %v3309_v52  ;;  %v3459_v62 = vsub.f32 1.0, %v3458_v12  ;;  %v18770_v46 = vld [vmem:[#allocation257_spill] sm:$0xff] }
 0x72c   : > { %18749 = vst [vmem:[#allocation353_spill] sm:$0xff] %v12317_v48  ;;  %v12373_v30 = vpop.xlane.xlu2 %2870  ;;  %v3513_v32 = vand.u32 2147483648, %v18752_v44  ;;  %v3618_v51 = vand.u32 2147483648, %v18754_v59  ;;  %vm3388_vm12 = vweird.f32 %v12046_v38  ;;  %v3564_v52 = vsub.f32 1.0, %v3563_v14  ;;  %v18777_v14 = vld [vmem:[#allocation216_spill] sm:$0xff] }
 0x72d   : > { %18750 = vst [vmem:[#allocation354_spill] sm:$0xff] %v12319_v55  ;;  %v3354_v12 = vsub.f32 1.0, %v3353_v0  ;;  %v12396_v55 = vmul.f32 %v18772_v24, %v3110_v17  ;;  %vm12410_vm15 = vcmp.eq.f32.partialorder %v3346_v7, 8.507059e+37  ;;  %v3151_v24 = vand.u32 2147483647, %v18626_v20 }
 0x72e   : > { %18751 = vst [vmem:[#allocation355_spill] sm:$0xff] %v12323_v11  ;;  %vm3387_vm1 = vweird.f32 %v11342_v15  ;;  %v12429_v7 = vor.u32 1.1754944e-38, %v3513_v32  ;;  %vm3192_vm2 = vweird.f32 %v18785_v22  ;;  %v12439_v48 = vor.u32 1.1754944e-38, %v3618_v51 }
 0x72f   : > { %18753 = vst [vmem:[#allocation356_spill] sm:$0xff] %v12342_v2  ;;  %v18761_v2 = vld [vmem:[#allocation119_spill] sm:$0xff]  ;;  %v12457_v51 = vmul.f32 %v12332_v47, %v3354_v12  ;;  %vm3152_vm4 = vcmp.eq.f32.partialorder %v3151_v24, 8.507059e+37  ;;  %v18793_v12 = vld [vmem:[#allocation329_spill] sm:$0xff]  ;;  %vm3268_vm5 = vweird.f32 %v12201_v40  ;;  %v3453_v24 = vand.u32 2147483648, %v18777_v14  ;;  %vm12521_vm9 = vmor %vm3387_vm1, %vm3388_vm12 }
 0x730   : > { %18755 = vst [vmem:[#allocation357_spill] sm:$0xff] %v12346_v6  ;;  %8688 = vrcp.f32 %v18761_v2  ;;  %v12378_v6 = vpop.eup %8684  ;;  %vm3267_vm6 = vweird.f32 %v11368_v50  ;;  %vm3238_vm8 = vweird.f32 %v11943_v27  ;;  %vm3433_vm11 = vweird.f32 %v12100_v13 }
 0x731   : > { %18756 = vst [vmem:[#allocation358_spill] sm:$0xff] %v12350_v49  ;;  %v12375_v49 = vpop.xlane.xlu1 %2900  ;;  %8690 = vrcp.f32 %v18769_v54  ;;  %v12391_v1 = vpop.eup %8686  ;;  %v3503_v45 = vmul.f32 %v12378_v6, %v18752_v44  ;;  %v12427_v44 = vmul.f32 %v12313_v16, %v3459_v62  ;;  %vm3312_vm1 = vweird.f32 %v11380_v37 }
 0x732   : > { %18758 = vst [vmem:[#allocation157_spill] sm:$0xff] %v12353_v8  ;;  %8692 = vrcp.f32 %v18770_v46  ;;  %v3608_v53 = vmul.f32 %v12391_v1, %v18754_v59  ;;  %5186 = vrot.lane.b32.xlu1 %v12206_v23, %s9228_s14  ;;  %v12443_v62 = vpop.xlane.xlu0 %2921  ;;  %v3558_v23 = vand.u32 2147483648, %v18769_v54 }
 0x733   : > { %18760 = vst [vmem:[#allocation203_spill] sm:$0xff] %v12356_v19  ;;  %8694 = vrcp.f32 %v18777_v14  ;;  %5196 = vrot.lane.b32.xlu0 %v12063_v60, %s9228_s14  ;;  %v18794_v60 = vld [vmem:[#allocation318_spill] sm:$0xff] }
 0x734   : > { %18763 = vst [vmem:[#allocation119_spill] sm:$0xff] %v12367_v58  ;;  %v18784_v58 = vld [vmem:[#allocation326_spill] sm:$0xff]  ;;  %v3609_v16 = vsub.f32 1.0, %v3608_v53  ;;  %v12486_v59 = vor.u32 1.1754944e-38, %v3558_v23 }
 0x735   : > { %18764 = vst [vmem:[#allocation359_spill] sm:$0xff] %v12369_v18  ;;  %v3408_v18 = vand.u32 2147483648, %v18761_v2 }
 0x736   : > { %18765 = vst [vmem:[#allocation360_spill] sm:$0xff] %v12373_v30  ;;  %v3341_v30 = vadd.f32 %v11964_v5, %v12090_v39  ;;  %v12415_v17 = vpop.eup %8688 }
 0x737   : > { %18766 = vst [vmem:[#allocation361_spill] sm:$0xff] %v12375_v49  ;;  %v18771_v49 = vld [vmem:[#allocation321_spill] sm:$0xff]  ;;  %v12451_v31 = vpop.eup %8690 }
 0x738   : > { %18768 = vst [vmem:[#allocation316_spill] sm:$0xff] %v12378_v6  ;;  %v3146_v41 = vadd.f32 %v11775_v29, %v18771_v49  ;;  %v18776_v49 = vld [vmem:[#allocation320_spill] sm:$0xff]  ;;  %v3345_v32 = vsel %vm12421_vm0, %v11964_v5, %v3341_v30  ;;  %v12464_v28 = vpop.eup %8692  ;;  %v3504_v5 = vsub.f32 1.0, %v3503_v45  ;;  %v18790_v30 = vld [vmem:[#allocation227_spill] sm:$0xff]  ;;  %v3391_v45 = vand.u32 2147483647, %v11342_v15 }
 0x739   : > { %18773 = vst [vmem:[#allocation321_spill] sm:$0xff] %v12396_v55  ;;  %vm3193_vm14 = vweird.f32 %v18776_v49  ;;  %v12433_v20 = vadd.f32 %v18776_v49, %v18784_v58  ;;  %8696 = vrcp.f32 %v18790_v30  ;;  %v3350_v39 = vsel %vm12410_vm15, %v18793_v12, %v3345_v32 }
 0x73a   : > { %18782 = vst [vmem:[#allocation107_spill] sm:$0xff] %v12427_v44  ;;  %v3150_v58 = vsel %vm12402_vm13, %v11775_v29, %v3146_v41  ;;  %v12459_v44 = vor.u32 1.1754944e-38, %v3408_v18  ;;  %v3398_v29 = vmul.f32 %v12415_v17, %v18761_v2  ;;  %v12469_v41 = vpop.xlane.xlu2 %2879  ;;  %v3663_v18 = vand.u32 2147483648, %v18770_v46  ;;  %5192 = vrot.lane.b32.xlu1 %v12287_v43, %s9228_s14  ;;  %vm12539_vm10 = vmor %vm3192_vm2, %vm3193_vm14 }
 0x73b   : > { %18783 = vst [vmem:[#allocation320_spill] sm:$0xff] %v12429_v7  ;;  %v12454_v7 = vmul.f32 %v12323_v11, %v3564_v52  ;;  %v12471_v52 = vpop.xlane.xlu1 %2909  ;;  %v3653_v0 = vmul.f32 %v12464_v28, %v18770_v46  ;;  %v3386_v32 = vadd.f32 %v12046_v38, %v12177_v61  ;;  %v12495_v53 = vmul.f32 %v12378_v6, %v3504_v5  ;;  %v18802_v46 = vld [vmem:[#allocation73_spill] sm:$0xff]  ;;  %v18803_v61 = vld [vmem:[#allocation124_spill] sm:$0xff]  ;;  %v18827_v5 = vld [vmem:[#allocation302_spill] sm:$0xff] }
 0x73c   : > { %18786 = vst [vmem:[#allocation216_spill] sm:$0xff] %v12439_v48  ;;  %v12479_v48 = vpop.eup %8694  ;;  %v3603_v12 = vand.u32 2147483648, %v18790_v30  ;;  %v12501_v23 = vor.u32 1.1754944e-38, %v3663_v18  ;;  %5170 = vrot.lane.b32.xlu2 %v18802_v46, %s9228_s14  ;;  %vm12510_vm7 = vcmp.eq.f32.partialorder %v3391_v45, 8.507059e+37  ;;  %v12526_v18 = vmul.f32 %v12391_v1, %v3609_v16  ;;  %v12532_v45 = vpop.xlane.xlu0 %2930  ;;  %5202 = vrot.lane.b32.xlu0 %v12212_v26, %s9228_s14  ;;  %vm12614_vm2 = vmor %vm3267_vm6, %vm3268_vm5 }
 0x73d   : > { %18787 = vst [vmem:[#allocation326_spill] sm:$0xff] %v12443_v62  ;;  %v3155_v62 = vsel %vm3152_vm4, %v18794_v60, %v3150_v58  ;;  %v18797_v60 = vld [vmem:[#allocation244_spill] sm:$0xff]  ;;  %v3399_v58 = vsub.f32 1.0, %v3398_v29  ;;  %v3654_v16 = vsub.f32 1.0, %v3653_v0  ;;  %v3390_v43 = vsel %vm12521_vm9, %v12046_v38, %v3386_v32 }
 0x73e   : > { %18788 = vst [vmem:[#allocation225_spill] sm:$0xff] %v12451_v31  ;;  %v12508_v11 = vmul.f32 %v18803_v61, %v3155_v62  ;;  %v3271_v61 = vand.u32 2147483647, %v11368_v50  ;;  %v3498_v0 = vand.u32 2147483648, %v18797_v60  ;;  %v3195_v38 = vsel %vm12539_vm10, %v18776_v49, %v12433_v20 }
 0x73f   : > { %18789 = vst [vmem:[#allocation362_spill] sm:$0xff] %v12454_v7  ;;  %v12514_v29 = vpop.eup %8696  ;;  %vm3432_vm13 = vweird.f32 %v11354_v57  ;;  %v18820_v26 = vand.u32 2147483647, %v18785_v22  ;;  %vm3313_vm15 = vweird.f32 %v12254_v42  ;;  %v3266_v20 = vadd.f32 %v12201_v40, %v12336_v25 }
 0x740   : > { %18791 = vst [vmem:[#allocation363_spill] sm:$0xff] %v12469_v41  ;;  %v3548_v41 = vmul.f32 %v12451_v31, %v18769_v54  ;;  %v18799_v54 = vld [vmem:[#allocation217_spill] sm:$0xff]  ;;  %v3436_v15 = vand.u32 2147483647, %v11354_v57  ;;  %v12591_v22 = vmul.f32 %v12464_v28, %v3654_v16  ;;  %vm12597_vm0 = vcmp.eq.f32.partialorder %v3271_v61, 8.507059e+37  ;;  %vm12682_vm6 = vmor %vm3432_vm13, %vm3433_vm11 }
 0x741   : > { %18792 = vst [vmem:[#allocation364_spill] sm:$0xff] %v12471_v52  ;;  %v18795_v52 = vld [vmem:[#allocation234_spill] sm:$0xff]  ;;  %v12499_v7 = vmul.f32 %v18799_v54, %v3350_v39  ;;  %v12528_v39 = vor.u32 1.1754944e-38, %v3453_v24  ;;  %v18814_v24 = vld [vmem:[#allocation113_spill] sm:$0xff]  ;;  %vm12576_vm14 = vcmp.eq.f32.partialorder %v18820_v26, 8.507059e+37  ;;  %v3270_v50 = vsel %vm12614_vm2, %v12201_v40, %v3266_v20  ;;  %vm12726_vm9 = vmor %vm3312_vm1, %vm3313_vm15 }
 0x742   : > { %8698 = vrcp.f32 %v18795_v52  ;;  %18796 = vst [vmem:[#allocation329_spill] sm:$0xff] %v12486_v59  ;;  %v3443_v59 = vmul.f32 %v12479_v48, %v18777_v14  ;;  %v3549_v62 = vsub.f32 1.0, %v3548_v41  ;;  %v3708_v41 = vand.u32 2147483648, %v18795_v52  ;;  %v12560_v6 = vpop.xlane.xlu2 %2888  ;;  %5198 = vrot.lane.b32.xlu1 %v12353_v8, %s9228_s14  ;;  %v18855_v57 = vld [vmem:[#allocation177_spill] sm:$0xff] }
 0x743   : > { %8700 = vrcp.f32 %v18797_v60  ;;  %18798 = vst [vmem:[#allocation318_spill] sm:$0xff] %v12495_v53  ;;  %v12555_v53 = vmul.f32 %v12415_v17, %v3399_v58  ;;  %v3593_v58 = vmul.f32 %v12514_v29, %v18790_v30  ;;  %v18832_v30 = vld [vmem:[#allocation233_spill] sm:$0xff]  ;;  %vm12672_vm5 = vcmp.eq.f32.partialorder %v3436_v15, 8.507059e+37 }
 0x744   : > { %18800 = vst [vmem:[#allocation244_spill] sm:$0xff] %v12499_v7  ;;  %8702 = vrcp.f32 %v18814_v24  ;;  %v3444_v54 = vsub.f32 1.0, %v3443_v59  ;;  %v12582_v49 = vmul.f32 %v12451_v31, %v3549_v62  ;;  %v3395_v59 = vsel %vm12510_vm7, %v12080_v35, %v3390_v43  ;;  %v12646_v8 = vpop.xlane.xlu0 %2939  ;;  %5208 = vrot.lane.b32.xlu0 %v12356_v19, %s9228_s14  ;;  %v18845_v19 = vld [vmem:[#allocation305_spill] sm:$0xff] }
 0x745   : > { %18801 = vst [vmem:[#allocation217_spill] sm:$0xff] %v12501_v23  ;;  %v12557_v23 = vor.u32 1.1754944e-38, %v3603_v12  ;;  %v18819_v12 = vld [vmem:[#allocation301_spill] sm:$0xff]  ;;  %v12604_v35 = vor.u32 1.1754944e-38, %v3498_v0  ;;  %v3648_v43 = vand.u32 2147483648, %v18814_v24  ;;  %v18831_v0 = vld [vmem:[#allocation91_spill] sm:$0xff]  ;;  %vm3358_vm7 = vweird.f32 %v12332_v47 }
 0x746   : > { %18804 = vst [vmem:[#allocation124_spill] sm:$0xff] %v12508_v11  ;;  %8704 = vrcp.f32 %v18819_v12  ;;  %5176 = vrot.lane.b32.xlu2 %v18831_v0, %s9228_s14  ;;  %v3311_v62 = vadd.f32 %v12254_v42, %v12381_v63  ;;  %vm3478_vm11 = vweird.f32 %v12174_v3 }
 0x747   : > { %18807 = vst [vmem:[#allocation365_spill] sm:$0xff] %v12514_v29  ;;  %8706 = vrcp.f32 %v18827_v5 }
 0x748   : > { %18810 = vst [vmem:[#allocation366_spill] sm:$0xff] %v12526_v18  ;;  %v12551_v46 = vpop.eup %8698  ;;  %v12562_v18 = vpop.xlane.xlu1 %2918 }
 0x749   : > { %18811 = vst [vmem:[#allocation367_spill] sm:$0xff] %v12532_v45  ;;  %v18815_v45 = vld [vmem:[#allocation210_spill] sm:$0xff]  ;;  %v12568_v32 = vpop.eup %8700  ;;  %v3698_v26 = vmul.f32 %v12551_v46, %v18795_v52  ;;  %v18835_v52 = vld [vmem:[#allocation303_spill] sm:$0xff] }
 0x74a   : > { %vm3237_vm12 = vweird.f32 %v18815_v45  ;;  %18816 = vst [vmem:[#allocation210_spill] sm:$0xff] %v12557_v23  ;;  %v3488_v25 = vmul.f32 %v12568_v32, %v18797_v60  ;;  %v12608_v16 = vpop.eup %8702  ;;  %v3594_v23 = vsub.f32 1.0, %v3593_v58  ;;  %8708 = vrcp.f32 %v18835_v52  ;;  %v12654_v20 = vpop.xlane.xlu2 %2897 }
 0x74b   : > { %18817 = vst [vmem:[#allocation368_spill] sm:$0xff] %v12560_v6  ;;  %v3699_v6 = vsub.f32 1.0, %v3698_v26  ;;  %v18841_v26 = vld [vmem:[#allocation140_spill] sm:$0xff]  ;;  %vm12663_vm4 = vmor %vm3237_vm12, %vm3238_vm8  ;;  %vm3357_vm8 = vweird.f32 %v11392_v4  ;;  %vm3403_vm12 = vweird.f32 %v12415_v17 }
 0x74c   : > { %18818 = vst [vmem:[#allocation369_spill] sm:$0xff] %v12562_v18  ;;  %v12595_v18 = vor.u32 1.1754944e-38, %v3708_v41  ;;  %v12619_v41 = vmul.f32 %v12479_v48, %v3444_v54  ;;  %v3431_v54 = vadd.f32 %v12100_v13, %v12227_v10  ;;  %v12641_v58 = vpop.eup %8704  ;;  %v3489_v40 = vsub.f32 1.0, %v3488_v25  ;;  %5214 = vrot.lane.b32.xlu0 %v12499_v7, %s9228_s14  ;;  %vm12804_vm15 = vmor %vm3357_vm8, %vm3358_vm7 }
 0x74d   : > { %18823 = vst [vmem:[#allocation370_spill] sm:$0xff] %v12582_v49  ;;  %v12624_v49 = vmul.f32 %v18832_v30, %v3395_v59  ;;  %v12639_v30 = vadd.f32 %v11943_v27, %v12068_v36  ;;  %v18837_v59 = vld [vmem:[#allocation304_spill] sm:$0xff]  ;;  %v3638_v10 = vmul.f32 %v12608_v16, %v18814_v24  ;;  %v12652_v36 = vor.u32 1.1754944e-38, %v3648_v43 }
 0x74e   : > { %18824 = vst [vmem:[#allocation371_spill] sm:$0xff] %v12595_v18  ;;  %v18834_v18 = vld [vmem:[#allocation322_spill] sm:$0xff]  ;;  %8710 = vrcp.f32 %v18837_v59  ;;  %v3693_v25 = vand.u32 2147483648, %v18835_v52  ;;  %v3275_v43 = vsel %vm12597_vm0, %v12280_v56, %v3270_v50  ;;  %v3743_v56 = vmul.f32 %v12641_v58, %v18819_v12  ;;  %5182 = vrot.lane.b32.xlu2 %v12396_v55, %s9228_s14  ;;  %v18862_v55 = vld [vmem:[#allocation328_spill] sm:$0xff] }
 0x74f   : > { %18828 = vst [vmem:[#allocation302_spill] sm:$0xff] %v12608_v16  ;;  %v3200_v31 = vsel %vm12576_vm14, %v18834_v18, %v3195_v38  ;;  %v3753_v18 = vand.u32 2147483648, %v18819_v12  ;;  %v3543_v38 = vand.u32 2147483648, %v18827_v5  ;;  %8712 = vrcp.f32 %v18845_v19 }
 0x750   : > { %18833 = vst [vmem:[#allocation233_spill] sm:$0xff] %v12624_v49  ;;  %v12657_v61 = vmul.f32 %v18841_v26, %v3200_v31  ;;  %v12676_v31 = vpop.eup %8706  ;;  %v12692_v15 = vpop.xlane.xlu1 %2927  ;;  %v12701_v50 = vmul.f32 %v12551_v46, %v3699_v6  ;;  %v3435_v24 = vsel %vm12682_vm6, %v12100_v13, %v3431_v54  ;;  %v12714_v63 = vmul.f32 %v12568_v32, %v3489_v40  ;;  %v18861_v26 = vld [vmem:[#allocation293_spill] sm:$0xff] }
 0x751   : > { %18836 = vst [vmem:[#allocation322_spill] sm:$0xff] %v12641_v58  ;;  %v3316_v6 = vand.u32 2147483647, %v11380_v37  ;;  %v3533_v54 = vmul.f32 %v12676_v31, %v18827_v5  ;;  %v3798_v40 = vand.u32 2147483648, %v18837_v59  ;;  %v3315_v37 = vsel %vm12726_vm9, %v12254_v42, %v3311_v62 }
 0x752   : > { %18838 = vst [vmem:[#allocation372_spill] sm:$0xff] %v12646_v8  ;;  %v12757_v13 = vadd.f32 %v18862_v55, %v12128_v33  ;;  %v18864_v8 = vld [vmem:[#allocation307_spill] sm:$0xff]  ;;  %v12771_v33 = vpop.xlane.xlu0 %2948  ;;  %vm3402_vm14 = vweird.f32 %v18761_v2  ;;  %vm3283_vm1 = vweird.f32 %v18862_v55  ;;  %vm3448_vm6 = vweird.f32 %v12479_v48 }
 0x753   : > { %18839 = vst [vmem:[#allocation373_spill] sm:$0xff] %v12652_v36  ;;  %v12703_v36 = vor.u32 1.1754944e-38, %v3753_v18  ;;  %vm3317_vm10 = vcmp.eq.f32.partialorder %v3316_v6, 8.507059e+37  ;;  %v3534_v62 = vsub.f32 1.0, %v3533_v54  ;;  %v12768_v7 = vor.u32 1.1754944e-38, %v3798_v40  ;;  %v18869_v6 = vld [vmem:[#allocation308_spill] sm:$0xff] }
 0x754   : > { %18840 = vst [vmem:[#allocation374_spill] sm:$0xff] %v12654_v20  ;;  %v12688_v20 = vmul.f32 %v12514_v29, %v3594_v23  ;;  %v12705_v23 = vor.u32 1.1754944e-38, %v3543_v38  ;;  %v12717_v29 = vmul.f32 %v18855_v57, %v3275_v43  ;;  %v12732_v38 = vor.u32 1.1754944e-38, %v3693_v25  ;;  %5220 = vrot.lane.b32.xlu0 %v12624_v49, %s9228_s14  ;;  %v18891_v49 = vld [vmem:[#allocation353_spill] sm:$0xff] }
 0x755   : > { %18842 = vst [vmem:[#allocation140_spill] sm:$0xff] %v12657_v61  ;;  %v3744_v43 = vsub.f32 1.0, %v3743_v56  ;;  %v3440_v25 = vsel %vm12672_vm5, %v12157_v21, %v3435_v24  ;;  %v3588_v56 = vand.u32 2147483648, %v18845_v19  ;;  %v12765_v24 = vpop.xlane.xlu2 %2906  ;;  %v3356_v54 = vadd.f32 %v12332_v47, %v12457_v51 }
 0x756   : > { %18850 = vst [vmem:[#allocation305_spill] sm:$0xff] %v12688_v20  ;;  %v3639_v20 = vsub.f32 1.0, %v3638_v10  ;;  %v18860_v10 = vld [vmem:[#allocation306_spill] sm:$0xff]  ;;  %5204 = vrot.lane.b32.xlu1 %v12717_v29, %s9228_s14  ;;  %5188 = vrot.lane.b32.xlu2 %v12508_v11, %s9228_s14  ;;  %vm3447_vm8 = vweird.f32 %v18777_v14 }
 0x757   : > { %18851 = vst [vmem:[#allocation375_spill] sm:$0xff] %v12692_v15  ;;  %v12710_v15 = vpop.eup %8708  ;;  %8714 = vrcp.f32 %v18860_v10  ;;  %v18888_v11 = vld [vmem:[#allocation226_spill] sm:$0xff] }
 0x758   : > { %18852 = vst [vmem:[#allocation376_spill] sm:$0xff] %v12701_v50  ;;  %v12720_v18 = vpop.eup %8710  ;;  %8716 = vrcp.f32 %v18861_v26  ;;  %v12760_v42 = vmul.f32 %v12608_v16, %v3639_v20  ;;  %v3320_v20 = vsel %vm3317_vm10, %v12321_v34, %v3315_v37  ;;  %v3843_v34 = vand.u32 2147483648, %v18861_v26  ;;  %v12795_v51 = vpop.xlane.xlu1 %2936  ;;  %vm12908_vm10 = vmor %vm3402_vm14, %vm3403_vm12 }
 0x759   : > { %18853 = vst [vmem:[#allocation377_spill] sm:$0xff] %v12703_v36  ;;  %v12747_v57 = vpop.eup %8712  ;;  %v3788_v21 = vmul.f32 %v12720_v18, %v18837_v59  ;;  %8718 = vrcp.f32 %v18864_v8  ;;  %v3633_v36 = vand.u32 2147483648, %v18864_v8  ;;  %v18872_v59 = vld [vmem:[#allocation283_spill] sm:$0xff]  ;;  %vm3282_vm5 = vweird.f32 %v18888_v11 }
 0x75a   : > { %18854 = vst [vmem:[#allocation378_spill] sm:$0xff] %v12710_v15  ;;  %8720 = vrcp.f32 %v18869_v6  ;;  %v3888_v0 = vand.u32 2147483648, %v18872_v59  ;;  %vm12958_vm14 = vmor %vm3282_vm5, %vm3283_vm1 }
 0x75b   : > { %18856 = vst [vmem:[#allocation177_spill] sm:$0xff] %v12717_v29  ;;  %v3241_v29 = vand.u32 2147483647, %v18815_v45  ;;  %v3738_v45 = vand.u32 2147483648, %v18860_v10  ;;  %v3789_v16 = vsub.f32 1.0, %v3788_v21  ;;  %8722 = vrcp.f32 %v18872_v59 }
 0x75c   : > { %18859 = vst [vmem:[#allocation379_spill] sm:$0xff] %v12732_v38  ;;  %v3683_v38 = vmul.f32 %v12710_v15, %v18835_v52  ;;  %v12776_v52 = vmul.f32 %v12641_v58, %v3744_v43  ;;  %v3361_v43 = vand.u32 2147483647, %v11392_v4 }
 0x75d   : > { %18863 = vst [vmem:[#allocation328_spill] sm:$0xff] %v12760_v42  ;;  %v12783_v40 = vpop.eup %8714  ;;  %v18871_v42 = vld [vmem:[#allocation102_spill] sm:$0xff]  ;;  %v12811_v21 = vor.u32 1.1754944e-38, %v3738_v45  ;;  %vm12818_vm0 = vcmp.eq.f32.partialorder %v3241_v29, 8.507059e+37  ;;  %v18884_v45 = vld [vmem:[#allocation297_spill] sm:$0xff] }
 0x75e   : > { %18865 = vst [vmem:[#allocation307_spill] sm:$0xff] %v12765_v24  ;;  %v3578_v24 = vmul.f32 %v12747_v57, %v18845_v19  ;;  %vm3477_vm13 = vweird.f32 %v18871_v42  ;;  %v12790_v37 = vpop.eup %8716  ;;  %v3728_v58 = vmul.f32 %v12783_v40, %v18860_v10  ;;  %8724 = vrcp.f32 %v18884_v45  ;;  %5194 = vrot.lane.b32.xlu2 %v12657_v61, %s9228_s14 }
 0x75f   : > { %18866 = vst [vmem:[#allocation380_spill] sm:$0xff] %v12768_v7  ;;  %v12786_v7 = vor.u32 1.1754944e-38, %v3588_v56  ;;  %v12809_v56 = vmul.f32 %v12676_v31, %v3534_v62  ;;  %v12822_v4 = vpop.eup %8718  ;;  %v3360_v62 = vsel %vm12804_vm15, %v12332_v47, %v3356_v54  ;;  %vm3362_vm2 = vcmp.eq.f32.partialorder %v3361_v43, 8.507059e+37  ;;  %vm12887_vm7 = vmor %vm3477_vm13, %vm3478_vm11 }
 0x760   : > { %18867 = vst [vmem:[#allocation381_spill] sm:$0xff] %v12771_v33  ;;  %v3684_v33 = vsub.f32 1.0, %v3683_v38  ;;  %v12844_v47 = vmul.f32 %v12720_v18, %v3789_v16  ;;  %v12846_v54 = vor.u32 1.1754944e-38, %v3843_v34  ;;  %v12848_v38 = vor.u32 1.1754944e-38, %v3633_v36  ;;  %v18890_v34 = vld [vmem:[#allocation325_spill] sm:$0xff] }
 0x761   : > { %18868 = vst [vmem:[#allocation382_spill] sm:$0xff] %v12776_v52  ;;  %v18874_v52 = vld [vmem:[#allocation199_spill] sm:$0xff]  ;;  %v3365_v43 = vsel %vm3362_vm2, %v12371_v9, %v3360_v62  ;;  %v18889_v16 = vsel %vm12663_vm4, %v11943_v27, %v12639_v30  ;;  %v3476_v10 = vadd.f32 %v12174_v3, %v18891_v49  ;;  %v3729_v9 = vsub.f32 1.0, %v3728_v58  ;;  %v18892_v30 = vld [vmem:[#allocation346_spill] sm:$0xff] }
 0x762   : > { %18870 = vst [vmem:[#allocation383_spill] sm:$0xff] %v12783_v40  ;;  %v12798_v12 = vmul.f32 %v18874_v52, %v3320_v20  ;;  %v3579_v20 = vsub.f32 1.0, %v3578_v24  ;;  %v12834_v29 = vmul.f32 %v12710_v15, %v3684_v33  ;;  %v3833_v24 = vmul.f32 %v12790_v37, %v18861_v26  ;;  %v18902_v26 = vld [vmem:[#allocation223_spill] sm:$0xff] }
 0x763   : > { %18873 = vst [vmem:[#allocation102_spill] sm:$0xff] %v12795_v51  ;;  %v18879_v51 = vld [vmem:[#allocation250_spill] sm:$0xff]  ;;  %v3783_v33 = vand.u32 2147483648, %v18869_v6  ;;  %v3245_v36 = vsel %vm12818_vm0, %v18890_v34, %v18889_v16  ;;  %v3401_v27 = vadd.f32 %v12415_v17, %v12555_v53  ;;  %vm3523_vm4 = vweird.f32 %v18892_v30  ;;  %v18893_v16 = vld [vmem:[#allocation309_spill] sm:$0xff]  ;;  %v12881_v34 = vpop.xlane.xlu0 %2957 }
 0x764   : > { %18875 = vst [vmem:[#allocation199_spill] sm:$0xff] %v12798_v12  ;;  %v12816_v50 = vmul.f32 %v18879_v51, %v3440_v25  ;;  %5210 = vrot.lane.b32.xlu1 %v12798_v12, %s9228_s14  ;;  %v3481_v25 = vand.u32 2147483647, %v18871_v42  ;;  %v12841_v51 = vpop.eup %8720  ;;  %v12851_v12 = vpop.xlane.xlu2 %2915  ;;  %v3834_v52 = vsub.f32 1.0, %v3833_v24  ;;  %v3678_v49 = vand.u32 2147483648, %v18884_v45 }
 0x765   : > { %18878 = vst [vmem:[#allocation384_spill] sm:$0xff] %v12811_v21  ;;  %v3623_v21 = vmul.f32 %v12822_v4, %v18864_v8  ;;  %v3773_v62 = vmul.f32 %v12841_v51, %v18869_v6  ;;  %8726 = vrcp.f32 %v18893_v16  ;;  %v12892_v53 = vor.u32 1.1754944e-38, %v3783_v33  ;;  %v18900_v6 = vld [vmem:[#allocation154_spill] sm:$0xff] }
 0x766   : > { %18880 = vst [vmem:[#allocation250_spill] sm:$0xff] %v12816_v50  ;;  %vm3522_vm9 = vweird.f32 %v18902_v26  ;;  %vm3482_vm11 = vcmp.eq.f32.partialorder %v3481_v25, 8.507059e+37  ;;  %v12932_v61 = vmul.f32 %v12790_v37, %v3834_v52  ;;  %5226 = vrot.lane.b32.xlu0 %v12816_v50, %s9228_s14  ;;  %v18913_v25 = vld [vmem:[#allocation345_spill] sm:$0xff]  ;;  %vm3493_vm0 = vweird.f32 %v12568_v32 }
 0x767   : > { %18883 = vst [vmem:[#allocation385_spill] sm:$0xff] %v12834_v29  ;;  %v12871_v29 = vmul.f32 %v12747_v57, %v3579_v20  ;;  %v18898_v20 = vld [vmem:[#allocation215_spill] sm:$0xff]  ;;  %v3624_v33 = vsub.f32 1.0, %v3623_v21  ;;  %v3405_v21 = vsel %vm12908_vm10, %v12415_v17, %v3401_v27  ;;  %v3774_v58 = vsub.f32 1.0, %v3773_v62 }
 0x768   : > { %18885 = vst [vmem:[#allocation297_spill] sm:$0xff] %v12841_v51  ;;  %v12895_v24 = vmul.f32 %v18898_v20, %v3365_v43  ;;  %v12921_v20 = vmul.f32 %v12783_v40, %v3729_v9  ;;  %v18910_v9 = vld [vmem:[#allocation334_spill] sm:$0xff]  ;;  %vm3492_vm2 = vweird.f32 %v18797_v60 }
 0x769   : > { %18886 = vst [vmem:[#allocation386_spill] sm:$0xff] %v12846_v54  ;;  %v12898_v54 = vmul.f32 %v18900_v6, %v3245_v36  ;;  %v18905_v6 = vld [vmem:[#allocation291_spill] sm:$0xff]  ;;  %v3480_v36 = vsel %vm12887_vm7, %v12174_v3, %v3476_v10  ;;  %v12934_v3 = vor.u32 1.1754944e-38, %v3888_v0  ;;  %v12936_v10 = vor.u32 1.1754944e-38, %v3678_v49  ;;  %vm12997_vm7 = vmor %vm3447_vm8, %vm3448_vm6 }
 0x76a   : > { %18887 = vst [vmem:[#allocation387_spill] sm:$0xff] %v12851_v12  ;;  %v12867_v12 = vpop.eup %8722  ;;  %8728 = vrcp.f32 %v18905_v6  ;;  %vm3328_vm12 = vweird.f32 %v18910_v9  ;;  %v3485_v27 = vsel %vm3482_vm11, %v18913_v25, %v3480_v36  ;;  %v12950_v0 = vmul.f32 %v12822_v4, %v3624_v33  ;;  %v18919_v25 = vld [vmem:[#allocation355_spill] sm:$0xff]  ;;  %vm13018_vm6 = vmor %vm3522_vm9, %vm3523_vm4 }
 0x76b   : > { %18894 = vst [vmem:[#allocation226_spill] sm:$0xff] %v12881_v34  ;;  %v3406_v34 = vand.u32 2147483647, %v18761_v2  ;;  %v12901_v15 = vpop.eup %8724  ;;  %v3878_v43 = vmul.f32 %v12867_v12, %v18872_v59  ;;  %v3828_v2 = vand.u32 2147483648, %v18893_v16  ;;  %v3933_v49 = vand.u32 2147483648, %v18905_v6  ;;  %v18924_v59 = vld [vmem:[#allocation231_spill] sm:$0xff]  ;;  %5200 = vrot.lane.b32.xlu2 %v12898_v54, %s9228_s14 }
 0x76c   : > { %18897 = vst [vmem:[#allocation325_spill] sm:$0xff] %v12892_v53  ;;  %v12924_v53 = vpop.xlane.xlu1 %2945  ;;  %5216 = vrot.lane.b32.xlu1 %v12895_v24, %s9228_s14  ;;  %v12944_v17 = vpop.xlane.xlu2 %2924  ;;  %vm3568_vm1 = vweird.f32 %v18919_v25  ;;  %vm3538_vm11 = vweird.f32 %v12676_v31 }
 0x76d   : > { %18899 = vst [vmem:[#allocation353_spill] sm:$0xff] %v12895_v24  ;;  %v3668_v24 = vmul.f32 %v12901_v15, %v18884_v45  ;;  %vm3407_vm13 = vcmp.eq.f32.partialorder %v3406_v34, 8.507059e+37  ;;  %v12947_v52 = vpop.eup %8726  ;;  %v3879_v62 = vsub.f32 1.0, %v3878_v43  ;;  %v18917_v34 = vld [vmem:[#allocation192_spill] sm:$0xff]  ;;  %v12964_v36 = vor.u32 1.1754944e-38, %v3828_v2 }
 0x76e   : > { %18901 = vst [vmem:[#allocation346_spill] sm:$0xff] %v12898_v54  ;;  %v3410_v42 = vsel %vm3407_vm13, %v12459_v44, %v3405_v21  ;;  %vm3327_vm15 = vweird.f32 %v18917_v34  ;;  %v3286_v43 = vand.u32 2147483647, %v18888_v11  ;;  %v3446_v44 = vadd.f32 %v12479_v48, %v12619_v41 }
 0x76f   : > { %18906 = vst [vmem:[#allocation215_spill] sm:$0xff] %v12921_v20  ;;  %v18921_v20 = vld [vmem:[#allocation262_spill] sm:$0xff]  ;;  %v3285_v2 = vsel %vm12958_vm14, %v18862_v55, %v12757_v13  ;;  %v3669_v41 = vsub.f32 1.0, %v3668_v24  ;;  %v3818_v40 = vmul.f32 %v12947_v52, %v18893_v16  ;;  %v13002_v50 = vmul.f32 %v12867_v12, %v3879_v62  ;;  %v18936_v16 = vld [vmem:[#allocation332_spill] sm:$0xff]  ;;  %vm13066_vm13 = vmor %vm3327_vm15, %vm3328_vm12 }
 0x770   : > { %18907 = vst [vmem:[#allocation154_spill] sm:$0xff] %v12924_v53  ;;  %v18911_v53 = vld [vmem:[#allocation163_spill] sm:$0xff]  ;;  %v12970_v21 = vpop.eup %8728  ;;  %v13004_v13 = vor.u32 1.1754944e-38, %v3933_v49  ;;  %v18931_v24 = vld [vmem:[#allocation310_spill] sm:$0xff]  ;;  %vm3287_vm8 = vcmp.eq.f32.partialorder %v3286_v43, 8.507059e+37  ;;  %v3450_v54 = vsel %vm12997_vm7, %v12479_v48, %v3446_v44  ;;  %vm3613_vm7 = vweird.f32 %v12391_v1  ;;  %vm13094_vm15 = vmor %vm3492_vm2, %vm3493_vm0 }
 0x771   : > { %18908 = vst [vmem:[#allocation223_spill] sm:$0xff] %v12932_v61  ;;  %8730 = vrcp.f32 %v18911_v53  ;;  %v3723_v33 = vand.u32 2147483648, %v18911_v53  ;;  %v3923_v62 = vmul.f32 %v12970_v21, %v18905_v6  ;;  %v3819_v43 = vsub.f32 1.0, %v3818_v40  ;;  %v18939_v44 = vld [vmem:[#allocation343_spill] sm:$0xff] }
 0x772   : > { %18909 = vst [vmem:[#allocation388_spill] sm:$0xff] %v12934_v3  ;;  %v12977_v3 = vmul.f32 %v18921_v20, %v3485_v27  ;;  %v3451_v20 = vand.u32 2147483647, %v18777_v14  ;;  %v18926_v27 = vld [vmem:[#allocation168_spill] sm:$0xff]  ;;  %8732 = vrcp.f32 %v18931_v24  ;;  %v3326_v55 = vadd.f32 %v18910_v9, %v18939_v44  ;;  %v18952_v61 = vld [vmem:[#allocation183_spill] sm:$0xff] }
 0x773   : > { %18912 = vst [vmem:[#allocation334_spill] sm:$0xff] %v12944_v17  ;;  %v12974_v17 = vmul.f32 %v12841_v51, %v3774_v58  ;;  %v12989_v58 = vmul.f32 %v18924_v59, %v3410_v42  ;;  %vm3567_vm5 = vweird.f32 %v18926_v27  ;;  %v13007_v59 = vpop.xlane.xlu0 %2966  ;;  %v3526_v42 = vand.u32 2147483647, %v18902_v26  ;;  %v18935_v26 = vld [vmem:[#allocation295_spill] sm:$0xff]  ;;  %v18940_v51 = vld [vmem:[#allocation338_spill] sm:$0xff] }
 0x774   : > { %18914 = vst [vmem:[#allocation163_spill] sm:$0xff] %v12947_v52  ;;  %v13024_v49 = vor.u32 1.1754944e-38, %v3723_v33  ;;  %8734 = vrcp.f32 %v18935_v26  ;;  %5232 = vrot.lane.b32.xlu0 %v12977_v3, %s9228_s14  ;;  %v13044_v48 = vpop.xlane.xlu2 %2933  ;;  %vm3452_vm4 = vcmp.eq.f32.partialorder %v3451_v20, 8.507059e+37  ;;  %vm3373_vm9 = vweird.f32 %v18940_v51  ;;  %v18943_v20 = vld [vmem:[#allocation354_spill] sm:$0xff] }
 0x775   : > { %18918 = vst [vmem:[#allocation345_spill] sm:$0xff] %v12964_v36  ;;  %v18923_v36 = vld [vmem:[#allocation119_spill] sm:$0xff]  ;;  %5222 = vrot.lane.b32.xlu1 %v12989_v58, %s9228_s14  ;;  %vm3527_vm10 = vcmp.eq.f32.partialorder %v3526_v42, 8.507059e+37  ;;  %v3924_v40 = vsub.f32 1.0, %v3923_v62  ;;  %v3491_v44 = vadd.f32 %v12568_v32, %v12714_v63  ;;  %v3331_v63 = vand.u32 2147483647, %v18917_v34 }
 0x776   : > { %18920 = vst [vmem:[#allocation192_spill] sm:$0xff] %v12974_v17  ;;  %v3521_v11 = vadd.f32 %v18892_v30, %v18923_v36  ;;  %v3290_v17 = vsel %vm3287_vm8, %v18936_v16, %v3285_v2  ;;  %v3978_v2 = vand.u32 2147483648, %v18935_v26  ;;  %v18948_v62 = vld [vmem:[#allocation362_spill] sm:$0xff]  ;;  %v3496_v6 = vand.u32 2147483647, %v18797_v60  ;;  %vm13109_vm8 = vmor %vm3567_vm5, %vm3568_vm1 }
 0x777   : > { %18922 = vst [vmem:[#allocation355_spill] sm:$0xff] %v12977_v3  ;;  %v13012_v36 = vpop.eup %8730  ;;  %vm3612_vm12 = vweird.f32 %v18952_v61  ;;  %vm3332_vm0 = vcmp.eq.f32.partialorder %v3331_v63, 8.507059e+37 }
 0x778   : > { %18925 = vst [vmem:[#allocation262_spill] sm:$0xff] %v12989_v58  ;;  %v3525_v33 = vsel %vm13018_vm6, %v18892_v30, %v3521_v11  ;;  %v13040_v58 = vmul.f32 %v12901_v15, %v3669_v41  ;;  %v3713_v16 = vmul.f32 %v13012_v36, %v18911_v53  ;;  %v3455_v30 = vsel %vm3452_vm4, %v12528_v39, %v3450_v54  ;;  %v18941_v11 = vld [vmem:[#allocation173_spill] sm:$0xff]  ;;  %v13060_v3 = vpop.eup %8732 }
 0x779   : > { %18929 = vst [vmem:[#allocation119_spill] sm:$0xff] %v13002_v50  ;;  %v13055_v41 = vmul.f32 %v18941_v11, %v3290_v17  ;;  %v3530_v14 = vsel %vm3527_vm10, %v18943_v20, %v3525_v33  ;;  %v18946_v54 = vld [vmem:[#allocation209_spill] sm:$0xff]  ;;  %v18947_v17 = vld [vmem:[#allocation170_spill] sm:$0xff]  ;;  %v3566_v33 = vadd.f32 %v18919_v25, %v18948_v62  ;;  %vm3537_vm6 = vweird.f32 %v18827_v5  ;;  %v18950_v20 = vld [vmem:[#allocation247_spill] sm:$0xff] }
 0x77a   : > { %18930 = vst [vmem:[#allocation231_spill] sm:$0xff] %v13004_v13  ;;  %v13042_v13 = vpop.xlane.xlu1 %2954  ;;  %vm3372_vm14 = vweird.f32 %v18946_v54  ;;  %8736 = vrcp.f32 %v18947_v17  ;;  %v3768_v42 = vand.u32 2147483648, %v18947_v17  ;;  %v13087_v50 = vpop.eup %8734  ;;  %v3571_v39 = vand.u32 2147483647, %v18926_v27 }
 0x77b   : > { %18932 = vst [vmem:[#allocation168_spill] sm:$0xff] %v13007_v59  ;;  %v3873_v59 = vand.u32 2147483648, %v18931_v24  ;;  %5206 = vrot.lane.b32.xlu2 %v13055_v41, %s9228_s14  ;;  %v3863_v62 = vmul.f32 %v13060_v3, %v18931_v24  ;;  %v13126_v27 = vmul.f32 %v12970_v21, %v3924_v40  ;;  %v18964_v40 = vld [vmem:[#allocation335_spill] sm:$0xff]  ;;  %vm3497_vm1 = vcmp.eq.f32.partialorder %v3496_v6, 8.507059e+37  ;;  %v18977_v24 = vld [vmem:[#allocation134_spill] sm:$0xff] }
 0x77c   : > { %18937 = vst [vmem:[#allocation295_spill] sm:$0xff] %v13042_v13  ;;  %v13081_v13 = vmul.f32 %v18950_v20, %v3455_v30  ;;  %v18955_v30 = vld [vmem:[#allocation311_spill] sm:$0xff]  ;;  %v13118_v20 = vor.u32 1.1754944e-38, %v3978_v2  ;;  %v3968_v2 = vmul.f32 %v13087_v50, %v18935_v26  ;;  %vm3572_vm5 = vcmp.eq.f32.partialorder %v3571_v39, 8.507059e+37 }
 0x77d   : > { %18938 = vst [vmem:[#allocation332_spill] sm:$0xff] %v13044_v48  ;;  %v13078_v11 = vor.u32 1.1754944e-38, %v3873_v59  ;;  %v3330_v48 = vsel %vm13066_vm13, %v18910_v9, %v3326_v55  ;;  %v3714_v59 = vsub.f32 1.0, %v3713_v16  ;;  %8738 = vrcp.f32 %v18955_v30  ;;  %v18956_v9 = vld [vmem:[#allocation269_spill] sm:$0xff] }
 0x77e   : > { %18942 = vst [vmem:[#allocation343_spill] sm:$0xff] %v13055_v41  ;;  %v13102_v55 = vmul.f32 %v18956_v9, %v3530_v14  ;;  %v13114_v16 = vmul.f32 %v12947_v52, %v3819_v43  ;;  %5228 = vrot.lane.b32.xlu1 %v13081_v13, %s9228_s14  ;;  %v3495_v14 = vsel %vm13094_vm15, %v12568_v32, %v3491_v44  ;;  %v13128_v9 = vor.u32 1.1754944e-38, %v3768_v42  ;;  %v13130_v41 = vpop.xlane.xlu0 %2975  ;;  %v13140_v44 = vpop.xlane.xlu2 %2942  ;;  %vm13174_vm15 = vmor %vm3372_vm14, %vm3373_vm9 }
 0x77f   : > { %18949 = vst [vmem:[#allocation338_spill] sm:$0xff] %v13078_v11  ;;  %v3570_v43 = vsel %vm13109_vm8, %v18919_v25, %v3566_v33  ;;  %v3918_v32 = vand.u32 2147483648, %v18955_v30  ;;  %v3335_v42 = vsel %vm3332_vm0, %v18964_v40, %v3330_v48  ;;  %v13147_v63 = vmul.f32 %v13012_v36, %v3714_v59  ;;  %v18966_v25 = vld [vmem:[#allocation351_spill] sm:$0xff]  ;;  %v18970_v11 = vld [vmem:[#allocation150_spill] sm:$0xff]  ;;  %vm13190_vm9 = vmor %vm3537_vm6, %vm3538_vm11 }
 0x780   : > { %18951 = vst [vmem:[#allocation173_spill] sm:$0xff] %v13081_v13  ;;  %5238 = vrot.lane.b32.xlu0 %v13102_v55, %s9228_s14  ;;  %v13143_v34 = vpop.eup %8736  ;;  %v18965_v13 = vld [vmem:[#allocation344_spill] sm:$0xff]  ;;  %v3500_v60 = vsel %vm3497_vm1, %v12604_v35, %v3495_v14  ;;  %v3371_v33 = vadd.f32 %v18940_v51, %v18966_v25  ;;  %vm3583_vm4 = vweird.f32 %v12747_v57  ;;  %v18968_v48 = vld [vmem:[#allocation359_spill] sm:$0xff]  ;;  %v3376_v40 = vand.u32 2147483647, %v18946_v54  ;;  %v18974_v25 = vld [vmem:[#allocation366_spill] sm:$0xff] }
 0x781   : > { %18957 = vst [vmem:[#allocation354_spill] sm:$0xff] %v13102_v55  ;;  %vm3418_vm2 = vweird.f32 %v18965_v13  ;;  %v3864_v55 = vsub.f32 1.0, %v3863_v62  ;;  %v3575_v6 = vsel %vm3572_vm5, %v18968_v48, %v3570_v43  ;;  %vm3417_vm10 = vweird.f32 %v18970_v11  ;;  %v18971_v35 = vld [vmem:[#allocation299_spill] sm:$0xff]  ;;  %v18972_v62 = vld [vmem:[#allocation190_spill] sm:$0xff]  ;;  %vm13208_vm11 = vmor %vm3612_vm12, %vm3613_vm7 }
 0x782   : > { %18960 = vst [vmem:[#allocation209_spill] sm:$0xff] %v13114_v16  ;;  %vm3658_vm13 = vweird.f32 %v12464_v28  ;;  %8740 = vrcp.f32 %v18971_v35  ;;  %v4023_v39 = vand.u32 2147483648, %v18971_v35  ;;  %v13166_v14 = vmul.f32 %v18972_v62, %v3335_v42  ;;  %v18982_v16 = vld [vmem:[#allocation312_spill] sm:$0xff] }
 0x783   : > { %18961 = vst [vmem:[#allocation170_spill] sm:$0xff] %v13118_v20  ;;  %v13159_v59 = vpop.eup %8738  ;;  %v3611_v43 = vadd.f32 %v12391_v1, %v18974_v25  ;;  %vm3582_vm8 = vweird.f32 %v18845_v19  ;;  %v3969_v48 = vsub.f32 1.0, %v3968_v2  ;;  %v13182_v42 = vmul.f32 %v18977_v24, %v3500_v60  ;;  %v18979_v25 = vld [vmem:[#allocation257_spill] sm:$0xff]  ;;  %v18983_v2 = vld [vmem:[#allocation271_spill] sm:$0xff] }
 0x784   : > { %18962 = vst [vmem:[#allocation362_spill] sm:$0xff] %v13130_v41  ;;  %v13153_v41 = vpop.xlane.xlu1 %2963  ;;  %v3541_v62 = vand.u32 2147483647, %v18827_v5  ;;  %vm3657_vm0 = vweird.f32 %v18979_v25  ;;  %8742 = vrcp.f32 %v18982_v16  ;;  %5212 = vrot.lane.b32.xlu2 %v13166_v14, %s9228_s14  ;;  %v13198_v24 = vmul.f32 %v18983_v2, %v3575_v6 }
 0x785   : > { %18963 = vst [vmem:[#allocation247_spill] sm:$0xff] %v13140_v44  ;;  %v3536_v44 = vadd.f32 %v12676_v31, %v12809_v56  ;;  %v3375_v60 = vsel %vm13174_vm15, %v18940_v51, %v3371_v33  ;;  %v3616_v20 = vand.u32 2147483647, %v18952_v61  ;;  %v13213_v52 = vmul.f32 %v13060_v3, %v3864_v55  ;;  %v18989_v33 = vld [vmem:[#allocation313_spill] sm:$0xff] }
 0x786   : > { %18967 = vst [vmem:[#allocation183_spill] sm:$0xff] %v13153_v41  ;;  %v3758_v41 = vmul.f32 %v13143_v34, %v18947_v17  ;;  %v3908_v6 = vmul.f32 %v13159_v59, %v18955_v30  ;;  %v13217_v2 = vor.u32 1.1754944e-38, %v3918_v32  ;;  %5234 = vrot.lane.b32.xlu1 %v13182_v42, %s9228_s14  ;;  %v3813_v61 = vand.u32 2147483648, %v18982_v16 }
 0x787   : > { %18969 = vst [vmem:[#allocation269_spill] sm:$0xff] %v13159_v59  ;;  %v3540_v51 = vsel %vm13190_vm9, %v12676_v31, %v3536_v44  ;;  %8744 = vrcp.f32 %v18989_v33  ;;  %vm3377_vm14 = vcmp.eq.f32.partialorder %v3376_v40, 8.507059e+37  ;;  %v3615_v55 = vsel %vm13208_vm11, %v12391_v1, %v3611_v43  ;;  %v18993_v44 = vld [vmem:[#allocation352_spill] sm:$0xff]  ;;  %v13242_v40 = vpop.xlane.xlu0 %2984  ;;  %v18995_v1 = vld [vmem:[#allocation357_spill] sm:$0xff]  ;;  %vm13268_vm9 = vmor %vm3417_vm10, %vm3418_vm2 }
 0x788   : > { %18973 = vst [vmem:[#allocation335_spill] sm:$0xff] %v13166_v14  ;;  %5244 = vrot.lane.b32.xlu0 %v13198_v24, %s9228_s14  ;;  %v3759_v32 = vsub.f32 1.0, %v3758_v41  ;;  %v13231_v56 = vor.u32 1.1754944e-38, %v4023_v39  ;;  %v18992_v14 = vld [vmem:[#allocation340_spill] sm:$0xff]  ;;  %vm3542_vm7 = vcmp.eq.f32.partialorder %v3541_v62, 8.507059e+37  ;;  %v13236_v31 = vpop.eup %8740  ;;  %vm3463_vm6 = vweird.f32 %v18993_v44  ;;  %vm13291_vm10 = vmor %vm3582_vm8, %vm3583_vm4 }
 0x789   : > { %18978 = vst [vmem:[#allocation344_spill] sm:$0xff] %v13182_v42  ;;  %v13233_v42 = vpop.xlane.xlu2 %2951  ;;  %v3380_v54 = vsel %vm3377_vm14, %v18992_v14, %v3375_v60  ;;  %v3545_v5 = vsel %vm3542_vm7, %v12705_v23, %v3540_v51  ;;  %vm3617_vm12 = vcmp.eq.f32.partialorder %v3616_v20, 8.507059e+37  ;;  %v3416_v41 = vadd.f32 %v18965_v13, %v18995_v1  ;;  %v18996_v43 = vld [vmem:[#allocation216_spill] sm:$0xff]  ;;  %v18998_v20 = vld [vmem:[#allocation207_spill] sm:$0xff]  ;;  %vm13309_vm4 = vmor %vm3657_vm0, %vm3658_vm13 }
 0x78a   : > { %18984 = vst [vmem:[#allocation351_spill] sm:$0xff] %v13198_v24  ;;  %vm3628_vm1 = vweird.f32 %v12822_v4  ;;  %v3909_v39 = vsub.f32 1.0, %v3908_v6  ;;  %v3963_v14 = vand.u32 2147483648, %v18989_v33  ;;  %v3620_v62 = vsel %vm3617_vm12, %v18996_v43, %v3615_v55  ;;  %v18997_v24 = vld [vmem:[#allocation95_spill] sm:$0xff]  ;;  %v19003_v43 = vld [vmem:[#allocation264_spill] sm:$0xff] }
 0x78b   : > { %18987 = vst [vmem:[#allocation359_spill] sm:$0xff] %v13213_v52  ;;  %v3581_v60 = vadd.f32 %v12747_v57, %v12871_v29  ;;  %vm3462_vm5 = vweird.f32 %v18997_v24  ;;  %vm3703_vm15 = vweird.f32 %v12551_v46  ;;  %v13256_v23 = vor.u32 1.1754944e-38, %v3813_v61 }
 0x78c   : > { %18988 = vst [vmem:[#allocation150_spill] sm:$0xff] %v13217_v2  ;;  %v13240_v2 = vmul.f32 %v13087_v50, %v3969_v48  ;;  %v13252_v48 = vpop.eup %8742  ;;  %v13259_v51 = vmul.f32 %v18998_v20, %v3380_v54  ;;  %v3421_v6 = vand.u32 2147483647, %v18970_v11  ;;  %v3656_v1 = vadd.f32 %v12464_v28, %v12591_v22  ;;  %v13278_v54 = vpop.xlane.xlu1 %2972 }
 0x78d   : > { %18990 = vst [vmem:[#allocation299_spill] sm:$0xff] %v13231_v56  ;;  %vm3627_vm11 = vweird.f32 %v18864_v8  ;;  %v13274_v61 = vmul.f32 %v13143_v34, %v3759_v32  ;;  %v4013_v55 = vmul.f32 %v13236_v31, %v18971_v35  ;;  %v13281_v22 = vmul.f32 %v19003_v43, %v3545_v5  ;;  %v13284_v11 = vpop.eup %8744  ;;  %v19010_v5 = vld [vmem:[#allocation180_spill] sm:$0xff] }
 0x78e   : > { %18991 = vst [vmem:[#allocation190_spill] sm:$0xff] %v13233_v42  ;;  %v3586_v20 = vand.u32 2147483647, %v18845_v19  ;;  %v19009_v42 = vld [vmem:[#allocation300_spill] sm:$0xff]  ;;  %5218 = vrot.lane.b32.xlu2 %v13259_v51, %s9228_s14  ;;  %v13299_v43 = vmul.f32 %v19010_v5, %v3620_v62  ;;  %v3661_v30 = vand.u32 2147483647, %v18979_v25  ;;  %v13314_v52 = vmul.f32 %v13159_v59, %v3909_v39 }
 0x78f   : > { %18994 = vst [vmem:[#allocation366_spill] sm:$0xff] %v13242_v40  ;;  %v19006_v40 = vld [vmem:[#allocation234_spill] sm:$0xff]  ;;  %8746 = vrcp.f32 %v19009_v42  ;;  %v3803_v62 = vmul.f32 %v13252_v48, %v18982_v16  ;;  %v13318_v5 = vor.u32 1.1754944e-38, %v3963_v14  ;;  %5240 = vrot.lane.b32.xlu1 %v13281_v22, %s9228_s14  ;;  %v4068_v25 = vand.u32 2147483648, %v19009_v42  ;;  %v19018_v32 = vld [vmem:[#allocation348_spill] sm:$0xff]  ;;  %v19021_v19 = vld [vmem:[#allocation107_spill] sm:$0xff] }
 0x790   : > { %18999 = vst [vmem:[#allocation134_spill] sm:$0xff] %v13259_v51  ;;  %vm3702_vm2 = vweird.f32 %v19006_v40  ;;  %5250 = vrot.lane.b32.xlu0 %v13299_v43, %s9228_s14  ;;  %vm3422_vm13 = vcmp.eq.f32.partialorder %v3421_v6, 8.507059e+37  ;;  %v3660_v39 = vsel %vm13309_vm4, %v12464_v28, %v3656_v1  ;;  %v4014_v14 = vsub.f32 1.0, %v4013_v55  ;;  %v19022_v55 = vld [vmem:[#allocation315_spill] sm:$0xff] }
 0x791   : > { %19002 = vst [vmem:[#allocation257_spill] sm:$0xff] %v13278_v54  ;;  %v3420_v54 = vsel %vm13268_vm9, %v18965_v13, %v3416_v41  ;;  %v3585_v13 = vsel %vm13291_vm10, %v12747_v57, %v3581_v60  ;;  %v19016_v41 = vld [vmem:[#allocation314_spill] sm:$0xff]  ;;  %v3953_v29 = vmul.f32 %v13284_v11, %v18989_v33  ;;  %vm3587_vm8 = vcmp.eq.f32.partialorder %v3586_v20, 8.507059e+37  ;;  %v19019_v60 = vld [vmem:[#allocation316_spill] sm:$0xff]  ;;  %vm13364_vm10 = vmor %vm3462_vm5, %vm3463_vm6 }
 0x792   : > { %19004 = vst [vmem:[#allocation312_spill] sm:$0xff] %v13281_v22  ;;  %8748 = vrcp.f32 %v19016_v41  ;;  %v13334_v22 = vpop.xlane.xlu2 %2960  ;;  %v3425_v57 = vsel %vm3422_vm13, %v19018_v32, %v3420_v54  ;;  %vm3508_vm0 = vweird.f32 %v19019_v60  ;;  %v3858_v51 = vand.u32 2147483648, %v19016_v41  ;;  %vm13382_vm6 = vmor %vm3627_vm11, %vm3628_vm1 }
 0x793   : > { %19005 = vst [vmem:[#allocation271_spill] sm:$0xff] %v13284_v11  ;;  %v3590_v6 = vsel %vm3587_vm8, %v12786_v7, %v3585_v13  ;;  %vm3662_vm14 = vcmp.eq.f32.partialorder %v3661_v30, 8.507059e+37  ;;  %v3461_v28 = vadd.f32 %v18993_v44, %v19021_v19  ;;  %vm3673_vm7 = vweird.f32 %v12901_v15  ;;  %v19026_v30 = vld [vmem:[#allocation220_spill] sm:$0xff]  ;;  %vm13402_vm1 = vmor %vm3702_vm2, %vm3703_vm15 }
 0x794   : > { %19011 = vst [vmem:[#allocation340_spill] sm:$0xff] %v13299_v43  ;;  %v3804_v1 = vsub.f32 1.0, %v3803_v62  ;;  %8750 = vrcp.f32 %v19022_v55  ;;  %v19023_v43 = vld [vmem:[#allocation217_spill] sm:$0xff]  ;;  %v3626_v20 = vadd.f32 %v12822_v4, %v12950_v0  ;;  %v4008_v7 = vand.u32 2147483648, %v19022_v55  ;;  %v19028_v19 = vld [vmem:[#allocation376_spill] sm:$0xff] }
 0x795   : > { %19014 = vst [vmem:[#allocation352_spill] sm:$0xff] %v13314_v52  ;;  %v3665_v54 = vsel %vm3662_vm14, %v19023_v43, %v3660_v39  ;;  %v13349_v32 = vpop.eup %8746  ;;  %v13355_v13 = vmul.f32 %v19026_v30, %v3425_v57  ;;  %v3466_v62 = vand.u32 2147483647, %v18997_v24  ;;  %v3701_v33 = vadd.f32 %v12551_v46, %v19028_v19  ;;  %v19032_v57 = vld [vmem:[#allocation100_spill] sm:$0xff]  ;;  %v19034_v19 = vld [vmem:[#allocation301_spill] sm:$0xff] }
 0x796   : > { %19015 = vst [vmem:[#allocation357_spill] sm:$0xff] %v13318_v5  ;;  %v13339_v5 = vpop.permute.xlu0 %5168  ;;  %vm3672_vm4 = vweird.f32 %v18884_v45  ;;  %v3954_v43 = vsub.f32 1.0, %v3953_v29  ;;  %v13369_v39 = vor.u32 1.1754944e-38, %v4068_v25  ;;  %v13372_v30 = vmul.f32 %v19032_v57, %v3590_v6  ;;  %v19037_v29 = vld [vmem:[#allocation277_spill] sm:$0xff] }
 0x797   : > { %19017 = vst [vmem:[#allocation216_spill] sm:$0xff] %v13334_v22  ;;  %v19024_v22 = vld [vmem:[#allocation240_spill] sm:$0xff]  ;;  %v3631_v52 = vand.u32 2147483647, %v18864_v8  ;;  %vm3747_vm13 = vweird.f32 %v19034_v19  ;;  %v13387_v25 = vmul.f32 %v13236_v31, %v4014_v14  ;;  %5224 = vrot.lane.b32.xlu2 %v13355_v13, %s9228_s14  ;;  %v13392_v6 = vmul.f32 %v19037_v29, %v3665_v54  ;;  %v13411_v29 = vpop.xlane.xlu1 %2981  ;;  %v19048_v24 = vld [vmem:[#allocation225_spill] sm:$0xff] }
 0x798   : > { %19020 = vst [vmem:[#allocation95_spill] sm:$0xff] %v13339_v5  ;;  %vm3507_vm12 = vweird.f32 %v19024_v22  ;;  %v19025_v5 = vld [vmem:[#allocation322_spill] sm:$0xff]  ;;  %v13375_v59 = vpop.eup %8748  ;;  %v3465_v57 = vsel %vm13364_vm10, %v18993_v44, %v3461_v28  ;;  %v4058_v14 = vmul.f32 %v13349_v32, %v19009_v42  ;;  %v19041_v54 = vld [vmem:[#allocation224_spill] sm:$0xff]  ;;  %5246 = vrot.lane.b32.xlu1 %v13372_v30, %s9228_s14  ;;  %v3630_v44 = vsel %vm13382_vm6, %v12822_v4, %v3626_v20 }
 0x799   : > { %vm3748_vm9 = vweird.f32 %v19025_v5  ;;  %19027 = vst [vmem:[#allocation207_spill] sm:$0xff] %v13355_v13  ;;  %v13408_v13 = vor.u32 1.1754944e-38, %v3858_v51  ;;  %8752 = vrcp.f32 %v19041_v54  ;;  %v13421_v28 = vor.u32 1.1754944e-38, %v4008_v7  ;;  %5256 = vrot.lane.b32.xlu0 %v13392_v6, %s9228_s14  ;;  %v19047_v20 = vld [vmem:[#allocation356_spill] sm:$0xff]  ;;  %vm13465_vm6 = vmor %vm3507_vm12, %vm3508_vm0 }
 0x79a   : > { %19031 = vst [vmem:[#allocation264_spill] sm:$0xff] %v13369_v39  ;;  %v3706_v39 = vand.u32 2147483647, %v19006_v40  ;;  %v13419_v40 = vmul.f32 %v13252_v48, %v3804_v1  ;;  %vm3467_vm5 = vcmp.eq.f32.partialorder %v3466_v62, 8.507059e+37  ;;  %v3705_v51 = vsel %vm13402_vm1, %v12551_v46, %v3701_v33  ;;  %v13428_v0 = vpop.eup %8750  ;;  %v13435_v1 = vpop.xlane.xlu2 %2969  ;;  %v19050_v33 = vld [vmem:[#allocation318_spill] sm:$0xff]  ;;  %vm13481_vm0 = vmor %vm3672_vm4, %vm3673_vm7 }
 0x79b   : > { %19033 = vst [vmem:[#allocation234_spill] sm:$0xff] %v13372_v30  ;;  %v13431_v30 = vmul.f32 %v13284_v11, %v3954_v43  ;;  %v3848_v4 = vmul.f32 %v13375_v59, %v19016_v41  ;;  %v3470_v7 = vsel %vm3467_vm5, %v19047_v20, %v3465_v57  ;;  %vm3632_vm15 = vcmp.eq.f32.partialorder %v3631_v52, 8.507059e+37  ;;  %v19053_v20 = vld [vmem:[#allocation202_spill] sm:$0xff]  ;;  %v19064_v11 = vld [vmem:[#allocation208_spill] sm:$0xff]  ;;  %vm13499_vm7 = vmor %vm3747_vm13, %vm3748_vm9 }
 0x79c   : > { %19038 = vst [vmem:[#allocation300_spill] sm:$0xff] %v13392_v6  ;;  %vm3553_vm11 = vweird.f32 %v19048_v24  ;;  %v4113_v62 = vand.u32 2147483648, %v19041_v54  ;;  %v3635_v46 = vsel %vm3632_vm15, %v12848_v38, %v3630_v44  ;;  %vm3707_vm2 = vcmp.eq.f32.partialorder %v3706_v39, 8.507059e+37  ;;  %v19054_v39 = vld [vmem:[#allocation235_spill] sm:$0xff] }
 0x79d   : > { %19042 = vst [vmem:[#allocation180_spill] sm:$0xff] %v13411_v29  ;;  %v3506_v43 = vadd.f32 %v19019_v60, %v19050_v33  ;;  %vm3718_vm8 = vweird.f32 %v13012_v36  ;;  %v4059_v8 = vsub.f32 1.0, %v4058_v14  ;;  %v19051_v29 = vld [vmem:[#allocation189_spill] sm:$0xff]  ;;  %v3671_v52 = vadd.f32 %v12901_v15, %v13040_v58 }
 0x79e   : > { %19043 = vst [vmem:[#allocation314_spill] sm:$0xff] %v13421_v28  ;;  %v13440_v6 = vpop.permute.xlu0 %5174  ;;  %8754 = vrcp.f32 %v19051_v29  ;;  %vm3552_vm14 = vweird.f32 %v19053_v20  ;;  %vm3793_vm10 = vweird.f32 %v12720_v18  ;;  %v3903_v38 = vand.u32 2147483648, %v19051_v29 }
 0x79f   : > { %19044 = vst [vmem:[#allocation348_spill] sm:$0xff] %v13428_v0  ;;  %v13454_v44 = vmul.f32 %v19054_v39, %v3470_v7  ;;  %v3511_v33 = vand.u32 2147483647, %v19024_v22  ;;  %v13459_v28 = vpop.eup %8752  ;;  %vm3717_vm1 = vweird.f32 %v18911_v53  ;;  %v19059_v7 = vld [vmem:[#allocation139_spill] sm:$0xff]  ;;  %8756 = vrcp.f32 %v19064_v11  ;;  %v13526_v22 = vpop.xlane.xlu1 %2990 }
 0x7a0   : > { %19045 = vst [vmem:[#allocation316_spill] sm:$0xff] %v13431_v30  ;;  %v13473_v39 = vmul.f32 %v19059_v7, %v3635_v46  ;;  %v19061_v30 = vld [vmem:[#allocation304_spill] sm:$0xff]  ;;  %v3510_v7 = vsel %vm13465_vm6, %v19019_v60, %v3506_v43  ;;  %v13504_v56 = vmul.f32 %v13349_v32, %v4059_v8  ;;  %v3675_v60 = vsel %vm13481_vm0, %v12901_v15, %v3671_v52  ;;  %vm13561_vm0 = vmor %vm3552_vm14, %vm3553_vm11 }
 0x7a1   : > { %19046 = vst [vmem:[#allocation107_spill] sm:$0xff] %v13435_v1  ;;  %v19052_v1 = vld [vmem:[#allocation371_spill] sm:$0xff]  ;;  %vm3792_vm5 = vweird.f32 %v19061_v30  ;;  %5230 = vrot.lane.b32.xlu2 %v13454_v44, %s9228_s14  ;;  %v13516_v43 = vor.u32 1.1754944e-38, %v3903_v38  ;;  %vm3512_vm12 = vcmp.eq.f32.partialorder %v3511_v33, 8.507059e+37  ;;  %v19073_v52 = vld [vmem:[#allocation320_spill] sm:$0xff]  ;;  %vm3763_vm15 = vweird.f32 %v13143_v34  ;;  %vm13580_vm11 = vmor %vm3717_vm1, %vm3718_vm8 }
 0x7a2   : > { %19049 = vst [vmem:[#allocation217_spill] sm:$0xff] %v13440_v6  ;;  %v3710_v57 = vsel %vm3707_vm2, %v19052_v1, %v3705_v51  ;;  %v19056_v6 = vld [vmem:[#allocation382_spill] sm:$0xff]  ;;  %v3849_v51 = vsub.f32 1.0, %v3848_v4  ;;  %v3998_v1 = vmul.f32 %v13428_v0, %v19022_v55  ;;  %v3751_v55 = vand.u32 2147483647, %v19034_v19  ;;  %5252 = vrot.lane.b32.xlu1 %v13473_v39, %s9228_s14  ;;  %v13528_v15 = vpop.xlane.xlu2 %2978  ;;  %vm13600_vm8 = vmor %vm3792_vm5, %vm3793_vm10 }
 0x7a3   : > { %19055 = vst [vmem:[#allocation240_spill] sm:$0xff] %v13454_v44  ;;  %v3746_v14 = vadd.f32 %v19025_v5, %v19056_v6  ;;  %v3676_v6 = vand.u32 2147483647, %v18884_v45  ;;  %v19065_v4 = vld [vmem:[#allocation286_spill] sm:$0xff]  ;;  %v13506_v44 = vor.u32 1.1754944e-38, %v4113_v62  ;;  %v4103_v19 = vmul.f32 %v13459_v28, %v19041_v54 }
 0x7a4   : > { %19060 = vst [vmem:[#allocation322_spill] sm:$0xff] %v13473_v39  ;;  %v13489_v46 = vmul.f32 %v19065_v4, %v3710_v57  ;;  %v4053_v57 = vand.u32 2147483648, %v19064_v11  ;;  %v13523_v8 = vpop.eup %8754  ;;  %v3999_v58 = vsub.f32 1.0, %v3998_v1  ;;  %v19070_v4 = vld [vmem:[#allocation198_spill] sm:$0xff]  ;;  %v3515_v38 = vsel %vm3512_vm12, %v19073_v52, %v3510_v7  ;;  %v19074_v39 = vld [vmem:[#allocation365_spill] sm:$0xff] }
 0x7a5   : > { %19069 = vst [vmem:[#allocation376_spill] sm:$0xff] %v13506_v44  ;;  %v3750_v62 = vsel %vm13499_vm7, %v19025_v5, %v3746_v14  ;;  %8758 = vrcp.f32 %v19070_v4  ;;  %vm3677_vm9 = vcmp.eq.f32.partialorder %v3676_v6, 8.507059e+37  ;;  %vm3598_vm4 = vweird.f32 %v19074_v39  ;;  %v19076_v14 = vld [vmem:[#allocation370_spill] sm:$0xff]  ;;  %v19078_v6 = vld [vmem:[#allocation377_spill] sm:$0xff]  ;;  %v19114_v44 = vld [vmem:[#allocation283_spill] sm:$0xff] }
 0x7a6   : > { %19066 = vst [vmem:[#allocation220_spill] sm:$0xff] %v13489_v46  ;;  %5262 = vrot.lane.b32.xlu0 %v13489_v46, %s9228_s14  ;;  %v13533_v33 = vmul.f32 %v13375_v59, %v3849_v51  ;;  %v13535_v46 = vpop.permute.xlu0 %5178  ;;  %v3680_v5 = vsel %vm3677_vm9, %v12936_v10, %v3675_v60  ;;  %vm3752_vm13 = vcmp.eq.f32.partialorder %v3751_v55, 8.507059e+37  ;;  %v3551_v1 = vadd.f32 %v19048_v24, %v19076_v14  ;;  %v19081_v55 = vld [vmem:[#allocation241_spill] sm:$0xff] }
 0x7a7   : > { %19071 = vst [vmem:[#allocation100_spill] sm:$0xff] %v13526_v22  ;;  %v13541_v45 = vor.u32 1.1754944e-38, %v4053_v57  ;;  %v4158_v7 = vand.u32 2147483648, %v19070_v4  ;;  %v3755_v52 = vsel %vm3752_vm13, %v19078_v6, %v3750_v62  ;;  %v3716_v51 = vadd.f32 %v13012_v36, %v13147_v63  ;;  %v13547_v22 = vpop.eup %8756 }
 0x7a8   : > { %19072 = vst [vmem:[#allocation301_spill] sm:$0xff] %v13528_v15  ;;  %vm3838_vm6 = vweird.f32 %v12790_v37  ;;  %v4104_v10 = vsub.f32 1.0, %v4103_v19  ;;  %v13552_v60 = vmul.f32 %v19081_v55, %v3515_v38  ;;  %v3556_v57 = vand.u32 2147483647, %v19053_v20  ;;  %v19086_v38 = vld [vmem:[#allocation158_spill] sm:$0xff]  ;;  %v19088_v55 = vld [vmem:[#allocation293_spill] sm:$0xff]  ;;  %v13626_v20 = vpop.permute.xlu1 %5172 }
 0x7a9   : > { %19075 = vst [vmem:[#allocation277_spill] sm:$0xff] %v13535_v46  ;;  %v19080_v46 = vld [vmem:[#allocation227_spill] sm:$0xff]  ;;  %v3791_v14 = vadd.f32 %v12720_v18, %v12844_v47  ;;  %vm3762_vm7 = vweird.f32 %v18947_v17  ;;  %v13567_v19 = vmul.f32 %v13428_v0, %v3999_v58  ;;  %v3893_v62 = vmul.f32 %v13523_v8, %v19051_v29  ;;  %v19091_v58 = vld [vmem:[#allocation178_spill] sm:$0xff]  ;;  %v19092_v15 = vld [vmem:[#allocation88_spill] sm:$0xff] }
 0x7aa   : > { %19077 = vst [vmem:[#allocation224_spill] sm:$0xff] %v13541_v45  ;;  %vm3597_vm2 = vweird.f32 %v19080_v46  ;;  %v13572_v6 = vmul.f32 %v19086_v38, %v3680_v5  ;;  %v3721_v47 = vand.u32 2147483647, %v18911_v53  ;;  %vm3837_vm12 = vweird.f32 %v19088_v55  ;;  %5236 = vrot.lane.b32.xlu2 %v13552_v60, %s9228_s14 }
 0x7ab   : > { %19079 = vst [vmem:[#allocation356_spill] sm:$0xff] %v13547_v22  ;;  %8760 = vrcp.f32 %v19091_v58  ;;  %v13588_v5 = vmul.f32 %v19092_v15, %v3755_v52  ;;  %v3555_v38 = vsel %vm13561_vm0, %v19048_v24, %v3551_v1  ;;  %v3796_v45 = vand.u32 2147483647, %v19061_v30  ;;  %v19097_v1 = vld [vmem:[#allocation222_spill] sm:$0xff] }
 0x7ac   : > { %19082 = vst [vmem:[#allocation225_spill] sm:$0xff] %v13552_v60  ;;  %v4043_v15 = vmul.f32 %v13547_v22, %v19064_v11  ;;  %v13606_v52 = vor.u32 1.1754944e-38, %v4158_v7  ;;  %v3948_v63 = vand.u32 2147483648, %v19091_v58  ;;  %5258 = vrot.lane.b32.xlu1 %v13572_v6, %s9228_s14  ;;  %v3720_v24 = vsel %vm13580_vm11, %v13012_v36, %v3716_v51  ;;  %v13624_v11 = vpop.xlane.xlu2 %2987  ;;  %v19100_v36 = vld [vmem:[#allocation329_spill] sm:$0xff]  ;;  %vm13657_vm11 = vmor %vm3597_vm2, %vm3598_vm4 }
 0x7ad   : > { %19085 = vst [vmem:[#allocation318_spill] sm:$0xff] %v13567_v19  ;;  %v13594_v19 = vpop.eup %8758  ;;  %v13615_v30 = vmul.f32 %v13459_v28, %v4104_v10  ;;  %8762 = vrcp.f32 %v19097_v1  ;;  %vm3557_vm14 = vcmp.eq.f32.partialorder %v3556_v57, 8.507059e+37  ;;  %v3795_v7 = vsel %vm13600_vm8, %v12720_v18, %v3791_v14  ;;  %v19101_v10 = vld [vmem:[#allocation302_spill] sm:$0xff]  ;;  %v19103_v18 = vld [vmem:[#allocation305_spill] sm:$0xff]  ;;  %vm13678_vm4 = vmor %vm3762_vm7, %vm3763_vm15 }
 0x7ae   : > { %19087 = vst [vmem:[#allocation189_spill] sm:$0xff] %v13572_v6  ;;  %5268 = vrot.lane.b32.xlu0 %v13588_v5, %s9228_s14  ;;  %v3894_v60 = vsub.f32 1.0, %v3893_v62  ;;  %v4098_v6 = vand.u32 2147483648, %v19097_v1  ;;  %v3560_v51 = vsel %vm3557_vm14, %v19100_v36, %v3555_v38  ;;  %vm3722_vm10 = vcmp.eq.f32.partialorder %v3721_v47, 8.507059e+37  ;;  %v13632_v57 = vpop.permute.xlu0 %5184  ;;  %v19105_v38 = vld [vmem:[#allocation380_spill] sm:$0xff]  ;;  %vm13695_vm15 = vmor %vm3837_vm12, %vm3838_vm6 }
 0x7af   : > { %19093 = vst [vmem:[#allocation371_spill] sm:$0xff] %v13588_v5  ;;  %vm3643_vm1 = vweird.f32 %v19101_v10  ;;  %v4148_v5 = vmul.f32 %v13594_v19, %v19070_v4  ;;  %v3725_v53 = vsel %vm3722_vm10, %v13024_v49, %v3720_v24  ;;  %vm3797_vm5 = vcmp.eq.f32.partialorder %v3796_v45, 8.507059e+37  ;;  %v19107_v45 = vld [vmem:[#allocation248_spill] sm:$0xff] }
 0x7b0   : > { %19096 = vst [vmem:[#allocation202_spill] sm:$0xff] %v13606_v52  ;;  %v3596_v14 = vadd.f32 %v19074_v39, %v19103_v18  ;;  %vm3808_vm9 = vweird.f32 %v13252_v48  ;;  %v4044_v62 = vsub.f32 1.0, %v4043_v15  ;;  %v3800_v47 = vsel %vm3797_vm5, %v19105_v38, %v3795_v7  ;;  %v19106_v52 = vld [vmem:[#allocation113_spill] sm:$0xff]  ;;  %v19109_v18 = vld [vmem:[#allocation223_spill] sm:$0xff] }
 0x7b1   : > { %19098 = vst [vmem:[#allocation235_spill] sm:$0xff] %v13624_v11  ;;  %v3761_v36 = vadd.f32 %v13143_v34, %v13274_v61  ;;  %v13642_v11 = vpop.eup %8760  ;;  %vm3642_vm13 = vweird.f32 %v19106_v52  ;;  %vm3883_vm0 = vweird.f32 %v12867_v12  ;;  %v13648_v24 = vmul.f32 %v19107_v45, %v3560_v51  ;;  %v19112_v38 = vld [vmem:[#allocation71_spill] sm:$0xff] }
 0x7b2   : > { %19099 = vst [vmem:[#allocation382_spill] sm:$0xff] %v13626_v20  ;;  %v19104_v20 = vld [vmem:[#allocation181_spill] sm:$0xff]  ;;  %v3601_v15 = vand.u32 2147483647, %v19080_v46  ;;  %vm3807_vm8 = vweird.f32 %v18982_v16  ;;  %v13663_v7 = vmul.f32 %v13523_v8, %v3894_v60  ;;  %v13665_v51 = vor.u32 1.1754944e-38, %v3948_v63  ;;  %v19117_v63 = vld [vmem:[#allocation112_spill] sm:$0xff] }
 0x7b3   : > { %19102 = vst [vmem:[#allocation139_spill] sm:$0xff] %v13632_v57  ;;  %8764 = vrcp.f32 %v19104_v20  ;;  %v4203_v49 = vand.u32 2147483648, %v19104_v20  ;;  %v3836_v57 = vadd.f32 %v12790_v37, %v19109_v18  ;;  %v13668_v45 = vmul.f32 %v19112_v38, %v3725_v53  ;;  %v13671_v0 = vpop.eup %8762  ;;  %5242 = vrot.lane.b32.xlu2 %v13648_v24, %s9228_s14 }
 0x7b4   : > { %19108 = vst [vmem:[#allocation304_spill] sm:$0xff] %v13648_v24  ;;  %v3766_v18 = vand.u32 2147483647, %v18947_v17  ;;  %vm3882_vm14 = vweird.f32 %v19114_v44  ;;  %v4149_v60 = vsub.f32 1.0, %v4148_v5  ;;  %v13685_v53 = vmul.f32 %v19117_v63, %v3800_v47  ;;  %v19122_v47 = vld [vmem:[#allocation110_spill] sm:$0xff]  ;;  %v19130_v17 = vld [vmem:[#allocation328_spill] sm:$0xff] }
 0x7b5   : > { %19113 = vst [vmem:[#allocation286_spill] sm:$0xff] %v13668_v45  ;;  %v3600_v38 = vsel %vm13657_vm11, %v19074_v39, %v3596_v14  ;;  %v3841_v4 = vand.u32 2147483647, %v19088_v55  ;;  %v3938_v5 = vmul.f32 %v13642_v11, %v19091_v58  ;;  %v13701_v24 = vor.u32 1.1754944e-38, %v4098_v6  ;;  %5264 = vrot.lane.b32.xlu1 %v13668_v45, %s9228_s14  ;;  %v19128_v45 = vld [vmem:[#allocation378_spill] sm:$0xff] }
 0x7b6   : > { %19118 = vst [vmem:[#allocation320_spill] sm:$0xff] %v13685_v53  ;;  %8766 = vrcp.f32 %v19122_v47  ;;  %v3765_v39 = vsel %vm13678_vm4, %v13143_v34, %v3761_v36  ;;  %v13710_v55 = vmul.f32 %v13547_v22, %v4044_v62  ;;  %v13712_v14 = vor.u32 1.1754944e-38, %v4203_v49  ;;  %5274 = vrot.lane.b32.xlu0 %v13685_v53, %s9228_s14  ;;  %v13724_v36 = vpop.permute.xlu2 %5170  ;;  %v13726_v62 = vpop.permute.xlu1 %5180  ;;  %v19127_v49 = vld [vmem:[#allocation210_spill] sm:$0xff]  ;;  %vm13758_vm4 = vmor %vm3642_vm13, %vm3643_vm1 }
 0x7b7   : > { %19121 = vst [vmem:[#allocation365_spill] sm:$0xff] %v13701_v24  ;;  %vm3602_vm2 = vcmp.eq.f32.partialorder %v3601_v15, 8.507059e+37  ;;  %v3840_v6 = vsel %vm13695_vm15, %v12790_v37, %v3836_v57  ;;  %v4088_v63 = vmul.f32 %v13671_v0, %v19097_v1  ;;  %v3993_v34 = vand.u32 2147483648, %v19122_v47  ;;  %v13733_v37 = vpop.permute.xlu0 %5190  ;;  %v19141_v1 = vld [vmem:[#allocation291_spill] sm:$0xff]  ;;  %vm13774_vm1 = vmor %vm3807_vm8, %vm3808_vm9 }
 0x7b8   : > { %19123 = vst [vmem:[#allocation370_spill] sm:$0xff] %v13710_v55  ;;  %v3605_v46 = vsel %vm3602_vm2, %v19127_v49, %v3600_v38  ;;  %vm3767_vm6 = vcmp.eq.f32.partialorder %v3766_v18, 8.507059e+37  ;;  %vm3688_vm7 = vweird.f32 %v19128_v45  ;;  %v13731_v15 = vmul.f32 %v13594_v19, %v4149_v60  ;;  %v19132_v38 = vld [vmem:[#allocation386_spill] sm:$0xff]  ;;  %v19133_v60 = vld [vmem:[#allocation303_spill] sm:$0xff]  ;;  %v19144_v55 = vld [vmem:[#allocation317_spill] sm:$0xff] }
 0x7b9   : > { %19124 = vst [vmem:[#allocation377_spill] sm:$0xff] %v13712_v14  ;;  %v13719_v61 = vpop.eup %8764  ;;  %v3770_v57 = vsel %vm3767_vm6, %v13128_v9, %v3765_v39  ;;  %vm3842_vm12 = vcmp.eq.f32.partialorder %v3841_v4, 8.507059e+37  ;;  %v3641_v53 = vadd.f32 %v19101_v10, %v19130_v17  ;;  %vm3853_vm10 = vweird.f32 %v13375_v59  ;;  %v19134_v4 = vld [vmem:[#allocation123_spill] sm:$0xff]  ;;  %vm13792_vm9 = vmor %vm3882_vm14, %vm3883_vm0 }
 0x7ba   : > { %19125 = vst [vmem:[#allocation227_spill] sm:$0xff] %v13724_v36  ;;  %v3939_v36 = vsub.f32 1.0, %v3938_v5  ;;  %v3845_v18 = vsel %vm3842_vm12, %v19132_v38, %v3840_v6  ;;  %v3806_v49 = vadd.f32 %v13252_v48, %v13419_v40  ;;  %vm3687_vm5 = vweird.f32 %v19133_v60  ;;  %v19139_v38 = vld [vmem:[#allocation90_spill] sm:$0xff] }
 0x7bb   : > { %19126 = vst [vmem:[#allocation241_spill] sm:$0xff] %v13726_v62  ;;  %v19131_v62 = vld [vmem:[#allocation200_spill] sm:$0xff]  ;;  %vm3928_vm11 = vweird.f32 %v12970_v21  ;;  %v13747_v39 = vmul.f32 %v19134_v4, %v3605_v46  ;;  %v3646_v17 = vand.u32 2147483647, %v19106_v52  ;;  %vm3852_vm15 = vweird.f32 %v19016_v41 }
 0x7bc   : > { %19129 = vst [vmem:[#allocation158_spill] sm:$0xff] %v13733_v37  ;;  %8768 = vrcp.f32 %v19131_v62  ;;  %v4143_v9 = vand.u32 2147483648, %v19131_v62  ;;  %v19136_v37 = vld [vmem:[#allocation119_spill] sm:$0xff]  ;;  %v13752_v24 = vpop.eup %8766  ;;  %v4089_v6 = vsub.f32 1.0, %v4088_v63  ;;  %v4193_v46 = vmul.f32 %v13719_v61, %v19104_v20  ;;  %v19145_v63 = vld [vmem:[#allocation133_spill] sm:$0xff] }
 0x7bd   : > { %19135 = vst [vmem:[#allocation293_spill] sm:$0xff] %v13747_v39  ;;  %v3881_v5 = vadd.f32 %v12867_v12, %v19136_v37  ;;  %v13766_v4 = vmul.f32 %v19139_v38, %v3770_v57  ;;  %v3811_v37 = vand.u32 2147483647, %v18982_v16  ;;  %vm3927_vm2 = vweird.f32 %v19141_v1  ;;  %5248 = vrot.lane.b32.xlu2 %v13747_v39, %s9228_s14  ;;  %v19154_v20 = vld [vmem:[#allocation383_spill] sm:$0xff] }
 0x7be   : > { %8770 = vrcp.f32 %v19144_v55  ;;  %v13782_v57 = vmul.f32 %v19145_v63, %v3845_v18  ;;  %v3645_v38 = vsel %vm13758_vm4, %v19101_v10, %v3641_v53  ;;  %v3886_v14 = vand.u32 2147483647, %v19114_v44  ;;  %v19149_v53 = vld [vmem:[#allocation193_spill] sm:$0xff]  ;;  %v13819_v52 = vpop.permute.xlu2 %5176 }
 0x7bf   : > { %19140 = vst [vmem:[#allocation178_spill] sm:$0xff] %v13766_v4  ;;  %v13797_v22 = vmul.f32 %v13642_v11, %v3939_v36  ;;  %v13799_v39 = vor.u32 1.1754944e-38, %v3993_v34  ;;  %v4248_v18 = vand.u32 2147483648, %v19144_v55  ;;  %5270 = vrot.lane.b32.xlu1 %v13766_v4, %s9228_s14  ;;  %v3810_v10 = vsel %vm13774_vm1, %v13252_v48, %v3806_v49  ;;  %v13821_v48 = vpop.permute.xlu1 %5186  ;;  %v19153_v49 = vld [vmem:[#allocation373_spill] sm:$0xff]  ;;  %vm13854_vm1 = vmor %vm3687_vm5, %vm3688_vm7 }
 0x7c0   : > { %19146 = vst [vmem:[#allocation88_spill] sm:$0xff] %v13782_v57  ;;  %v3983_v44 = vmul.f32 %v13752_v24, %v19122_v47  ;;  %8772 = vrcp.f32 %v19149_v53  ;;  %5280 = vrot.lane.b32.xlu0 %v13782_v57, %s9228_s14  ;;  %vm3647_vm13 = vcmp.eq.f32.partialorder %v3646_v17, 8.507059e+37  ;;  %v3885_v34 = vsel %vm13792_vm9, %v12867_v12, %v3881_v5  ;;  %v13828_v57 = vpop.permute.xlu0 %5196  ;;  %v19157_v5 = vld [vmem:[#allocation385_spill] sm:$0xff]  ;;  %vm13875_vm5 = vmor %vm3852_vm15, %vm3853_vm10 }
 0x7c1   : > { %v4194_v40 = vsub.f32 1.0, %v4193_v46  ;;  %v13817_v63 = vor.u32 1.1754944e-38, %v4143_v9  ;;  %19151 = vst [vmem:[#allocation302_spill] sm:$0xff] %v13819_v52  ;;  %v3650_v4 = vsel %vm3647_vm13, %v19153_v49, %v3645_v38  ;;  %vm3812_vm0 = vcmp.eq.f32.partialorder %v3811_v37, 8.507059e+37  ;;  %v19158_v37 = vld [vmem:[#allocation388_spill] sm:$0xff]  ;;  %v19159_v52 = vld [vmem:[#allocation306_spill] sm:$0xff]  ;;  %vm13893_vm10 = vmor %vm3927_vm2, %vm3928_vm11 }
 0x7c2   : > { %v13815_v36 = vpop.eup %8768  ;;  %19152 = vst [vmem:[#allocation305_spill] sm:$0xff] %v13821_v48  ;;  %vm3733_vm8 = vweird.f32 %v19154_v20  ;;  %v13826_v17 = vmul.f32 %v13671_v0, %v4089_v6  ;;  %v3815_v12 = vsel %vm3812_vm0, %v13256_v23, %v3810_v10  ;;  %vm3887_vm14 = vcmp.eq.f32.partialorder %v3886_v14, 8.507059e+37  ;;  %v19160_v14 = vld [vmem:[#allocation260_spill] sm:$0xff] }
 0x7c3   : > { %19150 = vst [vmem:[#allocation329_spill] sm:$0xff] %v13817_v63  ;;  %v3686_v9 = vadd.f32 %v19128_v45, %v19157_v5  ;;  %vm3898_vm6 = vweird.f32 %v13523_v8  ;;  %v13834_v46 = vor.u32 1.1754944e-38, %v4248_v18  ;;  %v4038_v38 = vand.u32 2147483648, %v19149_v53 }
 0x7c4   : > { %19155 = vst [vmem:[#allocation380_spill] sm:$0xff] %v13826_v17  ;;  %v3890_v16 = vsel %vm3887_vm14, %v19158_v37, %v3885_v34  ;;  %v3851_v6 = vadd.f32 %v13375_v59, %v13533_v33  ;;  %v13840_v49 = vpop.eup %8770  ;;  %vm3732_vm12 = vweird.f32 %v19159_v52  ;;  %vm3973_vm4 = vweird.f32 %v13087_v50  ;;  %v19164_v34 = vld [vmem:[#allocation106_spill] sm:$0xff] }
 0x7c5   : > { %19156 = vst [vmem:[#allocation113_spill] sm:$0xff] %v13828_v57  ;;  %v3984_v23 = vsub.f32 1.0, %v3983_v44  ;;  %v13845_v10 = vmul.f32 %v19160_v14, %v3650_v4  ;;  %v3691_v18 = vand.u32 2147483647, %v19133_v60  ;;  %v3926_v5 = vadd.f32 %v12970_v21, %v13126_v27  ;;  %v19177_v60 = vld [vmem:[#allocation297_spill] sm:$0xff] }
 0x7c6   : > { %vm3897_vm9 = vweird.f32 %v19051_v29  ;;  %v13860_v44 = vmul.f32 %v13719_v61, %v4194_v40  ;;  %v4133_v4 = vmul.f32 %v13815_v36, %v19131_v62  ;;  %v13865_v37 = vmul.f32 %v19164_v34, %v3815_v12  ;;  %v13868_v14 = vpop.eup %8772  ;;  %v19168_v40 = vld [vmem:[#allocation319_spill] sm:$0xff]  ;;  %v19169_v12 = vld [vmem:[#allocation149_spill] sm:$0xff]  ;;  %v19182_v62 = vld [vmem:[#allocation308_spill] sm:$0xff] }
 0x7c7   : > { %19161 = vst [vmem:[#allocation248_spill] sm:$0xff] %v13845_v10  ;;  %v3856_v27 = vand.u32 2147483647, %v19016_v41  ;;  %vm3972_vm7 = vweird.f32 %v18935_v26  ;;  %8774 = vrcp.f32 %v19168_v40  ;;  %5254 = vrot.lane.b32.xlu2 %v13845_v10, %s9228_s14  ;;  %v13883_v34 = vmul.f32 %v19169_v12, %v3890_v16 }
 0x7c8   : > { %19165 = vst [vmem:[#allocation223_spill] sm:$0xff] %v13865_v37  ;;  %v3690_v48 = vsel %vm13854_vm1, %v19128_v45, %v3686_v9  ;;  %v3931_v57 = vand.u32 2147483647, %v19141_v1  ;;  %v4238_v10 = vmul.f32 %v13840_v49, %v19144_v55  ;;  %v13899_v63 = vor.u32 1.1754944e-38, %v4038_v38  ;;  %5276 = vrot.lane.b32.xlu1 %v13865_v37, %s9228_s14  ;;  %v19173_v9 = vld [vmem:[#allocation172_spill] sm:$0xff]  ;;  %v13918_v37 = vpop.permute.xlu2 %5182 }
 0x7c9   : > { %19170 = vst [vmem:[#allocation71_spill] sm:$0xff] %v13883_v34  ;;  %v4188_v16 = vand.u32 2147483648, %v19168_v40  ;;  %v3855_v45 = vsel %vm13875_vm5, %v13375_v59, %v3851_v6  ;;  %v13908_v1 = vmul.f32 %v13752_v24, %v3984_v23  ;;  %8776 = vrcp.f32 %v19173_v9  ;;  %5286 = vrot.lane.b32.xlu0 %v13883_v34, %s9228_s14  ;;  %v13920_v59 = vpop.permute.xlu1 %5192  ;;  %v19176_v6 = vld [vmem:[#allocation379_spill] sm:$0xff]  ;;  %vm13950_vm5 = vmor %vm3732_vm12, %vm3733_vm8 }
 0x7ca   : > { %vm3692_vm11 = vcmp.eq.f32.partialorder %v3691_v18, 8.507059e+37  ;;  %v3930_v38 = vsel %vm13893_vm10, %v12970_v21, %v3926_v5  ;;  %v4134_v33 = vsub.f32 1.0, %v4133_v4  ;;  %v4028_v12 = vmul.f32 %v13868_v14, %v19149_v53  ;;  %19174 = vst [vmem:[#allocation283_spill] sm:$0xff] %v13918_v37  ;;  %v13925_v18 = vpop.permute.xlu0 %5202  ;;  %v19179_v21 = vld [vmem:[#allocation215_spill] sm:$0xff]  ;;  %vm13968_vm8 = vmor %vm3897_vm9, %vm3898_vm6 }
 0x7cb   : > { %19175 = vst [vmem:[#allocation112_spill] sm:$0xff] %v13920_v59  ;;  %v3695_v23 = vsel %vm3692_vm11, %v19176_v6, %v3690_v48  ;;  %vm3857_vm15 = vcmp.eq.f32.partialorder %v3856_v27, 8.507059e+37  ;;  %vm3778_vm2 = vweird.f32 %v19177_v60  ;;  %v4293_v34 = vand.u32 2147483648, %v19173_v9  ;;  %v19180_v37 = vld [vmem:[#allocation323_spill] sm:$0xff]  ;;  %vm13986_vm6 = vmor %vm3972_vm7, %vm3973_vm4 }
 0x7cc   : > { %19178 = vst [vmem:[#allocation110_spill] sm:$0xff] %v13925_v18  ;;  %v3860_v41 = vsel %vm3857_vm15, %v13408_v13, %v3855_v45  ;;  %vm3932_vm13 = vcmp.eq.f32.partialorder %v3931_v57, 8.507059e+37  ;;  %v3731_v5 = vadd.f32 %v19154_v20, %v19179_v21  ;;  %vm3943_vm0 = vweird.f32 %v13642_v11  ;;  %v19181_v59 = vld [vmem:[#allocation231_spill] sm:$0xff]  ;;  %v19183_v57 = vld [vmem:[#allocation145_spill] sm:$0xff] }
 0x7cd   : > { %v4239_v4 = vsub.f32 1.0, %v4238_v10  ;;  %8778 = vrcp.f32 %v19180_v37  ;;  %v3935_v48 = vsel %vm3932_vm13, %v19181_v59, %v3930_v38  ;;  %v3896_v27 = vadd.f32 %v13523_v8, %v13663_v7  ;;  %v13935_v6 = vpop.eup %8774 }
 0x7ce   : > { %vm3777_vm14 = vweird.f32 %v19182_v62  ;;  %vm4018_vm1 = vweird.f32 %v13236_v31  ;;  %v4083_v13 = vand.u32 2147483648, %v19180_v37  ;;  %v13941_v45 = vmul.f32 %v19183_v57, %v3695_v23  ;;  %v19188_v23 = vld [vmem:[#allocation126_spill] sm:$0xff] }
 0x7cf   : > { %v3736_v10 = vand.u32 2147483647, %v19159_v52  ;;  %v3971_v21 = vadd.f32 %v13087_v50, %v13240_v2  ;;  %vm3942_vm10 = vweird.f32 %v19091_v58  ;;  %v4029_v38 = vsub.f32 1.0, %v4028_v12  ;;  %v13961_v17 = vpop.eup %8776  ;;  %v19192_v52 = vld [vmem:[#allocation324_spill] sm:$0xff] }
 0x7d0   : > { %19184 = vst [vmem:[#allocation210_spill] sm:$0xff] %v13941_v45  ;;  %v13955_v59 = vor.u32 1.1754944e-38, %v4188_v16  ;;  %v13958_v57 = vmul.f32 %v19188_v23, %v3860_v41  ;;  %v3901_v18 = vand.u32 2147483647, %v19051_v29  ;;  %vm4017_vm11 = vweird.f32 %v18971_v35  ;;  %5260 = vrot.lane.b32.xlu2 %v13941_v45, %s9228_s14  ;;  %v19193_v16 = vld [vmem:[#allocation165_spill] sm:$0xff]  ;;  %v19203_v29 = vld [vmem:[#allocation192_spill] sm:$0xff] }
 0x7d1   : > { %8780 = vrcp.f32 %v19192_v52  ;;  %v13976_v12 = vmul.f32 %v19193_v16, %v3935_v48  ;;  %v3735_v41 = vsel %vm13950_vm5, %v19154_v20, %v3731_v5  ;;  %v3976_v23 = vand.u32 2147483647, %v18935_v26  ;;  %v19206_v45 = vld [vmem:[#allocation309_spill] sm:$0xff] }
 0x7d2   : > { %19187 = vst [vmem:[#allocation378_spill] sm:$0xff] %v13955_v59  ;;  %v13991_v59 = vmul.f32 %v13815_v36, %v4134_v33  ;;  %v4178_v48 = vmul.f32 %v13935_v6, %v19168_v40  ;;  %v13995_v16 = vor.u32 1.1754944e-38, %v4293_v34  ;;  %5282 = vrot.lane.b32.xlu1 %v13958_v57, %s9228_s14  ;;  %v3900_v20 = vsel %vm13968_vm8, %v13523_v8, %v3896_v27  ;;  %v14017_v27 = vpop.permute.xlu2 %5188  ;;  %vm14051_vm8 = vmor %vm3777_vm14, %vm3778_vm2 }
 0x7d3   : > { %19189 = vst [vmem:[#allocation328_spill] sm:$0xff] %v13958_v57  ;;  %v14003_v26 = vmul.f32 %v13840_v49, %v4239_v4  ;;  %v14005_v5 = vor.u32 1.1754944e-38, %v4083_v13  ;;  %5292 = vrot.lane.b32.xlu0 %v13976_v12, %s9228_s14  ;;  %vm3737_vm12 = vcmp.eq.f32.partialorder %v3736_v10, 8.507059e+37  ;;  %v3975_v34 = vsel %vm13986_vm6, %v13087_v50, %v3971_v21  ;;  %v14012_v33 = vpop.eup %8778  ;;  %v14019_v4 = vpop.permute.xlu1 %5198  ;;  %v19200_v13 = vld [vmem:[#allocation384_spill] sm:$0xff]  ;;  %v19201_v57 = vld [vmem:[#allocation163_spill] sm:$0xff]  ;;  %vm14067_vm2 = vmor %vm3942_vm10, %vm3943_vm0 }
 0x7d4   : > { %19194 = vst [vmem:[#allocation386_spill] sm:$0xff] %v13976_v12  ;;  %v4283_v7 = vmul.f32 %v13961_v17, %v19173_v9  ;;  %v4233_v8 = vand.u32 2147483648, %v19192_v52  ;;  %v3740_v2 = vsel %vm3737_vm12, %v19200_v13, %v3735_v41  ;;  %vm3902_vm4 = vcmp.eq.f32.partialorder %v3901_v18, 8.507059e+37  ;;  %v14026_v50 = vpop.permute.xlu0 %5208  ;;  %v19205_v41 = vld [vmem:[#allocation170_spill] sm:$0xff]  ;;  %vm14085_vm0 = vmor %vm4017_vm11, %vm4018_vm1 }
 0x7d5   : > { %19197 = vst [vmem:[#allocation303_spill] sm:$0xff] %v13991_v59  ;;  %vm3823_vm9 = vweird.f32 %v19201_v57  ;;  %v14024_v10 = vmul.f32 %v13868_v14, %v4029_v38  ;;  %v3905_v21 = vsel %vm3902_vm4, %v13516_v43, %v3900_v20  ;;  %vm3977_vm7 = vcmp.eq.f32.partialorder %v3976_v23, 8.507059e+37  ;;  %v19207_v23 = vld [vmem:[#allocation74_spill] sm:$0xff] }
 0x7d6   : > { %19198 = vst [vmem:[#allocation123_spill] sm:$0xff] %v14017_v27  ;;  %v3776_v12 = vadd.f32 %v19177_v60, %v19203_v29  ;;  %vm3988_vm15 = vweird.f32 %v13752_v24  ;;  %v4179_v27 = vsub.f32 1.0, %v4178_v48  ;;  %v3980_v18 = vsel %vm3977_vm7, %v19205_v41, %v3975_v34  ;;  %v19211_v41 = vld [vmem:[#allocation146_spill] sm:$0xff] }
 0x7d7   : > { %19199 = vst [vmem:[#allocation119_spill] sm:$0xff] %v14019_v4  ;;  %v19204_v4 = vld [vmem:[#allocation327_spill] sm:$0xff]  ;;  %v3941_v13 = vadd.f32 %v13642_v11, %v13797_v22  ;;  %v14036_v38 = vpop.eup %8780  ;;  %vm3822_vm13 = vweird.f32 %v19206_v45  ;;  %vm4063_vm5 = vweird.f32 %v13349_v32  ;;  %v14042_v20 = vmul.f32 %v19207_v23, %v3740_v2 }
 0x7d8   : > { %19202 = vst [vmem:[#allocation90_spill] sm:$0xff] %v14026_v50  ;;  %8782 = vrcp.f32 %v19204_v4  ;;  %v4338_v43 = vand.u32 2147483648, %v19204_v4  ;;  %v3781_v48 = vand.u32 2147483647, %v19182_v62  ;;  %v4016_v29 = vadd.f32 %v13236_v31, %v13387_v25  ;;  %v19215_v62 = vld [vmem:[#allocation330_spill] sm:$0xff] }
 0x7d9   : > { %19208 = vst [vmem:[#allocation291_spill] sm:$0xff] %v14042_v20  ;;  %vm3987_vm6 = vweird.f32 %v19122_v47  ;;  %v4284_v34 = vsub.f32 1.0, %v4283_v7  ;;  %v4073_v2 = vmul.f32 %v14012_v33, %v19180_v37  ;;  %v14059_v23 = vmul.f32 %v19211_v41, %v3905_v21  ;;  %5266 = vrot.lane.b32.xlu2 %v14042_v20, %s9228_s14  ;;  %v19216_v7 = vld [vmem:[#allocation185_spill] sm:$0xff] }
 0x7da   : > { %v3946_v50 = vand.u32 2147483647, %v19091_v58  ;;  %vm4062_vm12 = vweird.f32 %v19009_v42  ;;  %8784 = vrcp.f32 %v19215_v62  ;;  %v14075_v21 = vmul.f32 %v19216_v7, %v3980_v18 }
 0x7db   : > { %19212 = vst [vmem:[#allocation317_spill] sm:$0xff] %v14059_v23  ;;  %v3780_v41 = vsel %vm14051_vm8, %v19177_v60, %v3776_v12  ;;  %v4021_v40 = vand.u32 2147483647, %v18971_v35  ;;  %v14090_v59 = vmul.f32 %v13935_v6, %v4179_v27  ;;  %v4223_v18 = vmul.f32 %v14036_v38, %v19192_v52  ;;  %5288 = vrot.lane.b32.xlu1 %v14059_v23, %s9228_s14  ;;  %v19221_v12 = vld [vmem:[#allocation331_spill] sm:$0xff]  ;;  %v14112_v23 = vpop.permute.xlu2 %5194 }
 0x7dc   : > { %19217 = vst [vmem:[#allocation133_spill] sm:$0xff] %v14075_v21  ;;  %v14094_v7 = vor.u32 1.1754944e-38, %v4233_v8  ;;  %v3945_v60 = vsel %vm14067_vm2, %v13642_v11, %v3941_v13  ;;  %v4128_v35 = vand.u32 2147483648, %v19215_v62  ;;  %8786 = vrcp.f32 %v19221_v12  ;;  %5298 = vrot.lane.b32.xlu0 %v14075_v21, %s9228_s14  ;;  %v14114_v11 = vpop.permute.xlu1 %5204  ;;  %v19224_v13 = vld [vmem:[#allocation325_spill] sm:$0xff]  ;;  %v14121_v21 = vpop.permute.xlu0 %5214  ;;  %vm14147_vm2 = vmor %vm3822_vm13, %vm3823_vm9 }
 0x7dd   : > { %vm3782_vm14 = vcmp.eq.f32.partialorder %v3781_v48, 8.507059e+37  ;;  %v4020_v8 = vsel %vm14085_vm0, %v13236_v31, %v4016_v29  ;;  %v4074_v22 = vsub.f32 1.0, %v4073_v2  ;;  %v14110_v20 = vor.u32 1.1754944e-38, %v4338_v43  ;;  %19222 = vst [vmem:[#allocation373_spill] sm:$0xff] %v14112_v23  ;;  %v19226_v29 = vld [vmem:[#allocation209_spill] sm:$0xff]  ;;  %vm14168_vm13 = vmor %vm3987_vm6, %vm3988_vm15 }
 0x7de   : > { %19220 = vst [vmem:[#allocation193_spill] sm:$0xff] %v14094_v7  ;;  %v14108_v27 = vpop.eup %8782  ;;  %v3785_v25 = vsel %vm3782_vm14, %v19224_v13, %v3780_v41  ;;  %vm3947_vm1 = vcmp.eq.f32.partialorder %v3946_v50, 8.507059e+37  ;;  %vm3868_vm10 = vweird.f32 %v13060_v3  ;;  %v14119_v48 = vmul.f32 %v13961_v17, %v4284_v34  ;;  %v19227_v41 = vld [vmem:[#allocation299_spill] sm:$0xff]  ;;  %vm14186_vm15 = vmor %vm4062_vm12, %vm4063_vm5 }
 0x7df   : > { %19223 = vst [vmem:[#allocation383_spill] sm:$0xff] %v14114_v11  ;;  %v3950_v31 = vsel %vm3947_vm1, %v13665_v51, %v3945_v60  ;;  %vm4022_vm11 = vcmp.eq.f32.partialorder %v4021_v40, 8.507059e+37  ;;  %v3821_v43 = vadd.f32 %v19201_v57, %v19226_v29  ;;  %vm4033_vm4 = vweird.f32 %v13868_v14  ;;  %v19228_v11 = vld [vmem:[#allocation310_spill] sm:$0xff]  ;;  %v19229_v40 = vld [vmem:[#allocation92_spill] sm:$0xff] }
 0x7e0   : > { %19225 = vst [vmem:[#allocation385_spill] sm:$0xff] %v14121_v21  ;;  %v4224_v2 = vsub.f32 1.0, %v4223_v18  ;;  %v4278_v58 = vand.u32 2147483648, %v19221_v12  ;;  %v4025_v50 = vsel %vm4022_vm11, %v19227_v41, %v4020_v8  ;;  %v3986_v13 = vadd.f32 %v13752_v24, %v13908_v1  ;;  %v14131_v34 = vpop.eup %8784 }
 0x7e1   : > { %vm3867_vm7 = vweird.f32 %v19228_v11  ;;  %vm4108_vm8 = vweird.f32 %v13459_v28  ;;  %v14135_v51 = vor.u32 1.1754944e-38, %v4128_v35  ;;  %v14138_v60 = vmul.f32 %v19229_v40, %v3785_v25  ;;  %v19233_v25 = vld [vmem:[#allocation160_spill] sm:$0xff] }
 0x7e2   : > { %v3826_v18 = vand.u32 2147483647, %v19206_v45  ;;  %v4061_v29 = vadd.f32 %v13349_v32, %v13504_v56  ;;  %vm4032_vm0 = vweird.f32 %v19149_v53  ;;  %v14153_v35 = vmul.f32 %v14012_v33, %v4074_v22  ;;  %v14161_v40 = vpop.eup %8786  ;;  %v19238_v22 = vld [vmem:[#allocation333_spill] sm:$0xff] }
 0x7e3   : > { %19230 = vst [vmem:[#allocation388_spill] sm:$0xff] %v14138_v60  ;;  %v4328_v8 = vmul.f32 %v14108_v27, %v19204_v4  ;;  %v14158_v41 = vmul.f32 %v19233_v25, %v3950_v31  ;;  %v3991_v56 = vand.u32 2147483647, %v19122_v47  ;;  %vm4107_vm9 = vweird.f32 %v19041_v54  ;;  %5272 = vrot.lane.b32.xlu2 %v14138_v60, %s9228_s14  ;;  %v19239_v31 = vld [vmem:[#allocation205_spill] sm:$0xff]  ;;  %v14211_v60 = vpop.permute.xlu2 %5200 }
 0x7e4   : > { %19235 = vst [vmem:[#allocation260_spill] sm:$0xff] %v14161_v40  ;;  %8788 = vrcp.f32 %v19238_v22  ;;  %v14176_v25 = vmul.f32 %v19239_v31, %v4025_v50  ;;  %v3825_v21 = vsel %vm14147_vm2, %v19201_v57, %v3821_v43  ;;  %v4066_v23 = vand.u32 2147483647, %v19009_v42  ;;  %v19245_v43 = vld [vmem:[#allocation336_spill] sm:$0xff]  ;;  %v14213_v45 = vpop.permute.xlu1 %5210 }
 0x7e5   : > { %19234 = vst [vmem:[#allocation306_spill] sm:$0xff] %v14158_v41  ;;  %v14191_v7 = vmul.f32 %v14036_v38, %v4224_v2  ;;  %v4118_v50 = vmul.f32 %v14131_v34, %v19215_v62  ;;  %v14195_v31 = vor.u32 1.1754944e-38, %v4278_v58  ;;  %5294 = vrot.lane.b32.xlu1 %v14158_v41, %s9228_s14  ;;  %v3990_v57 = vsel %vm14168_vm13, %v13752_v24, %v3986_v13  ;;  %v19248_v24 = vld [vmem:[#allocation345_spill] sm:$0xff]  ;;  %vm14243_vm13 = vmor %vm3867_vm7, %vm3868_vm10 }
 0x7e6   : > { %19240 = vst [vmem:[#allocation106_spill] sm:$0xff] %v14176_v25  ;;  %v4383_v42 = vand.u32 2147483648, %v19238_v22  ;;  %8790 = vrcp.f32 %v19245_v43  ;;  %5304 = vrot.lane.b32.xlu0 %v14176_v25, %s9228_s14  ;;  %vm3827_vm5 = vcmp.eq.f32.partialorder %v3826_v18, 8.507059e+37  ;;  %v4065_v2 = vsel %vm14186_vm15, %v13349_v32, %v4061_v29  ;;  %v19249_v41 = vld [vmem:[#allocation269_spill] sm:$0xff]  ;;  %v14218_v18 = vpop.permute.xlu0 %5220  ;;  %v19251_v32 = vld [vmem:[#allocation359_spill] sm:$0xff]  ;;  %vm14261_vm10 = vmor %vm4032_vm0, %vm4033_vm4 }
 0x7e7   : > { %19243 = vst [vmem:[#allocation149_spill] sm:$0xff] %v14191_v7  ;;  %v4329_v58 = vsub.f32 1.0, %v4328_v8  ;;  %v4268_v1 = vmul.f32 %v14161_v40, %v19221_v12  ;;  %v3830_v13 = vsel %vm3827_vm5, %v19248_v24, %v3825_v21  ;;  %vm3992_vm6 = vcmp.eq.f32.partialorder %v3991_v56, 8.507059e+37  ;;  %vm14281_vm4 = vmor %vm4107_vm9, %vm4108_vm8 }
 0x7e8   : > { %19244 = vst [vmem:[#allocation172_spill] sm:$0xff] %v14195_v31  ;;  %vm3913_vm12 = vweird.f32 %v19249_v41  ;;  %v4173_v25 = vand.u32 2147483648, %v19245_v43  ;;  %v3995_v47 = vsel %vm3992_vm6, %v13799_v39, %v3990_v57  ;;  %vm4067_vm14 = vcmp.eq.f32.partialorder %v4066_v23, 8.507059e+37  ;;  %v19254_v31 = vld [vmem:[#allocation311_spill] sm:$0xff]  ;;  %v19255_v23 = vld [vmem:[#allocation109_spill] sm:$0xff] }
 0x7e9   : > { %19246 = vst [vmem:[#allocation379_spill] sm:$0xff] %v14211_v60  ;;  %v3866_v29 = vadd.f32 %v13060_v3, %v19251_v32  ;;  %vm4078_vm1 = vweird.f32 %v14012_v33  ;;  %v4119_v8 = vsub.f32 1.0, %v4118_v50  ;;  %v19252_v60 = vld [vmem:[#allocation337_spill] sm:$0xff]  ;;  %v4031_v56 = vadd.f32 %v13868_v14, %v14024_v10 }
 0x7ea   : > { %19247 = vst [vmem:[#allocation297_spill] sm:$0xff] %v14213_v45  ;;  %8792 = vrcp.f32 %v19252_v60  ;;  %v19253_v45 = vld [vmem:[#allocation264_spill] sm:$0xff]  ;;  %v14228_v24 = vpop.eup %8788  ;;  %vm3912_vm11 = vweird.f32 %v19254_v31  ;;  %vm4153_vm2 = vweird.f32 %v13594_v19  ;;  %v4323_v39 = vand.u32 2147483648, %v19252_v60 }
 0x7eb   : > { %19250 = vst [vmem:[#allocation215_spill] sm:$0xff] %v14218_v18  ;;  %v4070_v21 = vsel %vm4067_vm14, %v19253_v45, %v4065_v2  ;;  %v14234_v57 = vmul.f32 %v19255_v23, %v3830_v13  ;;  %v3871_v50 = vand.u32 2147483647, %v19228_v11  ;;  %v4106_v32 = vadd.f32 %v13459_v28, %v13615_v30  ;;  %v19259_v13 = vld [vmem:[#allocation179_spill] sm:$0xff]  ;;  %v19261_v30 = vld [vmem:[#allocation198_spill] sm:$0xff] }
 0x7ec   : > { %vm4077_vm15 = vweird.f32 %v19180_v37  ;;  %v4269_v2 = vsub.f32 1.0, %v4268_v1  ;;  %v14248_v45 = vor.u32 1.1754944e-38, %v4383_v42  ;;  %v14251_v23 = vmul.f32 %v19259_v13, %v3995_v47  ;;  %v14254_v12 = vpop.eup %8790  ;;  %v19264_v1 = vld [vmem:[#allocation219_spill] sm:$0xff] }
 0x7ed   : > { %19256 = vst [vmem:[#allocation323_spill] sm:$0xff] %v14234_v57  ;;  %v4036_v18 = vand.u32 2147483647, %v19149_v53  ;;  %vm4152_vm5 = vweird.f32 %v19261_v30  ;;  %v14266_v42 = vmul.f32 %v14108_v27, %v4329_v58  ;;  %5278 = vrot.lane.b32.xlu2 %v14234_v57, %s9228_s14  ;;  %v14271_v47 = vmul.f32 %v19264_v1, %v4070_v21  ;;  %v19268_v21 = vld [vmem:[#allocation339_spill] sm:$0xff] }
 0x7ee   : > { %19260 = vst [vmem:[#allocation231_spill] sm:$0xff] %v14251_v23  ;;  %v3870_v13 = vsel %vm14243_vm13, %v13060_v3, %v3866_v29  ;;  %v4111_v7 = vand.u32 2147483647, %v19041_v54  ;;  %v4373_v58 = vmul.f32 %v14228_v24, %v19238_v22  ;;  %v14287_v57 = vor.u32 1.1754944e-38, %v4173_v25  ;;  %5300 = vrot.lane.b32.xlu1 %v14251_v23, %s9228_s14 }
 0x7ef   : > { %19265 = vst [vmem:[#allocation308_spill] sm:$0xff] %v14271_v47  ;;  %8794 = vrcp.f32 %v19268_v21  ;;  %v4035_v3 = vsel %vm14261_vm10, %v13868_v14, %v4031_v56  ;;  %v14296_v54 = vmul.f32 %v14131_v34, %v4119_v8  ;;  %v14298_v29 = vor.u32 1.1754944e-38, %v4323_v39  ;;  %5310 = vrot.lane.b32.xlu0 %v14271_v47, %s9228_s14  ;;  %v14312_v8 = vpop.permute.xlu2 %5206  ;;  %v14314_v56 = vpop.permute.xlu1 %5216  ;;  %v19273_v39 = vld [vmem:[#allocation338_spill] sm:$0xff]  ;;  %v19277_v47 = vld [vmem:[#allocation341_spill] sm:$0xff]  ;;  %vm14344_vm10 = vmor %vm3912_vm11, %vm3913_vm12 }
 0x7f0   : > { %vm3872_vm7 = vcmp.eq.f32.partialorder %v3871_v50, 8.507059e+37  ;;  %v4110_v25 = vsel %vm14281_vm4, %v13459_v28, %v4106_v32  ;;  %v14305_v10 = vpop.eup %8792  ;;  %v14308_v1 = vmul.f32 %v14161_v40, %v4269_v2  ;;  %v4163_v14 = vmul.f32 %v14254_v12, %v19245_v43  ;;  %19271 = vst [vmem:[#allocation324_spill] sm:$0xff] %v14312_v8  ;;  %v19274_v50 = vld [vmem:[#allocation271_spill] sm:$0xff]  ;;  %v14319_v28 = vpop.permute.xlu0 %5226  ;;  %v19276_v2 = vld [vmem:[#allocation352_spill] sm:$0xff]  ;;  %vm14360_vm12 = vmor %vm4077_vm15, %vm4078_vm1 }
 0x7f1   : > { %19269 = vst [vmem:[#allocation145_spill] sm:$0xff] %v14298_v29  ;;  %v3875_v11 = vsel %vm3872_vm7, %v19273_v39, %v3870_v13  ;;  %vm4037_vm8 = vcmp.eq.f32.partialorder %v4036_v18, 8.507059e+37  ;;  %vm3958_vm0 = vweird.f32 %v19274_v50  ;;  %v4428_v53 = vand.u32 2147483648, %v19268_v21  ;;  %v19279_v39 = vld [vmem:[#allocation313_spill] sm:$0xff]  ;;  %vm14378_vm1 = vmor %vm4152_vm5, %vm4153_vm2 }
 0x7f2   : > { %19270 = vst [vmem:[#allocation126_spill] sm:$0xff] %v14308_v1  ;;  %v4040_v32 = vsel %vm4037_vm8, %v13899_v63, %v4035_v3  ;;  %vm4112_vm9 = vcmp.eq.f32.partialorder %v4111_v7, 8.507059e+37  ;;  %v3911_v23 = vadd.f32 %v19249_v41, %v19276_v2  ;;  %vm4123_vm6 = vweird.f32 %v14131_v34  ;;  %v19280_v7 = vld [vmem:[#allocation127_spill] sm:$0xff]  ;;  %v19286_v29 = vld [vmem:[#allocation181_spill] sm:$0xff]  ;;  %v19289_v1 = vld [vmem:[#allocation342_spill] sm:$0xff] }
 0x7f3   : > { %19272 = vst [vmem:[#allocation165_spill] sm:$0xff] %v14314_v56  ;;  %v4374_v8 = vsub.f32 1.0, %v4373_v58  ;;  %8796 = vrcp.f32 %v19277_v47  ;;  %v19278_v56 = vld [vmem:[#allocation376_spill] sm:$0xff]  ;;  %v4076_v18 = vadd.f32 %v14012_v33, %v14153_v35  ;;  %vm3957_vm14 = vweird.f32 %v19279_v39 }
 0x7f4   : > { %19275 = vst [vmem:[#allocation384_spill] sm:$0xff] %v14319_v28  ;;  %v4115_v13 = vsel %vm4112_vm9, %v19278_v56, %v4110_v25  ;;  %vm4198_vm13 = vweird.f32 %v13719_v61  ;;  %v4218_v63 = vand.u32 2147483648, %v19277_v47  ;;  %v14333_v3 = vmul.f32 %v19280_v7, %v3875_v11  ;;  %v19284_v11 = vld [vmem:[#allocation211_spill] sm:$0xff] }
 0x7f5   : > { %v3916_v2 = vand.u32 2147483647, %v19254_v31  ;;  %v4151_v58 = vadd.f32 %v13594_v19, %v13731_v15  ;;  %v14338_v28 = vpop.eup %8794  ;;  %vm4122_vm4 = vweird.f32 %v19215_v62  ;;  %v4164_v25 = vsub.f32 1.0, %v4163_v14  ;;  %v19290_v14 = vld [vmem:[#allocation236_spill] sm:$0xff] }
 0x7f6   : > { %19281 = vst [vmem:[#allocation163_spill] sm:$0xff] %v14333_v3  ;;  %v4313_v56 = vmul.f32 %v14305_v10, %v19252_v60  ;;  %v14352_v7 = vmul.f32 %v19284_v11, %v4040_v32  ;;  %v4081_v15 = vand.u32 2147483647, %v19180_v37  ;;  %vm4197_vm7 = vweird.f32 %v19286_v29  ;;  %5284 = vrot.lane.b32.xlu2 %v14333_v3, %s9228_s14 }
 0x7f7   : > { %8798 = vrcp.f32 %v19289_v1  ;;  %v14368_v32 = vmul.f32 %v19290_v14, %v4115_v13  ;;  %v3915_v11 = vsel %vm14344_vm10, %v19249_v41, %v3911_v23  ;;  %v4156_v60 = vand.u32 2147483647, %v19261_v30  ;;  %v19295_v30 = vld [vmem:[#allocation347_spill] sm:$0xff]  ;;  %v14405_v31 = vpop.permute.xlu2 %5212 }
 0x7f8   : > { %19285 = vst [vmem:[#allocation192_spill] sm:$0xff] %v14352_v7  ;;  %v14383_v40 = vmul.f32 %v14228_v24, %v4374_v8  ;;  %v14385_v3 = vor.u32 1.1754944e-38, %v4428_v53  ;;  %v4368_v13 = vand.u32 2147483648, %v19289_v1  ;;  %5306 = vrot.lane.b32.xlu1 %v14352_v7, %s9228_s14  ;;  %v4080_v41 = vsel %vm14360_vm12, %v14012_v33, %v4076_v18  ;;  %v14407_v33 = vpop.permute.xlu1 %5222  ;;  %v19298_v18 = vld [vmem:[#allocation150_spill] sm:$0xff]  ;;  %vm14438_vm12 = vmor %vm3957_vm14, %vm3958_vm0 }
 0x7f9   : > { %19291 = vst [vmem:[#allocation327_spill] sm:$0xff] %v14368_v32  ;;  %v4418_v23 = vmul.f32 %v14338_v28, %v19268_v21  ;;  %8800 = vrcp.f32 %v19295_v30  ;;  %5316 = vrot.lane.b32.xlu0 %v14368_v32, %s9228_s14  ;;  %vm3917_vm11 = vcmp.eq.f32.partialorder %v3916_v2, 8.507059e+37  ;;  %v4155_v8 = vsel %vm14378_vm1, %v13594_v19, %v4151_v58  ;;  %v14401_v53 = vpop.eup %8796  ;;  %v14412_v32 = vpop.permute.xlu0 %5232  ;;  %v19301_v58 = vld [vmem:[#allocation316_spill] sm:$0xff]  ;;  %vm14459_vm14 = vmor %vm4122_vm4, %vm4123_vm6 }
 0x7fa   : > { %19294 = vst [vmem:[#allocation170_spill] sm:$0xff] %v14385_v3  ;;  %v4314_v35 = vsub.f32 1.0, %v4313_v56  ;;  %v14403_v14 = vor.u32 1.1754944e-38, %v4218_v63  ;;  %v3920_v7 = vsel %vm3917_vm11, %v19298_v18, %v3915_v11  ;;  %vm4082_vm2 = vcmp.eq.f32.partialorder %v4081_v15, 8.507059e+37  ;;  %v19299_v3 = vld [vmem:[#allocation348_spill] sm:$0xff]  ;;  %v19303_v11 = vld [vmem:[#allocation202_spill] sm:$0xff]  ;;  %vm14477_vm6 = vmor %vm4197_vm7, %vm4198_vm13 }
 0x7fb   : > { %19296 = vst [vmem:[#allocation309_spill] sm:$0xff] %v14405_v31  ;;  %vm4003_vm15 = vweird.f32 %v19299_v3  ;;  %v4165_v2 = vmul.f32 %v14254_v12, %v4164_v25  ;;  %v4085_v19 = vsel %vm4082_vm2, %v14005_v5, %v4080_v41  ;;  %vm4157_vm5 = vcmp.eq.f32.partialorder %v4156_v60, 8.507059e+37  ;;  %v19305_v60 = vld [vmem:[#allocation142_spill] sm:$0xff] }
 0x7fc   : > { %19297 = vst [vmem:[#allocation74_spill] sm:$0xff] %v14407_v33  ;;  %v3956_v63 = vadd.f32 %v19274_v50, %v19301_v58  ;;  %vm4168_vm8 = vweird.f32 %v14254_v12  ;;  %v14418_v56 = vor.u32 1.1754944e-38, %v4368_v13  ;;  %v4473_v37 = vand.u32 2147483648, %v19295_v30 }
 0x7fd   : > { %19300 = vst [vmem:[#allocation146_spill] sm:$0xff] %v14412_v32  ;;  %v4160_v15 = vsel %vm4157_vm5, %v19303_v11, %v4155_v8  ;;  %v4121_v18 = vadd.f32 %v14131_v34, %v14296_v54  ;;  %v14424_v25 = vpop.eup %8798  ;;  %v19304_v32 = vld [vmem:[#allocation315_spill] sm:$0xff]  ;;  %vm4243_vm10 = vweird.f32 %v13840_v49  ;;  %v4419_v5 = vsub.f32 1.0, %v4418_v23  ;;  %v19310_v8 = vld [vmem:[#allocation228_spill] sm:$0xff] }
 0x7fe   : > { %19302 = vst [vmem:[#allocation330_spill] sm:$0xff] %v14418_v56  ;;  %vm4002_vm9 = vweird.f32 %v19304_v32  ;;  %v14429_v41 = vmul.f32 %v19305_v60, %v3920_v7  ;;  %v3961_v13 = vand.u32 2147483647, %v19279_v39  ;;  %v4196_v58 = vadd.f32 %v13719_v61, %v13860_v44  ;;  %v19324_v39 = vld [vmem:[#allocation356_spill] sm:$0xff] }
 0x7ff   : > { %vm4167_vm1 = vweird.f32 %v19245_v43  ;;  %v14444_v23 = vmul.f32 %v14305_v10, %v4314_v35  ;;  %v4208_v7 = vmul.f32 %v14401_v53, %v19277_v47  ;;  %v14449_v11 = vmul.f32 %v19310_v8, %v4085_v19  ;;  %v14452_v60 = vpop.eup %8800  ;;  %v19314_v35 = vld [vmem:[#allocation349_spill] sm:$0xff]  ;;  %v19315_v19 = vld [vmem:[#allocation251_spill] sm:$0xff] }
 0x800   : > { %19306 = vst [vmem:[#allocation185_spill] sm:$0xff] %v14429_v41  ;;  %v4126_v44 = vand.u32 2147483647, %v19215_v62  ;;  %vm4242_vm0 = vweird.f32 %v19144_v55  ;;  %8802 = vrcp.f32 %v19314_v35  ;;  %5290 = vrot.lane.b32.xlu2 %v14429_v41, %s9228_s14  ;;  %v14467_v8 = vmul.f32 %v19315_v19, %v4160_v15 }
 0x801   : > { %19309 = vst [vmem:[#allocation325_spill] sm:$0xff] %v14444_v23  ;;  %v3960_v31 = vsel %vm14438_vm12, %v19274_v50, %v3956_v63  ;;  %v4201_v33 = vand.u32 2147483647, %v19286_v29  ;;  %v4358_v41 = vmul.f32 %v14424_v25, %v19289_v1  ;;  %v14483_v56 = vor.u32 1.1754944e-38, %v4473_v37  ;;  %5312 = vrot.lane.b32.xlu1 %v14449_v11, %s9228_s14  ;;  %v19320_v63 = vld [vmem:[#allocation350_spill] sm:$0xff]  ;;  %v19329_v1 = vld [vmem:[#allocation208_spill] sm:$0xff] }
 0x802   : > { %19311 = vst [vmem:[#allocation209_spill] sm:$0xff] %v14449_v11  ;;  %v4263_v15 = vand.u32 2147483648, %v19314_v35  ;;  %v4125_v50 = vsel %vm14459_vm14, %v14131_v34, %v4121_v18  ;;  %v14492_v29 = vmul.f32 %v14338_v28, %v4419_v5  ;;  %8804 = vrcp.f32 %v19320_v63  ;;  %5322 = vrot.lane.b32.xlu0 %v14467_v8, %s9228_s14  ;;  %v14502_v11 = vpop.permute.xlu2 %5218  ;;  %v14504_v34 = vpop.permute.xlu1 %5228  ;;  %v19323_v18 = vld [vmem:[#allocation357_spill] sm:$0xff]  ;;  %vm14533_vm14 = vmor %vm4002_vm9, %vm4003_vm15 }
 0x803   : > { %19316 = vst [vmem:[#allocation299_spill] sm:$0xff] %v14467_v8  ;;  %vm3962_vm13 = vcmp.eq.f32.partialorder %v3961_v13, 8.507059e+37  ;;  %v4200_v37 = vsel %vm14477_vm6, %v13719_v61, %v4196_v58  ;;  %v4209_v54 = vsub.f32 1.0, %v4208_v7  ;;  %v4463_v19 = vmul.f32 %v14452_v60, %v19295_v30  ;;  %v14509_v13 = vpop.permute.xlu0 %5238  ;;  %v19326_v61 = vld [vmem:[#allocation318_spill] sm:$0xff]  ;;  %vm14551_vm15 = vmor %vm4167_vm1, %vm4168_vm8 }
 0x804   : > { %19319 = vst [vmem:[#allocation310_spill] sm:$0xff] %v14483_v56  ;;  %v3965_v5 = vsel %vm3962_vm13, %v19323_v18, %v3960_v31  ;;  %vm4127_vm4 = vcmp.eq.f32.partialorder %v4126_v44, 8.507059e+37  ;;  %vm4048_vm7 = vweird.f32 %v19324_v39  ;;  %v4413_v8 = vand.u32 2147483648, %v19320_v63  ;;  %vm14569_vm8 = vmor %vm4242_vm0, %vm4243_vm10 }
 0x805   : > { %19321 = vst [vmem:[#allocation92_spill] sm:$0xff] %v14502_v11  ;;  %v4130_v62 = vsel %vm4127_vm4, %v14135_v51, %v4125_v50  ;;  %vm4202_vm11 = vcmp.eq.f32.partialorder %v4201_v33, 8.507059e+37  ;;  %v4001_v58 = vadd.f32 %v19299_v3, %v19326_v61  ;;  %vm4213_vm2 = vweird.f32 %v14401_v53  ;;  %v19327_v11 = vld [vmem:[#allocation358_spill] sm:$0xff]  ;;  %v19330_v33 = vld [vmem:[#allocation156_spill] sm:$0xff] }
 0x806   : > { %19322 = vst [vmem:[#allocation160_spill] sm:$0xff] %v14504_v34  ;;  %v4359_v7 = vsub.f32 1.0, %v4358_v41  ;;  %8806 = vrcp.f32 %v19327_v11  ;;  %v19328_v34 = vld [vmem:[#allocation377_spill] sm:$0xff]  ;;  %v4166_v44 = vadd.f32 %v14254_v12, %v4165_v2  ;;  %v14518_v18 = vpop.eup %8802  ;;  %vm4047_vm5 = vweird.f32 %v19329_v1 }
 0x807   : > { %19325 = vst [vmem:[#allocation333_spill] sm:$0xff] %v14509_v13  ;;  %v4205_v31 = vsel %vm4202_vm11, %v19328_v34, %v4200_v37  ;;  %vm4288_vm12 = vweird.f32 %v13961_v17  ;;  %v4518_v51 = vand.u32 2147483648, %v19327_v11  ;;  %v14524_v50 = vmul.f32 %v19330_v33, %v3965_v5  ;;  %v19334_v5 = vld [vmem:[#allocation245_spill] sm:$0xff] }
 0x808   : > { %v4006_v61 = vand.u32 2147483647, %v19304_v32  ;;  %v4241_v41 = vadd.f32 %v13840_v49, %v14003_v26  ;;  %vm4212_vm6 = vweird.f32 %v19277_v47  ;;  %v4464_v37 = vsub.f32 1.0, %v4463_v19  ;;  %v14544_v23 = vpop.eup %8804  ;;  %v19338_v32 = vld [vmem:[#allocation360_spill] sm:$0xff] }
 0x809   : > { %19331 = vst [vmem:[#allocation205_spill] sm:$0xff] %v14524_v50  ;;  %v14538_v34 = vor.u32 1.1754944e-38, %v4263_v15  ;;  %v14541_v33 = vmul.f32 %v19334_v5, %v4130_v62  ;;  %v4171_v13 = vand.u32 2147483647, %v19245_v43  ;;  %vm4287_vm13 = vweird.f32 %v19173_v9  ;;  %5296 = vrot.lane.b32.xlu2 %v14524_v50, %s9228_s14  ;;  %v19339_v15 = vld [vmem:[#allocation253_spill] sm:$0xff]  ;;  %v19347_v43 = vld [vmem:[#allocation370_spill] sm:$0xff] }
 0x80a   : > { %8808 = vrcp.f32 %v19338_v32  ;;  %v14559_v19 = vmul.f32 %v19339_v15, %v4205_v31  ;;  %v4005_v62 = vsel %vm14533_vm14, %v19299_v3, %v4001_v58  ;;  %v4246_v5 = vand.u32 2147483647, %v19144_v55 }
 0x80b   : > { %19335 = vst [vmem:[#allocation336_spill] sm:$0xff] %v14541_v33  ;;  %v4210_v56 = vmul.f32 %v14401_v53, %v4209_v54  ;;  %v4253_v31 = vmul.f32 %v14518_v18, %v19314_v35  ;;  %v14576_v15 = vor.u32 1.1754944e-38, %v4413_v8  ;;  %5318 = vrot.lane.b32.xlu1 %v14541_v33, %s9228_s14  ;;  %v4170_v3 = vsel %vm14551_vm15, %v14254_v12, %v4166_v44  ;;  %v14598_v44 = vpop.permute.xlu2 %5224  ;;  %vm14631_vm15 = vmor %vm4047_vm5, %vm4048_vm7 }
 0x80c   : > { %19340 = vst [vmem:[#allocation345_spill] sm:$0xff] %v14559_v19  ;;  %v14584_v55 = vmul.f32 %v14424_v25, %v4359_v7  ;;  %v14586_v58 = vor.u32 1.1754944e-38, %v4518_v51  ;;  %5328 = vrot.lane.b32.xlu0 %v14559_v19, %s9228_s14  ;;  %vm4007_vm9 = vcmp.eq.f32.partialorder %v4006_v61, 8.507059e+37  ;;  %v4245_v8 = vsel %vm14569_vm8, %v13840_v49, %v4241_v41  ;;  %v14593_v54 = vpop.eup %8806  ;;  %v14600_v7 = vpop.permute.xlu1 %5234  ;;  %v19345_v51 = vld [vmem:[#allocation314_spill] sm:$0xff]  ;;  %vm14647_vm7 = vmor %vm4212_vm6, %vm4213_vm2 }
 0x80d   : > { %v4403_v2 = vmul.f32 %v14544_v23, %v19320_v63  ;;  %v4308_v12 = vand.u32 2147483648, %v19338_v32  ;;  %19343 = vst [vmem:[#allocation269_spill] sm:$0xff] %v14598_v44  ;;  %v4010_v26 = vsel %vm4007_vm9, %v19345_v51, %v4005_v62  ;;  %vm4172_vm10 = vcmp.eq.f32.partialorder %v4171_v13, 8.507059e+37  ;;  %v14607_v49 = vpop.permute.xlu0 %5244  ;;  %vm14665_vm2 = vmor %vm4287_vm13, %vm4288_vm12 }
 0x80e   : > { %19344 = vst [vmem:[#allocation359_spill] sm:$0xff] %v14600_v7  ;;  %vm4093_vm1 = vweird.f32 %v13671_v0  ;;  %v14605_v61 = vmul.f32 %v14452_v60, %v4464_v37  ;;  %v4175_v41 = vsel %vm4172_vm10, %v14287_v57, %v4170_v3  ;;  %vm4247_vm0 = vcmp.eq.f32.partialorder %v4246_v5, 8.507059e+37  ;;  %v19348_v7 = vld [vmem:[#allocation361_spill] sm:$0xff]  ;;  %v19349_v37 = vld [vmem:[#allocation222_spill] sm:$0xff]  ;;  %v19350_v5 = vld [vmem:[#allocation187_spill] sm:$0xff] }
 0x80f   : > { %19346 = vst [vmem:[#allocation264_spill] sm:$0xff] %v14607_v49  ;;  %v4046_v19 = vadd.f32 %v19324_v39, %v19347_v43  ;;  %v4254_v50 = vsub.f32 1.0, %v4253_v31  ;;  %vm4258_vm4 = vweird.f32 %v14518_v18  ;;  %8810 = vrcp.f32 %v19348_v7 }
 0x810   : > { %v4250_v13 = vsel %vm4247_vm0, %v13834_v46, %v4245_v8  ;;  %v4211_v62 = vadd.f32 %v14401_v53, %v4210_v56  ;;  %v14616_v51 = vpop.eup %8808  ;;  %vm4092_vm11 = vweird.f32 %v19349_v37  ;;  %vm4333_vm14 = vweird.f32 %v14108_v27 }
 0x811   : > { %v4458_v57 = vand.u32 2147483648, %v19348_v7  ;;  %v14622_v3 = vmul.f32 %v19350_v5, %v4010_v26  ;;  %v4051_v31 = vand.u32 2147483647, %v19329_v1  ;;  %v4286_v43 = vadd.f32 %v13961_v17, %v14119_v48  ;;  %v19354_v26 = vld [vmem:[#allocation256_spill] sm:$0xff]  ;;  %v19358_v1 = vld [vmem:[#allocation363_spill] sm:$0xff] }
 0x812   : > { %vm4257_vm8 = vweird.f32 %v19314_v35  ;;  %v4404_v56 = vsub.f32 1.0, %v4403_v2  ;;  %v4508_v8 = vmul.f32 %v14593_v54, %v19327_v11  ;;  %v14639_v5 = vmul.f32 %v19354_v26, %v4175_v41  ;;  %v19359_v2 = vld [vmem:[#allocation265_spill] sm:$0xff] }
 0x813   : > { %19351 = vst [vmem:[#allocation311_spill] sm:$0xff] %v14622_v3  ;;  %v4216_v49 = vand.u32 2147483647, %v19277_v47  ;;  %vm4332_vm9 = vweird.f32 %v19204_v4  ;;  %8812 = vrcp.f32 %v19358_v1  ;;  %5302 = vrot.lane.b32.xlu2 %v14622_v3, %s9228_s14  ;;  %v14655_v41 = vmul.f32 %v19359_v2, %v4250_v13 }
 0x814   : > { %19355 = vst [vmem:[#allocation109_spill] sm:$0xff] %v14639_v5  ;;  %v4050_v26 = vsel %vm14631_vm15, %v19324_v39, %v4046_v19  ;;  %v4291_v44 = vand.u32 2147483647, %v19173_v9  ;;  %v4255_v33 = vmul.f32 %v14518_v18, %v4254_v50  ;;  %v4298_v13 = vmul.f32 %v14616_v51, %v19338_v32  ;;  %5324 = vrot.lane.b32.xlu1 %v14639_v5, %s9228_s14  ;;  %v19363_v9 = vld [vmem:[#allocation326_spill] sm:$0xff] }
 0x815   : > { %19360 = vst [vmem:[#allocation179_spill] sm:$0xff] %v14655_v41  ;;  %v14672_v2 = vor.u32 1.1754944e-38, %v4308_v12  ;;  %v4215_v39 = vsel %vm14647_vm7, %v14401_v53, %v4211_v62  ;;  %v14679_v19 = vor.u32 1.1754944e-38, %v4458_v57  ;;  %8814 = vrcp.f32 %v19363_v9  ;;  %5334 = vrot.lane.b32.xlu0 %v14655_v41, %s9228_s14  ;;  %v14687_v12 = vpop.eup %8810  ;;  %v14693_v53 = vpop.permute.xlu2 %5230  ;;  %v19366_v57 = vld [vmem:[#allocation224_spill] sm:$0xff]  ;;  %vm14722_vm7 = vmor %vm4092_vm11, %vm4093_vm1 }
 0x816   : > { %vm4052_vm5 = vcmp.eq.f32.partialorder %v4051_v31, 8.507059e+37  ;;  %v4290_v50 = vsel %vm14665_vm2, %v13961_v17, %v4286_v43  ;;  %v14690_v46 = vmul.f32 %v14544_v23, %v4404_v56  ;;  %v4563_v48 = vand.u32 2147483648, %v19363_v9  ;;  %19364 = vst [vmem:[#allocation198_spill] sm:$0xff] %v14693_v53  ;;  %v14695_v62 = vpop.permute.xlu1 %5240  ;;  %v14699_v41 = vpop.permute.xlu0 %5250  ;;  %v19368_v43 = vld [vmem:[#allocation380_spill] sm:$0xff]  ;;  %vm14742_vm1 = vmor %vm4257_vm8, %vm4258_vm4 }
 0x817   : > { %19365 = vst [vmem:[#allocation219_spill] sm:$0xff] %v14695_v62  ;;  %v4055_v3 = vsel %vm4052_vm5, %v19366_v57, %v4050_v26  ;;  %vm4217_vm12 = vcmp.eq.f32.partialorder %v4216_v49, 8.507059e+37  ;;  %vm4138_vm6 = vweird.f32 %v13815_v36  ;;  %v4509_v31 = vsub.f32 1.0, %v4508_v8  ;;  %v19369_v49 = vld [vmem:[#allocation200_spill] sm:$0xff]  ;;  %vm14760_vm4 = vmor %vm4332_vm9, %vm4333_vm14 }
 0x818   : > { %19367 = vst [vmem:[#allocation339_spill] sm:$0xff] %v14699_v41  ;;  %v4220_v17 = vsel %vm4217_vm12, %v14403_v14, %v4215_v39  ;;  %vm4292_vm13 = vcmp.eq.f32.partialorder %v4291_v44, 8.507059e+37  ;;  %v4091_v56 = vadd.f32 %v13671_v0, %v19368_v43  ;;  %v4299_v47 = vsub.f32 1.0, %v4298_v13  ;;  %v19370_v14 = vld [vmem:[#allocation204_spill] sm:$0xff] }
 0x819   : > { %vm4303_vm10 = vweird.f32 %v14616_v51  ;;  %v4295_v53 = vsel %vm4292_vm13, %v13995_v16, %v4290_v50  ;;  %v4256_v62 = vadd.f32 %v14518_v18, %v4255_v33  ;;  %v14707_v26 = vpop.eup %8812  ;;  %vm4137_vm0 = vweird.f32 %v19369_v49  ;;  %v19374_v50 = vld [vmem:[#allocation259_spill] sm:$0xff] }
 0x81a   : > { %vm4378_vm15 = vweird.f32 %v14228_v24  ;;  %v4353_v8 = vand.u32 2147483648, %v19358_v1  ;;  %v14713_v44 = vmul.f32 %v19370_v14, %v4055_v3  ;;  %v4096_v39 = vand.u32 2147483647, %v19349_v37  ;;  %v19378_v14 = vld [vmem:[#allocation368_spill] sm:$0xff] }
 0x81b   : > { %v4331_v13 = vadd.f32 %v14108_v27, %v14266_v42  ;;  %vm4302_vm2 = vweird.f32 %v19338_v32  ;;  %v4448_v33 = vmul.f32 %v14687_v12, %v19348_v7  ;;  %v14729_v3 = vor.u32 1.1754944e-38, %v4563_v48  ;;  %v14735_v43 = vpop.eup %8814  ;;  %v19379_v48 = vld [vmem:[#allocation267_spill] sm:$0xff] }
 0x81c   : > { %19371 = vst [vmem:[#allocation338_spill] sm:$0xff] %v14713_v44  ;;  %v14732_v57 = vmul.f32 %v19374_v50, %v4220_v17  ;;  %v4261_v42 = vand.u32 2147483647, %v19314_v35  ;;  %vm4377_vm5 = vweird.f32 %v19238_v22  ;;  %8816 = vrcp.f32 %v19378_v14  ;;  %5308 = vrot.lane.b32.xlu2 %v14713_v44, %s9228_s14  ;;  %v19389_v44 = vld [vmem:[#allocation367_spill] sm:$0xff] }
 0x81d   : > { %v14750_v17 = vmul.f32 %v19379_v48, %v4295_v53  ;;  %v4095_v50 = vsel %vm14722_vm7, %v13671_v0, %v4091_v56  ;;  %v4336_v41 = vand.u32 2147483647, %v19204_v4  ;;  %v14765_v5 = vmul.f32 %v14593_v54, %v4509_v31  ;;  %v19383_v56 = vld [vmem:[#allocation364_spill] sm:$0xff]  ;;  %vm14815_vm7 = vmor %vm4137_vm0, %vm4138_vm6 }
 0x81e   : > { %19375 = vst [vmem:[#allocation271_spill] sm:$0xff] %v14732_v57  ;;  %v4300_v53 = vmul.f32 %v14616_v51, %v4299_v47  ;;  %v4343_v48 = vmul.f32 %v14707_v26, %v19358_v1  ;;  %5330 = vrot.lane.b32.xlu1 %v14732_v57, %s9228_s14  ;;  %v4260_v0 = vsel %vm14742_vm1, %v14518_v18, %v4256_v62  ;;  %v14775_v4 = vor.u32 1.1754944e-38, %v4353_v8  ;;  %v14786_v57 = vpop.permute.xlu2 %5236  ;;  %v14788_v18 = vpop.permute.xlu1 %5246  ;;  %v19386_v62 = vld [vmem:[#allocation365_spill] sm:$0xff]  ;;  %vm14833_vm6 = vmor %vm4302_vm2, %vm4303_vm10 }
 0x81f   : > { %19380 = vst [vmem:[#allocation352_spill] sm:$0xff] %v14750_v17  ;;  %8818 = vrcp.f32 %v19383_v56  ;;  %5340 = vrot.lane.b32.xlu0 %v14750_v17, %s9228_s14  ;;  %vm4097_vm11 = vcmp.eq.f32.partialorder %v4096_v39, 8.507059e+37  ;;  %v4335_v31 = vsel %vm14760_vm4, %v14108_v27, %v4331_v13  ;;  %v4553_v47 = vmul.f32 %v14735_v43, %v19363_v9  ;;  %v14792_v39 = vpop.permute.xlu0 %5256  ;;  %v19388_v27 = vld [vmem:[#allocation303_spill] sm:$0xff]  ;;  %vm14851_vm10 = vmor %vm4377_vm5, %vm4378_vm15 }
 0x820   : > { %v4503_v16 = vand.u32 2147483648, %v19383_v56  ;;  %19384 = vst [vmem:[#allocation341_spill] sm:$0xff] %v14786_v57  ;;  %v4100_v8 = vsel %vm4097_vm11, %v19386_v62, %v4095_v50  ;;  %vm4262_vm14 = vcmp.eq.f32.partialorder %v4261_v42, 8.507059e+37  ;;  %vm4183_vm8 = vweird.f32 %v13935_v6  ;;  %v19390_v42 = vld [vmem:[#allocation319_spill] sm:$0xff]  ;;  %v19395_v62 = vld [vmem:[#allocation136_spill] sm:$0xff] }
 0x821   : > { %19385 = vst [vmem:[#allocation376_spill] sm:$0xff] %v14788_v18  ;;  %v4449_v37 = vsub.f32 1.0, %v4448_v33  ;;  %v4265_v35 = vsel %vm4262_vm14, %v14538_v34, %v4260_v0  ;;  %vm4337_vm9 = vcmp.eq.f32.partialorder %v4336_v41, 8.507059e+37  ;;  %v4136_v13 = vadd.f32 %v13815_v36, %v19388_v27  ;;  %v19391_v34 = vld [vmem:[#allocation218_spill] sm:$0xff] }
 0x822   : > { %19387 = vst [vmem:[#allocation313_spill] sm:$0xff] %v14792_v39  ;;  %v4344_v17 = vsub.f32 1.0, %v4343_v48  ;;  %8820 = vrcp.f32 %v19389_v44  ;;  %v4340_v57 = vsel %vm4337_vm9, %v14110_v20, %v4335_v31  ;;  %v4301_v18 = vadd.f32 %v14616_v51, %v4300_v53  ;;  %v14800_v50 = vpop.eup %8816 }
 0x823   : > { %vm4182_vm12 = vweird.f32 %v19390_v42  ;;  %vm4423_vm13 = vweird.f32 %v14338_v28  ;;  %v4608_v33 = vand.u32 2147483648, %v19389_v44  ;;  %v14806_v41 = vmul.f32 %v19391_v34, %v4100_v8 }
 0x824   : > { %v4141_v0 = vand.u32 2147483647, %v19369_v49  ;;  %v4376_v48 = vadd.f32 %v14228_v24, %v14383_v40  ;;  %v4554_v53 = vsub.f32 1.0, %v4553_v47  ;;  %vm4347_vm1 = vweird.f32 %v19358_v1  ;;  %v19399_v49 = vld [vmem:[#allocation374_spill] sm:$0xff]  ;;  %v19400_v47 = vld [vmem:[#allocation77_spill] sm:$0xff] }
 0x825   : > { %19392 = vst [vmem:[#allocation127_spill] sm:$0xff] %v14806_v41  ;;  %v14820_v31 = vor.u32 1.1754944e-38, %v4503_v16  ;;  %v14823_v8 = vmul.f32 %v19395_v62, %v4265_v35  ;;  %v4306_v27 = vand.u32 2147483647, %v19338_v32  ;;  %v14826_v34 = vpop.eup %8818  ;;  %vm4422_vm4 = vweird.f32 %v19268_v21  ;;  %5314 = vrot.lane.b32.xlu2 %v14806_v41, %s9228_s14 }
 0x826   : > { %8822 = vrcp.f32 %v19399_v49  ;;  %v14841_v16 = vmul.f32 %v19400_v47, %v4340_v57  ;;  %v4140_v35 = vsel %vm14815_vm7, %v13815_v36, %v4136_v13  ;;  %v4381_v62 = vand.u32 2147483647, %v19238_v22  ;;  %vm14911_vm7 = vmor %vm4182_vm12, %vm4183_vm8 }
 0x827   : > { %19396 = vst [vmem:[#allocation211_spill] sm:$0xff] %v14823_v8  ;;  %v14856_v39 = vmul.f32 %v14687_v12, %v4449_v37  ;;  %v4345_v57 = vmul.f32 %v14707_v26, %v4344_v17  ;;  %v4388_v47 = vmul.f32 %v14800_v50, %v19378_v14  ;;  %5336 = vrot.lane.b32.xlu1 %v14823_v8, %s9228_s14  ;;  %vm4348_vm0 = vweird.f32 %v14707_v26  ;;  %vm14945_vm12 = vmor %vm4422_vm4, %vm4423_vm13 }
 0x828   : > { %19401 = vst [vmem:[#allocation181_spill] sm:$0xff] %v14841_v16  ;;  %v4305_v36 = vsel %vm14833_vm6, %v14616_v51, %v4301_v18  ;;  %v14867_v22 = vor.u32 1.1754944e-38, %v4608_v33  ;;  %5346 = vrot.lane.b32.xlu0 %v14841_v16, %s9228_s14  ;;  %vm4142_vm15 = vcmp.eq.f32.partialorder %v4141_v0, 8.507059e+37  ;;  %v4380_v17 = vsel %vm14851_vm10, %v14228_v24, %v4376_v48  ;;  %v14874_v37 = vpop.eup %8820  ;;  %v14879_v51 = vpop.permute.xlu2 %5242  ;;  %v19406_v33 = vld [vmem:[#allocation329_spill] sm:$0xff]  ;;  %vm14927_vm8 = vmor %vm4347_vm1, %vm4348_vm0 }
 0x829   : > { %v4493_v13 = vmul.f32 %v14826_v34, %v19383_v56  ;;  %v4398_v20 = vand.u32 2147483648, %v19378_v14  ;;  %19404 = vst [vmem:[#allocation236_spill] sm:$0xff] %v14879_v51  ;;  %v14881_v18 = vpop.permute.xlu1 %5252  ;;  %v4145_v40 = vsel %vm4142_vm15, %v19406_v33, %v4140_v35  ;;  %vm4307_vm2 = vcmp.eq.f32.partialorder %v4306_v27, 8.507059e+37  ;;  %v14888_v24 = vpop.permute.xlu0 %5262  ;;  %v19408_v51 = vld [vmem:[#allocation369_spill] sm:$0xff] }
 0x82a   : > { %19405 = vst [vmem:[#allocation347_spill] sm:$0xff] %v14881_v18  ;;  %vm4228_vm5 = vweird.f32 %v14036_v38  ;;  %v14886_v0 = vmul.f32 %v14735_v43, %v4554_v53  ;;  %v4310_v48 = vsel %vm4307_vm2, %v14672_v2, %v4305_v36  ;;  %vm4382_vm11 = vcmp.eq.f32.partialorder %v4381_v62, 8.507059e+37  ;;  %v19409_v2 = vld [vmem:[#allocation232_spill] sm:$0xff] }
 0x82b   : > { %19407 = vst [vmem:[#allocation150_spill] sm:$0xff] %v14888_v24  ;;  %v4181_v32 = vadd.f32 %v13935_v6, %v14090_v59  ;;  %v4389_v8 = vsub.f32 1.0, %v4388_v47  ;;  %8824 = vrcp.f32 %v19408_v51  ;;  %v4385_v18 = vsel %vm4382_vm11, %v14248_v45, %v4380_v17  ;;  %v19413_v17 = vld [vmem:[#allocation261_spill] sm:$0xff] }
 0x82c   : > { %v4346_v27 = vadd.f32 %v14707_v26, %v4345_v57  ;;  %v14896_v35 = vpop.eup %8822  ;;  %vm4227_vm14 = vweird.f32 %v19192_v52  ;;  %vm4468_vm9 = vweird.f32 %v14452_v60  ;;  %v4548_v53 = vand.u32 2147483648, %v19408_v51 }
 0x82d   : > { %v14902_v62 = vmul.f32 %v19409_v2, %v4145_v40  ;;  %v4186_v59 = vand.u32 2147483647, %v19390_v42  ;;  %v4421_v47 = vadd.f32 %v14338_v28, %v14492_v29  ;;  %v4494_v57 = vsub.f32 1.0, %v4493_v13  ;;  %v19417_v42 = vld [vmem:[#allocation307_spill] sm:$0xff]  ;;  %v19418_v13 = vld [vmem:[#allocation270_spill] sm:$0xff] }
 0x82e   : > { %v4598_v36 = vmul.f32 %v14874_v37, %v19389_v44  ;;  %vm4392_vm6 = vweird.f32 %v19378_v14  ;;  %v14919_v33 = vmul.f32 %v19413_v17, %v4310_v48  ;;  %v4351_v40 = vand.u32 2147483647, %v19358_v1  ;;  %v19425_v29 = vld [vmem:[#allocation378_spill] sm:$0xff] }
 0x82f   : > { %19410 = vst [vmem:[#allocation348_spill] sm:$0xff] %v14902_v62  ;;  %vm4467_vm10 = vweird.f32 %v19295_v30  ;;  %8826 = vrcp.f32 %v19417_v42  ;;  %5320 = vrot.lane.b32.xlu2 %v14902_v62, %s9228_s14  ;;  %v14935_v48 = vmul.f32 %v19418_v13, %v4385_v18  ;;  %v4185_v2 = vsel %vm14911_vm7, %v13935_v6, %v4181_v32  ;;  %v19422_v32 = vld [vmem:[#allocation372_spill] sm:$0xff]  ;;  %v19429_v1 = vld [vmem:[#allocation170_spill] sm:$0xff]  ;;  %vm15003_vm7 = vmor %vm4227_vm14, %vm4228_vm5 }
 0x830   : > { %19414 = vst [vmem:[#allocation316_spill] sm:$0xff] %v14919_v33  ;;  %v4426_v17 = vand.u32 2147483647, %v19268_v21  ;;  %v4390_v24 = vmul.f32 %v14800_v50, %v4389_v8  ;;  %v14950_v16 = vor.u32 1.1754944e-38, %v4398_v20  ;;  %v4433_v18 = vmul.f32 %v14896_v35, %v19399_v49  ;;  %5342 = vrot.lane.b32.xlu1 %v14919_v33, %s9228_s14  ;;  %vm15040_vm14 = vmor %vm4467_vm10, %vm4468_vm9 }
 0x831   : > { %19419 = vst [vmem:[#allocation202_spill] sm:$0xff] %v14935_v48  ;;  %v4350_v6 = vsel %vm14927_vm8, %v14707_v26, %v4346_v27  ;;  %8828 = vrcp.f32 %v19422_v32  ;;  %v4653_v21 = vand.u32 2147483648, %v19422_v32  ;;  %5352 = vrot.lane.b32.xlu0 %v14935_v48, %s9228_s14  ;;  %vm4187_vm13 = vcmp.eq.f32.partialorder %v4186_v59, 8.507059e+37  ;;  %v14966_v20 = vpop.eup %8824  ;;  %v14973_v26 = vpop.permute.xlu2 %5248  ;;  %v19426_v48 = vld [vmem:[#allocation260_spill] sm:$0xff] }
 0x832   : > { %v4425_v8 = vsel %vm14945_vm12, %v14338_v28, %v4421_v47  ;;  %v14969_v45 = vmul.f32 %v14826_v34, %v4494_v57  ;;  %v14971_v13 = vor.u32 1.1754944e-38, %v4548_v53  ;;  %19423 = vst [vmem:[#allocation315_spill] sm:$0xff] %v14973_v26  ;;  %v14975_v27 = vpop.permute.xlu1 %5258  ;;  %v4190_v33 = vsel %vm4187_vm13, %v19425_v29, %v4185_v2  ;;  %v14979_v41 = vpop.permute.xlu0 %5268  ;;  %v19428_v47 = vld [vmem:[#allocation149_spill] sm:$0xff] }
 0x833   : > { %19424 = vst [vmem:[#allocation142_spill] sm:$0xff] %v14975_v27  ;;  %vm4352_vm1 = vcmp.eq.f32.partialorder %v4351_v40, 8.507059e+37  ;;  %vm4273_vm4 = vweird.f32 %v19426_v48  ;;  %v4599_v59 = vsub.f32 1.0, %v4598_v36  ;;  %vm4427_vm0 = vcmp.eq.f32.partialorder %v4426_v17, 8.507059e+37  ;;  %v19430_v40 = vld [vmem:[#allocation331_spill] sm:$0xff] }
 0x834   : > { %19427 = vst [vmem:[#allocation228_spill] sm:$0xff] %v14979_v41  ;;  %v4355_v28 = vsel %vm4352_vm1, %v14775_v4, %v4350_v6  ;;  %v4226_v57 = vadd.f32 %v14036_v38, %v19428_v47  ;;  %vm4393_vm15 = vweird.f32 %v14800_v50  ;;  %v4434_v53 = vsub.f32 1.0, %v4433_v18  ;;  %v19431_v4 = vld [vmem:[#allocation237_spill] sm:$0xff] }
 0x835   : > { %v4430_v26 = vsel %vm4427_vm0, %v19429_v1, %v4425_v8  ;;  %v4391_v27 = vadd.f32 %v14800_v50, %v4390_v24  ;;  %v14987_v2 = vpop.eup %8826  ;;  %vm4272_vm2 = vweird.f32 %v19430_v40  ;;  %vm4513_vm11 = vweird.f32 %v14593_v54  ;;  %v19435_v8 = vld [vmem:[#allocation266_spill] sm:$0xff]  ;;  %vm15022_vm5 = vmor %vm4392_vm6, %vm4393_vm15  ;;  %v19439_v1 = vld [vmem:[#allocation387_spill] sm:$0xff] }
 0x836   : > { %v14991_v36 = vor.u32 1.1754944e-38, %v4653_v21  ;;  %v14994_v17 = vmul.f32 %v19431_v4, %v4190_v33  ;;  %v4231_v6 = vand.u32 2147483647, %v19192_v52  ;;  %v4466_v18 = vadd.f32 %v14452_v60, %v14605_v61 }
 0x837   : > { %v4538_v21 = vmul.f32 %v14966_v20, %v19408_v51  ;;  %vm4437_vm8 = vweird.f32 %v19399_v49  ;;  %v4443_v33 = vand.u32 2147483648, %v19399_v49  ;;  %v15012_v29 = vmul.f32 %v19435_v8, %v4355_v28  ;;  %v15015_v47 = vpop.eup %8828  ;;  %v19440_v28 = vld [vmem:[#allocation128_spill] sm:$0xff] }
 0x838   : > { %19432 = vst [vmem:[#allocation349_spill] sm:$0xff] %v14994_v17  ;;  %v4396_v61 = vand.u32 2147483647, %v19378_v14  ;;  %vm4512_vm12 = vweird.f32 %v19327_v11  ;;  %8830 = vrcp.f32 %v19439_v1  ;;  %5326 = vrot.lane.b32.xlu2 %v14994_v17, %s9228_s14  ;;  %v15030_v4 = vmul.f32 %v19440_v28, %v4430_v26 }
 0x839   : > { %19436 = vst [vmem:[#allocation251_spill] sm:$0xff] %v15012_v29  ;;  %v4230_v8 = vsel %vm15003_vm7, %v14036_v38, %v4226_v57  ;;  %v4471_v41 = vand.u32 2147483647, %v19295_v30  ;;  %v15045_v62 = vmul.f32 %v14874_v37, %v4599_v59  ;;  %v4435_v26 = vmul.f32 %v14896_v35, %v4434_v53  ;;  %5348 = vrot.lane.b32.xlu1 %v15012_v29, %s9228_s14  ;;  %v19444_v30 = vld [vmem:[#allocation375_spill] sm:$0xff]  ;;  %v15066_v29 = vpop.permute.xlu2 %5254  ;;  %vm15096_vm7 = vmor %vm4272_vm2, %vm4273_vm4 }
 0x83a   : > { %19441 = vst [vmem:[#allocation350_spill] sm:$0xff] %v15030_v4  ;;  %v4478_v28 = vmul.f32 %v14987_v2, %v19417_v42  ;;  %v4395_v38 = vsel %vm15022_vm5, %v14800_v50, %v4391_v27  ;;  %8832 = vrcp.f32 %v19444_v30  ;;  %v4593_v57 = vand.u32 2147483648, %v19444_v30  ;;  %5358 = vrot.lane.b32.xlu0 %v15030_v4, %s9228_s14  ;;  %v15068_v50 = vpop.permute.xlu1 %5264  ;;  %v19447_v27 = vld [vmem:[#allocation193_spill] sm:$0xff]  ;;  %vm15131_vm2 = vmor %vm4512_vm12, %vm4513_vm11 }
 0x83b   : > { %vm4232_vm9 = vcmp.eq.f32.partialorder %v4231_v6, 8.507059e+37  ;;  %v4470_v59 = vsel %vm15040_vm14, %v14452_v60, %v4466_v18  ;;  %v4539_v53 = vsub.f32 1.0, %v4538_v21  ;;  %v15064_v24 = vmul.f32 %v15015_v47, %v19422_v32  ;;  %19445 = vst [vmem:[#allocation357_spill] sm:$0xff] %v15066_v29  ;;  %v19448_v4 = vld [vmem:[#allocation381_spill] sm:$0xff]  ;;  %v15073_v6 = vpop.permute.xlu0 %5274  ;;  %v19450_v18 = vld [vmem:[#allocation126_spill] sm:$0xff] }
 0x83c   : > { %19446 = vst [vmem:[#allocation356_spill] sm:$0xff] %v15068_v50  ;;  %v4235_v52 = vsel %vm4232_vm9, %v19447_v27, %v4230_v8  ;;  %vm4397_vm6 = vcmp.eq.f32.partialorder %v4396_v61, 8.507059e+37  ;;  %vm4318_vm10 = vweird.f32 %v14305_v10  ;;  %8834 = vrcp.f32 %v19448_v4  ;;  %v19451_v29 = vld [vmem:[#allocation310_spill] sm:$0xff]  ;;  %v19452_v27 = vld [vmem:[#allocation337_spill] sm:$0xff] }
 0x83d   : > { %19449 = vst [vmem:[#allocation318_spill] sm:$0xff] %v15073_v6  ;;  %v4400_v60 = vsel %vm4397_vm6, %v14950_v16, %v4395_v38  ;;  %vm4472_vm13 = vcmp.eq.f32.partialorder %v4471_v41, 8.507059e+37  ;;  %v4271_v21 = vadd.f32 %v19426_v48, %v19450_v18  ;;  %vm4438_vm1 = vweird.f32 %v14896_v35  ;;  %v19453_v16 = vld [vmem:[#allocation239_spill] sm:$0xff]  ;;  %v19458_v18 = vld [vmem:[#allocation268_spill] sm:$0xff] }
 0x83e   : > { %v4479_v14 = vsub.f32 1.0, %v4478_v28  ;;  %v4475_v50 = vsel %vm4472_vm13, %v19451_v29, %v4470_v59  ;;  %v4436_v8 = vadd.f32 %v14896_v35, %v4435_v26  ;;  %v15081_v61 = vpop.eup %8830  ;;  %vm4317_vm0 = vweird.f32 %v19452_v27  ;;  %vm15113_vm4 = vmor %vm4437_vm8, %vm4438_vm1 }
 0x83f   : > { %vm4558_vm15 = vweird.f32 %v14735_v43  ;;  %v4698_v6 = vand.u32 2147483648, %v19448_v4  ;;  %v15087_v41 = vmul.f32 %v19453_v16, %v4235_v52  ;;  %v4276_v38 = vand.u32 2147483647, %v19430_v40  ;;  %v19461_v40 = vld [vmem:[#allocation334_spill] sm:$0xff] }
 0x840   : > { %v4511_v28 = vadd.f32 %v14593_v54, %v14765_v5  ;;  %v4444_v26 = vor.u32 1.1754944e-38, %v4443_v33  ;;  %v15100_v59 = vor.u32 1.1754944e-38, %v4593_v57  ;;  %v15103_v17 = vmul.f32 %v19458_v18, %v4400_v60  ;;  %v15106_v16 = vpop.eup %8832  ;;  %v19462_v33 = vld [vmem:[#allocation161_spill] sm:$0xff] }
 0x841   : > { %19454 = vst [vmem:[#allocation358_spill] sm:$0xff] %v15087_v41  ;;  %v4441_v52 = vand.u32 2147483647, %v19399_v49  ;;  %vm4557_vm5 = vweird.f32 %v19363_v9  ;;  %8836 = vrcp.f32 %v19461_v40  ;;  %5332 = vrot.lane.b32.xlu2 %v15087_v41, %s9228_s14  ;;  %v15121_v57 = vmul.f32 %v19462_v33, %v4475_v50  ;;  %v15158_v5 = vpop.permute.xlu2 %5260  ;;  %v19472_v41 = vld [vmem:[#allocation102_spill] sm:$0xff] }
 0x842   : > { %19457 = vst [vmem:[#allocation377_spill] sm:$0xff] %v15100_v59  ;;  %v4275_v60 = vsel %vm15096_vm7, %v19426_v48, %v4271_v21  ;;  %v4516_v18 = vand.u32 2147483647, %v19327_v11  ;;  %v15136_v59 = vmul.f32 %v14966_v20, %v4539_v53  ;;  %v4480_v50 = vmul.f32 %v14987_v2, %v4479_v14  ;;  %5354 = vrot.lane.b32.xlu1 %v15103_v17, %s9228_s14  ;;  %v15146_v11 = vpop.eup %8834  ;;  %vm15190_vm7 = vmor %vm4317_vm0, %vm4318_vm10 }
 0x843   : > { %19463 = vst [vmem:[#allocation208_spill] sm:$0xff] %v15121_v57  ;;  %v4523_v33 = vmul.f32 %v15081_v61, %v19439_v1  ;;  %v4440_v48 = vsel %vm15113_vm4, %v14896_v35, %v4436_v8  ;;  %v4644_v21 = vsub.f32 1.0, %v15064_v24  ;;  %v15149_v29 = vor.u32 1.1754944e-38, %v4698_v6  ;;  %5364 = vrot.lane.b32.xlu0 %v15121_v57, %s9228_s14  ;;  %v15160_v35 = vpop.permute.xlu1 %5270  ;;  %v19468_v8 = vld [vmem:[#allocation172_spill] sm:$0xff]  ;;  %vm15228_vm0 = vmor %vm4557_vm5, %vm4558_vm15 }
 0x844   : > { %vm4277_vm11 = vcmp.eq.f32.partialorder %v4276_v38, 8.507059e+37  ;;  %v4515_v53 = vsel %vm15131_vm2, %v14593_v54, %v4511_v28  ;;  %vm4482_vm8 = vweird.f32 %v19417_v42  ;;  %v4488_v14 = vand.u32 2147483648, %v19417_v42  ;;  %19466 = vst [vmem:[#allocation156_spill] sm:$0xff] %v15158_v5  ;;  %v15168_v38 = vpop.permute.xlu0 %5280  ;;  %v19470_v28 = vld [vmem:[#allocation325_spill] sm:$0xff] }
 0x845   : > { %19467 = vst [vmem:[#allocation245_spill] sm:$0xff] %v15160_v35  ;;  %v4280_v24 = vsel %vm4277_vm11, %v19468_v8, %v4275_v60  ;;  %vm4442_vm12 = vcmp.eq.f32.partialorder %v4441_v52, 8.507059e+37  ;;  %vm4363_vm14 = vweird.f32 %v14424_v25  ;;  %v15166_v6 = vmul.f32 %v15106_v16, %v19444_v30  ;;  %v19471_v8 = vld [vmem:[#allocation342_spill] sm:$0xff] }
 0x846   : > { %19469 = vst [vmem:[#allocation360_spill] sm:$0xff] %v15168_v38  ;;  %v4445_v54 = vsel %vm4442_vm12, %v4444_v26, %v4440_v48  ;;  %vm4517_vm9 = vcmp.eq.f32.partialorder %v4516_v18, 8.507059e+37  ;;  %v4316_v49 = vadd.f32 %v14305_v10, %v19470_v28  ;;  %vm4483_vm6 = vweird.f32 %v14987_v2  ;;  %v19473_v26 = vld [vmem:[#allocation242_spill] sm:$0xff] }
 0x847   : > { %v4524_v57 = vsub.f32 1.0, %v4523_v33  ;;  %v4520_v35 = vsel %vm4517_vm9, %v14586_v58, %v4515_v53  ;;  %v4481_v52 = vadd.f32 %v14987_v2, %v4480_v50  ;;  %v15175_v60 = vpop.eup %8836  ;;  %vm4362_vm13 = vweird.f32 %v19471_v8  ;;  %vm15210_vm10 = vmor %vm4482_vm8, %vm4483_vm6 }
 0x848   : > { %vm4603_vm1 = vweird.f32 %v14874_v37  ;;  %8838 = vrcp.f32 %v19472_v41  ;;  %v15181_v18 = vmul.f32 %v19473_v26, %v4280_v24  ;;  %v4321_v48 = vand.u32 2147483647, %v19452_v27  ;;  %v19477_v24 = vld [vmem:[#allocation118_spill] sm:$0xff]  ;;  %v19482_v26 = vld [vmem:[#allocation196_spill] sm:$0xff]  ;;  %vm15280_vm6 = vmor %vm4362_vm13, %vm4363_vm14 }
 0x849   : > { %v4556_v33 = vadd.f32 %v14735_v43, %v14886_v0  ;;  %v15195_v50 = vmul.f32 %v15015_v47, %v4644_v21  ;;  %v15199_v53 = vmul.f32 %v15146_v11, %v19448_v4  ;;  %v15202_v28 = vmul.f32 %v19477_v24, %v4445_v54  ;;  %v19481_v21 = vld [vmem:[#allocation332_spill] sm:$0xff] }
 0x84a   : > { %19474 = vst [vmem:[#allocation253_spill] sm:$0xff] %v15181_v18  ;;  %v4486_v0 = vand.u32 2147483647, %v19417_v42  ;;  %vm4602_vm4 = vweird.f32 %v19389_v44  ;;  %8840 = vrcp.f32 %v19481_v21  ;;  %5338 = vrot.lane.b32.xlu2 %v15181_v18, %s9228_s14  ;;  %v15218_v54 = vmul.f32 %v19482_v26, %v4520_v35  ;;  %v15249_v26 = vpop.permute.xlu2 %5266 }
 0x84b   : > { %19478 = vst [vmem:[#allocation314_spill] sm:$0xff] %v15202_v28  ;;  %v4320_v24 = vsel %vm15190_vm7, %v14305_v10, %v4316_v49  ;;  %v4561_v38 = vand.u32 2147483647, %v19363_v9  ;;  %v4489_v5 = vor.u32 1.1754944e-38, %v4488_v14  ;;  %v4525_v18 = vmul.f32 %v15081_v61, %v4524_v57  ;;  %5360 = vrot.lane.b32.xlu1 %v15202_v28, %s9228_s14  ;;  %v19486_v14 = vld [vmem:[#allocation226_spill] sm:$0xff]  ;;  %v15251_v27 = vpop.permute.xlu1 %5276  ;;  %vm15316_vm14 = vmor %vm4602_vm4, %vm4603_vm1 }
 0x84c   : > { %19483 = vst [vmem:[#allocation370_spill] sm:$0xff] %v15218_v54  ;;  %v4568_v35 = vmul.f32 %v15175_v60, %v19461_v40  ;;  %v4485_v10 = vsel %vm15210_vm10, %v14987_v2, %v4481_v52  ;;  %v4584_v49 = vsub.f32 1.0, %v15166_v6  ;;  %5370 = vrot.lane.b32.xlu0 %v15218_v54, %s9228_s14  ;;  %vm4322_vm15 = vcmp.eq.f32.partialorder %v4321_v48, 8.507059e+37  ;;  %v19489_v2 = vld [vmem:[#allocation145_spill] sm:$0xff]  ;;  %v15258_v9 = vpop.permute.xlu0 %5286 }
 0x84d   : > { %v4560_v57 = vsel %vm15228_vm0, %v14735_v43, %v4556_v33  ;;  %8842 = vrcp.f32 %v19486_v14  ;;  %v4743_v58 = vand.u32 2147483648, %v19486_v14  ;;  %19487 = vst [vmem:[#allocation361_spill] sm:$0xff] %v15249_v26  ;;  %v4325_v6 = vsel %vm4322_vm15, %v19489_v2, %v4320_v24 }
 0x84e   : > { %19488 = vst [vmem:[#allocation222_spill] sm:$0xff] %v15251_v27  ;;  %vm4487_vm5 = vcmp.eq.f32.partialorder %v4486_v0, 8.507059e+37  ;;  %v15254_v52 = vpop.eup %8838  ;;  %vm4408_vm2 = vweird.f32 %v14544_v23  ;;  %v4689_v48 = vsub.f32 1.0, %v15199_v53  ;;  %vm4562_vm11 = vcmp.eq.f32.partialorder %v4561_v38, 8.507059e+37 }
 0x84f   : > { %19490 = vst [vmem:[#allocation187_spill] sm:$0xff] %v15258_v9  ;;  %v4490_v43 = vsel %vm4487_vm5, %v4489_v5, %v4485_v10  ;;  %v4361_v33 = vadd.f32 %v14424_v25, %v14584_v55  ;;  %vm4528_vm8 = vweird.f32 %v15081_v61  ;;  %v4569_v42 = vsub.f32 1.0, %v4568_v35  ;;  %v19491_v5 = vld [vmem:[#allocation246_spill] sm:$0xff] }
 0x850   : > { %v4565_v26 = vsel %vm4562_vm11, %v14729_v3, %v4560_v57  ;;  %v4526_v0 = vadd.f32 %v15081_v61, %v4525_v18  ;;  %v15265_v24 = vpop.eup %8840  ;;  %vm4407_vm12 = vweird.f32 %v19320_v63  ;;  %vm4648_vm9 = vweird.f32 %v15015_v47  ;;  %v19495_v10 = vld [vmem:[#allocation86_spill] sm:$0xff] }
 0x851   : > { %v4533_v53 = vand.u32 2147483648, %v19439_v1  ;;  %v15271_v38 = vmul.f32 %v19491_v5, %v4325_v6  ;;  %v4366_v55 = vand.u32 2147483647, %v19471_v8  ;;  %v4601_v35 = vadd.f32 %v14874_v37, %v15045_v62  ;;  %v19499_v8 = vld [vmem:[#allocation247_spill] sm:$0xff] }
 0x852   : > { %v15286_v18 = vmul.f32 %v15254_v52, %v19472_v41  ;;  %vm4527_vm7 = vweird.f32 %v19439_v1  ;;  %v15290_v57 = vmul.f32 %v19495_v10, %v4490_v43  ;;  %v4531_v2 = vand.u32 2147483647, %v19439_v1  ;;  %v19500_v6 = vld [vmem:[#allocation275_spill] sm:$0xff] }
 0x853   : > { %19492 = vst [vmem:[#allocation256_spill] sm:$0xff] %v15271_v38  ;;  %vm4647_vm10 = vweird.f32 %v19422_v32  ;;  %vm15296_vm0 = vmor %vm4527_vm7, %vm4528_vm8  ;;  %8844 = vrcp.f32 %v19499_v8  ;;  %5344 = vrot.lane.b32.xlu2 %v15271_v38, %s9228_s14  ;;  %v15304_v5 = vmul.f32 %v19500_v6, %v4565_v26  ;;  %v4365_v1 = vsel %vm15280_vm6, %v14424_v25, %v4361_v33  ;;  %v15310_v10 = vpop.eup %8842  ;;  %v15344_v62 = vpop.permute.xlu1 %5282 }
 0x854   : > { %19496 = vst [vmem:[#allocation363_spill] sm:$0xff] %v15290_v57  ;;  %v4606_v43 = vand.u32 2147483647, %v19389_v44  ;;  %v15321_v54 = vmul.f32 %v15106_v16, %v4584_v49  ;;  %v4570_v26 = vmul.f32 %v15175_v60, %v4569_v42  ;;  %v4613_v25 = vmul.f32 %v15265_v24, %v19481_v21  ;;  %5366 = vrot.lane.b32.xlu1 %v15290_v57, %s9228_s14  ;;  %v15342_v57 = vpop.permute.xlu2 %5272  ;;  %vm15371_vm6 = vmor %vm4407_vm12, %vm4408_vm2 }
 0x855   : > { %19501 = vst [vmem:[#allocation265_spill] sm:$0xff] %v15304_v5  ;;  %v4530_v33 = vsel %vm15296_vm0, %v15081_v61, %v4526_v0  ;;  %v15331_v44 = vor.u32 1.1754944e-38, %v4743_v58  ;;  %v4534_v3 = vor.u32 1.1754944e-38, %v4533_v53  ;;  %5376 = vrot.lane.b32.xlu0 %v15304_v5, %s9228_s14  ;;  %vm4367_vm13 = vcmp.eq.f32.partialorder %v4366_v55, 8.507059e+37  ;;  %v19506_v61 = vld [vmem:[#allocation330_spill] sm:$0xff]  ;;  %v19507_v0 = vld [vmem:[#allocation168_spill] sm:$0xff]  ;;  %v15349_v53 = vpop.permute.xlu0 %5292  ;;  %vm15405_vm2 = vmor %vm4647_vm10, %vm4648_vm9 }
 0x856   : > { %v4605_v49 = vsel %vm15316_vm14, %v14874_v37, %v4601_v35  ;;  %v15339_v42 = vmul.f32 %v15146_v11, %v4689_v48  ;;  %v4629_v6 = vsub.f32 1.0, %v15286_v18  ;;  %19504 = vst [vmem:[#allocation326_spill] sm:$0xff] %v15342_v57  ;;  %v4370_v58 = vsel %vm4367_vm13, %v19506_v61, %v4365_v1  ;;  %v19509_v1 = vld [vmem:[#allocation249_spill] sm:$0xff]  ;;  %v19517_v61 = vld [vmem:[#allocation279_spill] sm:$0xff] }
 0x857   : > { %19505 = vst [vmem:[#allocation224_spill] sm:$0xff] %v15344_v62  ;;  %vm4532_vm1 = vcmp.eq.f32.partialorder %v4531_v2, 8.507059e+37  ;;  %vm4453_vm4 = vweird.f32 %v14687_v12  ;;  %8846 = vrcp.f32 %v19507_v0  ;;  %vm4607_vm15 = vcmp.eq.f32.partialorder %v4606_v43, 8.507059e+37 }
 0x858   : > { %19508 = vst [vmem:[#allocation380_spill] sm:$0xff] %v15349_v53  ;;  %v4535_v28 = vsel %vm4532_vm1, %v4534_v3, %v4530_v33  ;;  %v4406_v37 = vadd.f32 %v14544_v23, %v14690_v46  ;;  %vm4573_vm5 = vweird.f32 %v15175_v60  ;;  %v4614_v48 = vsub.f32 1.0, %v4613_v25  ;;  %v19512_v33 = vld [vmem:[#allocation272_spill] sm:$0xff] }
 0x859   : > { %v4610_v55 = vsel %vm4607_vm15, %v14867_v22, %v4605_v49  ;;  %v4571_v35 = vadd.f32 %v15175_v60, %v4570_v26  ;;  %v15356_v18 = vpop.eup %8844  ;;  %vm4452_vm11 = vweird.f32 %v19348_v7  ;;  %vm4693_vm8 = vweird.f32 %v15146_v11 }
 0x85a   : > { %v4578_v2 = vand.u32 2147483648, %v19461_v40  ;;  %v15362_v43 = vmul.f32 %v19509_v1, %v4370_v58  ;;  %v4411_v46 = vand.u32 2147483647, %v19320_v63  ;;  %v4646_v25 = vadd.f32 %v15015_v47, %v15195_v50  ;;  %v19516_v50 = vld [vmem:[#allocation190_spill] sm:$0xff] }
 0x85b   : > { %v15377_v26 = vmul.f32 %v15310_v10, %v19486_v14  ;;  %vm4572_vm7 = vweird.f32 %v19461_v40  ;;  %v15381_v3 = vmul.f32 %v19512_v33, %v4535_v28  ;;  %v4576_v49 = vand.u32 2147483647, %v19461_v40  ;;  %v19520_v33 = vld [vmem:[#allocation154_spill] sm:$0xff] }
 0x85c   : > { %vm4692_vm0 = vweird.f32 %v19448_v4  ;;  %vm15387_vm14 = vmor %vm4572_vm7, %vm4573_vm5  ;;  %8848 = vrcp.f32 %v19516_v50  ;;  %5350 = vrot.lane.b32.xlu2 %v15362_v43, %s9228_s14  ;;  %v15395_v58 = vmul.f32 %v19517_v61, %v4610_v55  ;;  %v4410_v40 = vsel %vm15371_vm6, %v14544_v23, %v4406_v37  ;;  %v15430_v63 = vpop.permute.xlu2 %5278 }
 0x85d   : > { %19513 = vst [vmem:[#allocation200_spill] sm:$0xff] %v15381_v3  ;;  %v4651_v28 = vand.u32 2147483647, %v19422_v32  ;;  %8850 = vrcp.f32 %v19520_v33  ;;  %v4615_v57 = vmul.f32 %v15265_v24, %v4614_v48  ;;  %v4658_v55 = vmul.f32 %v15356_v18, %v19499_v8  ;;  %5372 = vrot.lane.b32.xlu1 %v15381_v3, %s9228_s14  ;;  %v15418_v37 = vpop.eup %8846  ;;  %vm15461_vm6 = vmor %vm4452_vm11, %vm4453_vm4 }
 0x85e   : > { %v4575_v23 = vsel %vm15387_vm14, %v15175_v60, %v4571_v35  ;;  %v15421_v32 = vmul.f32 %v15254_v52, %v4629_v6  ;;  %v4579_v22 = vor.u32 1.1754944e-38, %v4578_v2  ;;  %5382 = vrot.lane.b32.xlu0 %v15395_v58, %s9228_s14  ;;  %vm4412_vm12 = vcmp.eq.f32.partialorder %v4411_v46, 8.507059e+37  ;;  %19521 = vst [vmem:[#allocation204_spill] sm:$0xff] %v15430_v63  ;;  %v15432_v60 = vpop.permute.xlu1 %5288  ;;  %v19523_v35 = vld [vmem:[#allocation362_spill] sm:$0xff]  ;;  %v15437_v2 = vpop.permute.xlu0 %5298  ;;  %vm15495_vm4 = vmor %vm4692_vm0, %vm4693_vm8 }
 0x85f   : > { %v4650_v48 = vsel %vm15405_vm2, %v15015_v47, %v4646_v25  ;;  %v4734_v61 = vsub.f32 1.0, %v15377_v26  ;;  %v4788_v27 = vand.u32 2147483648, %v19507_v0  ;;  %19522 = vst [vmem:[#allocation259_spill] sm:$0xff] %v15432_v60  ;;  %v4415_v6 = vsel %vm4412_vm12, %v14576_v15, %v4410_v40  ;;  %v19525_v40 = vld [vmem:[#allocation83_spill] sm:$0xff] }
 0x860   : > { %vm4577_vm9 = vcmp.eq.f32.partialorder %v4576_v49, 8.507059e+37  ;;  %vm4498_vm10 = vweird.f32 %v14826_v34  ;;  %8852 = vrcp.f32 %v19523_v35  ;;  %19524 = vst [vmem:[#allocation368_spill] sm:$0xff] %v15437_v2  ;;  %vm4652_vm13 = vcmp.eq.f32.partialorder %v4651_v28, 8.507059e+37 }
 0x861   : > { %v4580_v46 = vsel %vm4577_vm9, %v4579_v22, %v4575_v23  ;;  %v4451_v47 = vadd.f32 %v14687_v12, %v14856_v39  ;;  %vm4618_vm1 = vweird.f32 %v15265_v24  ;;  %v4659_v25 = vsub.f32 1.0, %v4658_v55  ;;  %v19528_v22 = vld [vmem:[#allocation273_spill] sm:$0xff] }
 0x862   : > { %v4655_v26 = vsel %vm4652_vm13, %v14991_v36, %v4650_v48  ;;  %v4616_v1 = vadd.f32 %v15265_v24, %v4615_v57  ;;  %v15444_v15 = vpop.eup %8848  ;;  %vm4497_vm15 = vweird.f32 %v19383_v56  ;;  %vm4738_vm5 = vweird.f32 %v15310_v10 }
 0x863   : > { %v4623_v49 = vand.u32 2147483648, %v19481_v21  ;;  %v15450_v28 = vmul.f32 %v19525_v40, %v4415_v6  ;;  %v4456_v39 = vand.u32 2147483647, %v19348_v7  ;;  %v4691_v55 = vadd.f32 %v15146_v11, %v15339_v42  ;;  %v15455_v23 = vpop.eup %8850  ;;  %v19532_v6 = vld [vmem:[#allocation216_spill] sm:$0xff]  ;;  %v19533_v40 = vld [vmem:[#allocation282_spill] sm:$0xff] }
 0x864   : > { %v15467_v57 = vmul.f32 %v15418_v37, %v19507_v0  ;;  %vm4617_vm7 = vweird.f32 %v19481_v21  ;;  %v15471_v48 = vmul.f32 %v19528_v22, %v4580_v46  ;;  %v4621_v42 = vand.u32 2147483647, %v19481_v21 }
 0x865   : > { %vm4737_vm14 = vweird.f32 %v19486_v14  ;;  %vm15477_vm2 = vmor %vm4617_vm7, %vm4618_vm1  ;;  %8854 = vrcp.f32 %v19532_v6  ;;  %5356 = vrot.lane.b32.xlu2 %v15450_v28, %s9228_s14  ;;  %v15485_v2 = vmul.f32 %v19533_v40, %v4655_v26  ;;  %v4455_v21 = vsel %vm15461_vm6, %v14687_v12, %v4451_v47 }
 0x866   : > { %19529 = vst [vmem:[#allocation267_spill] sm:$0xff] %v15471_v48  ;;  %v4696_v46 = vand.u32 2147483647, %v19448_v4  ;;  %v15499_v63 = vor.u32 1.1754944e-38, %v4788_v27  ;;  %v4660_v62 = vmul.f32 %v15356_v18, %v4659_v25  ;;  %v4703_v26 = vmul.f32 %v15444_v15, %v19516_v50  ;;  %5378 = vrot.lane.b32.xlu1 %v15471_v48, %s9228_s14  ;;  %v15509_v47 = vpop.eup %8852  ;;  %vm15549_vm1 = vmor %vm4497_vm15, %vm4498_vm10 }
 0x867   : > { %v4620_v12 = vsel %vm15477_vm2, %v15265_v24, %v4616_v1  ;;  %v4735_v4 = vmul.f32 %v15310_v10, %v4734_v61  ;;  %v4624_v36 = vor.u32 1.1754944e-38, %v4623_v49  ;;  %5388 = vrot.lane.b32.xlu0 %v15485_v2, %s9228_s14  ;;  %vm4457_vm11 = vcmp.eq.f32.partialorder %v4456_v39, 8.507059e+37  ;;  %v15522_v24 = vpop.permute.xlu2 %5284  ;;  %v15524_v1 = vpop.permute.xlu1 %5294  ;;  %v19538_v49 = vld [vmem:[#allocation366_spill] sm:$0xff]  ;;  %vm15583_vm10 = vmor %vm4737_vm14, %vm4738_vm5 }
 0x868   : > { %v4695_v27 = vsel %vm15495_vm4, %v15146_v11, %v4691_v55  ;;  %v15519_v25 = vmul.f32 %v15455_v23, %v19520_v33  ;;  %v4779_v7 = vsub.f32 1.0, %v15467_v57  ;;  %19536 = vst [vmem:[#allocation364_spill] sm:$0xff] %v15522_v24  ;;  %v4460_v61 = vsel %vm4457_vm11, %v14679_v19, %v4455_v21  ;;  %v15529_v39 = vpop.permute.xlu0 %5304  ;;  %v19540_v21 = vld [vmem:[#allocation252_spill] sm:$0xff] }
 0x869   : > { %19537 = vst [vmem:[#allocation365_spill] sm:$0xff] %v15524_v1  ;;  %vm4622_vm8 = vcmp.eq.f32.partialorder %v4621_v42, 8.507059e+37  ;;  %vm4543_vm0 = vweird.f32 %v14966_v20  ;;  %8856 = vrcp.f32 %v19538_v49  ;;  %vm4697_vm12 = vcmp.eq.f32.partialorder %v4696_v46, 8.507059e+37  ;;  %v19772_v1 = vld [vmem:[#allocation113_spill] sm:$0xff] }
 0x86a   : > { %19539 = vst [vmem:[#allocation303_spill] sm:$0xff] %v15529_v39  ;;  %v4625_v11 = vsel %vm4622_vm8, %v4624_v36, %v4620_v12  ;;  %v4496_v55 = vadd.f32 %v14826_v34, %v14969_v45  ;;  %vm4663_vm9 = vweird.f32 %v15356_v18  ;;  %v4704_v57 = vsub.f32 1.0, %v4703_v26  ;;  %v19544_v26 = vld [vmem:[#allocation274_spill] sm:$0xff] }
 0x86b   : > { %v4700_v40 = vsel %vm4697_vm12, %v15149_v29, %v4695_v27  ;;  %v4661_v22 = vadd.f32 %v15356_v18, %v4660_v62  ;;  %v15536_v19 = vpop.eup %8854  ;;  %vm4542_vm13 = vweird.f32 %v19408_v51  ;;  %v4668_v42 = vand.u32 2147483648, %v19499_v8  ;;  %v19549_v27 = vld [vmem:[#allocation289_spill] sm:$0xff] }
 0x86c   : > { %v15541_v39 = vmul.f32 %v19540_v21, %v4460_v61  ;;  %v4501_v46 = vand.u32 2147483647, %v19383_v56  ;;  %v4736_v45 = vadd.f32 %v15310_v10, %v4735_v4  ;;  %v15555_v62 = vmul.f32 %v15509_v47, %v19523_v35  ;;  %v19548_v4 = vld [vmem:[#allocation107_spill] sm:$0xff] }
 0x86d   : > { %vm4662_vm6 = vweird.f32 %v19499_v8  ;;  %v15559_v12 = vmul.f32 %v19544_v26, %v4625_v11  ;;  %v4666_v36 = vand.u32 2147483647, %v19499_v8  ;;  %vm4782_vm7 = vweird.f32 %v19507_v0  ;;  %v19553_v26 = vld [vmem:[#allocation295_spill] sm:$0xff] }
 0x86e   : > { %19541 = vst [vmem:[#allocation367_spill] sm:$0xff] %v15541_v39  ;;  %vm15565_vm2 = vmor %vm4662_vm6, %vm4663_vm9  ;;  %8858 = vrcp.f32 %v19548_v4  ;;  %5362 = vrot.lane.b32.xlu2 %v15541_v39, %s9228_s14  ;;  %v15573_v61 = vmul.f32 %v19549_v27, %v4700_v40  ;;  %v4500_v8 = vsel %vm15549_vm1, %v14826_v34, %v4496_v55  ;;  %v4741_v11 = vand.u32 2147483647, %v19486_v14 }
 0x86f   : > { %19545 = vst [vmem:[#allocation319_spill] sm:$0xff] %v15559_v12  ;;  %8860 = vrcp.f32 %v19553_v26  ;;  %v4705_v39 = vmul.f32 %v15444_v15, %v4704_v57  ;;  %v4748_v40 = vmul.f32 %v15536_v19, %v19532_v6  ;;  %5384 = vrot.lane.b32.xlu1 %v15559_v12, %s9228_s14  ;;  %v4665_v34 = vsel %vm15565_vm2, %v15356_v18, %v4661_v22  ;;  %v15596_v55 = vpop.eup %8856  ;;  %v15606_v5 = vpop.permute.xlu2 %5290  ;;  %vm15635_vm9 = vmor %vm4542_vm13, %vm4543_vm0  ;;  %v19791_v12 = vld [vmem:[#allocation41_spill] sm:$0xff] }
 0x870   : > { %19550 = vst [vmem:[#allocation218_spill] sm:$0xff] %v15573_v61  ;;  %v4780_v14 = vmul.f32 %v15418_v37, %v4779_v7  ;;  %v4669_v29 = vor.u32 1.1754944e-38, %v4668_v42  ;;  %5394 = vrot.lane.b32.xlu0 %v15573_v61, %s9228_s14  ;;  %vm4502_vm15 = vcmp.eq.f32.partialorder %v4501_v46, 8.507059e+37  ;;  %v4740_v57 = vsel %vm15583_vm10, %v15310_v10, %v4736_v45  ;;  %v15608_v18 = vpop.permute.xlu1 %5300  ;;  %v15613_v42 = vpop.permute.xlu0 %5310 }
 0x871   : > { %v4674_v27 = vsub.f32 1.0, %v15519_v25  ;;  %vm4783_vm5 = vweird.f32 %v15418_v37  ;;  %19554 = vst [vmem:[#allocation136_spill] sm:$0xff] %v15606_v5  ;;  %v4505_v22 = vsel %vm4502_vm15, %v14820_v31, %v4500_v8  ;;  %vm4667_vm14 = vcmp.eq.f32.partialorder %v4666_v36, 8.507059e+37  ;;  %v19557_v36 = vld [vmem:[#allocation255_spill] sm:$0xff] }
 0x872   : > { %19555 = vst [vmem:[#allocation374_spill] sm:$0xff] %v15608_v18  ;;  %vm4588_vm4 = vweird.f32 %v15106_v16  ;;  %v4824_v7 = vsub.f32 1.0, %v15555_v62  ;;  %v4670_v46 = vsel %vm4667_vm14, %v4669_v29, %v4665_v34  ;;  %vm4742_vm11 = vcmp.eq.f32.partialorder %v4741_v11, 8.507059e+37  ;;  %vm15669_vm0 = vmor %vm4782_vm7, %vm4783_vm5 }
 0x873   : > { %19556 = vst [vmem:[#allocation77_spill] sm:$0xff] %v15613_v42  ;;  %v4541_v10 = vadd.f32 %v14966_v20, %v15136_v59  ;;  %vm4708_vm8 = vweird.f32 %v15444_v15  ;;  %v4749_v25 = vsub.f32 1.0, %v4748_v40  ;;  %v4745_v45 = vsel %vm4742_vm11, %v15331_v44, %v4740_v57  ;;  %v19561_v40 = vld [vmem:[#allocation276_spill] sm:$0xff]  ;;  %v244_v42 = vld [vmem:[%s9316_s11 + $0xb0] sm:$0xff]  }
 0x874   : > { %v4706_v56 = vadd.f32 %v15444_v15, %v4705_v39  ;;  %v15620_v31 = vpop.eup %8858  ;;  %vm4587_vm12 = vweird.f32 %v19444_v30  ;;  %v4713_v62 = vand.u32 2147483648, %v19516_v50  ;;  %v15625_v8 = vmul.f32 %v19557_v36, %v4505_v22  ;;  %v19565_v57 = vld [vmem:[#allocation292_spill] sm:$0xff] }
 0x875   : > { %v4546_v11 = vand.u32 2147483647, %v19408_v51  ;;  %v4781_v59 = vadd.f32 %v15418_v37, %v4780_v14  ;;  %v15629_v21 = vpop.eup %8860  ;;  %v4868_v39 = vmul.f32 %v15596_v55, %v19538_v49  ;;  %vm4707_vm1 = vweird.f32 %v19516_v50  ;;  %v19564_v51 = vld [vmem:[#allocation301_spill] sm:$0xff]  ;;  %vm15715_vm11 = vmor %vm4587_vm12, %vm4588_vm4 }
 0x876   : > { %19558 = vst [vmem:[#allocation329_spill] sm:$0xff] %v15625_v8  ;;  %v15643_v34 = vmul.f32 %v19561_v40, %v4670_v46  ;;  %v4711_v14 = vand.u32 2147483647, %v19516_v50  ;;  %vm15648_vm6 = vmor %vm4707_vm1, %vm4708_vm8  ;;  %8862 = vrcp.f32 %v19564_v51  ;;  %5368 = vrot.lane.b32.xlu2 %v15625_v8, %s9228_s14  ;;  %v15656_v22 = vmul.f32 %v19565_v57, %v4745_v45  ;;  %v268_v8 = vld [vmem:[%s9316_s11 + $0x110] sm:$0xff]  }
 0x877   : > { %v4545_v46 = vsel %vm15635_vm9, %v14966_v20, %v4541_v10  ;;  %v4786_v50 = vand.u32 2147483647, %v19507_v0  ;;  %v15663_v36 = vmul.f32 %v15455_v23, %v4674_v27  ;;  %v4750_v45 = vmul.f32 %v15536_v19, %v4749_v25  ;;  %v15689_v44 = vpop.permute.xlu2 %5296 }
 0x878   : > { %19566 = vst [vmem:[#allocation369_spill] sm:$0xff] %v15656_v22  ;;  %v4793_v57 = vmul.f32 %v15620_v31, %v19548_v4  ;;  %5390 = vrot.lane.b32.xlu1 %v15643_v34, %s9228_s14  ;;  %v4710_v20 = vsel %vm15648_vm6, %v15444_v15, %v4706_v56  ;;  %v4825_v27 = vmul.f32 %v15509_v47, %v4824_v7  ;;  %v4714_v10 = vor.u32 1.1754944e-38, %v4713_v62  ;;  %v15691_v18 = vpop.permute.xlu1 %5306  ;;  %v15695_v56 = vpop.permute.xlu0 %5316 }
 0x879   : > { %5400 = vrot.lane.b32.xlu0 %v15656_v22, %s9228_s14  ;;  %vm4547_vm13 = vcmp.eq.f32.partialorder %v4546_v11, 8.507059e+37  ;;  %v4785_v0 = vsel %vm15669_vm0, %v15418_v37, %v4781_v59  ;;  %vm4828_vm7 = vweird.f32 %v15509_v47  ;;  %v4833_v25 = vand.u32 2147483648, %v19523_v35  ;;  %19569 = vst [vmem:[#allocation232_spill] sm:$0xff] %v15689_v44 }
 0x87a   : > { %19570 = vst [vmem:[#allocation261_spill] sm:$0xff] %v15691_v18  ;;  %v4550_v15 = vsel %vm4547_vm13, %v14971_v13, %v4545_v46  ;;  %vm4712_vm2 = vcmp.eq.f32.partialorder %v4711_v14, 8.507059e+37  ;;  %vm4633_vm10 = vweird.f32 %v15254_v52  ;;  %v4869_v7 = vsub.f32 1.0, %v4868_v39  ;;  %v19572_v39 = vld [vmem:[#allocation263_spill] sm:$0xff] }
 0x87b   : > { %19571 = vst [vmem:[#allocation307_spill] sm:$0xff] %v15695_v56  ;;  %v4715_v62 = vsel %vm4712_vm2, %v4714_v10, %v4710_v20  ;;  %vm4787_vm15 = vcmp.eq.f32.partialorder %v4786_v50, 8.507059e+37  ;;  %v4586_v37 = vadd.f32 %v15106_v16, %v15321_v54  ;;  %vm4753_vm5 = vweird.f32 %v15536_v19  ;;  %v19576_v50 = vld [vmem:[#allocation278_spill] sm:$0xff] }
 0x87c   : > { %v4794_v11 = vsub.f32 1.0, %v4793_v57  ;;  %v4790_v59 = vsel %vm4787_vm15, %v15499_v63, %v4785_v0  ;;  %v4751_v29 = vadd.f32 %v15536_v19, %v4750_v45  ;;  %v15702_v40 = vpop.eup %8862  ;;  %vm4632_vm14 = vweird.f32 %v19472_v41 }
 0x87d   : > { %v4758_v13 = vand.u32 2147483648, %v19532_v6  ;;  %v15707_v14 = vmul.f32 %v19572_v39, %v4550_v15  ;;  %v4591_v46 = vand.u32 2147483647, %v19444_v30  ;;  %v4826_v54 = vadd.f32 %v15509_v47, %v4825_v27  ;;  %v19580_v30 = vld [vmem:[#allocation235_spill] sm:$0xff]  ;;  %v19581_v27 = vld [vmem:[#allocation294_spill] sm:$0xff]  ;;  %vm15790_vm2 = vmor %vm4632_vm14, %vm4633_vm10 }
 0x87e   : > { %vm4827_vm8 = vweird.f32 %v19523_v35  ;;  %vm4752_vm9 = vweird.f32 %v19532_v6  ;;  %v15722_v45 = vmul.f32 %v19576_v50, %v4715_v62  ;;  %v4756_v57 = vand.u32 2147483647, %v19532_v6 }
 0x87f   : > { %19573 = vst [vmem:[#allocation270_spill] sm:$0xff] %v15707_v14  ;;  %vm15727_vm1 = vmor %vm4752_vm9, %vm4753_vm5  ;;  %8864 = vrcp.f32 %v19580_v30  ;;  %5374 = vrot.lane.b32.xlu2 %v15707_v14, %s9228_s14  ;;  %v15735_v10 = vmul.f32 %v19581_v27, %v4790_v59  ;;  %v4590_v0 = vsel %vm15715_vm11, %v15106_v16, %v4586_v37  ;;  %v4831_v6 = vand.u32 2147483647, %v19523_v35  ;;  %v19585_v59 = vld [vmem:[#allocation183_spill] sm:$0xff]  ;;  %v15766_v63 = vpop.permute.xlu2 %5302 }
 0x880   : > { %19577 = vst [vmem:[#allocation372_spill] sm:$0xff] %v15722_v45  ;;  %vm15743_vm4 = vmor %vm4827_vm8, %vm4828_vm7  ;;  %v4834_v62 = vor.u32 1.1754944e-38, %v4833_v25  ;;  %v4795_v39 = vmul.f32 %v15620_v31, %v4794_v11  ;;  %v4838_v50 = vmul.f32 %v15702_v40, %v19564_v51  ;;  %5396 = vrot.lane.b32.xlu1 %v15722_v45, %s9228_s14  ;;  %v4755_v16 = vsel %vm15727_vm1, %v15536_v19, %v4751_v29  ;;  %v15768_v19 = vpop.permute.xlu1 %5312 }
 0x881   : > { %19582 = vst [vmem:[#allocation378_spill] sm:$0xff] %v15735_v10  ;;  %v4870_v35 = vmul.f32 %v15596_v55, %v4869_v7  ;;  %v4759_v37 = vor.u32 1.1754944e-38, %v4758_v13  ;;  %5406 = vrot.lane.b32.xlu0 %v15735_v10, %s9228_s14  ;;  %vm4592_vm12 = vcmp.eq.f32.partialorder %v4591_v46, 8.507059e+37  ;;  %v4830_v25 = vsel %vm15743_vm4, %v15509_v47, %v4826_v54  ;;  %v19588_v7 = vld [vmem:[#allocation377_spill] sm:$0xff]  ;;  %v15772_v13 = vpop.permute.xlu0 %5322 }
 0x882   : > { %v15763_v11 = vmul.f32 %v15629_v21, %v19553_v26  ;;  %8866 = vrcp.f32 %v19585_v59  ;;  %19586 = vst [vmem:[#allocation260_spill] sm:$0xff] %v15766_v63  ;;  %v4595_v29 = vsel %vm4592_vm12, %v19588_v7, %v4590_v0  ;;  %vm4757_vm6 = vcmp.eq.f32.partialorder %v4756_v57, 8.507059e+37  ;;  %v19590_v57 = vld [vmem:[#allocation85_spill] sm:$0xff] }
 0x883   : > { %19587 = vst [vmem:[#allocation149_spill] sm:$0xff] %v15768_v19  ;;  %vm4873_vm0 = vweird.f32 %v15596_v55  ;;  %v4760_v46 = vsel %vm4757_vm6, %v4759_v37, %v4755_v16  ;;  %vm4832_vm13 = vcmp.eq.f32.partialorder %v4831_v6, 8.507059e+37  ;;  %v4631_v47 = vadd.f32 %v15254_v52, %v15421_v32  ;;  %v19598_v37 = vld [vmem:[#allocation296_spill] sm:$0xff] }
 0x884   : > { %19589 = vst [vmem:[#allocation170_spill] sm:$0xff] %v15772_v13  ;;  %vm4798_vm7 = vweird.f32 %v15620_v31  ;;  %v4839_v54 = vsub.f32 1.0, %v4838_v50  ;;  %v4835_v20 = vsel %vm4832_vm13, %v4834_v62, %v4830_v25  ;;  %v4796_v27 = vadd.f32 %v15620_v31, %v4795_v39  ;;  %v19594_v39 = vld [vmem:[#allocation281_spill] sm:$0xff]  ;;  %v310_v19 = vld [vmem:[%s9316_s11 + $0x1b8] sm:$0xff]  }
 0x885   : > { %v15778_v15 = vpop.eup %8864  ;;  %v4803_v0 = vand.u32 2147483648, %v19548_v4  ;;  %v15782_v7 = vmul.f32 %v19590_v57, %v4595_v29  ;;  %v4636_v44 = vand.u32 2147483647, %v19472_v41  ;;  %v4871_v6 = vadd.f32 %v15596_v55, %v4870_v35 }
 0x886   : > { %v4878_v62 = vand.u32 2147483648, %v19538_v49  ;;  %vm4797_vm15 = vweird.f32 %v19548_v4  ;;  %v15797_v50 = vmul.f32 %v19594_v39, %v4760_v46  ;;  %v4801_v16 = vand.u32 2147483647, %v19548_v4 }
 0x887   : > { %19591 = vst [vmem:[#allocation331_spill] sm:$0xff] %v15782_v7  ;;  %vm4872_vm5 = vweird.f32 %v19538_v49  ;;  %vm15803_vm11 = vmor %vm4797_vm15, %vm4798_vm7  ;;  %5380 = vrot.lane.b32.xlu2 %v15782_v7, %s9228_s14  ;;  %v15810_v25 = vmul.f32 %v19598_v37, %v4835_v20  ;;  %v4635_v29 = vsel %vm15790_vm2, %v15254_v52, %v4631_v47  ;;  %v4876_v4 = vand.u32 2147483647, %v19538_v49  ;;  %v15841_v32 = vpop.permute.xlu2 %5308 }
 0x888   : > { %19595 = vst [vmem:[#allocation237_spill] sm:$0xff] %v15797_v50  ;;  %v15816_v46 = vpop.eup %8866  ;;  %v19599_v57 = vand.u32 2147483648, %v19472_v41  ;;  %vm15822_vm10 = vmor %vm4872_vm5, %vm4873_vm0  ;;  %v4840_v20 = vmul.f32 %v15702_v40, %v4839_v54  ;;  %v4883_v37 = vmul.f32 %v15778_v15, %v19580_v30  ;;  %5402 = vrot.lane.b32.xlu1 %v15797_v50, %s9228_s14  ;;  %v4800_v52 = vsel %vm15803_vm11, %v15620_v31, %v4796_v27  ;;  %v298_v50 = vld [vmem:[%s9316_s11 + $0x188] sm:$0xff]  }
 0x889   : > { %v4683_v41 = vand.u32 2147483648, %v19520_v33  ;;  %v4804_v49 = vor.u32 1.1754944e-38, %v4803_v0  ;;  %5412 = vrot.lane.b32.xlu0 %v15810_v25, %s9228_s14  ;;  %vm4637_vm14 = vcmp.eq.f32.partialorder %v4636_v44, 8.507059e+37  ;;  %v4875_v47 = vsel %vm15822_vm10, %v15596_v55, %v4871_v6  ;;  %19602 = vst [vmem:[#allocation266_spill] sm:$0xff] %v15841_v32  ;;  %v15846_v27 = vpop.permute.xlu0 %5328  ;;  %v232_v32 = vld [vmem:[%s9316_s11 + $0x80] sm:$0xff]  }
 0x88a   : > { %v4639_v39 = vor.u32 1.1754944e-38, %v19599_v57  ;;  %vm4678_vm8 = vweird.f32 %v15455_v23  ;;  %v4879_v54 = vor.u32 1.1754944e-38, %v4878_v62  ;;  %v15843_v57 = vpop.permute.xlu1 %5318  ;;  %vm4802_vm9 = vcmp.eq.f32.partialorder %v4801_v16, 8.507059e+37  ;;  %19604 = vst [vmem:[#allocation128_spill] sm:$0xff] %v15846_v27  ;;  %v19605_v16 = vld [vmem:[#allocation166_spill] sm:$0xff] }
 0x88b   : > { %19603 = vst [vmem:[#allocation387_spill] sm:$0xff] %v15843_v57  ;;  %v4719_v31 = vsub.f32 1.0, %v15763_v11  ;;  %v4805_v0 = vsel %vm4802_vm9, %v4804_v49, %v4800_v52  ;;  %vm4877_vm1 = vcmp.eq.f32.partialorder %v4876_v4, 8.507059e+37  ;;  %v4676_v44 = vadd.f32 %v15455_v23, %v15663_v36  ;;  %v19608_v36 = vld [vmem:[#allocation257_spill] sm:$0xff] }
 0x88c   : > { %v4640_v35 = vsel %vm4637_vm14, %v4639_v39, %v4635_v29  ;;  %vm4843_vm4 = vweird.f32 %v15702_v40  ;;  %v4884_v55 = vsub.f32 1.0, %v4883_v37  ;;  %v4880_v63 = vsel %vm4877_vm1, %v4879_v54, %v4875_v47  ;;  %v19609_v39 = vld [vmem:[#allocation285_spill] sm:$0xff]  ;;  %v19613_v54 = vld [vmem:[#allocation298_spill] sm:$0xff] }
 0x88d   : > { %v4841_v6 = vadd.f32 %v15702_v40, %v4840_v20  ;;  %vm4677_vm12 = vweird.f32 %v19520_v33  ;;  %v4848_v62 = vand.u32 2147483648, %v19564_v51  ;;  %v15855_v11 = vmul.f32 %v19605_v16, %v4640_v35  ;;  %v200_v52 = vld [vmem:[%s9316_s11] sm:$0xff]  }
 0x88e   : > { %v4681_v29 = vand.u32 2147483647, %v19520_v33  ;;  %vm15860_vm6 = vmor %vm4677_vm12, %vm4678_vm8  ;;  %8868 = vrcp.f32 %v19608_v36  ;;  %vm4842_vm0 = vweird.f32 %v19564_v51  ;;  %v15867_v20 = vmul.f32 %v19609_v39, %v4805_v0 }
 0x88f   : > { %v4846_v37 = vand.u32 2147483647, %v19564_v51  ;;  %v4720_v49 = vmul.f32 %v15629_v21, %v4719_v31  ;;  %v4763_v33 = vmul.f32 %v15816_v46, %v19585_v59  ;;  %vm15876_vm13 = vmor %vm4842_vm0, %vm4843_vm4  ;;  %5386 = vrot.lane.b32.xlu2 %v15855_v11, %s9228_s14  ;;  %v15883_v35 = vmul.f32 %v19613_v54, %v4880_v63  ;;  %v15896_v27 = vpop.permute.xlu2 %5314 }
 0x890   : > { %19610 = vst [vmem:[#allocation375_spill] sm:$0xff] %v15867_v20  ;;  %v4680_v51 = vsel %vm15860_vm6, %v15455_v23, %v4676_v44  ;;  %v4684_v31 = vor.u32 1.1754944e-38, %v4683_v41  ;;  %v4885_v0 = vmul.f32 %v15778_v15, %v4884_v55  ;;  %5408 = vrot.lane.b32.xlu1 %v15867_v20, %s9228_s14  ;;  %v4845_v16 = vsel %vm15876_vm13, %v15702_v40, %v4841_v6 }
 0x891   : > { %v4849_v39 = vor.u32 1.1754944e-38, %v4848_v62  ;;  %5418 = vrot.lane.b32.xlu0 %v15883_v35, %s9228_s14  ;;  %vm4682_vm7 = vcmp.eq.f32.partialorder %v4681_v29, 8.507059e+37  ;;  %v4912_v63 = vunpack.c.l.bf16 %v200_v52  ;;  %v4913_v54 = vunpack.c.h.bf16 %v200_v52  ;;  %19614 = vst [vmem:[#allocation193_spill] sm:$0xff] %v15896_v27  ;;  %v15901_v55 = vpop.permute.xlu0 %5334  ;;  %v19617_v52 = vld [vmem:[#allocation186_spill] sm:$0xff] }
 0x892   : > { %v15898_v23 = vpop.permute.xlu1 %5324  ;;  %v4685_v41 = vsel %vm4682_vm7, %v4684_v31, %v4680_v51  ;;  %vm4847_vm2 = vcmp.eq.f32.partialorder %v4846_v37, 8.507059e+37  ;;  %vm4723_vm15 = vweird.f32 %v15629_v21  ;;  %v4764_v44 = vsub.f32 1.0, %v4763_v33  ;;  %19616 = vst [vmem:[#allocation126_spill] sm:$0xff] %v15901_v55  ;;  %v19621_v31 = vld [vmem:[#allocation180_spill] sm:$0xff] }
 0x893   : > { %19615 = vst [vmem:[#allocation381_spill] sm:$0xff] %v15898_v23  ;;  %v4850_v4 = vsel %vm4847_vm2, %v4849_v39, %v4845_v16  ;;  %v4721_v40 = vadd.f32 %v15629_v21, %v4720_v49  ;;  %vm4722_vm5 = vweird.f32 %v19553_v26  ;;  %v4728_v62 = vand.u32 2147483648, %v19553_v26  ;;  %v19622_v16 = vld [vmem:[#allocation288_spill] sm:$0xff]  ;;  %v19773_v23 = vld [vmem:[#allocation119_spill] sm:$0xff] }
 0x894   : > { %v15904_v6 = vpop.eup %8868  ;;  %vm4888_vm11 = vweird.f32 %v15778_v15  ;;  %v4886_v29 = vadd.f32 %v15778_v15, %v4885_v0  ;;  %v4893_v37 = vand.u32 2147483648, %v19580_v30  ;;  %v15912_v33 = vmul.f32 %v19617_v52, %v4685_v41  ;;  %vm15915_vm10 = vmor %vm4722_vm5, %vm4723_vm15  ;;  %v206_v55 = vld [vmem:[%s9316_s11 + $0x18] sm:$0xff]  }
 0x895   : > { %v8041_v47 = vpack.i.bf16 %v4913_v54, %v4912_v63  ;;  %v4726_v51 = vand.u32 2147483647, %v19553_v26  ;;  %8870 = vrcp.f32 %v19621_v31  ;;  %vm4887_vm14 = vweird.f32 %v19580_v30 }
 0x896   : > { %19618 = vst [vmem:[#allocation310_spill] sm:$0xff] %v15912_v33  ;;  %v15922_v39 = vmul.f32 %v19622_v16, %v4850_v4  ;;  %v4891_v0 = vand.u32 2147483647, %v19580_v30  ;;  %v4765_v41 = vmul.f32 %v15816_v46, %v4764_v44  ;;  %v4808_v63 = vmul.f32 %v15904_v6, %v19608_v36  ;;  %vm15929_vm8 = vmor %vm4887_vm14, %vm4888_vm11 }
 0x897   : > { %5392 = vrot.lane.b32.xlu2 %v15912_v33, %s9228_s14  ;;  %v4725_v54 = vsel %vm15915_vm10, %v15629_v21, %v4721_v40  ;;  %v4729_v4 = vor.u32 1.1754944e-38, %v4728_v62  ;;  %v4890_v30 = vsel %vm15929_vm8, %v15778_v15, %v4886_v29  ;;  %v4894_v44 = vor.u32 1.1754944e-38, %v4893_v37  ;;  %v15944_v33 = vpop.permute.xlu2 %5320 }
 0x898   : > { %19623 = vst [vmem:[#allocation337_spill] sm:$0xff] %v15922_v39  ;;  %5414 = vrot.lane.b32.xlu1 %v15922_v39, %s9228_s14  ;;  %vm4727_vm9 = vcmp.eq.f32.partialorder %v4726_v51, 8.507059e+37  ;;  %v4918_v52 = vunpack.c.l.bf16 %v206_v55  ;;  %v4919_v16 = vunpack.c.h.bf16 %v206_v55  ;;  %vm4892_vm1 = vcmp.eq.f32.partialorder %v4891_v0, 8.507059e+37 }
 0x899   : > { %8042 = vrot.lane.b32.xlu0 %v8041_v47, %s9229_s28  ;;  %19626 = vst [vmem:[#allocation239_spill] sm:$0xff] %v15944_v33  ;;  %v4730_v21 = vsel %vm4727_vm9, %v4729_v4, %v4725_v54  ;;  %vm4768_vm4 = vweird.f32 %v15816_v46  ;;  %v4809_v40 = vsub.f32 1.0, %v4808_v63  ;;  %v15949_v62 = vpop.permute.xlu0 %5340  ;;  %v4895_v15 = vsel %vm4892_vm1, %v4894_v44, %v4890_v30  ;;  %v19629_v47 = vld [vmem:[#allocation174_spill] sm:$0xff]  ;;  %v19633_v4 = vld [vmem:[#allocation100_spill] sm:$0xff]  ;;  %v212_v44 = vld [vmem:[%s9316_s11 + $0x30] sm:$0xff]  }
 0x89a   : > { %v15946_v49 = vpop.permute.xlu1 %5330  ;;  %19628 = vst [vmem:[#allocation334_spill] sm:$0xff] %v15949_v62  ;;  %v4766_v29 = vadd.f32 %v15816_v46, %v4765_v41  ;;  %v4773_v55 = vand.u32 2147483648, %v19585_v59  ;;  %vm4767_vm12 = vweird.f32 %v19585_v59  ;;  %v15957_v51 = vmul.f32 %v19629_v47, %v4730_v21  ;;  %v202_v54 = vld [vmem:[%s9316_s11 + $0x8] sm:$0xff]  }
 0x89b   : > { %19627 = vst [vmem:[#allocation268_spill] sm:$0xff] %v15946_v49  ;;  %v15952_v37 = vpop.eup %8870  ;;  %v8056_v26 = vpack.i.bf16 %v4919_v16, %v4918_v52  ;;  %v4771_v0 = vand.u32 2147483647, %v19585_v59  ;;  %vm15961_vm6 = vmor %vm4767_vm12, %vm4768_vm4  ;;  %8872 = vrcp.f32 %v19633_v4  ;;  %v19634_v41 = vld [vmem:[#allocation290_spill] sm:$0xff]  ;;  %v4810_v49 = vmul.f32 %v15904_v6, %v4809_v40 }
 0x89c   : > { %19630 = vst [vmem:[#allocation161_spill] sm:$0xff] %v15957_v51  ;;  %v15967_v30 = vmul.f32 %v19634_v41, %v4895_v15  ;;  %v4853_v21 = vmul.f32 %v15952_v37, %v19621_v31  ;;  %v4770_v59 = vsel %vm15961_vm6, %v15816_v46, %v4766_v29  ;;  %v4774_v52 = vor.u32 1.1754944e-38, %v4773_v55  ;;  %v19638_v63 = vld [vmem:[#allocation194_spill] sm:$0xff] }
 0x89d   : > { %v4914_v16 = vunpack.c.l.bf16 %v202_v54  ;;  %v4915_v15 = vunpack.c.h.bf16 %v202_v54  ;;  %vm4772_vm0 = vcmp.eq.f32.partialorder %v4771_v0, 8.507059e+37  ;;  %v4924_v40 = vunpack.c.l.bf16 %v212_v44 }
 0x89e   : > { %v4925_v47 = vunpack.c.h.bf16 %v212_v44  ;;  %v4775_v18 = vsel %vm4772_vm0, %v4774_v52, %v4770_v59  ;;  %vm4813_vm13 = vweird.f32 %v15904_v6  ;;  %v4854_v46 = vsub.f32 1.0, %v4853_v21  ;;  %v208_v52 = vld [vmem:[%s9316_s11 + $0x20] sm:$0xff]  }
 0x89f   : > { %5398 = vrot.lane.b32.xlu2 %v15957_v51, %s9228_s14  ;;  %v15981_v41 = vpop.permute.xlu2 %5326  ;;  %v4811_v55 = vadd.f32 %v15904_v6, %v4810_v49  ;;  %v8046_v0 = vpack.i.bf16 %v4915_v15, %v4914_v16  ;;  %vm4812_vm7 = vweird.f32 %v19608_v36  ;;  %v15994_v44 = vmul.f32 %v19638_v63, %v4775_v18  ;;  %v256_v51 = vld [vmem:[%s9316_s11 + $0xe0] sm:$0xff]  }
 0x8a0   : > { %5420 = vrot.lane.b32.xlu1 %v15967_v30, %s9228_s14  ;;  %19635 = vst [vmem:[#allocation172_spill] sm:$0xff] %v15981_v41  ;;  %v8071_v45 = vpack.i.bf16 %v4925_v47, %v4924_v40  ;;  %v4816_v59 = vand.u32 2147483647, %v19608_v36  ;;  %vm15998_vm2 = vmor %vm4812_vm7, %vm4813_vm13  ;;  %v4855_v49 = vmul.f32 %v15952_v37, %v4854_v46  ;;  %v4921_v15 = vunpack.c.h.bf16 %v208_v52 }
 0x8a1   : > { %8057 = vrot.lane.b32.xlu0 %v8056_v26, %s9229_s28  ;;  %v15986_v29 = vpop.permute.xlu0 %5346  ;;  %v15989_v54 = vpop.eup %8872  ;;  %v4818_v26 = vand.u32 2147483648, %v19608_v36  ;;  %19639 = vst [vmem:[#allocation102_spill] sm:$0xff] %v15994_v44  ;;  %v4815_v18 = vsel %vm15998_vm2, %v15904_v6, %v4811_v55  ;;  %v4920_v36 = vunpack.c.l.bf16 %v208_v52  ;;  %vm4858_vm5 = vweird.f32 %v15952_v37 }
 0x8a2   : > { %v15983_v62 = vpop.permute.xlu1 %5336  ;;  %19637 = vst [vmem:[#allocation342_spill] sm:$0xff] %v15986_v29  ;;  %v4898_v29 = vmul.f32 %v15989_v54, %v19633_v4  ;;  %vm4817_vm15 = vcmp.eq.f32.partialorder %v4816_v59, 8.507059e+37  ;;  %vm4857_vm11 = vweird.f32 %v19621_v31  ;;  %v19645_v59 = vld [vmem:[#allocation280_spill] sm:$0xff]  ;;  %v4861_v21 = vand.u32 2147483647, %v19621_v31 }
 0x8a3   : > { %19636 = vst [vmem:[#allocation325_spill] sm:$0xff] %v15983_v62  ;;  %v218_v62 = vld [vmem:[%s9316_s11 + $0x48] sm:$0xff]   ;;  %v4819_v16 = vor.u32 1.1754944e-38, %v4818_v26  ;;  %v4856_v26 = vadd.f32 %v15952_v37, %v4855_v49  ;;  %vm16028_vm10 = vmor %vm4857_vm11, %vm4858_vm5  ;;  %vm4903_vm8 = vweird.f32 %v15989_v54  ;;  %vm4902_vm9 = vweird.f32 %v19633_v4 }
 0x8a4   : > { %v4930_v40 = vunpack.c.l.bf16 %v218_v62  ;;  %v4931_v47 = vunpack.c.h.bf16 %v218_v62  ;;  %v4899_v6 = vsub.f32 1.0, %v4898_v29  ;;  %v224_v29 = vld [vmem:[%s9316_s11 + $0x60] sm:$0xff]   ;;  %vm4862_vm14 = vcmp.eq.f32.partialorder %v4861_v21, 8.507059e+37  ;;  %vm4904_vm1 = vmor %vm4902_vm9, %vm4903_vm8 }
 0x8a5   : > { %v4820_v61 = vsel %vm4817_vm15, %v4819_v16, %v4815_v18  ;;  %v4860_v49 = vsel %vm16028_vm10, %v15952_v37, %v4856_v26  ;;  %v4906_v18 = vand.u32 2147483647, %v19633_v4 }
 0x8a6   : > { %v16024_v62 = vmul.f32 %v19645_v59, %v4820_v61  ;;  %v8086_v52 = vpack.i.bf16 %v4931_v47, %v4930_v40  ;;  %v4900_v16 = vmul.f32 %v15989_v54, %v4899_v6  ;;  %v4937_v40 = vunpack.c.h.bf16 %v224_v29 }
 0x8a7   : > { %5404 = vrot.lane.b32.xlu2 %v15994_v44, %s9228_s14  ;;  %v16013_v46 = vpop.permute.xlu2 %5332  ;;  %vm4907_vm4 = vcmp.eq.f32.partialorder %v4906_v18, 8.507059e+37 }
 0x8a8   : > { %8047 = vrot.lane.b32.xlu1 %v8046_v0, %s9229_s28  ;;  %19642 = vst [vmem:[#allocation242_spill] sm:$0xff] %v16013_v46  ;;  %v4863_v0 = vand.u32 2147483648, %v19621_v31  ;;  %v214_v46 = vld [vmem:[%s9316_s11 + $0x38] sm:$0xff]   ;;  %v4901_v26 = vadd.f32 %v15989_v54, %v4900_v16 }
 0x8a9   : > { %8072 = vrot.lane.b32.xlu0 %v8071_v45, %s9229_s28  ;;  %v16018_v55 = vpop.permute.xlu0 %5352  ;;  %v8061_v45 = vpack.i.bf16 %v4921_v15, %v4920_v36  ;;  %19646 = vst [vmem:[#allocation196_spill] sm:$0xff] %v16024_v62  ;;  %v4926_v36 = vunpack.c.l.bf16 %v214_v46  ;;  %v4927_v31 = vunpack.c.h.bf16 %v214_v46  ;;  %v4936_v15 = vunpack.c.l.bf16 %v224_v29  ;;  %v220_v29 = vld [vmem:[%s9316_s11 + $0x50] sm:$0xff]  }
 0x8aa   : > { %v16015_v63 = vpop.permute.xlu1 %5342  ;;  %19644 = vst [vmem:[#allocation332_spill] sm:$0xff] %v16018_v55  ;;  %v4864_v61 = vor.u32 1.1754944e-38, %v4863_v0  ;;  %v4908_v46 = vand.u32 2147483648, %v19633_v4  ;;  %v4905_v16 = vsel %vm4904_vm1, %v15989_v54, %v4901_v26  ;;  %v204_v26 = vld [vmem:[%s9316_s11 + $0x10] sm:$0xff]  }
 0x8ab   : > { %19643 = vst [vmem:[#allocation118_spill] sm:$0xff] %v16015_v63  ;;  %v8076_v0 = vpack.i.bf16 %v4927_v31, %v4926_v36  ;;  %v8101_v21 = vpack.i.bf16 %v4937_v40, %v4936_v15  ;;  %v4932_v36 = vunpack.c.l.bf16 %v220_v29  ;;  %v4933_v31 = vunpack.c.h.bf16 %v220_v29  ;;  %v236_v29 = vld [vmem:[%s9316_s11 + $0x90] sm:$0xff]  }
 0x8ac   : > { %v4865_v59 = vsel %vm4862_vm14, %v4864_v61, %v4860_v49  ;;  %v230_v49 = vld [vmem:[%s9316_s11 + $0x78] sm:$0xff]   ;;  %v4909_v61 = vor.u32 1.1754944e-38, %v4908_v46  ;;  %v19656_v46 = vld [vmem:[#allocation287_spill] sm:$0xff]  ;;  %v4917_v18 = vunpack.c.h.bf16 %v204_v26 }
 0x8ad   : > { %v4942_v4 = vunpack.c.l.bf16 %v230_v49  ;;  %v4943_v15 = vunpack.c.h.bf16 %v230_v49  ;;  %v8091_v54 = vpack.i.bf16 %v4933_v31, %v4932_v36  ;;  %v4949_v36 = vunpack.c.h.bf16 %v236_v29 }
 0x8af   : > { %5410 = vrot.lane.b32.xlu2 %v16024_v62, %s9228_s14  ;;  %v16041_v47 = vpop.permute.xlu2 %5338 }
 0x8b0   : > { %8062 = vrot.lane.b32.xlu1 %v8061_v45, %s9229_s28  ;;  %19649 = vst [vmem:[#allocation226_spill] sm:$0xff] %v16041_v47  ;;  %v19652_v45 = vld [vmem:[#allocation284_spill] sm:$0xff] }
 0x8b1   : > { %8087 = vrot.lane.b32.xlu0 %v8086_v52, %s9229_s28  ;;  %v16046_v37 = vpop.permute.xlu0 %5358  ;;  %v16052_v52 = vmul.f32 %v19652_v45, %v4865_v59  ;;  %v4910_v45 = vsel %vm4907_vm4, %v4909_v61, %v4905_v16  ;;  %v4948_v61 = vunpack.c.l.bf16 %v236_v29  ;;  %v4945_v29 = vunpack.c.h.bf16 %v232_v32 }
 0x8b2   : > { %v16043_v6 = vpop.permute.xlu1 %5348  ;;  %19651 = vst [vmem:[#allocation246_spill] sm:$0xff] %v16046_v37  ;;  %v16070_v63 = vmul.f32 %v19656_v46, %v4910_v45 }
 0x8b3   : > { %19650 = vst [vmem:[#allocation145_spill] sm:$0xff] %v16043_v6  ;;  %v226_v6 = vld [vmem:[%s9316_s11 + $0x68] sm:$0xff]  }
 0x8b4   : > { %v4938_v49 = vunpack.c.l.bf16 %v226_v6  ;;  %v4939_v16 = vunpack.c.h.bf16 %v226_v6 }
 0x8b6   : > { %v8106_v46 = vpack.i.bf16 %v4939_v16, %v4938_v49 }
 0x8b7   : > { %5416 = vrot.lane.b32.xlu2 %v16052_v52, %s9228_s14  ;;  %v16062_v40 = vpop.permute.xlu2 %5344 }
 0x8b8   : > { %8077 = vrot.lane.b32.xlu1 %v8076_v0, %s9229_s28  ;;  %19653 = vst [vmem:[#allocation86_spill] sm:$0xff] %v16062_v40  ;;  %v8116_v0 = vpack.i.bf16 %v4943_v15, %v4942_v4  ;;  %v8131_v40 = vpack.i.bf16 %v4949_v36, %v4948_v61 }
 0x8b9   : > { %8102 = vrot.lane.b32.xlu0 %v8101_v21, %s9229_s28  ;;  %v16066_v47 = vpop.permute.xlu0 %5364  ;;  %v4916_v21 = vunpack.c.l.bf16 %v204_v26  ;;  %v242_v26 = vld [vmem:[%s9316_s11 + $0xa8] sm:$0xff]  }
 0x8ba   : > { %v16064_v59 = vpop.permute.xlu1 %5354  ;;  %19655 = vst [vmem:[#allocation275_spill] sm:$0xff] %v16066_v47  ;;  %v210_v47 = vld [vmem:[%s9316_s11 + $0x28] sm:$0xff]  }
 0x8bb   : > { %19654 = vst [vmem:[#allocation247_spill] sm:$0xff] %v16064_v59  ;;  %v8051_v45 = vpack.i.bf16 %v4917_v18, %v4916_v21  ;;  %v4922_v6 = vunpack.c.l.bf16 %v210_v47  ;;  %v4955_v21 = vunpack.c.h.bf16 %v242_v26  ;;  %v292_v59 = vld [vmem:[%s9316_s11 + $0x170] sm:$0xff]  }
 0x8bf   : > { %5422 = vrot.lane.b32.xlu2 %v16070_v63, %s9228_s14  ;;  %v16078_v31 = vpop.permute.xlu2 %5350 }
 0x8c0   : > { %8092 = vrot.lane.b32.xlu1 %v8091_v54, %s9229_s28  ;;  %19657 = vst [vmem:[#allocation330_spill] sm:$0xff] %v16078_v31  ;;  %v4923_v54 = vunpack.c.h.bf16 %v210_v47  ;;  %v238_v31 = vld [vmem:[%s9316_s11 + $0x98] sm:$0xff]   ;;  %v248_v47 = vld [vmem:[%s9316_s11 + $0xc0] sm:$0xff]  }
 0x8c1   : > { %8117 = vrot.lane.b32.xlu0 %v8116_v0, %s9229_s28  ;;  %v16082_v15 = vpop.permute.xlu0 %5370  ;;  %v4944_v0 = vunpack.c.l.bf16 %v232_v32 }
 0x8c2   : > { %v16080_v4 = vpop.permute.xlu1 %5360  ;;  %19659 = vst [vmem:[#allocation249_spill] sm:$0xff] %v16082_v15  ;;  %v8066_v61 = vpack.i.bf16 %v4923_v54, %v4922_v6  ;;  %v4961_v6 = vunpack.c.h.bf16 %v248_v47 }
 0x8c3   : > { %19658 = vst [vmem:[#allocation168_spill] sm:$0xff] %v16080_v4  ;;  %v4954_v4 = vunpack.c.l.bf16 %v242_v26  ;;  %v8121_v36 = vpack.i.bf16 %v4945_v29, %v4944_v0  ;;  %v4951_v26 = vunpack.c.h.bf16 %v238_v31 }
 0x8c5   : > { %v8146_v15 = vpack.i.bf16 %v4955_v21, %v4954_v4 }
 0x8c7   : > { %8052 = vrot.lane.b32.xlu2 %v8051_v45, %s9229_s28  ;;  %v16090_v18 = vpop.permute.xlu2 %5356  ;;  %v216_v45 = vld [vmem:[%s9316_s11 + $0x40] sm:$0xff]  }
 0x8c8   : > { %8107 = vrot.lane.b32.xlu1 %v8106_v46, %s9229_s28  ;;  %19660 = vst [vmem:[#allocation272_spill] sm:$0xff] %v16090_v18  ;;  %v4928_v32 = vunpack.c.l.bf16 %v216_v45  ;;  %v4950_v46 = vunpack.c.l.bf16 %v238_v31 }
 0x8c9   : > { %8132 = vrot.lane.b32.xlu0 %v8131_v40, %s9229_s28  ;;  %v16094_v16 = vpop.permute.xlu0 %5376  ;;  %v4929_v40 = vunpack.c.h.bf16 %v216_v45  ;;  %v254_v45 = vld [vmem:[%s9316_s11 + $0xd8] sm:$0xff]  }
 0x8ca   : > { %v16092_v49 = vpop.permute.xlu1 %5366  ;;  %19662 = vst [vmem:[#allocation279_spill] sm:$0xff] %v16094_v16  ;;  %v8136_v21 = vpack.i.bf16 %v4951_v26, %v4950_v46 }
 0x8cb   : > { %19661 = vst [vmem:[#allocation190_spill] sm:$0xff] %v16092_v49  ;;  %v4960_v49 = vunpack.c.l.bf16 %v248_v47  ;;  %v8081_v29 = vpack.i.bf16 %v4929_v40, %v4928_v32  ;;  %v4957_v47 = vunpack.c.h.bf16 %v244_v42  ;;  %v4967_v32 = vunpack.c.h.bf16 %v254_v45 }
 0x8cd   : > { %v8161_v16 = vpack.i.bf16 %v4961_v6, %v4960_v49 }
 0x8cf   : > { %8067 = vrot.lane.b32.xlu2 %v8066_v61, %s9229_s28  ;;  %v16102_v54 = vpop.permute.xlu2 %5362  ;;  %v222_v61 = vld [vmem:[%s9316_s11 + $0x58] sm:$0xff]  }
 0x8d0   : > { %8122 = vrot.lane.b32.xlu1 %v8121_v36, %s9229_s28  ;;  %19663 = vst [vmem:[#allocation154_spill] sm:$0xff] %v16102_v54  ;;  %v4934_v31 = vunpack.c.l.bf16 %v222_v61  ;;  %v4956_v36 = vunpack.c.l.bf16 %v244_v42  ;;  %v4966_v54 = vunpack.c.l.bf16 %v254_v45 }
 0x8d1   : > { %8147 = vrot.lane.b32.xlu0 %v8146_v15, %s9229_s28  ;;  %v16106_v0 = vpop.permute.xlu0 %5382  ;;  %v4935_v15 = vunpack.c.h.bf16 %v222_v61  ;;  %v260_v61 = vld [vmem:[%s9316_s11 + $0xf0] sm:$0xff]  }
 0x8d2   : > { %v16104_v4 = vpop.permute.xlu1 %5372  ;;  %19665 = vst [vmem:[#allocation83_spill] sm:$0xff] %v16106_v0  ;;  %v8151_v6 = vpack.i.bf16 %v4957_v47, %v4956_v36  ;;  %v250_v0 = vld [vmem:[%s9316_s11 + $0xc8] sm:$0xff]  }
 0x8d3   : > { %19664 = vst [vmem:[#allocation362_spill] sm:$0xff] %v16104_v4  ;;  %v8096_v26 = vpack.i.bf16 %v4935_v15, %v4934_v31  ;;  %v8176_v4 = vpack.i.bf16 %v4967_v32, %v4966_v54  ;;  %v4963_v45 = vunpack.c.h.bf16 %v250_v0  ;;  %v4973_v31 = vunpack.c.h.bf16 %v260_v61 }
 0x8d7   : > { %8082 = vrot.lane.b32.xlu2 %v8081_v29, %s9229_s28  ;;  %v16114_v40 = vpop.permute.xlu2 %5368  ;;  %v228_v29 = vld [vmem:[%s9316_s11 + $0x70] sm:$0xff]  }
 0x8d8   : > { %8137 = vrot.lane.b32.xlu1 %v8136_v21, %s9229_s28  ;;  %19666 = vst [vmem:[#allocation273_spill] sm:$0xff] %v16114_v40  ;;  %v4940_v42 = vunpack.c.l.bf16 %v228_v29  ;;  %v4962_v21 = vunpack.c.l.bf16 %v250_v0  ;;  %v4972_v40 = vunpack.c.l.bf16 %v260_v61  ;;  %v4969_v61 = vunpack.c.h.bf16 %v256_v51 }
 0x8d9   : > { %8162 = vrot.lane.b32.xlu0 %v8161_v16, %s9229_s28  ;;  %v16118_v46 = vpop.permute.xlu0 %5388  ;;  %v4941_v16 = vunpack.c.h.bf16 %v228_v29  ;;  %v266_v29 = vld [vmem:[%s9316_s11 + $0x108] sm:$0xff]  }
 0x8da   : > { %v16116_v49 = vpop.permute.xlu1 %5378  ;;  %19668 = vst [vmem:[#allocation282_spill] sm:$0xff] %v16118_v46  ;;  %v8166_v32 = vpack.i.bf16 %v4963_v45, %v4962_v21 }
 0x8db   : > { %19667 = vst [vmem:[#allocation216_spill] sm:$0xff] %v16116_v49  ;;  %v8111_v47 = vpack.i.bf16 %v4941_v16, %v4940_v42  ;;  %v8191_v49 = vpack.i.bf16 %v4973_v31, %v4972_v40  ;;  %v4979_v42 = vunpack.c.h.bf16 %v266_v29 }
 0x8df   : > { %8097 = vrot.lane.b32.xlu2 %v8096_v26, %s9229_s28  ;;  %v16126_v15 = vpop.permute.xlu2 %5374  ;;  %v234_v26 = vld [vmem:[%s9316_s11 + $0x88] sm:$0xff]  }
 0x8e0   : > { %8152 = vrot.lane.b32.xlu1 %v8151_v6, %s9229_s28  ;;  %19669 = vst [vmem:[#allocation366_spill] sm:$0xff] %v16126_v15  ;;  %v4946_v0 = vunpack.c.l.bf16 %v234_v26  ;;  %v4968_v6 = vunpack.c.l.bf16 %v256_v51 }
 0x8e1   : > { %8177 = vrot.lane.b32.xlu0 %v8176_v4, %s9229_s28  ;;  %v4947_v4 = vunpack.c.h.bf16 %v234_v26  ;;  %v272_v26 = vld [vmem:[%s9316_s11 + $0x120] sm:$0xff]  }
 0x8e2   : > { %v16128_v54 = vpop.permute.xlu1 %5384  ;;  %v16130_v36 = vpop.permute.xlu0 %5394  ;;  %v8181_v31 = vpack.i.bf16 %v4969_v61, %v4968_v6 }
 0x8e3   : > { %19670 = vst [vmem:[#allocation252_spill] sm:$0xff] %v16128_v54  ;;  %v8126_v45 = vpack.i.bf16 %v4947_v4, %v4946_v0  ;;  %v262_v54 = vld [vmem:[%s9316_s11 + $0xf8] sm:$0xff]   ;;  %v4985_v0 = vunpack.c.h.bf16 %v272_v26 }
 0x8e4   : > { %19671 = vst [vmem:[#allocation274_spill] sm:$0xff] %v16130_v36  ;;  %v4978_v36 = vunpack.c.l.bf16 %v266_v29  ;;  %v4975_v29 = vunpack.c.h.bf16 %v262_v54 }
 0x8e6   : > { %v8206_v15 = vpack.i.bf16 %v4979_v42, %v4978_v36 }
 0x8e7   : > { %8112 = vrot.lane.b32.xlu2 %v8111_v47, %s9229_s28  ;;  %v16138_v16 = vpop.permute.xlu2 %5380  ;;  %v240_v47 = vld [vmem:[%s9316_s11 + $0xa0] sm:$0xff]  }
 0x8e8   : > { %8167 = vrot.lane.b32.xlu1 %v8166_v32, %s9229_s28  ;;  %19672 = vst [vmem:[#allocation107_spill] sm:$0xff] %v16138_v16  ;;  %v4952_v51 = vunpack.c.l.bf16 %v240_v47  ;;  %v4974_v32 = vunpack.c.l.bf16 %v262_v54 }
 0x8e9   : > { %8192 = vrot.lane.b32.xlu0 %v8191_v49, %s9229_s28  ;;  %v4953_v49 = vunpack.c.h.bf16 %v240_v47  ;;  %v278_v47 = vld [vmem:[%s9316_s11 + $0x138] sm:$0xff]  }
 0x8ea   : > { %v16140_v40 = vpop.permute.xlu1 %5390  ;;  %v8196_v42 = vpack.i.bf16 %v4975_v29, %v4974_v32 }
 0x8eb   : > { %19673 = vst [vmem:[#allocation289_spill] sm:$0xff] %v16140_v40  ;;  %v16142_v21 = vpop.permute.xlu0 %5400  ;;  %v8141_v61 = vpack.i.bf16 %v4953_v49, %v4952_v51  ;;  %v4991_v51 = vunpack.c.h.bf16 %v278_v47  ;;  %v304_v40 = vld [vmem:[%s9316_s11 + $0x1a0] sm:$0xff]  }
 0x8ec   : > { %19674 = vst [vmem:[#allocation295_spill] sm:$0xff] %v16142_v21  ;;  %v4984_v21 = vunpack.c.l.bf16 %v272_v26  ;;  %v4981_v26 = vunpack.c.h.bf16 %v268_v8 }
 0x8ee   : > { %v8221_v16 = vpack.i.bf16 %v4985_v0, %v4984_v21 }
 0x8ef   : > { %8127 = vrot.lane.b32.xlu2 %v8126_v45, %s9229_s28  ;;  %v16150_v4 = vpop.permute.xlu2 %5386  ;;  %v246_v45 = vld [vmem:[%s9316_s11 + $0xb8] sm:$0xff]  }
 0x8f0   : > { %8182 = vrot.lane.b32.xlu1 %v8181_v31, %s9229_s28  ;;  %19675 = vst [vmem:[#allocation255_spill] sm:$0xff] %v16150_v4  ;;  %v4958_v54 = vunpack.c.l.bf16 %v246_v45  ;;  %v4980_v31 = vunpack.c.l.bf16 %v268_v8  ;;  %v274_v4 = vld [vmem:[%s9316_s11 + $0x128] sm:$0xff]  }
 0x8f1   : > { %8207 = vrot.lane.b32.xlu0 %v8206_v15, %s9229_s28  ;;  %v4959_v15 = vunpack.c.h.bf16 %v246_v45  ;;  %v284_v45 = vld [vmem:[%s9316_s11 + $0x150] sm:$0xff]  }
 0x8f2   : > { %v16152_v36 = vpop.permute.xlu1 %5396  ;;  %v8211_v0 = vpack.i.bf16 %v4981_v26, %v4980_v31 }
 0x8f3   : > { %19676 = vst [vmem:[#allocation276_spill] sm:$0xff] %v16152_v36  ;;  %v16154_v6 = vpop.permute.xlu0 %5406  ;;  %v4990_v36 = vunpack.c.l.bf16 %v278_v47  ;;  %v8156_v29 = vpack.i.bf16 %v4959_v15, %v4958_v54  ;;  %v4987_v47 = vunpack.c.h.bf16 %v274_v4  ;;  %v4997_v54 = vunpack.c.h.bf16 %v284_v45 }
 0x8f4   : > { %19677 = vst [vmem:[#allocation301_spill] sm:$0xff] %v16154_v6 }
 0x8f5   : > { %v8236_v6 = vpack.i.bf16 %v4991_v51, %v4990_v36 }
 0x8f7   : > { %8142 = vrot.lane.b32.xlu2 %v8141_v61, %s9229_s28  ;;  %v16162_v49 = vpop.permute.xlu2 %5392  ;;  %v252_v61 = vld [vmem:[%s9316_s11 + $0xd0] sm:$0xff]  }
 0x8f8   : > { %8197 = vrot.lane.b32.xlu1 %v8196_v42, %s9229_s28  ;;  %19678 = vst [vmem:[#allocation292_spill] sm:$0xff] %v16162_v49  ;;  %v4964_v8 = vunpack.c.l.bf16 %v252_v61  ;;  %v4986_v42 = vunpack.c.l.bf16 %v274_v4  ;;  %v4996_v49 = vunpack.c.l.bf16 %v284_v45 }
 0x8f9   : > { %8222 = vrot.lane.b32.xlu0 %v8221_v16, %s9229_s28  ;;  %v4965_v16 = vunpack.c.h.bf16 %v252_v61  ;;  %v290_v61 = vld [vmem:[%s9316_s11 + $0x168] sm:$0xff]  }
 0x8fa   : > { %v16164_v21 = vpop.permute.xlu1 %5402  ;;  %v8226_v51 = vpack.i.bf16 %v4987_v47, %v4986_v42 }
 0x8fb   : > { %19679 = vst [vmem:[#allocation263_spill] sm:$0xff] %v16164_v21  ;;  %v16166_v32 = vpop.permute.xlu0 %5412  ;;  %v8171_v26 = vpack.i.bf16 %v4965_v16, %v4964_v8  ;;  %v8251_v21 = vpack.i.bf16 %v4997_v54, %v4996_v49  ;;  %v5003_v8 = vunpack.c.h.bf16 %v290_v61 }
 0x8fc   : > { %19680 = vst [vmem:[#allocation278_spill] sm:$0xff] %v16166_v32  ;;  %v280_v32 = vld [vmem:[%s9316_s11 + $0x140] sm:$0xff]  }
 0x8fd   : > { %v4993_v45 = vunpack.c.h.bf16 %v280_v32 }
 0x8ff   : > { %8157 = vrot.lane.b32.xlu2 %v8156_v29, %s9229_s28  ;;  %v16174_v15 = vpop.permute.xlu2 %5398  ;;  %v258_v29 = vld [vmem:[%s9316_s11 + $0xe8] sm:$0xff]  }
 0x900   : > { %8212 = vrot.lane.b32.xlu1 %v8211_v0, %s9229_s28  ;;  %19681 = vst [vmem:[#allocation235_spill] sm:$0xff] %v16174_v15  ;;  %v4970_v4 = vunpack.c.l.bf16 %v258_v29  ;;  %v4992_v0 = vunpack.c.l.bf16 %v280_v32  ;;  %v5002_v15 = vunpack.c.l.bf16 %v290_v61 }
 0x901   : > { %8237 = vrot.lane.b32.xlu0 %v8236_v6, %s9229_s28  ;;  %v4971_v6 = vunpack.c.h.bf16 %v258_v29  ;;  %v296_v29 = vld [vmem:[%s9316_s11 + $0x180] sm:$0xff]  }
 0x902   : > { %v16176_v36 = vpop.permute.xlu1 %5408  ;;  %v8241_v54 = vpack.i.bf16 %v4993_v45, %v4992_v0 }
 0x903   : > { %19682 = vst [vmem:[#allocation294_spill] sm:$0xff] %v16176_v36  ;;  %v16178_v31 = vpop.permute.xlu0 %5418  ;;  %v8186_v47 = vpack.i.bf16 %v4971_v6, %v4970_v4  ;;  %v8266_v36 = vpack.i.bf16 %v5003_v8, %v5002_v15  ;;  %v5009_v4 = vunpack.c.h.bf16 %v296_v29 }
 0x904   : > { %19683 = vst [vmem:[#allocation183_spill] sm:$0xff] %v16178_v31  ;;  %v286_v31 = vld [vmem:[%s9316_s11 + $0x158] sm:$0xff]  }
 0x905   : > { %v4999_v61 = vunpack.c.h.bf16 %v286_v31 }
 0x907   : > { %8172 = vrot.lane.b32.xlu2 %v8171_v26, %s9229_s28  ;;  %v16186_v16 = vpop.permute.xlu2 %5404  ;;  %v264_v26 = vld [vmem:[%s9316_s11 + $0x100] sm:$0xff]  }
 0x908   : > { %8227 = vrot.lane.b32.xlu1 %v8226_v51, %s9229_s28  ;;  %19684 = vst [vmem:[#allocation377_spill] sm:$0xff] %v16186_v16  ;;  %v4976_v32 = vunpack.c.l.bf16 %v264_v26  ;;  %v4998_v51 = vunpack.c.l.bf16 %v286_v31  ;;  %v5008_v16 = vunpack.c.l.bf16 %v296_v29  ;;  %v5005_v29 = vunpack.c.h.bf16 %v292_v59 }
 0x909   : > { %8252 = vrot.lane.b32.xlu0 %v8251_v21, %s9229_s28  ;;  %v4977_v21 = vunpack.c.h.bf16 %v264_v26  ;;  %v302_v26 = vld [vmem:[%s9316_s11 + $0x198] sm:$0xff]  }
 0x90a   : > { %v16188_v49 = vpop.permute.xlu1 %5414  ;;  %v8256_v8 = vpack.i.bf16 %v4999_v61, %v4998_v51 }
 0x90b   : > { %19685 = vst [vmem:[#allocation85_spill] sm:$0xff] %v16188_v49  ;;  %v16190_v42 = vpop.permute.xlu0 %8042  ;;  %v8201_v45 = vpack.i.bf16 %v4977_v21, %v4976_v32  ;;  %v8281_v49 = vpack.i.bf16 %v5009_v4, %v5008_v16  ;;  %v5015_v32 = vunpack.c.h.bf16 %v302_v26 }
 0x90f   : > { %8187 = vrot.lane.b32.xlu2 %v8186_v47, %s9229_s28  ;;  %v16198_v6 = vpop.permute.xlu2 %5410  ;;  %v270_v47 = vld [vmem:[%s9316_s11 + $0x118] sm:$0xff]  }
 0x910   : > { %8242 = vrot.lane.b32.xlu1 %v8241_v54, %s9229_s28  ;;  %19686 = vst [vmem:[#allocation281_spill] sm:$0xff] %v16198_v6  ;;  %v4982_v31 = vunpack.c.l.bf16 %v270_v47  ;;  %v5004_v54 = vunpack.c.l.bf16 %v292_v59  ;;  %v5014_v6 = vunpack.c.l.bf16 %v302_v26  ;;  %v5011_v26 = vunpack.c.h.bf16 %v298_v50 }
 0x911   : > { %8267 = vrot.lane.b32.xlu0 %v8266_v36, %s9229_s28  ;;  %v4983_v36 = vunpack.c.h.bf16 %v270_v47  ;;  %v308_v47 = vld [vmem:[%s9316_s11 + $0x1b0] sm:$0xff]  }
 0x912   : > { %v16200_v15 = vpop.permute.xlu1 %5420  ;;  %v8271_v4 = vpack.i.bf16 %v5005_v29, %v5004_v54  ;;  %v8296_v55 = vpack.i.bf16 %v5015_v32, %v5014_v6 }
 0x913   : > { %19687 = vst [vmem:[#allocation296_spill] sm:$0xff] %v16200_v15  ;;  %v16202_v0 = vpop.permute.xlu0 %8057  ;;  %v8216_v61 = vpack.i.bf16 %v4983_v36, %v4982_v31  ;;  %v5021_v31 = vunpack.c.h.bf16 %v308_v47 }
 0x914   : > { %v8059_v10 = vunpack.i.l.bf16 %v16202_v0 }
 0x917   : > { %8202 = vrot.lane.b32.xlu2 %v8201_v45, %s9229_s28  ;;  %v16210_v21 = vpop.permute.xlu2 %5416  ;;  %v276_v45 = vld [vmem:[%s9316_s11 + $0x130] sm:$0xff]  }
 0x918   : > { %8257 = vrot.lane.b32.xlu1 %v8256_v8, %s9229_s28  ;;  %19688 = vst [vmem:[#allocation166_spill] sm:$0xff] %v16210_v21  ;;  %v4988_v59 = vunpack.c.l.bf16 %v276_v45  ;;  %v5010_v8 = vunpack.c.l.bf16 %v298_v50  ;;  %v5020_v21 = vunpack.c.l.bf16 %v308_v47  ;;  %v5017_v47 = vunpack.c.h.bf16 %v304_v40 }
 0x919   : > { %8282 = vrot.lane.b32.xlu0 %v8281_v49, %s9229_s28  ;;  %v4989_v49 = vunpack.c.h.bf16 %v276_v45  ;;  %v314_v45 = vld [vmem:[%s9316_s11 + $0x1c8] sm:$0xff]  }
 0x91a   : > { %v16212_v16 = vpop.permute.xlu1 %8047  ;;  %v8286_v32 = vpack.i.bf16 %v5011_v26, %v5010_v8  ;;  %v8311_v44 = vpack.i.bf16 %v5021_v31, %v5020_v21  ;;  %v5026_v46 = vunpack.c.l.bf16 %v314_v45 }
 0x91b   : > { %v16214_v51 = vpop.permute.xlu0 %8072  ;;  %v8231_v29 = vpack.i.bf16 %v4989_v49, %v4988_v59  ;;  %v5027_v59 = vunpack.c.h.bf16 %v314_v45  ;;  %v5023_v45 = vunpack.c.h.bf16 %v310_v19  ;;  %v8050_v38 = vunpack.i.h.bf16 %v16212_v16 }
 0x91d   : > { %v8326_v27 = vpack.i.bf16 %v5027_v59, %v5026_v46 }
 0x91f   : > { %8217 = vrot.lane.b32.xlu2 %v8216_v61, %s9229_s28  ;;  %v16222_v36 = vpop.permute.xlu2 %5422  ;;  %v282_v61 = vld [vmem:[%s9316_s11 + $0x148] sm:$0xff]  }
 0x920   : > { %8272 = vrot.lane.b32.xlu1 %v8271_v4, %s9229_s28  ;;  %19689 = vst [vmem:[#allocation257_spill] sm:$0xff] %v16222_v36  ;;  %v4994_v50 = vunpack.c.l.bf16 %v282_v61  ;;  %v5016_v4 = vunpack.c.l.bf16 %v304_v40  ;;  %v316_v36 = vld [vmem:[%s9316_s11 + $0x1d0] sm:$0xff]  }
 0x921   : > { %8297 = vrot.lane.b32.xlu0 %v8296_v55, %s9229_s28  ;;  %v4995_v55 = vunpack.c.h.bf16 %v282_v61  ;;  %v320_v61 = vld [vmem:[%s9316_s11 + $0x1e0] sm:$0xff]  }
 0x922   : > { %v16224_v6 = vpop.permute.xlu1 %8062  ;;  %v8301_v31 = vpack.i.bf16 %v5017_v47, %v5016_v4  ;;  %v5032_v22 = vunpack.c.l.bf16 %v320_v61 }
 0x923   : > { %v16226_v54 = vpop.permute.xlu0 %8087  ;;  %v8246_v26 = vpack.i.bf16 %v4995_v55, %v4994_v50  ;;  %v5033_v50 = vunpack.c.h.bf16 %v320_v61  ;;  %v5029_v61 = vunpack.c.h.bf16 %v316_v36 }
 0x925   : > { %v8341_v14 = vpack.i.bf16 %v5033_v50, %v5032_v22  ;;  %v300_v50 = vld [vmem:[%s9316_s11 + $0x190] sm:$0xff]  }
 0x927   : > { %8232 = vrot.lane.b32.xlu2 %v8231_v29, %s9229_s28  ;;  %v16234_v49 = vpop.permute.xlu2 %8052  ;;  %v288_v29 = vld [vmem:[%s9316_s11 + $0x160] sm:$0xff]  }
 0x928   : > { %8287 = vrot.lane.b32.xlu1 %v8286_v32, %s9229_s28  ;;  %v5000_v40 = vunpack.c.l.bf16 %v288_v29  ;;  %v5022_v32 = vunpack.c.l.bf16 %v310_v19 }
 0x929   : > { %8312 = vrot.lane.b32.xlu0 %v8311_v44, %s9229_s28  ;;  %v5001_v44 = vunpack.c.h.bf16 %v288_v29  ;;  %v326_v29 = vld [vmem:[%s9316_s11 + $0x1f8] sm:$0xff]  }
 0x92a   : > { %v16236_v21 = vpop.permute.xlu1 %8077  ;;  %v8316_v59 = vpack.i.bf16 %v5023_v45, %v5022_v32  ;;  %v5038_v15 = vunpack.c.l.bf16 %v326_v29  ;;  %v5039_v62 = vunpack.c.h.bf16 %v326_v29 }
 0x92b   : > { %v16238_v8 = vpop.permute.xlu0 %8102  ;;  %v8261_v47 = vpack.i.bf16 %v5001_v44, %v5000_v40 }
 0x92f   : > { %8247 = vrot.lane.b32.xlu2 %v8246_v26, %s9229_s28  ;;  %v16246_v55 = vpop.permute.xlu2 %8067  ;;  %v294_v26 = vld [vmem:[%s9316_s11 + $0x178] sm:$0xff]  }
 0x930   : > { %8302 = vrot.lane.b32.xlu1 %v8301_v31, %s9229_s28  ;;  %v5006_v19 = vunpack.c.l.bf16 %v294_v26  ;;  %v5028_v31 = vunpack.c.l.bf16 %v316_v36  ;;  %v5013_v36 = vunpack.c.h.bf16 %v300_v50 }
 0x931   : > { %8327 = vrot.lane.b32.xlu0 %v8326_v27, %s9229_s28  ;;  %v5007_v27 = vunpack.c.h.bf16 %v294_v26  ;;  %v322_v26 = vld [vmem:[%s9316_s11 + $0x1e8] sm:$0xff]  }
 0x932   : > { %v16248_v46 = vpop.permute.xlu1 %8092  ;;  %v8331_v45 = vpack.i.bf16 %v5029_v61, %v5028_v31  ;;  %v5035_v29 = vunpack.c.h.bf16 %v322_v26  ;;  %v306_v31 = vld [vmem:[%s9316_s11 + $0x1a8] sm:$0xff]   ;;  %v19691_v61 = vld [vmem:[#allocation89_spill] sm:$0xff] }
 0x933   : > { %v16250_v4 = vpop.permute.xlu0 %8117  ;;  %v8276_v32 = vpack.i.bf16 %v5007_v27, %v5006_v19  ;;  %v8049_v19 = vunpack.i.l.bf16 %v16212_v16 }
 0x937   : > { %8262 = vrot.lane.b32.xlu2 %v8261_v47, %s9229_s28  ;;  %v16258_v40 = vpop.permute.xlu2 %8082  ;;  %v8356_v47 = vpack.i.bf16 %v5039_v62, %v5038_v15 }
 0x938   : > { %8317 = vrot.lane.b32.xlu1 %v8316_v59, %s9229_s28  ;;  %v5012_v59 = vunpack.c.l.bf16 %v300_v50 }
 0x939   : > { %8342 = vrot.lane.b32.xlu0 %v8341_v14, %s9229_s28  ;;  %v5034_v14 = vunpack.c.l.bf16 %v322_v26  ;;  %v5019_v26 = vunpack.c.h.bf16 %v306_v31 }
 0x93a   : > { %v16260_v44 = vpop.permute.xlu1 %8107  ;;  %v8291_v62 = vpack.i.bf16 %v5013_v36, %v5012_v59  ;;  %v8055_v59 = vunpack.i.h.bf16 %v16234_v49 }
 0x93b   : > { %v16262_v22 = vpop.permute.xlu0 %8132  ;;  %v8346_v15 = vpack.i.bf16 %v5035_v29, %v5034_v14  ;;  %v19693_v29 = vld [vmem:[#allocation72_spill] sm:$0xff] }
 0x93c   : > { %19690 = vst [vmem:[#allocation285_spill] sm:$0xff] %v16262_v22 }
 0x93f   : > { %8277 = vrot.lane.b32.xlu2 %v8276_v32, %s9229_s28  ;;  %v16269_v18 = vpop.permute.xlu2 %8097  ;;  %v5682_v32 = vsub.f32 1.0, %v19691_v61  ;;  %v19694_v61 = vld [vmem:[#allocation213_spill] sm:$0xff] }
 0x940   : > { %8332 = vrot.lane.b32.xlu1 %v8331_v45, %s9229_s28  ;;  %v5018_v45 = vunpack.c.l.bf16 %v306_v31  ;;  %v5685_v31 = vsub.f32 1.0, %v19694_v61  ;;  %v19696_v61 = vld [vmem:[#allocation130_spill] sm:$0xff] }
 0x941   : > { %8357 = vrot.lane.b32.xlu0 %v8356_v47, %s9229_s28  ;;  %v6322_v50 = vmul.f32 %v8049_v19, %v5682_v32  ;;  %v8044_v47 = vunpack.i.l.bf16 %v16190_v42  ;;  %v5680_v19 = vsub.f32 1.0, %v19693_v29 }
 0x942   : > { %v16271_v37 = vpop.permute.xlu1 %8122  ;;  %v8306_v14 = vpack.i.bf16 %v5019_v26, %v5018_v45  ;;  %v6325_v32 = vmul.f32 %v8055_v59, %v5685_v31  ;;  %v8064_v26 = vunpack.i.l.bf16 %v16224_v6  ;;  %v19695_v59 = vld [vmem:[#allocation99_spill] sm:$0xff] }
 0x943   : > { %v16274_v27 = vpop.permute.xlu0 %8147 }
 0x947   : > { %8292 = vrot.lane.b32.xlu2 %v8291_v62, %s9229_s28  ;;  %v16282_v24 = vpop.permute.xlu2 %8112  ;;  %v312_v62 = vld [vmem:[%s9316_s11 + $0x1c0] sm:$0xff]  }
 0x948   : > { %8347 = vrot.lane.b32.xlu1 %v8346_v15, %s9229_s28  ;;  %v6320_v15 = vmul.f32 %v8044_v47, %v5680_v19  ;;  %v5025_v3 = vunpack.c.h.bf16 %v312_v62  ;;  %v5683_v19 = vsub.f32 1.0, %v19695_v59 }
 0x949   : > { %6580 = vrot.lane.b32.xlu0 %v6322_v50, %s9228_s14  ;;  %v5024_v50 = vunpack.c.l.bf16 %v312_v62  ;;  %v5688_v62 = vsub.f32 1.0, %v19696_v61  ;;  %v19699_v61 = vld [vmem:[#allocation147_spill] sm:$0xff] }
 0x94a   : > { %v16284_v9 = vpop.permute.xlu1 %8137  ;;  %v6323_v31 = vmul.f32 %v8050_v38, %v5683_v19 }
 0x94b   : > { %v16287_v36 = vpop.permute.xlu0 %8162  ;;  %v8321_v47 = vpack.i.bf16 %v5025_v3, %v5024_v50  ;;  %v8070_v50 = vunpack.i.h.bf16 %v16246_v55 }
 0x94c   : > { %19692 = vst [vmem:[#allocation298_spill] sm:$0xff] %v16287_v36 }
 0x94f   : > { %8307 = vrot.lane.b32.xlu2 %v8306_v14, %s9229_s28  ;;  %v16296_v36 = vpop.permute.xlu2 %8127  ;;  %v318_v14 = vld [vmem:[%s9316_s11 + $0x1d8] sm:$0xff]  }
 0x950   : > { %6576 = vrot.lane.b32.xlu1 %v6320_v15, %s9228_s14  ;;  %v6328_v15 = vmul.f32 %v8064_v26, %v5688_v62  ;;  %v5030_v16 = vunpack.c.l.bf16 %v318_v14  ;;  %v19698_v26 = vld [vmem:[#allocation104_spill] sm:$0xff] }
 0x951   : > { %6586 = vrot.lane.b32.xlu0 %v6325_v32, %s9228_s14  ;;  %v5031_v32 = vunpack.c.h.bf16 %v318_v14  ;;  %v5686_v19 = vsub.f32 1.0, %v19698_v26  ;;  %v5691_v14 = vsub.f32 1.0, %v19699_v61 }
 0x952   : > { %v16298_v45 = vpop.permute.xlu1 %8152 }
 0x953   : > { %v16301_v29 = vpop.permute.xlu0 %8177  ;;  %v8336_v38 = vpack.i.bf16 %v5031_v32, %v5030_v16  ;;  %v6326_v62 = vmul.f32 %v8059_v10, %v5686_v19  ;;  %v8079_v32 = vunpack.i.l.bf16 %v16236_v21 }
 0x957   : > { %8322 = vrot.lane.b32.xlu2 %v8321_v47, %s9229_s28  ;;  %v16310_v57 = vpop.permute.xlu2 %8142  ;;  %v324_v47 = vld [vmem:[%s9316_s11 + $0x1f0] sm:$0xff]   ;;  %s7512_s11 = scalar_lea.hbm %s17468_s4, %s7990_s8 }
 0x958   : > { %6582 = vrot.lane.b32.xlu1 %v6323_v31, %s9228_s14  ;;  %v6331_v31 = vmul.f32 %v8070_v50, %v5691_v14  ;;  %v5037_v56 = vunpack.c.h.bf16 %v324_v47  ;;  %v19701_v50 = vld [vmem:[#allocation122_spill] sm:$0xff]  ;;  %s7516_s13 = sshll.u32 %s7512_s11, 4  ;;  %s7517_s13 = int_to_ptr.hbm [resolvable:$true] %s7516_s13 }
 0x959   : > { %6592 = vrot.lane.b32.xlu0 %v6328_v15, %s9228_s14  ;;  %v5036_v15 = vunpack.c.l.bf16 %v324_v47  ;;  %v5689_v19 = vsub.f32 1.0, %v19701_v50  ;;  %v8085_v50 = vunpack.i.h.bf16 %v16258_v40  ;;  %s9178_s20 = sshra.s32 %s7517_s13, 4  ;;  %s9179_s20 = int_to_ptr.hbm [resolvable:$true] %s9178_s20 }
 0x95a   : > { %v16312_v3 = vpop.permute.xlu1 %8167  ;;  %s9180_s19 = scalar_lea.hbm %s9179_s20, 64  ;;  %p9185_p0 = scmp.lt.s32.totalorder %s9179_s20, %s17468_s4 }
 0x95b   : > { %19697 = vst [vmem:[#allocation186_spill] sm:$0xff] %v16312_v3  ;;  %v16315_v59 = vpop.permute.xlu0 %8192  ;;  %v8065_v3 = vunpack.i.h.bf16 %v16224_v6  ;;  %v8351_v10 = vpack.i.bf16 %v5037_v56, %v5036_v15  ;;  %v8045_v6 = vunpack.i.h.bf16 %v16190_v42  ;;  %v19704_v56 = vld [vmem:[#allocation73_spill] sm:$0xff]  ;;  %p9181_p11 = scmp.ne.s32.totalorder %s9179_s20, %s9180_s19  ;;  %p9186_p1 = scmp.lt.s32.totalorder %s9184_s27, %s9180_s19 }
 0x95c   : > { %v5681_v15 = vsub.f32 1.0, %v19704_v56  ;;  %v8080_v56 = vunpack.i.h.bf16 %v16236_v21  ;;  %v8060_v21 = vunpack.i.h.bf16 %v16202_v0 }
 0x95d   : > { %v6329_v47 = vmul.f32 %v8065_v3, %v5689_v19  ;;  %p9182_p12 = pnand %p9181_p11, %p9293_p5  ;;  %p9187_p2 = por %p9186_p1, %p9185_p0 }
 0x95e   : > { %v6321_v19 = vmul.f32 %v8045_v6, %v5681_v15  ;;  %v8119_v15 = vunpack.i.l.bf16 %v16250_v4 }
 0x95f   : > { %8337 = vrot.lane.b32.xlu2 %v8336_v38, %s9229_s28  ;;  %v16324_v5 = vpop.permute.xlu2 %8157  ;;  %v19702_v38 = vld [vmem:[#allocation162_spill] sm:$0xff]  ;;  %p9183_p13 = pneg %p9182_p12 }
 0x960   : > { %6588 = vrot.lane.b32.xlu1 %v6326_v62, %s9228_s14  ;;  %v5694_v61 = vsub.f32 1.0, %v19702_v38  ;;  %v8074_v62 = vunpack.i.l.bf16 %v16214_v51  ;;  %v19706_v38 = vld [vmem:[#allocation184_spill] sm:$0xff] }
 0x961   : > { %6598 = vrot.lane.b32.xlu0 %v6331_v31, %s9228_s14  ;;  %p9188_p3 = pnand %p9187_p2, %p9183_p13 }
 0x962   : > { %v16326_v16 = vpop.permute.xlu1 %8182  ;;  %v6334_v14 = vmul.f32 %v8079_v32, %v5694_v61  ;;  %v19705_v32 = vld [vmem:[#allocation143_spill] sm:$0xff]  ;;  %v5697_v61 = vsub.f32 1.0, %v19706_v38  ;;  %v19710_v38 = vld [vmem:[#allocation173_spill] sm:$0xff] }
 0x963   : > { %v16329_v26 = vpop.permute.xlu0 %8207 }
 0x964   : > { %19700 = vst [vmem:[#allocation180_spill] sm:$0xff] %v16329_v26 }
 0x967   : > { %8352 = vrot.lane.b32.xlu2 %v8351_v10, %s9229_s28  ;;  %v16338_v31 = vpop.permute.xlu2 %8172  ;;  %v5692_v10 = vsub.f32 1.0, %v19705_v32  ;;  %v19708_v32 = vld [vmem:[#allocation91_spill] sm:$0xff] }
 0x968   : > { %6594 = vrot.lane.b32.xlu1 %v6329_v47, %s9228_s14  ;;  %19703 = vst [vmem:[#allocation288_spill] sm:$0xff] %v16338_v31  ;;  %v6337_v47 = vmul.f32 %v8085_v50, %v5697_v61  ;;  %v5684_v6 = vsub.f32 1.0, %v19708_v32  ;;  %v19709_v50 = vld [vmem:[#allocation157_spill] sm:$0xff]  ;;  %v5710_v61 = vsub.f32 1.0, %v19710_v38  ;;  %v19715_v38 = vld [vmem:[#allocation207_spill] sm:$0xff]  ;;  %v19779_v31 = vld [vmem:[#allocation42_spill] sm:$0xff] }
 0x969   : > { %6604 = vrot.lane.b32.xlu0 %v6334_v14, %s9228_s14  ;;  %v6332_v42 = vmul.f32 %v8074_v62, %v5692_v10  ;;  %v8054_v14 = vunpack.i.l.bf16 %v16234_v49  ;;  %v5695_v10 = vsub.f32 1.0, %v19709_v50  ;;  %v19712_v50 = vld [vmem:[#allocation321_spill] sm:$0xff] }
 0x96a   : > { %v16340_v26 = vpop.permute.xlu1 %8197 }
 0x96b   : > { %v16344_v3 = vpop.permute.xlu0 %8222  ;;  %v6335_v49 = vmul.f32 %v8080_v56, %v5695_v10 }
 0x96f   : > { %6578 = vrot.lane.b32.xlu2 %v6321_v19, %s9228_s14  ;;  %v16353_v60 = vpop.permute.xlu2 %8187  ;;  %v6324_v19 = vmul.f32 %v8054_v14, %v5684_v6  ;;  %v5687_v14 = vsub.f32 1.0, %v19712_v50  ;;  %v8114_v6 = vunpack.i.l.bf16 %v16282_v24  ;;  %v8120_v50 = vunpack.i.h.bf16 %v16250_v4 }
 0x970   : > { %6600 = vrot.lane.b32.xlu1 %v6332_v42, %s9228_s14  ;;  %v6350_v42 = vmul.f32 %v8119_v15, %v5710_v61  ;;  %v19714_v15 = vld [vmem:[#allocation177_spill] sm:$0xff]  ;;  %v5708_v61 = vsub.f32 1.0, %v19715_v38  ;;  %v8075_v4 = vunpack.i.h.bf16 %v16214_v51 }
 0x971   : > { %6610 = vrot.lane.b32.xlu0 %v6337_v47, %s9228_s14  ;;  %v8089_v47 = vunpack.i.l.bf16 %v16226_v54  ;;  %v5698_v10 = vsub.f32 1.0, %v19714_v15  ;;  %v19717_v15 = vld [vmem:[#allocation124_spill] sm:$0xff]  ;;  %v19719_v38 = vld [vmem:[#allocation233_spill] sm:$0xff] }
 0x972   : > { %v16355_v7 = vpop.permute.xlu1 %8212 }
 0x973   : > { %19707 = vst [vmem:[#allocation174_spill] sm:$0xff] %v16355_v7  ;;  %v16359_v62 = vpop.permute.xlu0 %8237  ;;  %v6338_v0 = vmul.f32 %v8089_v47, %v5698_v10 }
 0x977   : > { %6584 = vrot.lane.b32.xlu2 %v6324_v19, %s9228_s14  ;;  %v16368_v32 = vpop.permute.xlu2 %8202  ;;  %v6327_v19 = vmul.f32 %v8060_v21, %v5687_v14  ;;  %v5690_v21 = vsub.f32 1.0, %v19717_v15  ;;  %v8109_v14 = vunpack.i.l.bf16 %v16260_v44 }
 0x978   : > { %6606 = vrot.lane.b32.xlu1 %v6335_v49, %s9228_s14  ;;  %19711 = vst [vmem:[#allocation100_spill] sm:$0xff] %v16368_v32  ;;  %v6348_v49 = vmul.f32 %v8114_v6, %v5708_v61  ;;  %v19718_v6 = vld [vmem:[#allocation240_spill] sm:$0xff]  ;;  %v5706_v61 = vsub.f32 1.0, %v19719_v38  ;;  %v19724_v38 = vld [vmem:[#allocation134_spill] sm:$0xff] }
 0x979   : > { %6636 = vrot.lane.b32.xlu0 %v6350_v42, %s9228_s14  ;;  %v8069_v42 = vunpack.i.l.bf16 %v16246_v55  ;;  %v5711_v10 = vsub.f32 1.0, %v19718_v6  ;;  %v19721_v6 = vld [vmem:[#allocation140_spill] sm:$0xff] }
 0x97a   : > { %v16370_v33 = vpop.permute.xlu1 %8227 }
 0x97b   : > { %v16374_v56 = vpop.permute.xlu0 %8252  ;;  %v6351_v55 = vmul.f32 %v8120_v50, %v5711_v10 }
 0x97c   : > { %19713 = vst [vmem:[#allocation290_spill] sm:$0xff] %v16374_v56 }
 0x97f   : > { %6590 = vrot.lane.b32.xlu2 %v6327_v19, %s9228_s14  ;;  %v16383_v32 = vpop.permute.xlu2 %8217  ;;  %v6330_v19 = vmul.f32 %v8069_v42, %v5690_v21  ;;  %v5693_v42 = vsub.f32 1.0, %v19721_v6  ;;  %v8105_v21 = vunpack.i.h.bf16 %v16238_v8 }
 0x980   : > { %6612 = vrot.lane.b32.xlu1 %v6338_v0, %s9228_s14  ;;  %v6346_v0 = vmul.f32 %v8109_v14, %v5706_v61  ;;  %v19723_v14 = vld [vmem:[#allocation250_spill] sm:$0xff]  ;;  %v5705_v61 = vsub.f32 1.0, %v19724_v38  ;;  %v19729_v38 = vld [vmem:[#allocation355_spill] sm:$0xff] }
 0x981   : > { %6632 = vrot.lane.b32.xlu0 %v6348_v49, %s9228_s14  ;;  %v8115_v49 = vunpack.i.h.bf16 %v16282_v24  ;;  %v5709_v10 = vsub.f32 1.0, %v19723_v14  ;;  %v8084_v24 = vunpack.i.l.bf16 %v16258_v40  ;;  %v19726_v14 = vld [vmem:[#allocation346_spill] sm:$0xff] }
 0x982   : > { %v16385_v56 = vpop.permute.xlu1 %8242 }
 0x983   : > { %19716 = vst [vmem:[#allocation194_spill] sm:$0xff] %v16385_v56  ;;  %v16389_v47 = vpop.permute.xlu0 %8267  ;;  %v6349_v51 = vmul.f32 %v8115_v49, %v5709_v10 }
 0x987   : > { %6596 = vrot.lane.b32.xlu2 %v6330_v19, %s9228_s14  ;;  %v16398_v15 = vpop.permute.xlu2 %8232  ;;  %v6333_v19 = vmul.f32 %v8075_v4, %v5693_v42  ;;  %v5696_v4 = vsub.f32 1.0, %v19726_v14  ;;  %v8124_v42 = vunpack.i.l.bf16 %v16271_v37 }
 0x988   : > { %6638 = vrot.lane.b32.xlu1 %v6351_v55, %s9228_s14  ;;  %v6345_v55 = vmul.f32 %v8105_v21, %v5705_v61  ;;  %v19728_v21 = vld [vmem:[#allocation262_spill] sm:$0xff]  ;;  %v5712_v61 = vsub.f32 1.0, %v19729_v38 }
 0x989   : > { %6628 = vrot.lane.b32.xlu0 %v6346_v0, %s9228_s14  ;;  %v8110_v0 = vunpack.i.h.bf16 %v16260_v44  ;;  %v5707_v10 = vsub.f32 1.0, %v19728_v21  ;;  %v8090_v44 = vunpack.i.h.bf16 %v16226_v54  ;;  %v19732_v21 = vld [vmem:[#allocation343_spill] sm:$0xff]  ;;  %v19734_v38 = vld [vmem:[#allocation354_spill] sm:$0xff] }
 0x98a   : > { %v16400_v56 = vpop.permute.xlu1 %8257 }
 0x98b   : > { %19720 = vst [vmem:[#allocation280_spill] sm:$0xff] %v16400_v56  ;;  %v16404_v50 = vpop.permute.xlu0 %8282  ;;  %v6347_v40 = vmul.f32 %v8110_v0, %v5707_v10 }
 0x98c   : > { %19722 = vst [vmem:[#allocation284_spill] sm:$0xff] %v16404_v50 }
 0x98f   : > { %6602 = vrot.lane.b32.xlu2 %v6333_v19, %s9228_s14  ;;  %v16413_v6 = vpop.permute.xlu2 %8247  ;;  %v6336_v19 = vmul.f32 %v8084_v24, %v5696_v4  ;;  %v5699_v24 = vsub.f32 1.0, %v19732_v21  ;;  %v8130_v4 = vunpack.i.h.bf16 %v16296_v36  ;;  %v8125_v21 = vunpack.i.h.bf16 %v16271_v37 }
 0x990   : > { %6634 = vrot.lane.b32.xlu1 %v6349_v51, %s9228_s14  ;;  %19725 = vst [vmem:[#allocation287_spill] sm:$0xff] %v16413_v6  ;;  %v6352_v51 = vmul.f32 %v8124_v42, %v5712_v61  ;;  %v19733_v42 = vld [vmem:[#allocation335_spill] sm:$0xff]  ;;  %v5715_v61 = vsub.f32 1.0, %v19734_v38  ;;  %v19739_v38 = vld [vmem:[#allocation109_spill] sm:$0xff]  ;;  %v8095_v37 = vunpack.i.h.bf16 %v16248_v46 }
 0x991   : > { %6626 = vrot.lane.b32.xlu0 %v6345_v55, %s9228_s14  ;;  %v8099_v55 = vunpack.i.l.bf16 %v16269_v18  ;;  %v5702_v10 = vsub.f32 1.0, %v19733_v42  ;;  %v19736_v42 = vld [vmem:[#allocation203_spill] sm:$0xff] }
 0x992   : > { %v16415_v50 = vpop.permute.xlu1 %8272 }
 0x993   : > { %v16419_v49 = vpop.permute.xlu0 %8297  ;;  %v6342_v54 = vmul.f32 %v8099_v55, %v5702_v10 }
 0x994   : > { %19727 = vst [vmem:[#allocation89_spill] sm:$0xff] %v16419_v49 }
 0x997   : > { %6608 = vrot.lane.b32.xlu2 %v6336_v19, %s9228_s14  ;;  %v16428_v14 = vpop.permute.xlu2 %8262  ;;  %v6339_v19 = vmul.f32 %v8090_v44, %v5699_v24  ;;  %v5700_v44 = vsub.f32 1.0, %v19736_v42  ;;  %v8239_v24 = vunpack.i.l.bf16 %v16359_v62 }
 0x998   : > { %6630 = vrot.lane.b32.xlu1 %v6347_v40, %s9228_s14  ;;  %19730 = vst [vmem:[#allocation72_spill] sm:$0xff] %v16428_v14  ;;  %v6355_v40 = vmul.f32 %v8130_v4, %v5715_v61  ;;  %v19738_v4 = vld [vmem:[#allocation344_spill] sm:$0xff]  ;;  %v5758_v61 = vsub.f32 1.0, %v19739_v38  ;;  %v19744_v38 = vld [vmem:[#allocation306_spill] sm:$0xff] }
 0x999   : > { %6640 = vrot.lane.b32.xlu0 %v6352_v51, %s9228_s14  ;;  %v8094_v51 = vunpack.i.l.bf16 %v16248_v46  ;;  %v5713_v10 = vsub.f32 1.0, %v19738_v4  ;;  %v19741_v4 = vld [vmem:[#allocation199_spill] sm:$0xff] }
 0x99a   : > { %v16430_v6 = vpop.permute.xlu1 %8287  ;;  %v6398_v56 = vmul.f32 %v8239_v24, %v5758_v61  ;;  %v19743_v24 = vld [vmem:[#allocation210_spill] sm:$0xff]  ;;  %v5743_v61 = vsub.f32 1.0, %v19744_v38  ;;  %v19748_v38 = vld [vmem:[#allocation348_spill] sm:$0xff] }
 0x99b   : > { %19731 = vst [vmem:[#allocation213_spill] sm:$0xff] %v16430_v6  ;;  %v16434_v0 = vpop.permute.xlu0 %8312 }
 0x99f   : > { %6614 = vrot.lane.b32.xlu2 %v6339_v19, %s9228_s14  ;;  %v16443_v6 = vpop.permute.xlu2 %8277  ;;  %v6340_v19 = vmul.f32 %v8094_v51, %v5700_v44  ;;  %v5701_v51 = vsub.f32 1.0, %v19741_v4  ;;  %v8200_v44 = vunpack.i.h.bf16 %v16340_v26  ;;  %v8240_v4 = vunpack.i.h.bf16 %v16359_v62 }
 0x9a0   : > { %6620 = vrot.lane.b32.xlu1 %v6342_v54, %s9228_s14  ;;  %v6353_v54 = vmul.f32 %v8125_v21, %v5713_v10  ;;  %v5726_v10 = vsub.f32 1.0, %v19743_v24  ;;  %v19746_v24 = vld [vmem:[#allocation353_spill] sm:$0xff]  ;;  %v8100_v62 = vunpack.i.h.bf16 %v16269_v18 }
 0x9a1   : > { %6646 = vrot.lane.b32.xlu0 %v6355_v40, %s9228_s14  ;;  %v8159_v40 = vunpack.i.l.bf16 %v16324_v5 }
 0x9a2   : > { %v16445_v49 = vpop.permute.xlu1 %8302 }
 0x9a3   : > { %19735 = vst [vmem:[#allocation99_spill] sm:$0xff] %v16445_v49  ;;  %v16449_v55 = vpop.permute.xlu0 %8327  ;;  %v6366_v46 = vmul.f32 %v8159_v40, %v5726_v10 }
 0x9a4   : > { %19737 = vst [vmem:[#allocation130_spill] sm:$0xff] %v16449_v55 }
 0x9a7   : > { %6616 = vrot.lane.b32.xlu2 %v6340_v19, %s9228_s14  ;;  %v16458_v42 = vpop.permute.xlu2 %8292  ;;  %v6341_v19 = vmul.f32 %v8095_v37, %v5701_v51  ;;  %v5704_v37 = vsub.f32 1.0, %v19746_v24  ;;  %v8234_v51 = vunpack.i.l.bf16 %v16398_v15 }
 0x9a8   : > { %6642 = vrot.lane.b32.xlu1 %v6353_v54, %s9228_s14  ;;  %19740 = vst [vmem:[#allocation104_spill] sm:$0xff] %v16458_v42  ;;  %v6383_v54 = vmul.f32 %v8200_v44, %v5743_v61  ;;  %v19747_v44 = vld [vmem:[#allocation349_spill] sm:$0xff]  ;;  %v5756_v61 = vsub.f32 1.0, %v19748_v38 }
 0x9a9   : > { %6732 = vrot.lane.b32.xlu0 %v6398_v56, %s9228_s14  ;;  %v8104_v56 = vunpack.i.l.bf16 %v16238_v8  ;;  %v5759_v10 = vsub.f32 1.0, %v19747_v44  ;;  %v19750_v44 = vld [vmem:[#allocation244_spill] sm:$0xff]  ;;  %v19752_v38 = vld [vmem:[#allocation185_spill] sm:$0xff] }
 0x9aa   : > { %v16460_v55 = vpop.permute.xlu1 %8317 }
 0x9ab   : > { %v16464_v21 = vpop.permute.xlu0 %8342  ;;  %v6399_v8 = vmul.f32 %v8240_v4, %v5759_v10 }
 0x9ac   : > { %19742 = vst [vmem:[#allocation147_spill] sm:$0xff] %v16464_v21 }
 0x9af   : > { %6618 = vrot.lane.b32.xlu2 %v6341_v19, %s9228_s14  ;;  %v16473_v42 = vpop.permute.xlu2 %8307  ;;  %v6344_v19 = vmul.f32 %v8104_v56, %v5704_v37  ;;  %v5703_v56 = vsub.f32 1.0, %v19750_v44  ;;  %v8195_v37 = vunpack.i.h.bf16 %v16315_v59  ;;  %v8235_v44 = vunpack.i.h.bf16 %v16398_v15 }
 0x9b0   : > { %6668 = vrot.lane.b32.xlu1 %v6366_v46, %s9228_s14  ;;  %v6396_v46 = vmul.f32 %v8234_v51, %v5756_v61  ;;  %v19751_v51 = vld [vmem:[#allocation300_spill] sm:$0xff]  ;;  %v5741_v61 = vsub.f32 1.0, %v19752_v38  ;;  %v19756_v38 = vld [vmem:[#allocation327_spill] sm:$0xff]  ;;  %v8160_v15 = vunpack.i.h.bf16 %v16324_v5 }
 0x9b1   : > { %6702 = vrot.lane.b32.xlu0 %v6383_v54, %s9228_s14  ;;  %v8154_v54 = vunpack.i.l.bf16 %v16298_v45  ;;  %v5724_v10 = vsub.f32 1.0, %v19751_v51  ;;  %v19754_v51 = vld [vmem:[#allocation225_spill] sm:$0xff] }
 0x9b2   : > { %v16475_v48 = vpop.permute.xlu1 %8332 }
 0x9b3   : > { %19745 = vst [vmem:[#allocation122_spill] sm:$0xff] %v16475_v48  ;;  %v16479_v40 = vpop.permute.xlu0 %8357  ;;  %v6364_v18 = vmul.f32 %v8154_v54, %v5724_v10 }
 0x9b7   : > { %6624 = vrot.lane.b32.xlu2 %v6344_v19, %s9228_s14  ;;  %v16488_v24 = vpop.permute.xlu2 %8322  ;;  %v6343_v19 = vmul.f32 %v8100_v62, %v5703_v56  ;;  %v5714_v62 = vsub.f32 1.0, %v19754_v51  ;;  %v8229_v56 = vunpack.i.l.bf16 %v16370_v33 }
 0x9b8   : > { %6734 = vrot.lane.b32.xlu1 %v6399_v8, %s9228_s14  ;;  %19749 = vst [vmem:[#allocation162_spill] sm:$0xff] %v16488_v24  ;;  %v6381_v8 = vmul.f32 %v8195_v37, %v5741_v61  ;;  %v19755_v37 = vld [vmem:[#allocation299_spill] sm:$0xff]  ;;  %v5754_v61 = vsub.f32 1.0, %v19756_v38  ;;  %v19759_v38 = vld [vmem:[#allocation350_spill] sm:$0xff] }
 0x9b9   : > { %6728 = vrot.lane.b32.xlu0 %v6396_v46, %s9228_s14  ;;  %v8129_v46 = vunpack.i.l.bf16 %v16296_v36  ;;  %v5757_v10 = vsub.f32 1.0, %v19755_v37  ;;  %v19757_v37 = vld [vmem:[#allocation220_spill] sm:$0xff] }
 0x9ba   : > { %v16490_v48 = vpop.permute.xlu1 %8347 }
 0x9bb   : > { %v16494_v4 = vpop.permute.xlu0 %6580  ;;  %v6397_v36 = vmul.f32 %v8235_v44, %v5757_v10 }
 0x9bf   : > { %6622 = vrot.lane.b32.xlu2 %v6343_v19, %s9228_s14  ;;  %v16503_v24 = vpop.permute.xlu2 %8337  ;;  %v6354_v19 = vmul.f32 %v8129_v46, %v5714_v62  ;;  %v5727_v46 = vsub.f32 1.0, %v19757_v37  ;;  %v8280_v62 = vunpack.i.h.bf16 %v16443_v6  ;;  %v8230_v37 = vunpack.i.h.bf16 %v16370_v33 }
 0x9c0   : > { %6664 = vrot.lane.b32.xlu1 %v6364_v18, %s9228_s14  ;;  %19753 = vst [vmem:[#allocation73_spill] sm:$0xff] %v16503_v24  ;;  %v6394_v18 = vmul.f32 %v8229_v56, %v5754_v61  ;;  %v19758_v56 = vld [vmem:[#allocation322_spill] sm:$0xff]  ;;  %v5775_v61 = vsub.f32 1.0, %v19759_v38  ;;  %v19762_v38 = vld [vmem:[#allocation163_spill] sm:$0xff]  ;;  %v8155_v33 = vunpack.i.h.bf16 %v16298_v45 }
 0x9c1   : > { %6698 = vrot.lane.b32.xlu0 %v6381_v8, %s9228_s14  ;;  %v8149_v8 = vunpack.i.l.bf16 %v16274_v27  ;;  %v5722_v10 = vsub.f32 1.0, %v19758_v56  ;;  %v19760_v56 = vld [vmem:[#allocation386_spill] sm:$0xff] }
 0x9c2   : > { %v16505_v13 = vpop.permute.xlu1 %6576 }
 0x9c3   : > { %v16509_v54 = vpop.permute.xlu0 %6586  ;;  %v6362_v5 = vmul.f32 %v8149_v8, %v5722_v10 }
 0x9c7   : > { %6644 = vrot.lane.b32.xlu2 %v6354_v19, %s9228_s14  ;;  %v16518_v51 = vpop.permute.xlu2 %8352  ;;  %v6367_v19 = vmul.f32 %v8160_v15, %v5727_v46  ;;  %v5742_v15 = vsub.f32 1.0, %v19760_v56  ;;  %v8189_v46 = vunpack.i.l.bf16 %v16353_v60 }
 0x9c8   : > { %6730 = vrot.lane.b32.xlu1 %v6397_v36, %s9228_s14  ;;  %v6415_v36 = vmul.f32 %v8280_v62, %v5775_v61  ;;  %v19761_v62 = vld [vmem:[#allocation336_spill] sm:$0xff]  ;;  %v5738_v61 = vsub.f32 1.0, %v19762_v38 }
 0x9c9   : > { %6724 = vrot.lane.b32.xlu0 %v6394_v18, %s9228_s14  ;;  %v8199_v18 = vunpack.i.l.bf16 %v16340_v26  ;;  %v5755_v10 = vsub.f32 1.0, %v19761_v62  ;;  %v19763_v62 = vld [vmem:[#allocation189_spill] sm:$0xff] }
 0x9ca   : > { %v16520_v24 = vpop.permute.xlu1 %6582 }
 0x9cb   : > { %v16524_v44 = vpop.permute.xlu0 %6592  ;;  %v6395_v26 = vmul.f32 %v8230_v37, %v5755_v10 }
 0x9cf   : > { %6670 = vrot.lane.b32.xlu2 %v6367_v19, %s9228_s14  ;;  %v16533_v20 = vpop.permute.xlu2 %6578  ;;  %v6382_v19 = vmul.f32 %v8199_v18, %v5742_v15  ;;  %v5725_v18 = vsub.f32 1.0, %v19763_v62  ;;  %v8320_v15 = vunpack.i.h.bf16 %v16460_v55  ;;  %v8190_v62 = vunpack.i.h.bf16 %v16353_v60 }
 0x9d0   : > { %6660 = vrot.lane.b32.xlu1 %v6362_v5, %s9228_s14  ;;  %v6378_v5 = vmul.f32 %v8189_v46, %v5738_v61  ;;  %v5806_v46 = vsub.f32 1.0, %v15967_v30  ;;  %v19764_v61 = vld [vmem:[#allocation60_spill] sm:$0xff] }
 0x9d1   : > { %6766 = vrot.lane.b32.xlu0 %v6415_v36, %s9228_s14  ;;  %v8359_v36 = vunpack.i.l.bf16 %v16479_v40  ;;  %v6365_v10 = vmul.f32 %v8155_v33, %v5725_v18  ;;  %8874 = vtanh.f32 %v19764_v61  ;;  %v8224_v18 = vunpack.i.l.bf16 %v16344_v3 }
 0x9d2   : > { %v16535_v49 = vpop.permute.xlu1 %6588 }
 0x9d3   : > { %v16539_v8 = vpop.permute.xlu0 %6598  ;;  %v6446_v38 = vmul.f32 %v8359_v36, %v5806_v46  ;;  %v19768_v46 = vld [vmem:[#allocation71_spill] sm:$0xff] }
 0x9d7   : > { %6700 = vrot.lane.b32.xlu2 %v6382_v19, %s9228_s14  ;;  %v16548_v56 = vpop.permute.xlu2 %6584  ;;  %v5791_v19 = vsub.f32 1.0, %v15643_v34  ;;  %v19766_v34 = vld [vmem:[#allocation317_spill] sm:$0xff] }
 0x9d8   : > { %6726 = vrot.lane.b32.xlu1 %v6395_v26, %s9228_s14  ;;  %v8194_v26 = vunpack.i.l.bf16 %v16315_v59  ;;  %v5740_v36 = vsub.f32 1.0, %v19766_v34  ;;  %v19771_v34 = vld [vmem:[#allocation51_spill] sm:$0xff] }
 0x9d9   : > { %6692 = vrot.lane.b32.xlu0 %v6378_v5, %s9228_s14  ;;  %v6431_v45 = vmul.f32 %v8320_v15, %v5791_v19  ;;  %v19765_v5 = vld [vmem:[#allocation65_spill] sm:$0xff] }
 0x9da   : > { %v16550_v39 = vpop.permute.xlu1 %6594  ;;  %8876 = vtanh.f32 %v19765_v5  ;;  %v6380_v19 = vmul.f32 %v8194_v26, %v5740_v36  ;;  %v19770_v5 = vld [vmem:[#allocation5_spill] sm:$0xff]  ;;  %v8150_v26 = vunpack.i.h.bf16 %v16274_v27  ;;  %v8144_v36 = vunpack.i.l.bf16 %v16310_v57 }
 0x9db   : > { %v6605_v37 = vpop.permute.xlu0 %6604  ;;  %8878 = vtanh.f32 %v19770_v5 }
 0x9dc   : > { %8880 = vtanh.f32 %v19771_v34 }
 0x9df   : > { %6666 = vrot.lane.b32.xlu2 %v6365_v10, %s9228_s14  ;;  %v16563_v30 = vpop.permute.xlu2 %6590  ;;  %v5739_v10 = vsub.f32 1.0, %v19768_v46 }
 0x9e0   : > { %6828 = vrot.lane.b32.xlu1 %v6446_v38, %s9228_s14  ;;  %v19769_v38 = vld [vmem:[#allocation209_spill] sm:$0xff] }
 0x9e1   : > { %6798 = vrot.lane.b32.xlu0 %v6431_v45, %s9228_s14  ;;  %v5752_v59 = vsub.f32 1.0, %v19769_v38  ;;  %v6379_v61 = vmul.f32 %v8190_v62, %v5739_v10  ;;  %v8875_v45 = vpop.eup %8874  ;;  %v19774_v62 = vld [vmem:[#allocation56_spill] sm:$0xff]  ;;  %v8275_v38 = vunpack.i.h.bf16 %v16415_v50 }
 0x9e2   : > { %v6601_v33 = vpop.permute.xlu1 %6600  ;;  %v8877_v60 = vpop.eup %8876  ;;  %v5566_v53 = vmul.f32 %v8875_v45, %v19772_v1  ;;  %8882 = vtanh.f32 %v19774_v62  ;;  %v19775_v10 = vld [vmem:[#allocation248_spill] sm:$0xff]  ;;  %v19776_v1 = vld [vmem:[#allocation10_spill] sm:$0xff]  ;;  %v19778_v45 = vld [vmem:[#allocation11_spill] sm:$0xff] }
 0x9e3   : > { %v16567_v15 = vpop.permute.xlu0 %6610  ;;  %v6392_v21 = vmul.f32 %v8224_v18, %v5752_v59  ;;  %v5567_v41 = vmul.f32 %v8877_v60, %v19773_v23  ;;  %8884 = vtanh.f32 %v19776_v1  ;;  %v19777_v23 = vld [vmem:[#allocation293_spill] sm:$0xff]  ;;  %v5773_v60 = vsub.f32 1.0, %v15103_v17  ;;  %v16589_v62 = vpop.eup %8878  ;;  %v19782_v17 = vld [vmem:[#allocation148_spill] sm:$0xff] }
 0x9e4   : > { %19767 = vst [vmem:[#allocation143_spill] sm:$0xff] %v16567_v15  ;;  %v6974_v59 = vadd.f32 %v6605_v37, %v5566_v53  ;;  %v5720_v27 = vsub.f32 1.0, %v19777_v23  ;;  %8886 = vtanh.f32 %v19778_v45  ;;  %v8881_v14 = vpop.eup %8880  ;;  %v19780_v53 = vld [vmem:[#allocation20_spill] sm:$0xff]  ;;  %v19781_v1 = vld [vmem:[#allocation49_spill] sm:$0xff]  ;;  %v8225_v23 = vunpack.i.h.bf16 %v16344_v3 }
 0x9e5   : > { %8888 = vtanh.f32 %v19779_v31  ;;  %v19784_v31 = vld [vmem:[#allocation373_spill] sm:$0xff]  ;;  %v19793_v15 = vld [vmem:[#allocation152_spill] sm:$0xff] }
 0x9e6   : > { %8890 = vtanh.f32 %v19780_v53 }
 0x9e7   : > { %6696 = vrot.lane.b32.xlu2 %v6380_v19, %s9228_s14  ;;  %v6597_v18 = vpop.permute.xlu2 %6596  ;;  %v5723_v19 = vsub.f32 1.0, %v19775_v10  ;;  %v6360_v10 = vmul.f32 %v8144_v36, %v5720_v27  ;;  %8892 = vtanh.f32 %v19781_v1 }
 0x9e8   : > { %6694 = vrot.lane.b32.xlu1 %v6379_v61, %s9228_s14  ;;  %8894 = vtanh.f32 %v19782_v17  ;;  %v19789_v17 = vld [vmem:[#allocation123_spill] sm:$0xff] }
 0x9e9   : > { %6720 = vrot.lane.b32.xlu0 %v6392_v21, %s9228_s14  ;;  %v6363_v21 = vmul.f32 %v8150_v26, %v5723_v19  ;;  %v19783_v26 = vld [vmem:[#allocation112_spill] sm:$0xff] }
 0x9ea   : > { %v6607_v46 = vpop.permute.xlu1 %6606  ;;  %v5564_v19 = vmul.f32 %v8881_v14, %v19783_v26  ;;  %v5774_v14 = vsub.f32 1.0, %v15450_v28  ;;  %v19790_v26 = vld [vmem:[#allocation88_spill] sm:$0xff] }
 0x9eb   : > { %v6975_v61 = vadd.f32 %v6607_v46, %v5567_v41  ;;  %v16583_v5 = vpop.permute.xlu0 %6636  ;;  %v6413_v41 = vmul.f32 %v8275_v38, %v5773_v60  ;;  %v8883_v46 = vpop.eup %8882  ;;  %v8184_v60 = vunpack.i.l.bf16 %v16326_v16 }
 0x9ec   : > { %v5565_v36 = vmul.f32 %v8883_v46, %v19784_v31  ;;  %v16602_v38 = vpop.eup %8884  ;;  %v5736_v31 = vsub.f32 1.0, %v19790_v26 }
 0x9ed   : > { %v7096_v34 = vpack.c.bf16 %v6975_v61, %v6974_v59  ;;  %v8279_v59 = vunpack.i.l.bf16 %v16443_v6  ;;  %v19785_v61 = vld [vmem:[#allocation169_spill] sm:$0xff] }
 0x9ee   : > { %8896 = vtanh.f32 %v19785_v61 }
 0x9ef   : > { %6662 = vrot.lane.b32.xlu2 %v6363_v21, %s9228_s14  ;;  %v7178_v37 = vsel %vm2607_vm3, %v7096_v34, 0  ;;  %v6603_v27 = vpop.permute.xlu2 %6602  ;;  %v8887_v21 = vpop.eup %8886  ;;  %v6972_v34 = vadd.f32 %v6601_v33, %v5564_v19  ;;  %v6414_v61 = vmul.f32 %v8279_v59, %v5774_v14  ;;  %v19792_v19 = vld [vmem:[#allocation158_spill] sm:$0xff]  ;;  %v19794_v59 = vld [vmem:[#allocation160_spill] sm:$0xff] }
 0x9f0   : > { %6656 = vrot.lane.b32.xlu1 %v6360_v10, %s9228_s14  ;;  %7348 = vmatpush.bf16.xpose.msrb.mxu1 %v7178_v37  ;;  %v6973_v10 = vadd.f32 %v6603_v27, %v5565_v36  ;;  %v8889_v6 = vpop.eup %8888  ;;  %v19788_v37 = vld [vmem:[#allocation127_spill] sm:$0xff]  ;;  %v6376_v27 = vmul.f32 %v8184_v60, %v5736_v31 }
 0x9f1   : > { %6762 = vrot.lane.b32.xlu0 %v6413_v41, %s9228_s14  ;;  %v19787_v41 = vld [vmem:[#allocation36_spill] sm:$0xff]  ;;  %v5753_v46 = vsub.f32 1.0, %v19788_v37  ;;  %v8891_v1 = vpop.eup %8890  ;;  %v5562_v3 = vmul.f32 %v8889_v6, %v19789_v17  ;;  %v19796_v60 = vld [vmem:[#allocation159_spill] sm:$0xff]  ;;  %v8354_v6 = vunpack.i.l.bf16 %v16518_v51 }
 0x9f2   : > { %v16606_v45 = vpop.permute.xlu1 %6612  ;;  %8898 = vtanh.f32 %v19787_v41  ;;  %v8893_v22 = vpop.eup %8892 }
 0x9f3   : > { %19786 = vst [vmem:[#allocation184_spill] sm:$0xff] %v16606_v45  ;;  %v16610_v53 = vpop.permute.xlu0 %6632  ;;  %v7095_v45 = vpack.c.bf16 %v6973_v10, %v6972_v34  ;;  %8900 = vtanh.f32 %v19791_v12  ;;  %v6393_v28 = vmul.f32 %v8225_v23, %v5753_v46  ;;  %v8895_v33 = vpop.eup %8894  ;;  %v5563_v36 = vmul.f32 %v8893_v22, %v19792_v19  ;;  %v19795_v34 = vld [vmem:[#allocation198_spill] sm:$0xff] }
 0x9f4   : > { %v6970_v7 = vadd.f32 %v6597_v18, %v5562_v3  ;;  %v8897_v37 = vpop.eup %8896  ;;  %8902 = vtanh.f32 %v19793_v15  ;;  %v5582_v14 = vmul.f32 %v8895_v33, %v19794_v59  ;;  %v8360_v23 = vunpack.i.h.bf16 %v16479_v40  ;;  %v19799_v33 = vld [vmem:[#allocation382_spill] sm:$0xff] }
 0x9f5   : > { %v7175_v41 = vsel %vm2607_vm3, %v7095_v45, 0  ;;  %v5583_v12 = vmul.f32 %v8897_v37, %v19795_v34  ;;  %v6971_v22 = vadd.f32 %v16539_v8, %v5563_v36  ;;  %8904 = vtanh.f32 %v19796_v60  ;;  %v19797_v45 = vld [vmem:[#allocation217_spill] sm:$0xff]  ;;  %v19803_v60 = vld [vmem:[#allocation144_spill] sm:$0xff] }
 0x9f6   : > { %v5555_v10 = vmul.f32 %v8891_v1, %v19797_v45  ;;  %v5807_v15 = vsub.f32 1.0, %v16070_v63  ;;  %v8315_v3 = vunpack.i.h.bf16 %v16434_v0  ;;  %v6990_v40 = vadd.f32 %v16583_v5, %v5582_v14  ;;  %v19800_v36 = vld [vmem:[#allocation305_spill] sm:$0xff]  ;;  %v19801_v14 = vld [vmem:[#allocation32_spill] sm:$0xff] }
 0x9f7   : > { %6764 = vrot.lane.b32.xlu2 %v6414_v61, %s9228_s14  ;;  %v16631_v46 = vpop.permute.xlu2 %6608  ;;  %v7094_v31 = vpack.c.bf16 %v6971_v22, %v6970_v7  ;;  %v5554_v1 = vmul.f32 %v8887_v21, %v19799_v33  ;;  %v5804_v63 = vsub.f32 1.0, %v16052_v52  ;;  %v19802_v7 = vld [vmem:[#allocation139_spill] sm:$0xff] }
 0x9f8   : > { %6722 = vrot.lane.b32.xlu1 %v6393_v28, %s9228_s14  ;;  %7349 = vmatpush.bf16.xpose.msrb.mxu1 %v7175_v41  ;;  %v8899_v18 = vpop.eup %8898  ;;  %v19798_v28 = vld [vmem:[#allocation27_spill] sm:$0xff]  ;;  %v16641_v19 = vadd.f32 %v16520_v24, %v5555_v10  ;;  %v5789_v41 = vsub.f32 1.0, %v15855_v11  ;;  %v6447_v37 = vmul.f32 %v8360_v23, %v5807_v15  ;;  %v19805_v10 = vld [vmem:[#allocation269_spill] sm:$0xff] }
 0x9f9   : > { %6688 = vrot.lane.b32.xlu0 %v6376_v27, %s9228_s14  ;;  %v8901_v61 = vpop.eup %8900  ;;  %8906 = vtanh.f32 %v19798_v28  ;;  %v5560_v34 = vmul.f32 %v8899_v18, %v19802_v7  ;;  %v6444_v21 = vmul.f32 %v8354_v6, %v5804_v63  ;;  %v7172_v24 = vsel %vm2607_vm3, %v7094_v31, 0  ;;  %v19804_v18 = vld [vmem:[#allocation384_spill] sm:$0xff]  ;;  %v19812_v7 = vld [vmem:[#allocation338_spill] sm:$0xff] }
 0x9fa   : > { %v6639_v17 = vpop.permute.xlu1 %6638  ;;  %v5561_v27 = vmul.f32 %v8901_v61, %v19800_v36  ;;  %v8903_v59 = vpop.eup %8902  ;;  %8908 = vtanh.f32 %v19801_v14  ;;  %v6429_v22 = vmul.f32 %v8315_v3, %v5789_v41  ;;  %v19806_v3 = vld [vmem:[#allocation132_spill] sm:$0xff]  ;;  %v8185_v31 = vunpack.i.h.bf16 %v16326_v16  ;;  %v19808_v41 = vld [vmem:[#allocation21_spill] sm:$0xff] }
 0x9fb   : > { %v6991_v26 = vadd.f32 %v6639_v17, %v5583_v12  ;;  %v16635_v8 = vpop.permute.xlu0 %6628  ;;  %v16648_v12 = vadd.f32 %v16494_v4, %v5554_v1  ;;  %v8905_v23 = vpop.eup %8904  ;;  %8910 = vtanh.f32 %v19803_v60  ;;  %v5580_v15 = vmul.f32 %v8903_v59, %v19805_v10  ;;  %v19810_v16 = vld [vmem:[#allocation328_spill] sm:$0xff]  ;;  %v19811_v59 = vld [vmem:[#allocation283_spill] sm:$0xff] }
 0x9fc   : > { %v6969_v52 = vadd.f32 %v16550_v39, %v5561_v27  ;;  %v5581_v45 = vmul.f32 %v8905_v23, %v19804_v18  ;;  %v8319_v39 = vunpack.i.l.bf16 %v16460_v55  ;;  %v6968_v6 = vadd.f32 %v16524_v44, %v5560_v34 }
 0x9fd   : > { %v7104_v5 = vpack.c.bf16 %v6991_v26, %v6990_v40  ;;  %v7090_v4 = vpack.c.bf16 %v16641_v19, %v16648_v12  ;;  %8912 = vtanh.f32 %v19806_v3  ;;  %v19807_v40 = vld [vmem:[#allocation227_spill] sm:$0xff]  ;;  %v5790_v61 = vsub.f32 1.0, %v15485_v2 }
 0x9fe   : > { %v5553_v26 = vmul.f32 %v16602_v38, %v19807_v40  ;;  %v8219_v55 = vunpack.i.l.bf16 %v16383_v32  ;;  %v6988_v44 = vadd.f32 %v16610_v53, %v5580_v15  ;;  %v7093_v36 = vpack.c.bf16 %v6969_v52, %v6968_v6  ;;  %v19814_v52 = vld [vmem:[#allocation241_spill] sm:$0xff] }
 0x9ff   : > { %6830 = vrot.lane.b32.xlu2 %v6447_v37, %s9228_s14  ;;  %v7202_v11 = vsel %vm2607_vm3, %v7104_v5, 0  ;;  %v8907_v17 = vpop.eup %8906  ;;  %v16668_v28 = vpop.permute.xlu2 %6614  ;;  %8914 = vtanh.f32 %v19808_v41  ;;  %v19809_v37 = vld [vmem:[#allocation95_spill] sm:$0xff]  ;;  %v5737_v5 = vsub.f32 1.0, %v19810_v16  ;;  %v5750_v34 = vsub.f32 1.0, %v19812_v7  ;;  %v19820_v7 = vld [vmem:[#allocation277_spill] sm:$0xff] }
 0xa00   : > { %6824 = vrot.lane.b32.xlu1 %v6444_v21, %s9228_s14  ;;  %7350 = vmatpush.bf16.xpose.msrb.mxu1 %v7172_v24  ;;  %v8909_v27 = vpop.eup %8908  ;;  %v5552_v38 = vmul.f32 %v16589_v62, %v19809_v37  ;;  %v16679_v2 = vadd.f32 %v16533_v20, %v5553_v26  ;;  %v6430_v53 = vmul.f32 %v8319_v39, %v5790_v61  ;;  %v19813_v24 = vld [vmem:[#allocation25_spill] sm:$0xff]  ;;  %v7169_v20 = vsel %vm2607_vm3, %v7093_v36, 0  ;;  %v19815_v39 = vld [vmem:[#allocation215_spill] sm:$0xff] }
 0xa01   : > { %7361 = vmatpush.bf16.xpose.msrb.mxu2 %v7202_v11  ;;  %6794 = vrot.lane.b32.xlu0 %v6429_v22, %s9228_s14  ;;  %v5559_v14 = vmul.f32 %v8909_v27, %v19811_v59  ;;  %v8911_v22 = vpop.eup %8910  ;;  %8916 = vtanh.f32 %v19813_v24  ;;  %v5558_v11 = vmul.f32 %v8907_v17, %v19814_v52  ;;  %v6377_v23 = vmul.f32 %v8185_v31, %v5737_v5  ;;  %v19817_v31 = vld [vmem:[#allocation340_spill] sm:$0xff]  ;;  %v19818_v41 = vld [vmem:[#allocation351_spill] sm:$0xff] }
 0xa02   : > { %v6635_v33 = vpop.permute.xlu1 %6634  ;;  %v16686_v60 = vadd.f32 %v16505_v13, %v5552_v38  ;;  %v6390_v62 = vmul.f32 %v8219_v55, %v5750_v34  ;;  %v5578_v6 = vmul.f32 %v8911_v22, %v19815_v39  ;;  %v19816_v13 = vld [vmem:[#allocation74_spill] sm:$0xff]  ;;  %v8145_v3 = vunpack.i.h.bf16 %v16310_v57  ;;  %v19821_v52 = vld [vmem:[#allocation75_spill] sm:$0xff] }
 0xa03   : > { %v6989_v1 = vadd.f32 %v6635_v33, %v5581_v45  ;;  %v16672_v63 = vpop.permute.xlu0 %6626  ;;  %v6967_v18 = vadd.f32 %v16563_v30, %v5559_v14  ;;  %v8913_v10 = vpop.eup %8912  ;;  %v6966_v30 = vadd.f32 %v16535_v49, %v5558_v11  ;;  %v8139_v26 = vunpack.i.l.bf16 %v16284_v9  ;;  %v19819_v38 = vld [vmem:[#allocation302_spill] sm:$0xff]  ;;  %v19822_v11 = vld [vmem:[#allocation115_spill] sm:$0xff] }
 0xa04   : > { %v7089_v15 = vpack.c.bf16 %v16679_v2, %v16686_v60  ;;  %v5579_v17 = vmul.f32 %v8913_v10, %v19816_v13  ;;  %v5721_v61 = vsub.f32 1.0, %v19817_v31  ;;  %v5718_v37 = vsub.f32 1.0, %v19818_v41  ;;  %v19825_v39 = vld [vmem:[#allocation202_spill] sm:$0xff]  ;;  %v19826_v13 = vld [vmem:[#allocation308_spill] sm:$0xff]  ;;  %v19830_v41 = vld [vmem:[#allocation165_spill] sm:$0xff] }
 0xa05   : > { %v7103_v21 = vpack.c.bf16 %v6989_v1, %v6988_v44  ;;  %v8915_v40 = vpop.eup %8914  ;;  %v8270_v44 = vunpack.i.h.bf16 %v16389_v47  ;;  %v6986_v1 = vadd.f32 %v16635_v8, %v5578_v6  ;;  %v7092_v57 = vpack.c.bf16 %v6967_v18, %v6966_v30  ;;  %v19851_v60 = vld [vmem:[#allocation72_spill] sm:$0xff] }
 0xa06   : > { %v5556_v16 = vmul.f32 %v8915_v40, %v19819_v38  ;;  %v6361_v5 = vmul.f32 %v8145_v3, %v5721_v61  ;;  %v5771_v59 = vsub.f32 1.0, %v15362_v43  ;;  %8918 = vtanh.f32 %v19821_v52  ;;  %v19827_v3 = vld [vmem:[#allocation223_spill] sm:$0xff]  ;;  %v19831_v38 = vld [vmem:[#allocation92_spill] sm:$0xff] }
 0xa07   : > { %6796 = vrot.lane.b32.xlu2 %v6430_v53, %s9228_s14  ;;  %v7199_v45 = vsel %vm2607_vm3, %v7103_v21, 0  ;;  %v16702_v33 = vpop.permute.xlu2 %6616  ;;  %v8917_v49 = vpop.eup %8916  ;;  %v6358_v53 = vmul.f32 %v8139_v26, %v5718_v37  ;;  %v7166_v8 = vsel %vm2607_vm3, %v7092_v57, 0  ;;  %8920 = vtanh.f32 %v19822_v11  ;;  %v19829_v57 = vld [vmem:[#allocation379_spill] sm:$0xff] }
 0xa08   : > { %6690 = vrot.lane.b32.xlu1 %v6377_v23, %s9228_s14  ;;  %7351 = vmatpush.bf16.xpose.msrb.mxu1 %v7169_v20  ;;  %v5557_v34 = vmul.f32 %v8917_v49, %v19820_v7  ;;  %v6411_v21 = vmul.f32 %v8270_v44, %v5771_v59  ;;  %v6964_v22 = vadd.f32 %v16548_v56, %v5556_v16  ;;  %v8274_v43 = vunpack.i.l.bf16 %v16415_v50  ;;  %v19823_v56 = vld [vmem:[#allocation131_spill] sm:$0xff]  ;;  %v19832_v59 = vld [vmem:[#allocation125_spill] sm:$0xff] }
 0xa09   : > { %7362 = vmatpush.bf16.xpose.msrb.mxu2 %v7199_v45  ;;  %6716 = vrot.lane.b32.xlu0 %v6390_v62, %s9228_s14  ;;  %8922 = vtanh.f32 %v19823_v56  ;;  %v8220_v62 = vunpack.i.h.bf16 %v16383_v32  ;;  %v19824_v45 = vld [vmem:[#allocation78_spill] sm:$0xff]  ;;  %v8179_v10 = vunpack.i.l.bf16 %v16301_v29  ;;  %v5772_v6 = vsub.f32 1.0, %v19825_v39  ;;  %v19835_v39 = vld [vmem:[#allocation97_spill] sm:$0xff] }
 0xa0a   : > { %v6631_v55 = vpop.permute.xlu1 %6630  ;;  %v6965_v23 = vadd.f32 %v16509_v54, %v5557_v34  ;;  %8924 = vtanh.f32 %v19824_v45  ;;  %v5734_v30 = vsub.f32 1.0, %v19827_v3  ;;  %v8349_v34 = vunpack.i.l.bf16 %v16490_v48 }
 0xa0b   : > { %v6987_v36 = vadd.f32 %v6631_v55, %v5579_v17  ;;  %v16706_v27 = vpop.permute.xlu0 %6640  ;;  %v5751_v17 = vsub.f32 1.0, %v19826_v13  ;;  %v6412_v40 = vmul.f32 %v8274_v43, %v5772_v6  ;;  %v5802_v43 = vsub.f32 1.0, %v15810_v25  ;;  %v19836_v13 = vld [vmem:[#allocation105_spill] sm:$0xff] }
 0xa0c   : > { %v7091_v54 = vpack.c.bf16 %v6965_v23, %v6964_v22  ;;  %v8919_v26 = vpop.eup %8918  ;;  %v6374_v61 = vmul.f32 %v8179_v10, %v5734_v30  ;;  %v5787_v23 = vsub.f32 1.0, %v15395_v58  ;;  %v7160_v58 = vsel %vm2607_vm3, %v7090_v4, 0  ;;  %v19838_v30 = vld [vmem:[#allocation309_spill] sm:$0xff] }
 0xa0d   : > { %v7102_v14 = vpack.c.bf16 %v6987_v36, %v6986_v1  ;;  %v6391_v32 = vmul.f32 %v8220_v62, %v5751_v17  ;;  %v8921_v31 = vpop.eup %8920  ;;  %v19828_v1 = vld [vmem:[#allocation111_spill] sm:$0xff]  ;;  %v5568_v49 = vmul.f32 %v8919_v26, %v19829_v57  ;;  %v6442_v6 = vmul.f32 %v8349_v34, %v5802_v43  ;;  %v19837_v17 = vld [vmem:[#allocation385_spill] sm:$0xff]  ;;  %v19845_v34 = vld [vmem:[#allocation90_spill] sm:$0xff] }
 0xa0e   : > { %v7163_v55 = vsel %vm2607_vm3, %v7091_v54, 0  ;;  %8926 = vtanh.f32 %v19828_v1  ;;  %v5576_v37 = vmul.f32 %v8921_v31, %v19830_v41  ;;  %v19834_v62 = vld [vmem:[#allocation143_spill] sm:$0xff]  ;;  %v8314_v26 = vunpack.i.l.bf16 %v16434_v0  ;;  %v19842_v41 = vld [vmem:[#allocation297_spill] sm:$0xff]  ;;  %v19847_v43 = vld [vmem:[#allocation254_spill] sm:$0xff] }
 0xa0f   : > { %6658 = vrot.lane.b32.xlu2 %v6361_v5, %s9228_s14  ;;  %v7196_v24 = vsel %vm2607_vm3, %v7102_v14, 0  ;;  %v16724_v18 = vpop.permute.xlu2 %6618  ;;  %v8923_v44 = vpop.eup %8922  ;;  %v8355_v5 = vunpack.i.h.bf16 %v16518_v51  ;;  %8928 = vtanh.f32 %v19832_v59  ;;  %v19833_v14 = vld [vmem:[#allocation110_spill] sm:$0xff]  ;;  %v19840_v1 = vld [vmem:[#allocation319_spill] sm:$0xff] }
 0xa10   : > { %6652 = vrot.lane.b32.xlu1 %v6358_v53, %s9228_s14  ;;  %7352 = vmatpush.bf16.xpose.msrb.mxu1 %v7166_v8  ;;  %v8925_v36 = vpop.eup %8924  ;;  %v5577_v16 = vmul.f32 %v8923_v44, %v19831_v38  ;;  %v5805_v53 = vsub.f32 1.0, %v15883_v35  ;;  %v8310_v8 = vunpack.i.h.bf16 %v16473_v42  ;;  %8930 = vtanh.f32 %v19835_v39  ;;  %v19843_v38 = vld [vmem:[#allocation106_spill] sm:$0xff] }
 0xa11   : > { %7363 = vmatpush.bf16.xpose.msrb.mxu2 %v7196_v24  ;;  %6758 = vrot.lane.b32.xlu0 %v6411_v21, %s9228_s14  ;;  %v5569_v7 = vmul.f32 %v8925_v36, %v19833_v14  ;;  %v16752_v24 = vadd.f32 %v16631_v46, %v5568_v49  ;;  %8932 = vtanh.f32 %v19836_v13  ;;  %v5788_v19 = vsub.f32 1.0, %v19840_v1  ;;  %v19841_v49 = vld [vmem:[#allocation323_spill] sm:$0xff]  ;;  %v19844_v14 = vld [vmem:[#allocation94_spill] sm:$0xff] }
 0xa12   : > { %v16726_v20 = vpop.permute.xlu1 %6620  ;;  %v6985_v51 = vadd.f32 %v16672_v63, %v5577_v16  ;;  %v6445_v56 = vmul.f32 %v8355_v5, %v5805_v53  ;;  %v6427_v46 = vmul.f32 %v8310_v8, %v5787_v23  ;;  %v5735_v0 = vsub.f32 1.0, %v19841_v49  ;;  %v19853_v13 = vld [vmem:[#allocation23_spill] sm:$0xff] }
 0xa13   : > { %v16731_v50 = vpop.permute.xlu0 %6646  ;;  %v16760_v35 = vadd.f32 %v19834_v62, %v5569_v7  ;;  %v5748_v16 = vsub.f32 1.0, %v19843_v38  ;;  %8934 = vtanh.f32 %v19844_v14  ;;  %v8140_v23 = vunpack.i.h.bf16 %v16284_v9  ;;  %v19849_v62 = vld [vmem:[#allocation285_spill] sm:$0xff]  ;;  %v19857_v1 = vld [vmem:[#allocation383_spill] sm:$0xff]  ;;  %v19860_v38 = vld [vmem:[#allocation156_spill] sm:$0xff] }
 0xa14   : > { %v8927_v10 = vpop.eup %8926  ;;  %v19863_v14 = vld [vmem:[#allocation288_spill] sm:$0xff] }
 0xa15   : > { %v7097_v54 = vpack.c.bf16 %v16760_v35, %v16752_v24  ;;  %v8929_v25 = vpop.eup %8928  ;;  %v8309_v24 = vunpack.i.l.bf16 %v16473_v42  ;;  %v19887_v35 = vld [vmem:[#allocation59_spill] sm:$0xff] }
 0xa16   : > { %v5575_v3 = vmul.f32 %v8929_v25, %v19837_v17  ;;  %v8931_v57 = vpop.eup %8930  ;;  %v19852_v25 = vld [vmem:[#allocation312_spill] sm:$0xff] }
 0xa17   : > { %6760 = vrot.lane.b32.xlu2 %v6412_v40, %s9228_s14  ;;  %v6625_v21 = vpop.permute.xlu2 %6624  ;;  %v5574_v40 = vmul.f32 %v8927_v10, %v19838_v30  ;;  %v8933_v59 = vpop.eup %8932  ;;  %v19855_v30 = vld [vmem:[#allocation181_spill] sm:$0xff] }
 0xa18   : > { %6718 = vrot.lane.b32.xlu1 %v6391_v32, %s9228_s14  ;;  %7353 = vmatpush.bf16.xpose.msrb.mxu1 %v7163_v55  ;;  %v6984_v52 = vadd.f32 %v6625_v21, %v5576_v37  ;;  %v8180_v32 = vunpack.i.h.bf16 %v16301_v29  ;;  %v19839_v55 = vld [vmem:[#allocation174_spill] sm:$0xff]  ;;  %v5573_v37 = vmul.f32 %v8931_v57, %v19842_v41  ;;  %v6428_v29 = vmul.f32 %v8314_v26, %v5788_v19 }
 0xa19   : > { %6684 = vrot.lane.b32.xlu0 %v6374_v61, %s9228_s14  ;;  %v8214_v44 = vunpack.i.l.bf16 %v19839_v55  ;;  %v6982_v12 = vadd.f32 %v16726_v20, %v5574_v40  ;;  %v5572_v53 = vmul.f32 %v8933_v59, %v19845_v34  ;;  %v8935_v9 = vpop.eup %8934  ;;  %v5769_v40 = vsub.f32 1.0, %v19855_v30  ;;  %v19859_v41 = vld [vmem:[#allocation150_spill] sm:$0xff]  ;;  %v19864_v34 = vld [vmem:[#allocation251_spill] sm:$0xff] }
 0xa1a   : > { %v16748_v22 = vpop.permute.xlu1 %6642  ;;  %v7101_v45 = vpack.c.bf16 %v6985_v51, %v6984_v52  ;;  %v6375_v7 = vmul.f32 %v8180_v32, %v5735_v0  ;;  %v6981_v20 = vadd.f32 %v16724_v18, %v5573_v37  ;;  %v19846_v51 = vld [vmem:[#allocation82_spill] sm:$0xff]  ;;  %v7157_v52 = vsel %vm2607_vm3, %v7089_v15, 0  ;;  %v19858_v0 = vld [vmem:[#allocation63_spill] sm:$0xff] }
 0xa1b   : > { %v16755_v11 = vpop.permute.xlu0 %6732  ;;  %v6388_v21 = vmul.f32 %v8214_v44, %v5748_v16  ;;  %8936 = vtanh.f32 %v19846_v51  ;;  %v6980_v18 = vadd.f32 %v16702_v33, %v5572_v53  ;;  %v8265_v15 = vunpack.i.h.bf16 %v19851_v60  ;;  %v19856_v32 = vld [vmem:[#allocation26_spill] sm:$0xff] }
 0xa1c   : > { %v7193_v63 = vsel %vm2607_vm3, %v7101_v45, 0  ;;  %8938 = vtanh.f32 %v19847_v43  ;;  %v8134_v45 = vunpack.i.l.bf16 %v19849_v62  ;;  %v5716_v33 = vsub.f32 1.0, %v19852_v25  ;;  %v19867_v25 = vld [vmem:[#allocation17_spill] sm:$0xff]  ;;  %v19869_v30 = vld [vmem:[#allocation14_spill] sm:$0xff] }
 0xa1d   : > { %7364 = vmatpush.bf16.xpose.msrb.mxu2 %v7193_v63  ;;  %v7099_v63 = vpack.c.bf16 %v6981_v20, %v6980_v18  ;;  %v5770_v53 = vsub.f32 1.0, %v19864_v34  ;;  %v8215_v51 = vunpack.i.h.bf16 %v19839_v55 }
 0xa1f   : > { %6826 = vrot.lane.b32.xlu2 %v6445_v56, %s9228_s14  ;;  %v6623_v31 = vpop.permute.xlu2 %6622  ;;  %v19848_v56 = vld [vmem:[#allocation258_spill] sm:$0xff]  ;;  %v7187_v57 = vsel %vm2607_vm3, %v7099_v63, 0 }
 0xa20   : > { %6820 = vrot.lane.b32.xlu1 %v6442_v6, %s9228_s14  ;;  %7354 = vmatpush.bf16.xpose.msrb.mxu1 %v7160_v58  ;;  %v6983_v4 = vadd.f32 %v6623_v31, %v5575_v3  ;;  %8940 = vtanh.f32 %v19848_v56  ;;  %v19850_v6 = vld [vmem:[#allocation234_spill] sm:$0xff]  ;;  %v19854_v58 = vld [vmem:[#allocation324_spill] sm:$0xff]  ;;  %v6356_v31 = vmul.f32 %v8134_v45, %v5716_v33 }
 0xa21   : > { %6790 = vrot.lane.b32.xlu0 %v6427_v46, %s9228_s14  ;;  %v5719_v2 = vsub.f32 1.0, %v19850_v6  ;;  %8942 = vtanh.f32 %v19853_v13  ;;  %v5571_v17 = vmul.f32 %v8935_v9, %v19854_v58  ;;  %v8937_v26 = vpop.eup %8936  ;;  %v19865_v56 = vld [vmem:[#allocation388_spill] sm:$0xff] }
 0xa22   : > { %v16778_v61 = vpop.permute.xlu1 %6668  ;;  %v7100_v5 = vpack.c.bf16 %v6983_v4, %v6982_v12  ;;  %8944 = vtanh.f32 %v19856_v32  ;;  %v8939_v44 = vpop.eup %8938  ;;  %v5570_v19 = vmul.f32 %v8937_v26, %v19857_v1  ;;  %v6409_v12 = vmul.f32 %v8265_v15, %v5769_v40  ;;  %v19866_v6 = vld [vmem:[#allocation192_spill] sm:$0xff]  ;;  %v19870_v40 = vld [vmem:[#allocation381_spill] sm:$0xff] }
 0xa23   : > { %v16783_v36 = vpop.permute.xlu0 %6702  ;;  %v6359_v3 = vmul.f32 %v8140_v23, %v5719_v2  ;;  %v6979_v4 = vadd.f32 %v16668_v28, %v5571_v17  ;;  %8946 = vtanh.f32 %v19858_v0  ;;  %v5598_v16 = vmul.f32 %v8939_v44, %v19860_v38  ;;  %v19862_v28 = vld [vmem:[#allocation67_spill] sm:$0xff]  ;;  %v19868_v33 = vld [vmem:[#allocation172_spill] sm:$0xff]  ;;  %v19876_v38 = vld [vmem:[#allocation337_spill] sm:$0xff] }
 0xa24   : > { %v7190_v8 = vsel %vm2607_vm3, %v7100_v5, 0  ;;  %v19861_v5 = vld [vmem:[#allocation184_spill] sm:$0xff]  ;;  %8948 = vtanh.f32 %v19862_v28  ;;  %v5732_v45 = vsub.f32 1.0, %v19865_v56  ;;  %v5749_v2 = vsub.f32 1.0, %v19866_v6  ;;  %v19877_v28 = vld [vmem:[#allocation99_spill] sm:$0xff] }
 0xa25   : > { %7365 = vmatpush.bf16.xpose.msrb.mxu2 %v7190_v8  ;;  %v6978_v59 = vadd.f32 %v19861_v5, %v5570_v19  ;;  %8950 = vtanh.f32 %v19867_v25  ;;  %v19872_v44 = vld [vmem:[#allocation380_spill] sm:$0xff]  ;;  %v19873_v19 = vld [vmem:[#allocation365_spill] sm:$0xff] }
 0xa26   : > { %v8941_v49 = vpop.eup %8940  ;;  %v6389_v55 = vmul.f32 %v8215_v51, %v5749_v2  ;;  %8952 = vtanh.f32 %v19869_v30  ;;  %v7181_v2 = vsel %vm2607_vm3, %v7097_v54, 0 }
 0xa27   : > { %6792 = vrot.lane.b32.xlu2 %v6428_v29, %s9228_s14  ;;  %v16805_v10 = vpop.permute.xlu2 %6644  ;;  %v5599_v37 = vmul.f32 %v8941_v49, %v19859_v41  ;;  %v8269_v29 = vunpack.i.l.bf16 %v16389_v47  ;;  %v8943_v8 = vpop.eup %8942  ;;  %v7098_v23 = vpack.c.bf16 %v6979_v4, %v6978_v59  ;;  %v8350_v4 = vunpack.i.h.bf16 %v16490_v48  ;;  %v19875_v41 = vld [vmem:[#allocation147_spill] sm:$0xff] }
 0xa28   : > { %6686 = vrot.lane.b32.xlu1 %v6375_v7, %s9228_s14  ;;  %7355 = vmatpush.bf16.xpose.msrb.mxu1 %v7157_v52  ;;  %v8174_v7 = vunpack.i.l.bf16 %v19863_v14  ;;  %v7006_v52 = vadd.f32 %v16778_v61, %v5598_v16  ;;  %v8945_v18 = vpop.eup %8944  ;;  %v5630_v26 = vmul.f32 %v8943_v8, %v19870_v40  ;;  %v5803_v16 = vsub.f32 1.0, %v19876_v38 }
 0xa29   : > { %6712 = vrot.lane.b32.xlu0 %v6388_v21, %s9228_s14  ;;  %v6410_v15 = vmul.f32 %v8269_v29, %v5770_v53  ;;  %v8947_v9 = vpop.eup %8946  ;;  %v5631_v13 = vmul.f32 %v8945_v18, %v19868_v33  ;;  %v7184_v61 = vsel %vm2607_vm3, %v7098_v23, 0  ;;  %v19878_v53 = vld [vmem:[#allocation375_spill] sm:$0xff] }
 0xa2a   : > { %v6735_v39 = vpop.permute.xlu1 %6734  ;;  %v6372_v58 = vmul.f32 %v8174_v7, %v5732_v45  ;;  %v5614_v1 = vmul.f32 %v8947_v9, %v19872_v44  ;;  %v7038_v49 = vadd.f32 %v16755_v11, %v5630_v26  ;;  %v8305_v7 = vunpack.i.h.bf16 %v19877_v28  ;;  %v19881_v18 = vld [vmem:[#allocation267_spill] sm:$0xff] }
 0xa2b   : > { %v16809_v46 = vpop.permute.xlu0 %6728  ;;  %v7039_v32 = vadd.f32 %v6735_v39, %v5631_v13  ;;  %v6443_v8 = vmul.f32 %v8350_v4, %v5803_v16  ;;  %v5785_v56 = vsub.f32 1.0, %v19881_v18  ;;  %v19883_v9 = vld [vmem:[#allocation239_spill] sm:$0xff]  ;;  %v19889_v4 = vld [vmem:[#allocation280_spill] sm:$0xff] }
 0xa2c   : > { %v19891_v16 = vld [vmem:[#allocation352_spill] sm:$0xff] }
 0xa2d   : > { %7366 = vmatpush.bf16.xpose.msrb.mxu2 %v7187_v57  ;;  %v19874_v57 = vld [vmem:[#allocation230_spill] sm:$0xff]  ;;  %v7128_v34 = vpack.c.bf16 %v7039_v32, %v7038_v49  ;;  %v6425_v33 = vmul.f32 %v8305_v7, %v5785_v56  ;;  %v8175_v32 = vunpack.i.h.bf16 %v19863_v14  ;;  %v8135_v56 = vunpack.i.h.bf16 %v19849_v62 }
 0xa2e   : > { %v19892_v7 = vld [vmem:[#allocation214_spill] sm:$0xff] }
 0xa2f   : > { %6654 = vrot.lane.b32.xlu2 %v6359_v3, %s9228_s14  ;;  %v6671_v21 = vpop.permute.xlu2 %6670  ;;  %v8949_v3 = vpop.eup %8948 }
 0xa30   : > { %6648 = vrot.lane.b32.xlu1 %v6356_v31, %s9228_s14  ;;  %v7007_v43 = vadd.f32 %v6671_v21, %v5599_v37  ;;  %v19871_v31 = vld [vmem:[#allocation243_spill] sm:$0xff]  ;;  %v8344_v37 = vunpack.i.l.bf16 %v19875_v41  ;;  %v8951_v48 = vpop.eup %8950  ;;  %v5800_v21 = vsub.f32 1.0, %v19878_v53 }
 0xa31   : > { %6754 = vrot.lane.b32.xlu0 %v6409_v12, %s9228_s14  ;;  %8954 = vtanh.f32 %v19871_v31  ;;  %v5615_v12 = vmul.f32 %v8949_v3, %v19873_v19  ;;  %v8953_v11 = vpop.eup %8952  ;;  %v19886_v3 = vld [vmem:[#allocation142_spill] sm:$0xff]  ;;  %v19888_v31 = vld [vmem:[#allocation331_spill] sm:$0xff] }
 0xa32   : > { %v16830_v20 = vpop.permute.xlu1 %6664  ;;  %v7112_v63 = vpack.c.bf16 %v7007_v43, %v7006_v52  ;;  %8956 = vtanh.f32 %v19874_v57  ;;  %v19879_v52 = vld [vmem:[#allocation7_spill] sm:$0xff]  ;;  %v19880_v43 = vld [vmem:[#allocation170_spill] sm:$0xff]  ;;  %v6440_v6 = vmul.f32 %v8344_v37, %v5800_v21  ;;  %v5628_v25 = vmul.f32 %v8953_v11, %v19883_v9 }
 0xa33   : > { %v16834_v47 = vpop.permute.xlu0 %6698  ;;  %v7023_v29 = vadd.f32 %v16783_v36, %v5615_v12  ;;  %8958 = vtanh.f32 %v19879_v52  ;;  %v5629_v23 = vmul.f32 %v8951_v48, %v19880_v43  ;;  %v19882_v36 = vld [vmem:[#allocation13_spill] sm:$0xff]  ;;  %v5786_v44 = vsub.f32 1.0, %v19888_v31  ;;  %v19895_v52 = vld [vmem:[#allocation307_spill] sm:$0xff]  ;;  %v19903_v31 = vld [vmem:[#allocation16_spill] sm:$0xff] }
 0xa34   : > { %v7226_v17 = vsel %vm2607_vm3, %v7112_v63, 0  ;;  %8960 = vtanh.f32 %v19882_v36  ;;  %v7036_v54 = vadd.f32 %v16809_v46, %v5628_v25  ;;  %v8259_v57 = vunpack.i.l.bf16 %v19889_v4  ;;  %v19890_v46 = vld [vmem:[#allocation320_spill] sm:$0xff] }
 0xa35   : > { %7367 = vmatpush.bf16.xpose.msrb.mxu2 %v7184_v61  ;;  %7374 = vmatpush.bf16.xpose.msrb.mxu3 %v7226_v17  ;;  %v19885_v61 = vld [vmem:[#allocation313_spill] sm:$0xff]  ;;  %v6426_v37 = vmul.f32 %v8309_v24, %v5786_v44  ;;  %v19898_v36 = vld [vmem:[#allocation304_spill] sm:$0xff] }
 0xa37   : > { %6756 = vrot.lane.b32.xlu2 %v6410_v15, %s9228_s14  ;;  %v6701_v0 = vpop.permute.xlu2 %6700  ;;  %v8955_v45 = vpop.eup %8954 }
 0xa38   : > { %6714 = vrot.lane.b32.xlu1 %v6389_v55, %s9228_s14  ;;  %v7022_v5 = vadd.f32 %v6701_v0, %v5614_v1  ;;  %v8957_v63 = vpop.eup %8956  ;;  %v19884_v55 = vld [vmem:[#allocation55_spill] sm:$0xff]  ;;  %v5596_v17 = vmul.f32 %v8955_v45, %v19885_v61  ;;  %v19897_v45 = vld [vmem:[#allocation238_spill] sm:$0xff] }
 0xa39   : > { %6680 = vrot.lane.b32.xlu0 %v6372_v58, %s9228_s14  ;;  %v7274_v58 = vsel %vm2607_vm3, %v7128_v34, 0  ;;  %8962 = vtanh.f32 %v19884_v55  ;;  %v5597_v30 = vmul.f32 %v8957_v63, %v19886_v3  ;;  %v8959_v12 = vpop.eup %8958  ;;  %v19893_v34 = vld [vmem:[#allocation259_spill] sm:$0xff]  ;;  %v19900_v55 = vld [vmem:[#allocation73_spill] sm:$0xff] }
 0xa3a   : > { %v6731_v39 = vpop.permute.xlu1 %6730  ;;  %v7120_v51 = vpack.c.bf16 %v7023_v29, %v7022_v5  ;;  %8964 = vtanh.f32 %v19887_v35  ;;  %v7004_v1 = vadd.f32 %v16830_v20, %v5596_v17  ;;  %v8961_v0 = vpop.eup %8960  ;;  %v5766_v29 = vsub.f32 1.0, %v19891_v16  ;;  %v19901_v3 = vld [vmem:[#allocation231_spill] sm:$0xff] }
 0xa3b   : > { %v16856_v59 = vpop.permute.xlu0 %6724  ;;  %v7037_v13 = vadd.f32 %v6731_v39, %v5629_v23  ;;  %v5733_v39 = vsub.f32 1.0, %v19890_v46  ;;  %8966 = vtanh.f32 %v19892_v7  ;;  %v5626_v43 = vmul.f32 %v8959_v12, %v19895_v52  ;;  %v19896_v23 = vld [vmem:[#allocation387_spill] sm:$0xff]  ;;  %v19907_v46 = vld [vmem:[#allocation357_spill] sm:$0xff] }
 0xa3c   : > { %v7250_v15 = vsel %vm2607_vm3, %v7120_v51, 0  ;;  %v6406_v21 = vmul.f32 %v8259_v57, %v5766_v29  ;;  %v19894_v51 = vld [vmem:[#allocation136_spill] sm:$0xff]  ;;  %v5627_v18 = vmul.f32 %v8961_v0, %v19896_v23  ;;  %8968 = vtanh.f32 %v19897_v45 }
 0xa3d   : > { %7368 = vmatpush.bf16.xpose.msrb.mxu2 %v7181_v2  ;;  %7387 = vmatpush.bf16.xpose.msra.mxu1 %v7250_v15  ;;  %v7127_v49 = vpack.c.bf16 %v7037_v13, %v7036_v54  ;;  %v6373_v14 = vmul.f32 %v8175_v32, %v5733_v39  ;;  %v19899_v2 = vld [vmem:[#allocation180_spill] sm:$0xff]  ;;  %v8340_v61 = vunpack.i.h.bf16 %v19900_v55  ;;  %8970 = vtanh.f32 %v19903_v31 }
 0xa3e   : > { %v8209_v15 = vunpack.i.l.bf16 %v19899_v2  ;;  %v19905_v57 = vld [vmem:[#allocation52_spill] sm:$0xff] }
 0xa3f   : > { %6822 = vrot.lane.b32.xlu2 %v6443_v8, %s9228_s14  ;;  %v6667_v40 = vpop.permute.xlu2 %6666  ;;  %v8963_v5 = vpop.eup %8962  ;;  %v7271_v8 = vsel %vm2607_vm3, %v7127_v49, 0  ;;  %v19906_v49 = vld [vmem:[#allocation347_spill] sm:$0xff]  ;;  %v19912_v23 = vld [vmem:[#allocation200_spill] sm:$0xff] }
 0xa40   : > { %6816 = vrot.lane.b32.xlu1 %v6440_v6, %s9228_s14  ;;  %v7005_v19 = vadd.f32 %v6667_v40, %v5597_v30  ;;  %v8965_v48 = vpop.eup %8964  ;;  %v5612_v53 = vmul.f32 %v8963_v5, %v19893_v34  ;;  %v5717_v6 = vsub.f32 1.0, %v19898_v36  ;;  %v5746_v30 = vsub.f32 1.0, %v19901_v3  ;;  %v19902_v40 = vld [vmem:[#allocation378_spill] sm:$0xff]  ;;  %v19913_v36 = vld [vmem:[#allocation167_spill] sm:$0xff] }
 0xa41   : > { %6786 = vrot.lane.b32.xlu0 %v6425_v33, %s9228_s14  ;;  %v5613_v11 = vmul.f32 %v8965_v48, %v19894_v51  ;;  %v7034_v33 = vadd.f32 %v16856_v59, %v5626_v43  ;;  %v8967_v54 = vpop.eup %8966  ;;  %v5799_v32 = vsub.f32 1.0, %v19902_v40  ;;  %v8260_v5 = vunpack.i.h.bf16 %v19889_v4  ;;  %v19918_v3 = vld [vmem:[#allocation191_spill] sm:$0xff] }
 0xa42   : > { %v16880_v26 = vpop.permute.xlu1 %6660  ;;  %v7111_v38 = vpack.c.bf16 %v7005_v19, %v7004_v1  ;;  %v6357_v17 = vmul.f32 %v8135_v56, %v5717_v6  ;;  %v6386_v44 = vmul.f32 %v8209_v15, %v5746_v30  ;;  %v8969_v1 = vpop.eup %8968  ;;  %v19904_v19 = vld [vmem:[#allocation18_spill] sm:$0xff]  ;;  %v5594_v0 = vmul.f32 %v8967_v54, %v19906_v49  ;;  %v19914_v6 = vld [vmem:[#allocation187_spill] sm:$0xff] }
 0xa43   : > { %v16885_v42 = vpop.permute.xlu0 %6766  ;;  %v7021_v25 = vadd.f32 %v16834_v47, %v5613_v11  ;;  %8972 = vtanh.f32 %v19904_v19  ;;  %v6439_v12 = vmul.f32 %v8340_v61, %v5799_v32  ;;  %v5595_v39 = vmul.f32 %v8969_v1, %v19907_v46  ;;  %v19919_v30 = vld [vmem:[#allocation186_spill] sm:$0xff]  ;;  %v19921_v1 = vld [vmem:[#allocation100_spill] sm:$0xff] }
 0xa44   : > { %v7223_v20 = vsel %vm2607_vm3, %v7111_v38, 0  ;;  %8974 = vtanh.f32 %v19905_v57  ;;  %v19908_v38 = vld [vmem:[#allocation45_spill] sm:$0xff]  ;;  %v7002_v48 = vadd.f32 %v16880_v26, %v5594_v0  ;;  %v8205_v19 = vunpack.i.h.bf16 %v19921_v1 }
 0xa45   : > { %7400 = vmatpush.bf16.xpose.msra.mxu2 %v7274_v58  ;;  %7375 = vmatpush.bf16.xpose.msrb.mxu3 %v7223_v20  ;;  %8976 = vtanh.f32 %v19908_v38 }
 0xa46   : > { %8978 = vtanh.f32 %v19913_v36 }
 0xa47   : > { %6788 = vrot.lane.b32.xlu2 %v6426_v37, %s9228_s14  ;;  %v6697_v63 = vpop.permute.xlu2 %6696  ;;  %v8264_v37 = vunpack.i.l.bf16 %v19851_v60  ;;  %v19910_v60 = vld [vmem:[#allocation89_spill] sm:$0xff]  ;;  %8980 = vtanh.f32 %v19918_v3 }
 0xa48   : > { %6682 = vrot.lane.b32.xlu1 %v6373_v14, %s9228_s14  ;;  %v7020_v13 = vadd.f32 %v6697_v63, %v5612_v53  ;;  %v19909_v14 = vld [vmem:[#allocation256_spill] sm:$0xff]  ;;  %v8299_v53 = vunpack.i.l.bf16 %v19910_v60  ;;  %v19935_v3 = vld [vmem:[#allocation149_spill] sm:$0xff] }
 0xa49   : > { %6748 = vrot.lane.b32.xlu0 %v6406_v21, %s9228_s14  ;;  %v5768_v20 = vsub.f32 1.0, %v19909_v14  ;;  %v8971_v21 = vpop.eup %8970  ;;  %v19925_v14 = vld [vmem:[#allocation87_spill] sm:$0xff] }
 0xa4a   : > { %v6727_v9 = vpop.permute.xlu1 %6726  ;;  %v7119_v24 = vpack.c.bf16 %v7021_v25, %v7020_v13  ;;  %v8973_v43 = vpop.eup %8972 }
 0xa4b   : > { %v7035_v58 = vadd.f32 %v6727_v9, %v5627_v18  ;;  %v6693_v62 = vpop.permute.xlu0 %6692  ;;  %v6408_v11 = vmul.f32 %v8264_v37, %v5768_v20  ;;  %v5782_v18 = vsub.f32 1.0, %v19912_v23  ;;  %v8975_v56 = vpop.eup %8974  ;;  %v19915_v9 = vld [vmem:[#allocation364_spill] sm:$0xff]  ;;  %v19923_v37 = vld [vmem:[#allocation133_spill] sm:$0xff]  ;;  %v8300_v23 = vunpack.i.h.bf16 %v19910_v60 }
 0xa4c   : > { %v7247_v47 = vsel %vm2607_vm3, %v7119_v24, 0  ;;  %v8977_v26 = vpop.eup %8976  ;;  %v5611_v15 = vmul.f32 %v8975_v56, %v19914_v6  ;;  %v8169_v24 = vunpack.i.l.bf16 %v19919_v30  ;;  %v5745_v38 = vsub.f32 1.0, %v19923_v37  ;;  %v19933_v60 = vld [vmem:[#allocation369_spill] sm:$0xff] }
 0xa4d   : > { %7401 = vmatpush.bf16.xpose.msra.mxu2 %v7271_v8  ;;  %v7126_v35 = vpack.c.bf16 %v7035_v58, %v7034_v33  ;;  %7388 = vmatpush.bf16.xpose.msra.mxu1 %v7247_v47  ;;  %v19911_v8 = vld [vmem:[#allocation316_spill] sm:$0xff]  ;;  %v6422_v63 = vmul.f32 %v8299_v53, %v5782_v18  ;;  %v5610_v25 = vmul.f32 %v8977_v26, %v19915_v9  ;;  %v19916_v33 = vld [vmem:[#allocation246_spill] sm:$0xff]  ;;  %v19930_v18 = vld [vmem:[#allocation265_spill] sm:$0xff] }
 0xa4e   : > { %v5767_v51 = vsub.f32 1.0, %v19911_v8  ;;  %v5647_v13 = vmul.f32 %v8973_v43, %v19916_v33  ;;  %v19917_v58 = vld [vmem:[#allocation272_spill] sm:$0xff]  ;;  %v6385_v20 = vmul.f32 %v8205_v19, %v5745_v38  ;;  %v5784_v56 = vsub.f32 1.0, %v19930_v18  ;;  %v19945_v18 = vld [vmem:[#allocation9_spill] sm:$0xff] }
 0xa4f   : > { %6650 = vrot.lane.b32.xlu2 %v6357_v17, %s9228_s14  ;;  %v7268_v59 = vsel %vm2607_vm3, %v7126_v35, 0  ;;  %v6663_v16 = vpop.permute.xlu2 %6662  ;;  %v5646_v61 = vmul.f32 %v8971_v21, %v19917_v58  ;;  %v8345_v17 = vunpack.i.h.bf16 %v19875_v41  ;;  %v19920_v35 = vld [vmem:[#allocation196_spill] sm:$0xff]  ;;  %v19928_v21 = vld [vmem:[#allocation257_spill] sm:$0xff] }
 0xa50   : > { %6708 = vrot.lane.b32.xlu1 %v6386_v44, %s9228_s14  ;;  %v7003_v7 = vadd.f32 %v6663_v16, %v5595_v39  ;;  %v6407_v45 = vmul.f32 %v8260_v5, %v5767_v51  ;;  %v5801_v54 = vsub.f32 1.0, %v19920_v35  ;;  %v16945_v31 = vadd.f32 %v16885_v42, %v5647_v13  ;;  %v8979_v39 = vpop.eup %8978  ;;  %v19924_v16 = vld [vmem:[#allocation93_spill] sm:$0xff] }
 0xa51   : > { %6814 = vrot.lane.b32.xlu0 %v6439_v12, %s9228_s14  ;;  %v7018_v44 = vadd.f32 %v6693_v62, %v5610_v25  ;;  %v19922_v12 = vld [vmem:[#allocation371_spill] sm:$0xff]  ;;  %8982 = vtanh.f32 %v19924_v16  ;;  %v8981_v5 = vpop.eup %8980  ;;  %v8304_v51 = vunpack.i.l.bf16 %v19877_v28  ;;  %v19931_v28 = vld [vmem:[#allocation122_spill] sm:$0xff]  ;;  %v5796_v13 = vsub.f32 1.0, %v19933_v60 }
 0xa52   : > { %v16921_v29 = vpop.permute.xlu1 %6828  ;;  %v7110_v52 = vpack.c.bf16 %v7003_v7, %v7002_v48  ;;  %v5730_v57 = vsub.f32 1.0, %v19922_v12  ;;  %v6441_v49 = vmul.f32 %v8345_v17, %v5801_v54  ;;  %8984 = vtanh.f32 %v19925_v14  ;;  %v19926_v48 = vld [vmem:[#allocation117_spill] sm:$0xff]  ;;  %v19927_v7 = vld [vmem:[#allocation296_spill] sm:$0xff] }
 0xa53   : > { %v16926_v34 = vpop.permute.xlu0 %6798  ;;  %8986 = vtanh.f32 %v19926_v48  ;;  %v5678_v53 = vmul.f32 %v8979_v39, %v19927_v7  ;;  %v5679_v8 = vmul.f32 %v8981_v5, %v19928_v21  ;;  %v8334_v36 = vunpack.i.l.bf16 %v19931_v28  ;;  %v19934_v17 = vld [vmem:[#allocation221_spill] sm:$0xff]  ;;  %v19941_v39 = vld [vmem:[#allocation290_spill] sm:$0xff] }
 0xa54   : > { %v7220_v4 = vsel %vm2607_vm3, %v7110_v52, 0  ;;  %v6370_v42 = vmul.f32 %v8169_v24, %v5730_v57  ;;  %v6424_v9 = vmul.f32 %v8304_v51, %v5784_v56  ;;  %v19936_v54 = vld [vmem:[#allocation193_spill] sm:$0xff]  ;;  %v8210_v12 = vunpack.i.h.bf16 %v19899_v2 }
 0xa55   : > { %7402 = vmatpush.bf16.xpose.msra.mxu2 %v7268_v59  ;;  %7376 = vmatpush.bf16.xpose.msrb.mxu3 %v7220_v4  ;;  %v6436_v35 = vmul.f32 %v8334_v36, %v5796_v13  ;;  %v19939_v57 = vld [vmem:[#allocation229_spill] sm:$0xff]  ;;  %v8254_v37 = vunpack.i.l.bf16 %v19941_v39  ;;  %v19946_v36 = vld [vmem:[#allocation15_spill] sm:$0xff]  ;;  %v8339_v13 = vunpack.i.l.bf16 %v19900_v55 }
 0xa57   : > { %6752 = vrot.lane.b32.xlu2 %v6408_v11, %s9228_s14  ;;  %v6765_v40 = vpop.permute.xlu2 %6764  ;;  %v19929_v11 = vld [vmem:[#allocation135_spill] sm:$0xff]  ;;  %v8983_v6 = vpop.eup %8982 }
 0xa58   : > { %6750 = vrot.lane.b32.xlu1 %v6407_v45, %s9228_s14  ;;  %v16947_v47 = vadd.f32 %v6765_v40, %v5646_v61  ;;  %8988 = vtanh.f32 %v19929_v11  ;;  %v16968_v45 = vadd.f32 %v16921_v29, %v5678_v53  ;;  %v8985_v33 = vpop.eup %8984  ;;  %v19943_v53 = vld [vmem:[#allocation211_spill] sm:$0xff] }
 0xa59   : > { %6780 = vrot.lane.b32.xlu0 %v6422_v63, %s9228_s14  ;;  %v8987_v58 = vpop.eup %8986  ;;  %8990 = vtanh.f32 %v19934_v17  ;;  %v5764_v21 = vsub.f32 1.0, %v19943_v53  ;;  %v8335_v17 = vunpack.i.h.bf16 %v19931_v28  ;;  %v19957_v53 = vld [vmem:[#allocation224_spill] sm:$0xff] }
 0xa5a   : > { %v6695_v32 = vpop.permute.xlu1 %6694  ;;  %v7136_v0 = vpack.c.bf16 %v16945_v31, %v16947_v47  ;;  %v5624_v24 = vmul.f32 %v8987_v58, %v19935_v3  ;;  %8992 = vtanh.f32 %v19939_v57  ;;  %v19950_v58 = vld [vmem:[#allocation44_spill] sm:$0xff]  ;;  %v19951_v3 = vld [vmem:[#allocation102_spill] sm:$0xff] }
 0xa5b   : > { %v7019_v59 = vadd.f32 %v6695_v32, %v5611_v15  ;;  %v6721_v41 = vpop.permute.xlu0 %6720  ;;  %v19932_v15 = vld [vmem:[#allocation270_spill] sm:$0xff]  ;;  %8994 = vtanh.f32 %v19945_v18  ;;  %v8170_v18 = vunpack.i.h.bf16 %v19919_v30 }
 0xa5c   : > { %v5783_v63 = vsub.f32 1.0, %v19932_v15  ;;  %v19937_v32 = vld [vmem:[#allocation282_spill] sm:$0xff]  ;;  %8996 = vtanh.f32 %v19946_v36  ;;  %v19947_v15 = vld [vmem:[#allocation39_spill] sm:$0xff]  ;;  %v19962_v36 = vld [vmem:[#allocation104_spill] sm:$0xff] }
 0xa5d   : > { %v7118_v46 = vpack.c.bf16 %v7019_v59, %v7018_v44  ;;  %v5662_v44 = vmul.f32 %v8983_v6, %v19937_v32  ;;  %v19938_v59 = vld [vmem:[#allocation289_spill] sm:$0xff]  ;;  %8998 = vtanh.f32 %v19947_v15  ;;  %v19952_v32 = vld [vmem:[#allocation287_spill] sm:$0xff] }
 0xa5e   : > { %v6423_v61 = vmul.f32 %v8300_v23, %v5783_v63  ;;  %v8989_v29 = vpop.eup %8988  ;;  %v5663_v19 = vmul.f32 %v8985_v33, %v19938_v59  ;;  %v19948_v63 = vld [vmem:[#allocation339_spill] sm:$0xff]  ;;  %9000 = vtanh.f32 %v19950_v58  ;;  %v19953_v59 = vld [vmem:[#allocation237_spill] sm:$0xff]  ;;  %v19963_v58 = vld [vmem:[#allocation130_spill] sm:$0xff] }
 0xa5f   : > { %6818 = vrot.lane.b32.xlu2 %v6441_v49, %s9228_s14  ;;  %v7244_v62 = vsel %vm2607_vm3, %v7118_v46, 0  ;;  %v6831_v52 = vpop.permute.xlu2 %6830  ;;  %v5625_v40 = vmul.f32 %v8989_v29, %v19936_v54  ;;  %v19940_v49 = vld [vmem:[#allocation311_spill] sm:$0xff]  ;;  %v8991_v11 = vpop.eup %8990 }
 0xa60   : > { %7389 = vmatpush.bf16.xpose.msra.mxu1 %v7244_v62  ;;  %6676 = vrot.lane.b32.xlu1 %v6370_v42, %s9228_s14  ;;  %v16970_v4 = vadd.f32 %v6831_v52, %v5679_v8  ;;  %v5747_v46 = vsub.f32 1.0, %v19940_v49  ;;  %v16992_v42 = vadd.f32 %v16926_v34, %v5663_v19  ;;  %v7032_v62 = vadd.f32 %v6721_v41, %v5624_v24  ;;  %v19944_v52 = vld [vmem:[#allocation291_spill] sm:$0xff]  ;;  %v8993_v56 = vpop.eup %8992 }
 0xa61   : > { %6706 = vrot.lane.b32.xlu0 %v6385_v20, %s9228_s14  ;;  %v19942_v20 = vld [vmem:[#allocation298_spill] sm:$0xff]  ;;  %v5729_v23 = vsub.f32 1.0, %v19944_v52  ;;  %v6404_v34 = vmul.f32 %v8254_v37, %v5764_v21  ;;  %v19949_v33 = vld [vmem:[#allocation315_spill] sm:$0xff]  ;;  %v5798_v24 = vsub.f32 1.0, %v19951_v3  ;;  %v8995_v55 = vpop.eup %8994  ;;  %v5797_v19 = vsub.f32 1.0, %v19953_v59  ;;  %v19964_v3 = vld [vmem:[#allocation329_spill] sm:$0xff] }
 0xa62   : > { %v6657_v43 = vpop.permute.xlu1 %6656  ;;  %v7152_v25 = vpack.c.bf16 %v16970_v4, %v16968_v45  ;;  %v8165_v48 = vunpack.i.h.bf16 %v19942_v20  ;;  %v6387_v7 = vmul.f32 %v8210_v12, %v5747_v46  ;;  %v5592_v60 = vmul.f32 %v8991_v11, %v19949_v33  ;;  %v8997_v49 = vpop.eup %8996  ;;  %v19954_v46 = vld [vmem:[#allocation358_spill] sm:$0xff]  ;;  %v19959_v52 = vld [vmem:[#allocation247_spill] sm:$0xff] }
 0xa63   : > { %v16972_v26 = vpop.permute.xlu0 %6762  ;;  %v6438_v12 = vmul.f32 %v8339_v13, %v5798_v24  ;;  %v5762_v37 = vsub.f32 1.0, %v19954_v46  ;;  %v5780_v24 = vsub.f32 1.0, %v19964_v3  ;;  %v19968_v46 = vld [vmem:[#allocation129_spill] sm:$0xff] }
 0xa64   : > { %v6369_v6 = vmul.f32 %v8165_v48, %v5729_v23  ;;  %v5645_v23 = vmul.f32 %v8997_v49, %v19959_v52 }
 0xa67   : > { %6784 = vrot.lane.b32.xlu2 %v6424_v9, %s9228_s14  ;;  %v6797_v38 = vpop.permute.xlu2 %6796  ;;  %v5593_v9 = vmul.f32 %v8993_v56, %v19948_v63 }
 0xa68   : > { %6782 = vrot.lane.b32.xlu1 %v6423_v61, %s9228_s14  ;;  %v16994_v5 = vadd.f32 %v6797_v38, %v5662_v44  ;;  %v8249_v44 = vunpack.i.l.bf16 %v19952_v32  ;;  %v8999_v38 = vpop.eup %8998 }
 0xa69   : > { %6808 = vrot.lane.b32.xlu0 %v6436_v35, %s9228_s14  ;;  %v7000_v35 = vadd.f32 %v6657_v43, %v5592_v60  ;;  %v9001_v43 = vpop.eup %9000 }
 0xa6a   : > { %v6723_v16 = vpop.permute.xlu1 %6722  ;;  %v7144_v8 = vpack.c.bf16 %v16992_v42, %v16994_v5  ;;  %v5609_v21 = vmul.f32 %v9001_v43, %v19957_v53  ;;  %v8204_v43 = vunpack.i.l.bf16 %v19921_v1  ;;  %v19973_v1 = vld [vmem:[#allocation194_spill] sm:$0xff] }
 0xa6b   : > { %v7033_v14 = vadd.f32 %v6723_v16, %v5625_v40  ;;  %v6689_v2 = vpop.permute.xlu0 %6688  ;;  %v6437_v16 = vmul.f32 %v8335_v17, %v5797_v19  ;;  %v19966_v19 = vld [vmem:[#allocation70_spill] sm:$0xff] }
 0xa6d   : > { %v7125_v51 = vpack.c.bf16 %v7033_v14, %v7032_v62  ;;  %v19955_v62 = vld [vmem:[#allocation171_spill] sm:$0xff]  ;;  %v19956_v14 = vld [vmem:[#allocation360_spill] sm:$0xff] }
 0xa6e   : > { %9002 = vtanh.f32 %v19955_v62  ;;  %v5608_v48 = vmul.f32 %v8999_v38, %v19956_v14  ;;  %v19971_v62 = vld [vmem:[#allocation114_spill] sm:$0xff] }
 0xa6f   : > { %6710 = vrot.lane.b32.xlu2 %v6387_v7, %s9228_s14  ;;  %v7265_v41 = vsel %vm2607_vm3, %v7125_v51, 0  ;;  %v6659_v61 = vpop.permute.xlu2 %6658  ;;  %v6402_v7 = vmul.f32 %v8249_v44, %v5762_v37  ;;  %v19958_v51 = vld [vmem:[#allocation332_spill] sm:$0xff]  ;;  %v19969_v37 = vld [vmem:[#allocation183_spill] sm:$0xff] }
 0xa70   : > { %7403 = vmatpush.bf16.xpose.msra.mxu2 %v7265_v41  ;;  %6744 = vrot.lane.b32.xlu1 %v6404_v34, %s9228_s14  ;;  %v7001_v54 = vadd.f32 %v6659_v61, %v5593_v9  ;;  %v5644_v11 = vmul.f32 %v8995_v55, %v19958_v51  ;;  %v19960_v34 = vld [vmem:[#allocation195_spill] sm:$0xff]  ;;  %v19961_v41 = vld [vmem:[#allocation178_spill] sm:$0xff]  ;;  %v17035_v9 = vadd.f32 %v16972_v26, %v5645_v23  ;;  %v8330_v61 = vunpack.i.h.bf16 %v19963_v58  ;;  %v19965_v55 = vld [vmem:[#allocation161_spill] sm:$0xff] }
 0xa71   : > { %6674 = vrot.lane.b32.xlu0 %v6369_v6, %s9228_s14  ;;  %9004 = vtanh.f32 %v19960_v34  ;;  %v5731_v56 = vsub.f32 1.0, %v19961_v41  ;;  %v8294_v6 = vunpack.i.l.bf16 %v19962_v36  ;;  %v7016_v33 = vadd.f32 %v6689_v2, %v5608_v48  ;;  %v19974_v41 = vld [vmem:[#allocation179_spill] sm:$0xff] }
 0xa72   : > { %v17012_v29 = vpop.permute.xlu1 %6824  ;;  %v7109_v57 = vpack.c.bf16 %v7001_v54, %v7000_v35  ;;  %v5795_v59 = vsub.f32 1.0, %v19965_v55  ;;  %9006 = vtanh.f32 %v19966_v19  ;;  %v8244_v23 = vunpack.i.l.bf16 %v19973_v1  ;;  %v19979_v55 = vld [vmem:[#allocation252_spill] sm:$0xff]  ;;  %v19980_v19 = vld [vmem:[#allocation255_spill] sm:$0xff] }
 0xa73   : > { %v17016_v40 = vpop.permute.xlu0 %6794  ;;  %v6371_v17 = vmul.f32 %v8170_v18, %v5731_v56  ;;  %v6420_v26 = vmul.f32 %v8294_v6, %v5780_v24  ;;  %v5763_v56 = vsub.f32 1.0, %v19974_v41 }
 0xa74   : > { %v7217_v28 = vsel %vm2607_vm3, %v7109_v57, 0  ;;  %v9003_v44 = vpop.eup %9002  ;;  %v19967_v57 = vld [vmem:[#allocation81_spill] sm:$0xff]  ;;  %v6435_v49 = vmul.f32 %v8330_v61, %v5795_v59  ;;  %v19976_v61 = vld [vmem:[#allocation212_spill] sm:$0xff] }
 0xa75   : > { %7377 = vmatpush.bf16.xpose.msrb.mxu3 %v7217_v28  ;;  %9008 = vtanh.f32 %v19967_v57  ;;  %v19982_v57 = vld [vmem:[#allocation253_spill] sm:$0xff] }
 0xa76   : > { %9010 = vtanh.f32 %v19968_v46  ;;  %v19983_v46 = vld [vmem:[#allocation213_spill] sm:$0xff] }
 0xa77   : > { %6812 = vrot.lane.b32.xlu2 %v6438_v12, %s9228_s14  ;;  %v6761_v15 = vpop.permute.xlu2 %6760  ;;  %v9005_v12 = vpop.eup %9004  ;;  %9012 = vtanh.f32 %v19971_v62 }
 0xa78   : > { %6810 = vrot.lane.b32.xlu1 %v6437_v16, %s9228_s14  ;;  %v17037_v60 = vadd.f32 %v6761_v15, %v5644_v11  ;;  %v5677_v38 = vmul.f32 %v9005_v12, %v19969_v37  ;;  %v19970_v16 = vld [vmem:[#allocation166_spill] sm:$0xff]  ;;  %v9007_v18 = vpop.eup %9006  ;;  %9014 = vtanh.f32 %v19976_v61  ;;  %v19981_v12 = vld [vmem:[#allocation201_spill] sm:$0xff]  ;;  %v8289_v37 = vunpack.i.l.bf16 %v19983_v46  ;;  %v19989_v61 = vld [vmem:[#allocation188_spill] sm:$0xff] }
 0xa79   : > { %6740 = vrot.lane.b32.xlu0 %v6402_v7, %s9228_s14  ;;  %v5676_v28 = vmul.f32 %v9003_v44, %v19970_v16  ;;  %v19972_v7 = vld [vmem:[#allocation205_spill] sm:$0xff]  ;;  %v5660_v59 = vmul.f32 %v9007_v18, %v19979_v55  ;;  %9016 = vtanh.f32 %v19981_v12  ;;  %v8245_v12 = vunpack.i.h.bf16 %v19973_v1 }
 0xa7a   : > { %v6691_v63 = vpop.permute.xlu1 %6690  ;;  %v7135_v35 = vpack.c.bf16 %v17035_v9, %v17037_v60  ;;  %v5744_v53 = vsub.f32 1.0, %v19972_v7  ;;  %v19984_v7 = vld [vmem:[#allocation162_spill] sm:$0xff]  ;;  %v19992_v55 = vld [vmem:[#allocation197_spill] sm:$0xff] }
 0xa7b   : > { %v7017_v13 = vadd.f32 %v6691_v63, %v5609_v21  ;;  %v6717_v30 = vpop.permute.xlu0 %6716  ;;  %v8250_v21 = vunpack.i.h.bf16 %v19952_v32  ;;  %v17058_v51 = vadd.f32 %v17012_v29, %v5676_v28  ;;  %v9009_v15 = vpop.eup %9008  ;;  %v19975_v63 = vld [vmem:[#allocation345_spill] sm:$0xff] }
 0xa7c   : > { %v6384_v34 = vmul.f32 %v8204_v43, %v5744_v53  ;;  %v9011_v32 = vpop.eup %9010  ;;  %v8325_v53 = vunpack.i.h.bf16 %v19984_v7 }
 0xa7d   : > { %v7117_v54 = vpack.c.bf16 %v7017_v13, %v7016_v33  ;;  %v5760_v33 = vsub.f32 1.0, %v19975_v63  ;;  %v6403_v13 = vmul.f32 %v8250_v21, %v5763_v56  ;;  %v9013_v29 = vpop.eup %9012 }
 0xa7e   : > { %v9015_v56 = vpop.eup %9014 }
 0xa7f   : > { %6678 = vrot.lane.b32.xlu2 %v6371_v17, %s9228_s14  ;;  %v7241_v2 = vsel %vm2607_vm3, %v7117_v54, 0  ;;  %v6827_v14 = vpop.permute.xlu2 %6826  ;;  %v19977_v17 = vld [vmem:[#allocation77_spill] sm:$0xff]  ;;  %v6400_v24 = vmul.f32 %v8244_v23, %v5760_v33  ;;  %v19978_v54 = vld [vmem:[#allocation266_spill] sm:$0xff]  ;;  %v19985_v23 = vld [vmem:[#allocation208_spill] sm:$0xff] }
 0xa80   : > { %7390 = vmatpush.bf16.xpose.msra.mxu1 %v7241_v2  ;;  %6776 = vrot.lane.b32.xlu1 %v6420_v26, %s9228_s14  ;;  %v17060_v11 = vadd.f32 %v6827_v14, %v5677_v38  ;;  %v5623_v3 = vmul.f32 %v9011_v32, %v19977_v17  ;;  %v5622_v44 = vmul.f32 %v9013_v29, %v19978_v54  ;;  %v8255_v2 = vunpack.i.h.bf16 %v19941_v39  ;;  %v19987_v33 = vld [vmem:[#allocation31_spill] sm:$0xff]  ;;  %v9017_v32 = vpop.eup %9016  ;;  %v19990_v17 = vld [vmem:[#allocation264_spill] sm:$0xff] }
 0xa81   : > { %6806 = vrot.lane.b32.xlu0 %v6435_v49, %s9228_s14  ;;  %v5661_v26 = vmul.f32 %v9009_v15, %v19980_v19  ;;  %v5765_v49 = vsub.f32 1.0, %v19982_v57  ;;  %v5778_v18 = vsub.f32 1.0, %v19985_v23  ;;  %v19986_v15 = vld [vmem:[#allocation218_spill] sm:$0xff]  ;;  %9018 = vtanh.f32 %v19987_v33 }
 0xa82   : > { %v6653_v48 = vpop.permute.xlu1 %6652  ;;  %v7151_v6 = vpack.c.bf16 %v17060_v11, %v17058_v51  ;;  %v7030_v43 = vadd.f32 %v6717_v30, %v5622_v44  ;;  %v5793_v63 = vsub.f32 1.0, %v19986_v15  ;;  %v8164_v44 = vunpack.i.l.bf16 %v19942_v20  ;;  %v19994_v20 = vld [vmem:[#allocation271_spill] sm:$0xff]  ;;  %v19998_v15 = vld [vmem:[#allocation341_spill] sm:$0xff]  ;;  %v19999_v33 = vld [vmem:[#allocation222_spill] sm:$0xff] }
 0xa83   : > { %v17062_v52 = vpop.permute.xlu0 %6758  ;;  %v17082_v28 = vadd.f32 %v17016_v40, %v5661_v26  ;;  %v6405_v21 = vmul.f32 %v8255_v2, %v5765_v49  ;;  %v6418_v40 = vmul.f32 %v8289_v37, %v5778_v18  ;;  %v19993_v26 = vld [vmem:[#allocation286_spill] sm:$0xff]  ;;  %v19996_v18 = vld [vmem:[#allocation176_spill] sm:$0xff] }
 0xa84   : > { %v6433_v29 = vmul.f32 %v8325_v53, %v5793_v63  ;;  %v5728_v2 = vsub.f32 1.0, %v19993_v26 }
 0xa87   : > { %6704 = vrot.lane.b32.xlu2 %v6384_v34, %s9228_s14  ;;  %v6793_v38 = vpop.permute.xlu2 %6792 }
 0xa88   : > { %6742 = vrot.lane.b32.xlu1 %v6403_v13, %s9228_s14  ;;  %v17084_v62 = vadd.f32 %v6793_v38, %v5660_v59  ;;  %v19988_v13 = vld [vmem:[#allocation35_spill] sm:$0xff]  ;;  %v9019_v38 = vpop.eup %9018 }
 0xa89   : > { %6736 = vrot.lane.b32.xlu0 %v6400_v24, %s9228_s14  ;;  %9020 = vtanh.f32 %v19988_v13  ;;  %v19991_v24 = vld [vmem:[#allocation376_spill] sm:$0xff]  ;;  %v8295_v13 = vunpack.i.h.bf16 %v19962_v36 }
 0xa8a   : > { %v6719_v16 = vpop.permute.xlu1 %6718  ;;  %v7143_v34 = vpack.c.bf16 %v17082_v28, %v17084_v62  ;;  %9022 = vtanh.f32 %v19989_v61  ;;  %v5591_v54 = vmul.f32 %v9017_v32, %v19991_v24  ;;  %v20002_v61 = vld [vmem:[#allocation333_spill] sm:$0xff] }
 0xa8b   : > { %v7031_v14 = vadd.f32 %v6719_v16, %v5623_v3  ;;  %v6685_v39 = vpop.permute.xlu0 %6684  ;;  %v5590_v3 = vmul.f32 %v9015_v56, %v19990_v17  ;;  %9024 = vtanh.f32 %v19992_v55  ;;  %v6368_v16 = vmul.f32 %v8164_v44, %v5728_v2  ;;  %v19997_v56 = vld [vmem:[#allocation164_spill] sm:$0xff] }
 0xa8c   : > { %v20004_v55 = vld [vmem:[#allocation284_spill] sm:$0xff] }
 0xa8d   : > { %v7124_v41 = vpack.c.bf16 %v7031_v14, %v7030_v43  ;;  %v6998_v57 = vadd.f32 %v6653_v48, %v5590_v3  ;;  %v5761_v43 = vsub.f32 1.0, %v19994_v20  ;;  %v20003_v3 = vld [vmem:[#allocation370_spill] sm:$0xff] }
 0xa8e   : > { %v5781_v24 = vsub.f32 1.0, %v20003_v3 }
 0xa8f   : > { %6746 = vrot.lane.b32.xlu2 %v6405_v21, %s9228_s14  ;;  %v7262_v30 = vsel %vm2607_vm3, %v7124_v41, 0  ;;  %v6655_v59 = vpop.permute.xlu2 %6654  ;;  %v9021_v53 = vpop.eup %9020  ;;  %v19995_v21 = vld [vmem:[#allocation175_spill] sm:$0xff]  ;;  %v6401_v41 = vmul.f32 %v8245_v12, %v5761_v43 }
 0xa90   : > { %7404 = vmatpush.bf16.xpose.msra.mxu2 %v7262_v30  ;;  %6772 = vrot.lane.b32.xlu1 %v6418_v40, %s9228_s14  ;;  %v6999_v49 = vadd.f32 %v6655_v59, %v5591_v54  ;;  %9026 = vtanh.f32 %v19995_v21  ;;  %v9023_v23 = vpop.eup %9022  ;;  %v5606_v40 = vmul.f32 %v9019_v38, %v19999_v33  ;;  %v20000_v30 = vld [vmem:[#allocation204_spill] sm:$0xff]  ;;  %v8284_v59 = vunpack.i.l.bf16 %v20004_v55 }
 0xa91   : > { %6802 = vrot.lane.b32.xlu0 %v6433_v29, %s9228_s14  ;;  %9028 = vtanh.f32 %v19996_v18  ;;  %v9025_v48 = vpop.eup %9024  ;;  %v5586_v63 = vmul.f32 %v9023_v23, %v19998_v15  ;;  %v5607_v32 = vmul.f32 %v9021_v53, %v20000_v30  ;;  %v20001_v29 = vld [vmem:[#allocation151_spill] sm:$0xff]  ;;  %v6421_v43 = vmul.f32 %v8295_v13, %v5781_v24  ;;  %v20007_v23 = vld [vmem:[#allocation69_spill] sm:$0xff]  ;;  %v20010_v15 = vld [vmem:[#allocation146_spill] sm:$0xff] }
 0xa92   : > { %v17102_v19 = vpop.permute.xlu1 %6820  ;;  %v7108_v14 = vpack.c.bf16 %v6999_v49, %v6998_v57  ;;  %9030 = vtanh.f32 %v19997_v56  ;;  %v5587_v17 = vmul.f32 %v9025_v48, %v20002_v61  ;;  %v7014_v2 = vadd.f32 %v6685_v39, %v5606_v40  ;;  %v20005_v49 = vld [vmem:[#allocation64_spill] sm:$0xff]  ;;  %v20008_v18 = vld [vmem:[#allocation359_spill] sm:$0xff]  ;;  %v20012_v40 = vld [vmem:[#allocation85_spill] sm:$0xff] }
 0xa93   : > { %v17106_v37 = vpop.permute.xlu0 %6790  ;;  %9032 = vtanh.f32 %v20001_v29  ;;  %v17126_v26 = vadd.f32 %v16805_v10, %v5586_v63  ;;  %v20009_v56 = vld [vmem:[#allocation108_spill] sm:$0xff]  ;;  %v20011_v63 = vld [vmem:[#allocation278_spill] sm:$0xff]  ;;  %v20013_v61 = vld [vmem:[#allocation101_spill] sm:$0xff] }
 0xa94   : > { %v7214_v1 = vsel %vm2607_vm3, %v7108_v14, 0  ;;  %9034 = vtanh.f32 %v20005_v49  ;;  %v17131_v14 = vadd.f32 %v16731_v50, %v5587_v17  ;;  %v20014_v24 = vld [vmem:[#allocation372_spill] sm:$0xff] }
 0xa95   : > { %7378 = vmatpush.bf16.xpose.msrb.mxu3 %v7214_v1  ;;  %9036 = vtanh.f32 %v20007_v23  ;;  %v8290_v23 = vunpack.i.h.bf16 %v19983_v46 }
 0xa96   : > { %v9027_v36 = vpop.eup %9026  ;;  %v7106_v1 = vpack.c.bf16 %v17131_v14, %v17126_v26  ;;  %9038 = vtanh.f32 %v20009_v56 }
 0xa97   : > { %6672 = vrot.lane.b32.xlu2 %v6368_v16, %s9228_s14  ;;  %v17122_v54 = vpop.permute.xlu2 %6756  ;;  %v9029_v38 = vpop.eup %9028  ;;  %v20006_v16 = vld [vmem:[#allocation314_spill] sm:$0xff]  ;;  %v5674_v33 = vmul.f32 %v9027_v36, %v20011_v63  ;;  %9040 = vtanh.f32 %v20013_v61 }
 0xa98   : > { %6738 = vrot.lane.b32.xlu1 %v6401_v41, %s9228_s14  ;;  %v5776_v20 = vsub.f32 1.0, %v20006_v16  ;;  %v9031_v21 = vpop.eup %9030  ;;  %v5584_v50 = vmul.f32 %v9029_v38, %v20010_v15  ;;  %v20021_v15 = vld [vmem:[#allocation363_spill] sm:$0xff] }
 0xa99   : > { %v5585_v10 = vmul.f32 %v9031_v21, %v20008_v18  ;;  %v9033_v48 = vpop.eup %9032  ;;  %v20018_v18 = vld [vmem:[#allocation206_spill] sm:$0xff] }
 0xa9a   : > { %v6687_v44 = vpop.permute.xlu1 %6686  ;;  %v6416_v41 = vmul.f32 %v8284_v59, %v5776_v20  ;;  %v5675_v30 = vmul.f32 %v9033_v48, %v20012_v40  ;;  %v9035_v29 = vpop.eup %9034  ;;  %v17151_v59 = vadd.f32 %v16706_v27, %v5584_v50  ;;  %v20015_v20 = vld [vmem:[#allocation182_spill] sm:$0xff]  ;;  %v5779_v50 = vsub.f32 1.0, %v20021_v15 }
 0xa9b   : > { %v7015_v12 = vadd.f32 %v6687_v44, %v5607_v32  ;;  %v6713_v57 = vpop.permute.xlu0 %6712  ;;  %v8329_v32 = vunpack.i.l.bf16 %v19963_v58  ;;  %v17145_v13 = vadd.f32 %v16748_v22, %v5585_v10  ;;  %v5794_v44 = vsub.f32 1.0, %v20014_v24  ;;  %v9037_v22 = vpop.eup %9036  ;;  %v20019_v10 = vld [vmem:[#allocation303_spill] sm:$0xff] }
 0xa9c   : > { %v9039_v16 = vpop.eup %9038  ;;  %9042 = vtanh.f32 %v20015_v20  ;;  %v6419_v61 = vmul.f32 %v8290_v23, %v5779_v50  ;;  %v8324_v20 = vunpack.i.l.bf16 %v19984_v7  ;;  %v20027_v50 = vld [vmem:[#allocation137_spill] sm:$0xff] }
 0xa9d   : > { %v7116_v53 = vpack.c.bf16 %v7015_v12, %v7014_v2  ;;  %v17154_v2 = vadd.f32 %v17102_v19, %v5674_v33  ;;  %v6434_v36 = vmul.f32 %v8329_v32, %v5794_v44  ;;  %v7105_v38 = vpack.c.bf16 %v17145_v13, %v17151_v59  ;;  %v9041_v27 = vpop.eup %9040  ;;  %v20016_v19 = vld [vmem:[#allocation83_spill] sm:$0xff] }
 0xa9e   : > { %9044 = vtanh.f32 %v20018_v18 }
 0xa9f   : > { %6778 = vrot.lane.b32.xlu2 %v6421_v43, %s9228_s14  ;;  %v7238_v39 = vsel %vm2607_vm3, %v7116_v53, 0  ;;  %v6823_v17 = vpop.permute.xlu2 %6822  ;;  %v5659_v43 = vmul.f32 %v9037_v22, %v20016_v19  ;;  %v20017_v53 = vld [vmem:[#allocation107_spill] sm:$0xff] }
 0xaa0   : > { %7391 = vmatpush.bf16.xpose.msra.mxu1 %v7238_v39  ;;  %6768 = vrot.lane.b32.xlu1 %v6416_v41, %s9228_s14  ;;  %v17156_v12 = vadd.f32 %v6823_v17, %v5675_v30  ;;  %v5658_v21 = vmul.f32 %v9035_v29, %v20017_v53  ;;  %v5620_v41 = vmul.f32 %v9039_v16, %v20019_v10  ;;  %v20020_v39 = vld [vmem:[#allocation261_spill] sm:$0xff]  ;;  %v20023_v16 = vld [vmem:[#allocation236_spill] sm:$0xff]  ;;  %v20026_v53 = vld [vmem:[#allocation310_spill] sm:$0xff] }
 0xaa1   : > { %v5621_v48 = vmul.f32 %v9041_v27, %v20020_v39  ;;  %v17174_v63 = vadd.f32 %v17106_v37, %v5659_v43  ;;  %v20025_v43 = vld [vmem:[#allocation28_spill] sm:$0xff] }
 0xaa2   : > { %v6649_v3 = vpop.permute.xlu1 %6648  ;;  %v7150_v49 = vpack.c.bf16 %v17156_v12, %v17154_v2  ;;  %v7028_v32 = vadd.f32 %v6713_v57, %v5620_v41  ;;  %v9043_v24 = vpop.eup %9042  ;;  %v20024_v57 = vld [vmem:[#allocation22_spill] sm:$0xff]  ;;  %v20083_v2 = vld [vmem:[#allocation120_spill] sm:$0xff]  ;;  %v7319_v12 = vsel %vm2607_vm3, %v7143_v34, 0 }
 0xaa3   : > { %v17158_v58 = vpop.permute.xlu0 %6754  ;;  %9046 = vtanh.f32 %v20024_v57 }
 0xaa4   : > { %v9045_v44 = vpop.eup %9044  ;;  %9048 = vtanh.f32 %v20025_v43 }
 0xaa5   : > { %v5589_v27 = vmul.f32 %v9045_v44, %v20023_v16  ;;  %9050 = vtanh.f32 %v20027_v50  ;;  %v20031_v44 = vld [vmem:[#allocation367_spill] sm:$0xff] }
 0xaa7   : > { %6804 = vrot.lane.b32.xlu2 %v6434_v36, %s9228_s14  ;;  %v6789_v56 = vpop.permute.xlu2 %6788  ;;  %v20022_v36 = vld [vmem:[#allocation219_spill] sm:$0xff] }
 0xaa8   : > { %v17176_v33 = vadd.f32 %v6789_v56, %v5658_v21  ;;  %v5588_v37 = vmul.f32 %v9043_v24, %v20022_v36  ;;  %v5792_v21 = vsub.f32 1.0, %v20026_v53 }
 0xaa9   : > { %v9047_v15 = vpop.eup %9046 }
 0xaaa   : > { %v6715_v40 = vpop.permute.xlu1 %6714  ;;  %v7142_v46 = vpack.c.bf16 %v17174_v63, %v17176_v33  ;;  %v6996_v23 = vadd.f32 %v6649_v3, %v5588_v37  ;;  %v6432_v39 = vmul.f32 %v8324_v20, %v5792_v21  ;;  %v9049_v7 = vpop.eup %9048  ;;  %v20032_v21 = vld [vmem:[#allocation57_spill] sm:$0xff]  ;;  %v20093_v63 = vld [vmem:[#allocation276_spill] sm:$0xff] }
 0xaab   : > { %v6681_v30 = vpop.permute.xlu0 %6680  ;;  %v7029_v29 = vadd.f32 %v6715_v40, %v5621_v48  ;;  %v8285_v40 = vunpack.i.h.bf16 %v20004_v55  ;;  %v7208_v55 = vsel %vm2607_vm3, %v7106_v1, 0 }
 0xaad   : > { %v7123_v17 = vpack.c.bf16 %v7029_v29, %v7028_v32  ;;  %v20028_v32 = vld [vmem:[#allocation153_spill] sm:$0xff]  ;;  %v20029_v29 = vld [vmem:[#allocation318_spill] sm:$0xff] }
 0xaae   : > { %9052 = vtanh.f32 %v20028_v32  ;;  %v5605_v3 = vmul.f32 %v9049_v7, %v20029_v29  ;;  %v7205_v32 = vsel %vm2607_vm3, %v7105_v38, 0 }
 0xaaf   : > { %6774 = vrot.lane.b32.xlu2 %v6419_v61, %s9228_s14  ;;  %v7259_v22 = vsel %vm2607_vm3, %v7123_v17, 0  ;;  %v6651_v19 = vpop.permute.xlu2 %6650  ;;  %v20030_v61 = vld [vmem:[#allocation326_spill] sm:$0xff]  ;;  %9054 = vtanh.f32 %v20032_v21 }
 0xab0   : > { %7405 = vmatpush.bf16.xpose.msra.mxu2 %v7259_v22  ;;  %v6997_v18 = vadd.f32 %v6651_v19, %v5589_v27  ;;  %v5604_v17 = vmul.f32 %v9047_v15, %v20030_v61  ;;  %v5777_v22 = vsub.f32 1.0, %v20031_v44  ;;  %v9051_v19 = vpop.eup %9050  ;;  %v20038_v61 = vld [vmem:[#allocation84_spill] sm:$0xff]  ;;  %v20044_v21 = vld [vmem:[#allocation330_spill] sm:$0xff] }
 0xab2   : > { %v6817_v10 = vpop.permute.xlu1 %6816  ;;  %v7107_v48 = vpack.c.bf16 %v6997_v18, %v6996_v23  ;;  %v7012_v37 = vadd.f32 %v6681_v30, %v5604_v17  ;;  %v6417_v20 = vmul.f32 %v8285_v40, %v5777_v22  ;;  %v20033_v30 = vld [vmem:[#allocation294_spill] sm:$0xff]  ;;  %v20034_v18 = vld [vmem:[#allocation281_spill] sm:$0xff]  ;;  %v20036_v40 = vld [vmem:[#allocation68_spill] sm:$0xff] }
 0xab3   : > { %v6787_v41 = vpop.permute.xlu0 %6786  ;;  %v5672_v23 = vmul.f32 %v9051_v19, %v20033_v30  ;;  %v20039_v17 = vld [vmem:[#allocation279_spill] sm:$0xff]  ;;  %v20040_v22 = vld [vmem:[#allocation216_spill] sm:$0xff] }
 0xab4   : > { %v7211_v56 = vsel %vm2607_vm3, %v7107_v48, 0  ;;  %v9053_v43 = vpop.eup %9052  ;;  %v20035_v48 = vld [vmem:[#allocation62_spill] sm:$0xff] }
 0xab5   : > { %7379 = vmatpush.bf16.xpose.msrb.mxu3 %v7211_v56  ;;  %9056 = vtanh.f32 %v20035_v48  ;;  %v17210_v15 = vadd.f32 %v6817_v10, %v5672_v23  ;;  %v9055_v50 = vpop.eup %9054  ;;  %v7298_v10 = vsel %vm2607_vm3, %v7136_v0, 0  ;;  %v7295_v23 = vsel %vm2607_vm3, %v7135_v35, 0  ;;  %v20046_v48 = vld [vmem:[#allocation374_spill] sm:$0xff]  ;;  %v20049_v35 = vld [vmem:[#allocation53_spill] sm:$0xff] }
 0xab6   : > { %9058 = vtanh.f32 %v20036_v40  ;;  %v5656_v44 = vmul.f32 %v9055_v50, %v20039_v17  ;;  %v20047_v50 = vld [vmem:[#allocation260_spill] sm:$0xff] }
 0xab7   : > { %6800 = vrot.lane.b32.xlu2 %v6432_v39, %s9228_s14  ;;  %v17195_v24 = vpop.permute.xlu2 %6752  ;;  %v5673_v39 = vmul.f32 %v9053_v43, %v20034_v18  ;;  %v20043_v43 = vld [vmem:[#allocation61_spill] sm:$0xff] }
 0xab8   : > { %v17249_v18 = vld [vmem:[%s17464_s0] sm:$0xf] }
 0xab9   : > { %7912 = vmatmul.msk.bf16.vlgmr.msrb.gmra.mxu2 %vm2607_vm3, %v17249_v18  ;;  %7911 = vmatmul.msk.bf16.vlgmr.msrb.gmra.mxu1 %vm2607_vm3, %v17249_v18 }
 0xaba   : > { %v6683_v36 = vpop.permute.xlu1 %6682 }
 0xabb   : > { %v7013_v16 = vadd.f32 %v6683_v36, %v5605_v3  ;;  %v17198_v27 = vpop.permute.xlu0 %6748  ;;  %v9057_v29 = vpop.eup %9056  ;;  %v20037_v3 = vld [vmem:[#allocation79_spill] sm:$0xff] }
 0xabc   : > { %9060 = vtanh.f32 %v20037_v3  ;;  %v5657_v36 = vmul.f32 %v9057_v29, %v20040_v22 }
 0xabd   : > { %v7115_v57 = vpack.c.bf16 %v7013_v16, %v7012_v37  ;;  %7380 = vmatpush.bf16.xpose.msrb.mxu3 %v7208_v55  ;;  %9062 = vtanh.f32 %v20038_v61  ;;  %v20041_v37 = vld [vmem:[#allocation96_spill] sm:$0xff] }
 0xabe   : > { %9064 = vtanh.f32 %v20041_v37  ;;  %v17232_v59 = vadd.f32 %v6787_v41, %v5657_v36  ;;  %v20051_v37 = vld [vmem:[#allocation58_spill] sm:$0xff] }
 0xabf   : > { %6770 = vrot.lane.b32.xlu2 %v6417_v20, %s9228_s14  ;;  %v7235_v53 = vsel %vm2607_vm3, %v7115_v57, 0  ;;  %v6819_v56 = vpop.permute.xlu2 %6818  ;;  %v9059_v20 = vpop.eup %9058  ;;  %v20042_v57 = vld [vmem:[#allocation145_spill] sm:$0xff]  ;;  %9066 = vtanh.f32 %v20043_v43  ;;  %s7501_s14 = scalar_lea.sflag [#allocation3], %s189_s5 }
 0xac0   : > { %7392 = vmatpush.bf16.xpose.msra.mxu1 %v7235_v53  ;;  %v17212_v7 = vadd.f32 %v6819_v56, %v5673_v39  ;;  %v5642_v19 = vmul.f32 %v9059_v20, %v20042_v57  ;;  %v20045_v39 = vld [vmem:[#allocation66_spill] sm:$0xff] }
 0xac1   : > { %9068 = vtanh.f32 %v20045_v39  ;;  %v20053_v57 = vld [vmem:[#allocation342_spill] sm:$0xff] }
 0xac2   : > { %v6709_v26 = vpop.permute.xlu1 %6708  ;;  %v7149_v1 = vpack.c.bf16 %v17212_v7, %v17210_v15  ;;  %v9061_v0 = vpop.eup %9060  ;;  %v7050_v41 = vadd.f32 %v17122_v54, %v5642_v19  ;;  %v20048_v54 = vld [vmem:[#allocation48_spill] sm:$0xff] }
 0xac3   : > { %v17214_v14 = vpop.permute.xlu0 %6814  ;;  %v9063_v55 = vpop.eup %9062  ;;  %v5643_v30 = vmul.f32 %v9061_v0, %v20044_v21  ;;  %9070 = vtanh.f32 %v20048_v54  ;;  %v20052_v0 = vld [vmem:[#allocation12_spill] sm:$0xff]  ;;  %v20055_v21 = vld [vmem:[#allocation19_spill] sm:$0xff] }
 0xac4   : > { %v9065_v53 = vpop.eup %9064  ;;  %v5618_v56 = vmul.f32 %v9063_v55, %v20046_v48  ;;  %9072 = vtanh.f32 %v20049_v35  ;;  %v20058_v35 = vld [vmem:[#allocation118_spill] sm:$0xff] }
 0xac5   : > { %7381 = vmatpush.bf16.xpose.msrb.mxu3 %v7205_v32  ;;  %v5619_v40 = vmul.f32 %v9065_v53, %v20047_v50  ;;  %v7051_v9 = vadd.f32 %v17062_v52, %v5643_v30  ;;  %v9067_v61 = vpop.eup %9066  ;;  %9074 = vtanh.f32 %v20051_v37  ;;  %v20054_v53 = vld [vmem:[#allocation54_spill] sm:$0xff] }
 0xac6   : > { %v7026_v32 = vadd.f32 %v6709_v26, %v5618_v56  ;;  %9076 = vtanh.f32 %v20052_v0  ;;  %v20056_v30 = vld [vmem:[#allocation362_spill] sm:$0xff] }
 0xac7   : > { %v6785_v13 = vpop.permute.xlu2 %6784  ;;  %v9069_v36 = vpop.eup %9068  ;;  %9078 = vtanh.f32 %v20054_v53 }
 0xac8   : > { %v17234_v38 = vadd.f32 %v6785_v13, %v5656_v44  ;;  %v20050_v44 = vld [vmem:[#allocation86_spill] sm:$0xff]  ;;  %v5641_v19 = vmul.f32 %v9069_v36, %v20053_v57  ;;  %9080 = vtanh.f32 %v20055_v21  ;;  %v20060_v36 = vld [vmem:[#allocation76_spill] sm:$0xff] }
 0xac9   : > { %v5640_v22 = vmul.f32 %v9067_v61, %v20050_v44  ;;  %v9071_v20 = vpop.eup %9070  ;;  %9082 = vtanh.f32 %v20060_v36  ;;  %v20063_v57 = vld [vmem:[#allocation80_spill] sm:$0xff]  ;;  %v20068_v36 = vld [vmem:[#allocation6_spill] sm:$0xff] }
 0xaca   : > { %v6751_v16 = vpop.permute.xlu1 %6750  ;;  %v7141_v31 = vpack.c.bf16 %v17232_v59, %v17234_v38  ;;  %v9073_v43 = vpop.eup %9072  ;;  %v7049_v48 = vadd.f32 %v17158_v58, %v5641_v19  ;;  %9084 = vtanh.f32 %v20063_v57 }
 0xacb   : > { %v6781_v47 = vpop.permute.xlu0 %6780  ;;  %v7048_v26 = vadd.f32 %v17195_v24, %v5640_v22 }
 0xacc   : > { %7913 = vmatmul.msk.bf16.vlgmr.msrb.gmra.mxu3 %vm2607_vm3, %v17249_v18 }
 0xacd   : > { %7413 = vmatpush.bf16.xpose.msra.mxu3 %v7298_v10  ;;  %v7134_v10 = vpack.c.bf16 %v7051_v9, %v7050_v41  ;;  %v5654_v41 = vmul.f32 %v9071_v20, %v20056_v30  ;;  %v9075_v9 = vpop.eup %9074 }
 0xacf   : > { %v6711_v60 = vpop.permute.xlu2 %6710  ;;  %v7292_v55 = vsel %vm2607_vm3, %v7134_v10, 0  ;;  %v17277_v24 = vadd.f32 %v6781_v47, %v5654_v41  ;;  %v20061_v47 = vld [vmem:[#allocation228_spill] sm:$0xff] }
 0xad0   : > { %v7027_v29 = vadd.f32 %v6711_v60, %v5619_v40  ;;  %v7133_v40 = vpack.c.bf16 %v7049_v48, %v7048_v26  ;;  %v9077_v60 = vpop.eup %9076  ;;  %v20064_v48 = vld [vmem:[#allocation46_spill] sm:$0xff] }
 0xad1   : > { %v9079_v10 = vpop.eup %9078  ;;  %v5602_v37 = vmul.f32 %v9077_v60, %v20061_v47  ;;  %9086 = vtanh.f32 %v20064_v48  ;;  %v7346_v47 = vsel %vm2607_vm3, %v7152_v25, 0  ;;  %v20074_v48 = vld [vmem:[#allocation356_spill] sm:$0xff] }
 0xad2   : > { %v6677_v3 = vpop.permute.xlu1 %6676  ;;  %v7122_v17 = vpack.c.bf16 %v7027_v29, %v7026_v32  ;;  %v5639_v32 = vmul.f32 %v9075_v9, %v20058_v35  ;;  %v9081_v61 = vpop.eup %9080  ;;  %v7289_v22 = vsel %vm2607_vm3, %v7133_v40, 0  ;;  %v20066_v9 = vld [vmem:[#allocation232_spill] sm:$0xff] }
 0xad3   : > { %v6707_v52 = vpop.permute.xlu0 %6706  ;;  %v9083_v30 = vpop.eup %9082 }
 0xad4   : > { %v7256_v13 = vsel %vm2607_vm3, %v7122_v17, 0  ;;  %v20059_v17 = vld [vmem:[#allocation334_spill] sm:$0xff]  ;;  %v7047_v58 = vadd.f32 %v6751_v16, %v5639_v32  ;;  %v5616_v60 = vmul.f32 %v9083_v30, %v20066_v9 }
 0xad5   : > { %7414 = vmatpush.bf16.xpose.msra.mxu3 %v7295_v23  ;;  %7406 = vmatpush.bf16.xpose.msra.mxu2 %v7256_v13  ;;  %v20057_v23 = vld [vmem:[#allocation366_spill] sm:$0xff]  ;;  %v5638_v44 = vmul.f32 %v9079_v10, %v20059_v17  ;;  %v20062_v13 = vld [vmem:[#allocation245_spill] sm:$0xff] }
 0xad6   : > { %v5655_v39 = vmul.f32 %v9073_v43, %v20057_v23  ;;  %v5603_v20 = vmul.f32 %v9081_v61, %v20062_v13  ;;  %v9085_v23 = vpop.eup %9084 }
 0xad7   : > { %v17275_v56 = vpop.permute.xlu2 %6812  ;;  %v7046_v19 = vadd.f32 %v17198_v27, %v5638_v44  ;;  %v20067_v27 = vld [vmem:[#allocation50_spill] sm:$0xff]  ;;  %v9087_v44 = vpop.eup %9086 }
 0xad8   : > { %9088 = vtanh.f32 %v20067_v27 }
 0xad9   : > { %v7132_v16 = vpack.c.bf16 %v7047_v58, %v7046_v19  ;;  %9090 = vtanh.f32 %v20068_v36  ;;  %v20072_v19 = vld [vmem:[#allocation37_spill] sm:$0xff] }
 0xada   : > { %v6783_v50 = vpop.permute.xlu1 %6782 }
 0xadb   : > { %v17279_v54 = vadd.f32 %v6783_v50, %v5655_v39  ;;  %v17289_v0 = vpop.permute.xlu0 %6808  ;;  %v7286_v39 = vsel %vm2607_vm3, %v7132_v16, 0  ;;  %v20065_v50 = vld [vmem:[#allocation368_spill] sm:$0xff] }
 0xadc   : > { %v5617_v40 = vmul.f32 %v9085_v23, %v20065_v50 }
 0xadd   : > { %7415 = vmatpush.bf16.xpose.msra.mxu3 %v7292_v55  ;;  %v7140_v29 = vpack.c.bf16 %v17279_v54, %v17277_v24  ;;  %v7010_v55 = vadd.f32 %v6677_v3, %v5602_v37  ;;  %v20069_v37 = vld [vmem:[#allocation8_spill] sm:$0xff]  ;;  %v20105_v54 = vld [vmem:[#allocation29_spill] sm:$0xff] }
 0xade   : > { %v7025_v35 = vadd.f32 %v6707_v52, %v5617_v40  ;;  %9092 = vtanh.f32 %v20069_v37  ;;  %v20070_v52 = vld [vmem:[#allocation325_spill] sm:$0xff]  ;;  %v20078_v37 = vld [vmem:[#allocation138_spill] sm:$0xff] }
 0xadf   : > { %v6679_v26 = vpop.permute.xlu2 %6678  ;;  %v5636_v13 = vmul.f32 %v9087_v44, %v20070_v52  ;;  %9094 = vtanh.f32 %v20072_v19  ;;  %v20075_v40 = vld [vmem:[#allocation361_spill] sm:$0xff] }
 0xae0   : > { %v7011_v43 = vadd.f32 %v6679_v26, %v5603_v20  ;;  %v20071_v20 = vld [vmem:[#allocation226_spill] sm:$0xff] }
 0xae2   : > { %v6745_v53 = vpop.permute.xlu1 %6744  ;;  %v7114_v21 = vpack.c.bf16 %v7011_v43, %v7010_v55  ;;  %v20073_v55 = vld [vmem:[#allocation43_spill] sm:$0xff] }
 0xae3   : > { %v6675_v32 = vpop.permute.xlu0 %6674  ;;  %9096 = vtanh.f32 %v20073_v55  ;;  %v7044_v43 = vadd.f32 %v6745_v53, %v5636_v13  ;;  %v20079_v13 = vld [vmem:[#allocation30_spill] sm:$0xff] }
 0xae4   : > { %v7232_v41 = vsel %vm2607_vm3, %v7114_v21, 0  ;;  %9098 = vtanh.f32 %v20078_v37  ;;  %v20092_v37 = vld [vmem:[#allocation47_spill] sm:$0xff] }
 0xae5   : > { %7416 = vmatpush.bf16.xpose.msra.mxu3 %v7289_v22  ;;  %7393 = vmatpush.bf16.xpose.msra.mxu1 %v7232_v41  ;;  %v9089_v22 = vpop.eup %9088  ;;  %9100 = vtanh.f32 %v20079_v13 }
 0xae6   : > { %v5637_v57 = vmul.f32 %v9089_v22, %v20071_v20  ;;  %v9091_v4 = vpop.eup %9090  ;;  %v7340_v20 = vsel %vm2607_vm3, %v7150_v49, 0 }
 0xae7   : > { %v6705_v3 = vpop.permute.xlu2 %6704  ;;  %v9093_v25 = vpop.eup %9092  ;;  %v5600_v50 = vmul.f32 %v9091_v4, %v20074_v48  ;;  %v20087_v48 = vld [vmem:[#allocation268_spill] sm:$0xff] }
 0xae8   : > { %v7024_v10 = vadd.f32 %v6705_v3, %v5616_v60  ;;  %v9095_v23 = vpop.eup %9094  ;;  %v5601_v9 = vmul.f32 %v9093_v25, %v20075_v40  ;;  %v20076_v60 = vld [vmem:[#allocation126_spill] sm:$0xff] }
 0xae9   : > { %v9097_v53 = vpop.eup %9096  ;;  %v20077_v3 = vld [vmem:[#allocation242_spill] sm:$0xff] }
 0xaea   : > { %v17299_v61 = vpop.permute.xlu1 %6810  ;;  %v7121_v17 = vpack.c.bf16 %v7025_v35, %v7024_v10  ;;  %v5635_v27 = vmul.f32 %v9097_v53, %v20076_v60  ;;  %v5634_v35 = vmul.f32 %v9095_v23, %v20077_v3  ;;  %v9099_v42 = vpop.eup %9098  ;;  %v20085_v23 = vld [vmem:[#allocation141_spill] sm:$0xff]  ;;  %v20088_v3 = vld [vmem:[#allocation263_spill] sm:$0xff] }
 0xaeb   : > { %v6741_v30 = vpop.permute.xlu0 %6740  ;;  %v9101_v5 = vpop.eup %9100 }
 0xaec   : > { %v7253_v58 = vsel %vm2607_vm3, %v7121_v17, 0  ;;  %v7009_v17 = vadd.f32 %v6675_v32, %v5601_v9  ;;  %v7042_v22 = vadd.f32 %v6741_v30, %v5634_v35  ;;  %v7322_v32 = vsel %vm2607_vm3, %v7144_v8, 0  ;;  %v20082_v8 = vld [vmem:[#allocation377_spill] sm:$0xff] }
 0xaed   : > { %7417 = vmatpush.bf16.xpose.msra.mxu3 %v7286_v39  ;;  %7407 = vmatpush.bf16.xpose.msra.mxu2 %v7253_v58  ;;  %v7343_v39 = vsel %vm2607_vm3, %v7151_v6, 0  ;;  %v20084_v30 = vld [vmem:[#allocation301_spill] sm:$0xff] }
 0xaef   : > { %v6747_v26 = vpop.permute.xlu2 %6746 }
 0xaf0   : > { %v7045_v16 = vadd.f32 %v6747_v26, %v5637_v57  ;;  %v20080_v57 = vld [vmem:[#allocation155_spill] sm:$0xff]  ;;  %v20081_v26 = vld [vmem:[#allocation34_spill] sm:$0xff] }
 0xaf1   : > { %9102 = vtanh.f32 %v20080_v57 }
 0xaf2   : > { %v17312_v21 = vpop.permute.xlu1 %6776  ;;  %v7131_v45 = vpack.c.bf16 %v7045_v16, %v7044_v43  ;;  %9104 = vtanh.f32 %v20081_v26  ;;  %v5670_v43 = vmul.f32 %v9099_v42, %v20082_v8  ;;  %v20097_v26 = vld [vmem:[#allocation121_spill] sm:$0xff] }
 0xaf3   : > { %v17325_v11 = vpop.permute.xlu0 %6806  ;;  %9106 = vtanh.f32 %v20083_v2  ;;  %v20099_v2 = vld [vmem:[#allocation38_spill] sm:$0xff] }
 0xaf4   : > { %v7283_v41 = vsel %vm2607_vm3, %v7131_v45, 0  ;;  %7915 = vmatmul.msk.bf16.vlgmr.msra.gmra.mxu2 %vm2607_vm3, %v17249_v18  ;;  %v7078_v4 = vadd.f32 %v17275_v56, %v5670_v43  ;;  %9108 = vtanh.f32 %v20085_v23  ;;  %v20102_v23 = vld [vmem:[#allocation33_spill] sm:$0xff] }
 0xaf5   : > { %7439 = vmatpush.bf16.xpose.msrb.mxu2 %v7346_v47  ;;  %7418 = vmatpush.bf16.xpose.msra.mxu3 %v7283_v41  ;;  %v7337_v41 = vsel %vm2607_vm3, %v7149_v1, 0  ;;  %v20089_v1 = vld [vmem:[#allocation103_spill] sm:$0xff] }
 0xaf6   : > { %9110 = vtanh.f32 %v20089_v1 }
 0xaf7   : > { %v6673_v10 = vpop.permute.xlu2 %6672  ;;  %v9103_v16 = vpop.eup %9102 }
 0xaf8   : > { %v7008_v44 = vadd.f32 %v6673_v10, %v5600_v50  ;;  %v9105_v49 = vpop.eup %9104  ;;  %v5671_v45 = vmul.f32 %v9103_v16, %v20084_v30  ;;  %v7316_v10 = vsel %vm2607_vm3, %v7142_v46, 0 }
 0xaf9   : > { %v5633_v28 = vmul.f32 %v9105_v49, %v20087_v48  ;;  %v9107_v60 = vpop.eup %9106 }
 0xafa   : > { %v6743_v58 = vpop.permute.xlu1 %6742  ;;  %v7113_v47 = vpack.c.bf16 %v7009_v17, %v7008_v44  ;;  %v7079_v34 = vadd.f32 %v17214_v14, %v5671_v45  ;;  %v5669_v15 = vmul.f32 %v9107_v60, %v20088_v3  ;;  %v9109_v7 = vpop.eup %9108  ;;  %v20090_v17 = vld [vmem:[#allocation295_spill] sm:$0xff]  ;;  %v20101_v45 = vld [vmem:[#allocation273_spill] sm:$0xff] }
 0xafb   : > { %v7043_v36 = vadd.f32 %v6743_v58, %v5635_v27  ;;  %v6737_v25 = vpop.permute.xlu0 %6736  ;;  %v5668_v14 = vmul.f32 %v9109_v7, %v20090_v17  ;;  %v20108_v17 = vld [vmem:[#allocation154_spill] sm:$0xff] }
 0xafc   : > { %v7229_v6 = vsel %vm2607_vm3, %v7113_v47, 0  ;;  %v7148_v9 = vpack.c.bf16 %v7079_v34, %v7078_v4  ;;  %v7077_v44 = vadd.f32 %v17299_v61, %v5669_v15  ;;  %v7313_v61 = vsel %vm2607_vm3, %v7141_v31, 0  ;;  %v20098_v31 = vld [vmem:[#allocation249_spill] sm:$0xff]  ;;  %v20107_v15 = vld [vmem:[#allocation24_spill] sm:$0xff] }
 0xafd   : > { %7440 = vmatpush.bf16.xpose.msrb.mxu2 %v7343_v39  ;;  %v7130_v51 = vpack.c.bf16 %v7043_v36, %v7042_v22  ;;  %7394 = vmatpush.bf16.xpose.msra.mxu1 %v7229_v6  ;;  %v20086_v39 = vld [vmem:[#allocation128_spill] sm:$0xff]  ;;  %v7076_v36 = vadd.f32 %v17289_v0, %v5668_v14  ;;  %v9111_v6 = vpop.eup %9110  ;;  %v20096_v0 = vld [vmem:[#allocation235_spill] sm:$0xff] }
 0xafe   : > { %v5632_v53 = vmul.f32 %v9101_v5, %v20086_v39  ;;  %v7334_v58 = vsel %vm2607_vm3, %v7148_v9, 0  ;;  %v20091_v22 = vld [vmem:[#allocation116_spill] sm:$0xff]  ;;  %v5666_v33 = vmul.f32 %v9111_v6, %v20093_v63  ;;  %v20103_v39 = vld [vmem:[#allocation274_spill] sm:$0xff] }
 0xaff   : > { %v7280_v52 = vsel %vm2607_vm3, %v7130_v51, 0  ;;  %v17340_v19 = vpop.permute.xlu2 %6778  ;;  %9112 = vtanh.f32 %v20091_v22  ;;  %v7147_v51 = vpack.c.bf16 %v7077_v44, %v7076_v36  ;;  %v20109_v22 = vld [vmem:[#allocation168_spill] sm:$0xff] }
 0xb00   : > { %7419 = vmatpush.bf16.xpose.msra.mxu3 %v7280_v52  ;;  %v7040_v40 = vadd.f32 %v6737_v25, %v5632_v53  ;;  %9114 = vtanh.f32 %v20092_v37  ;;  %v20094_v52 = vld [vmem:[#allocation98_spill] sm:$0xff] }
 0xb01   : > { %9116 = vtanh.f32 %v20094_v52  ;;  %v7331_v57 = vsel %vm2607_vm3, %v7147_v51, 0 }
 0xb02   : > { %v17343_v55 = vpop.permute.xlu1 %6772 }
 0xb04   : > { %7914 = vmatmul.msk.bf16.vlgmr.msra.gmra.mxu1 %vm2607_vm3, %v17249_v18 }
 0xb05   : > { %7426 = vmatpush.bf16.xpose.msrb.mxu1 %v7322_v32  ;;  %7441 = vmatpush.bf16.xpose.msrb.mxu2 %v7340_v20  ;;  %v9113_v46 = vpop.eup %9112  ;;  %v20095_v32 = vld [vmem:[#allocation40_spill] sm:$0xff] }
 0xb06   : > { %9118 = vtanh.f32 %v20095_v32  ;;  %v5667_v13 = vmul.f32 %v9113_v46, %v20096_v0  ;;  %v9115_v5 = vpop.eup %9114 }
 0xb07   : > { %v6805_v62 = vpop.permute.xlu2 %6804  ;;  %9120 = vtanh.f32 %v20097_v26  ;;  %v9117_v38 = vpop.eup %9116  ;;  %v5653_v8 = vmul.f32 %v9115_v5, %v20098_v31 }
 0xb08   : > { %v7074_v20 = vadd.f32 %v6805_v62, %v5666_v33  ;;  %v7075_v42 = vadd.f32 %v17325_v11, %v5667_v13  ;;  %9122 = vtanh.f32 %v20099_v2  ;;  %v7310_v11 = vsel %vm2607_vm3, %v7140_v29, 0  ;;  %v20106_v29 = vld [vmem:[#allocation275_spill] sm:$0xff] }
 0xb09   : > { %v7061_v25 = vadd.f32 %v17340_v19, %v5653_v8  ;;  %9124 = vtanh.f32 %v20102_v23 }
 0xb0a   : > { %v6739_v50 = vpop.permute.xlu1 %6738  ;;  %v7146_v59 = vpack.c.bf16 %v7075_v42, %v7074_v20  ;;  %9126 = vtanh.f32 %v20105_v54 }
 0xb0b   : > { %v7041_v56 = vadd.f32 %v6739_v50, %v5633_v28  ;;  %9128 = vtanh.f32 %v20107_v15 }
 0xb0c   : > { %v9119_v16 = vpop.eup %9118  ;;  %v7328_v28 = vsel %vm2607_vm3, %v7146_v59, 0 }
 0xb0d   : > { %7427 = vmatpush.bf16.xpose.msrb.mxu1 %v7319_v12  ;;  %7442 = vmatpush.bf16.xpose.msrb.mxu2 %v7337_v41  ;;  %v7129_v27 = vpack.c.bf16 %v7041_v56, %v7040_v40  ;;  %v20100_v12 = vld [vmem:[#allocation292_spill] sm:$0xff]  ;;  %v9121_v30 = vpop.eup %9120  ;;  %v5652_v4 = vmul.f32 %v9119_v16, %v20101_v45  ;;  %v6803_v41 = vpop.permute.xlu0 %6802  ;;  %v20104_v56 = vld [vmem:[#allocation190_spill] sm:$0xff] }
 0xb0e   : > { %v5664_v49 = vmul.f32 %v9117_v38, %v20100_v12  ;;  %v5665_v53 = vmul.f32 %v9121_v30, %v20103_v39  ;;  %v9123_v19 = vpop.eup %9122 }
 0xb0f   : > { %v7277_v35 = vsel %vm2607_vm3, %v7129_v27, 0  ;;  %v6775_v47 = vpop.permute.xlu2 %6774  ;;  %v7060_v62 = vadd.f32 %v17312_v21, %v5652_v4  ;;  %v5651_v9 = vmul.f32 %v9123_v19, %v20104_v56  ;;  %v9125_v24 = vpop.eup %9124 }
 0xb10   : > { %7420 = vmatpush.bf16.xpose.msra.mxu3 %v7277_v35  ;;  %v7073_v34 = vadd.f32 %v6803_v41, %v5665_v53  ;;  %v5650_v60 = vmul.f32 %v9125_v24, %v20106_v29  ;;  %v9127_v35 = vpop.eup %9126 }
 0xb11   : > { %v7139_v50 = vpack.c.bf16 %v7061_v25, %v7060_v62  ;;  %v7059_v27 = vadd.f32 %v6775_v47, %v5651_v9  ;;  %v5649_v14 = vmul.f32 %v9127_v35, %v20108_v17  ;;  %v9129_v44 = vpop.eup %9128 }
 0xb12   : > { %v7058_v7 = vadd.f32 %v17343_v55, %v5650_v60  ;;  %v5648_v36 = vmul.f32 %v9129_v44, %v20109_v22 }
 0xb13   : > { %v7307_v3 = vsel %vm2607_vm3, %v7139_v50, 0 }
 0xb14   : > { %v7138_v1 = vpack.c.bf16 %v7059_v27, %v7058_v7 }
 0xb15   : > { %7428 = vmatpush.bf16.xpose.msrb.mxu1 %v7316_v10  ;;  %7443 = vmatpush.bf16.xpose.msrb.mxu2 %v7334_v58  ;;  %v6769_v58 = vpop.permute.xlu1 %6768 }
 0xb16   : > { %v7304_v51 = vsel %vm2607_vm3, %v7138_v1, 0  ;;  %v7056_v6 = vadd.f32 %v6769_v58, %v5648_v36 }
 0xb17   : > { %7916 = vmatmul.msk.bf16.vlgmr.msra.gmra.mxu3 %vm2607_vm3, %v17249_v18  ;;  %v6801_v43 = vpop.permute.xlu2 %6800 }
 0xb18   : > { %v7072_v48 = vadd.f32 %v6801_v43, %v5664_v49 }
 0xb1a   : > { %v7145_v40 = vpack.c.bf16 %v7073_v34, %v7072_v48 }
 0xb1c   : > { %v7325_v21 = vsel %vm2607_vm3, %v7145_v40, 0 }
 0xb1d   : > { %7429 = vmatpush.bf16.xpose.msrb.mxu1 %v7313_v61  ;;  %7444 = vmatpush.bf16.xpose.msrb.mxu2 %v7331_v57 }
 0xb1f   : > { %v6771_v10 = vpop.permute.xlu2 %6770 }
 0xb20   : > { %v7057_v47 = vadd.f32 %v6771_v10, %v5649_v14 }
 0xb22   : > { %v7137_v37 = vpack.c.bf16 %v7057_v47, %v7056_v6 }
 0xb24   : > { %v7301_v55 = vsel %vm2607_vm3, %v7137_v37, 0 }
 0xb25   : > { %7430 = vmatpush.bf16.xpose.msrb.mxu1 %v7310_v11  ;;  %7445 = vmatpush.bf16.xpose.msrb.mxu2 %v7328_v28 }
 0xb2d   : > { %7431 = vmatpush.bf16.xpose.msrb.mxu1 %v7307_v3  ;;  %7446 = vmatpush.bf16.xpose.msrb.mxu2 %v7325_v21 }
 0xb34   : > { %7918 = vmatmul.msk.bf16.vlgmr.msrb.gmra.mxu2 %vm2607_vm3, %v17249_v18 }
 0xb35   : > { %7432 = vmatpush.bf16.xpose.msrb.mxu1 %v7304_v51 }
 0xb36   : > { %v7357_v63 = vpop.f32.mrf.mxu1 }
 0xb37   : > { %v7452_v33 = vsub.f32 0.0, %v7357_v63 }
 0xb39   : > { %v7460_v46 = vmul.f32 1.442695, %v7452_v33 }
 0xb3b   : > { %9130 = vpow2.f32 %v7460_v46 }
 0xb3c   : > { %v7370_v52 = vpop.f32.mrf.mxu2 }
 0xb3d   : > { %7433 = vmatpush.bf16.xpose.msrb.mxu1 %v7301_v55  ;;  %v7453_v61 = vsub.f32 0.0, %v7370_v52 }
 0xb3e   : > { %v7359_v20 = vpop.f32.mrf.mxu1 }
 0xb3f   : > { %v7462_v13 = vmul.f32 1.442695, %v7453_v61 }
 0xb41   : > { %9132 = vpow2.f32 %v7462_v13  ;;  %v9131_v26 = vpop.eup %9130 }
 0xb42   : > { %v7476_v42 = vadd.f32 1.0, %v9131_v26 }
 0xb44   : > { %7917 = vmatmul.msk.bf16.vlgmr.msrb.gmra.mxu1 %vm2607_vm3, %v17249_v18  ;;  %v7372_v5 = vpop.f32.mrf.mxu2 }
 0xb47   : > { %v9133_v59 = vpop.eup %9132 }
 0xb48   : > { %v7477_v31 = vadd.f32 1.0, %v9133_v59 }
 0xb4f   : > { %v7383_v32 = vpop.f32.mrf.mxu3 }
 0xb50   : > { %v7454_v0 = vsub.f32 0.0, %v7383_v32 }
 0xb52   : > { %v7464_v57 = vmul.f32 1.442695, %v7454_v0 }
 0xb54   : > { %9134 = vpow2.f32 %v7464_v57 }
 0xb55   : > { %9136 = vrcp.f32 %v7476_v42 }
 0xb56   : > { %9138 = vrcp.f32 %v7477_v31 }
 0xb57   : > { %v7385_v18 = vpop.f32.mrf.mxu3 }
 0xb5a   : > { %v9135_v38 = vpop.eup %9134 }
 0xb5b   : > { %v7478_v8 = vadd.f32 1.0, %v9135_v38  ;;  %v9137_v43 = vpop.eup %9136 }
 0xb5c   : > { %7492 = vst [vmem:[%s17420_s7] sm:$0xff] %v9137_v43  ;;  %v9139_v16 = vpop.eup %9138 }
 0xb5d   : > { %9140 = vrcp.f32 %v7478_v8  ;;  %7493 = vst [vmem:[%s17420_s7 + $0x8] sm:$0xff] %v9139_v16 }
 0xb63   : > { %v9141_v2 = vpop.eup %9140 }
 0xb64   : > { %7494 = vst [vmem:[%s17420_s7 + $0x10] sm:$0xff] %v9141_v2 }
 0xb77   : > { %v7409_v12 = vpop.f32.mrf.mxu2 }
 0xb78   : > { %v7456_v49 = vsub.f32 0.0, %v7409_v12 }
 0xb7a   : > { %v7468_v30 = vmul.f32 1.442695, %v7456_v49 }
 0xb7c   : > { %9142 = vpow2.f32 %v7468_v30 }
 0xb7f   : > { %v7411_v45 = vpop.f32.mrf.mxu2 }
 0xb81   : > { %v7396_v4 = vpop.f32.mrf.mxu1 }
 0xb82   : > { %v9143_v25 = vpop.eup %9142  ;;  %v7455_v41 = vsub.f32 0.0, %v7396_v4 }
 0xb83   : > { %v7480_v11 = vadd.f32 1.0, %v9143_v25 }
 0xb84   : > { %v7466_v23 = vmul.f32 1.442695, %v7455_v41 }
 0xb85   : > { %9144 = vrcp.f32 %v7480_v11 }
 0xb86   : > { %9146 = vpow2.f32 %v7466_v23 }
 0xb89   : > { %v7398_v39 = vpop.f32.mrf.mxu1 }
 0xb8b   : > { %v9145_v53 = vpop.eup %9144 }
 0xb8c   : > { %v9147_v48 = vpop.eup %9146  ;;  %7496 = vst [vmem:[%s17420_s7 + $0x20] sm:$0xff] %v9145_v53 }
 0xb8d   : > { %v7479_v28 = vadd.f32 1.0, %v9147_v48 }
 0xb8f   : > { %9148 = vrcp.f32 %v7479_v28 }
 0xb95   : > { %v9149_v62 = vpop.eup %9148 }
 0xb96   : > { %7495 = vst [vmem:[%s17420_s7 + $0x18] sm:$0xff] %v9149_v62 }
 0xb9a   : > { %v7422_v34 = vpop.f32.mrf.mxu3 }
 0xb9b   : > { %v7457_v50 = vsub.f32 0.0, %v7422_v34 }
 0xb9d   : > { %v7470_v19 = vmul.f32 1.442695, %v7457_v50 }
 0xb9f   : > { %9150 = vpow2.f32 %v7470_v19 }
 0xba2   : > { %v7424_v40 = vpop.f32.mrf.mxu3 }
 0xba5   : > { %v9151_v56 = vpop.eup %9150 }
 0xba6   : > { %v7481_v9 = vadd.f32 1.0, %v9151_v56 }
 0xba8   : > { %9152 = vrcp.f32 %v7481_v9 }
 0xbae   : > { %v9153_v24 = vpop.eup %9152 }
 0xbaf   : > { %7497 = vst [vmem:[%s17420_s7 + $0x28] sm:$0xff] %v9153_v24 }
 0xbb7   : > { %v7448_v54 = vpop.f32.mrf.mxu2 }
 0xbb8   : > { %v7459_v29 = vsub.f32 0.0, %v7448_v54 }
 0xbba   : > { %v7474_v60 = vmul.f32 1.442695, %v7459_v29 }
 0xbbc   : > { %9154 = vpow2.f32 %v7474_v60 }
 0xbbf   : > { %v7450_v27 = vpop.f32.mrf.mxu2 }
 0xbc1   : > { %v7435_v3 = vpop.f32.mrf.mxu1 }
 0xbc2   : > { %v7458_v15 = vsub.f32 0.0, %v7435_v3  ;;  %v9155_v21 = vpop.eup %9154 }
 0xbc3   : > { %v7483_v1 = vadd.f32 1.0, %v9155_v21 }
 0xbc4   : > { %v7472_v7 = vmul.f32 1.442695, %v7458_v15 }
 0xbc6   : > { %9156 = vpow2.f32 %v7472_v7 }
 0xbc7   : > { %9158 = vrcp.f32 %v7483_v1 }
 0xbc9   : > { %v7437_v35 = vpop.f32.mrf.mxu1 }
 0xbcc   : > { %v9157_v10 = vpop.eup %9156 }
 0xbcd   : > { %v9159_v17 = vpop.eup %9158  ;;  %v7482_v14 = vadd.f32 1.0, %v9157_v10 }
 0xbce   : > { %7499 = vst [vmem:[%s17420_s7 + $0x38] sm:$0xff] %v9159_v17 }
 0xbcf   : > { %9160 = vrcp.f32 %v7482_v14 }
 0xbd5   : > { %v9161_v44 = vpop.eup %9160 }
 0xbd6   : > { %7498 = vst [vmem:[%s17420_s7 + $0x30] sm:$0xff] %v9161_v44 }
 0xbd7   : > { %9191 = shalt.err (!%p9188_p3)
}
 0xbd8   : > { %8000 = dma.vmem_to_hbm [thread:$0]  (%p9293_p5), %s7515_s12, 1024, %s7517_s13, %s7501_s14  }
 0xbd9 PF: > { %p8006_p4 = scmp.ge.s32.totalorder %s9226_s18, 2  ;;  %s7528_s30 = sand.u32 1, %s9214_s15  }
 0xbda   : > { %s7529_s5 = scalar_lea.sflag [#allocation3], %s7528_s30 }
 0xbdb   : > { %p8003_p7 = pnand %p8006_p4, %p9297_p6 }
 0xbdd   : > { %p8004_p8 = pneg %p8003_p7 }
 0xbdf   : > { %9209 = dma.done.wait (%p8004_p8), %s7529_s5, 1024  }
 0xbe0   : > { %9211 = vsyncadd (%p8004_p8), %s7529_s5, 4294966272  ;;  %p14_p9 = scmp.ge.s32.totalorder %s9280_s21, 4   ;;  %s20110_s15 = smov %s9218_s16 }
 0xbe1   : > { %s20111_s16 = smov %s9222_s17  ;;  %s20112_s17 = smov %s9291_s24 }
 0xbe2   : > { %s20113_s18 = smov %s9280_s21  ;;  %16 = sbr.rel (!%p14_p9) target bundleno = 3 (0x3), region = 71 }
 0xbe7   :  { %7535 = vsyncpa [#allocation3], 1 }
 0xbe8   :  { %7537 = vsyncpa [#allocation3 + $0x1], 1 }

</bundles_post_ra>
